<compile_context>
chip_gen: v7x
topology: tpu7x:2x2x1
jax: 0.10.0
libtpu: 0.0.40
codegen_flags: <defaults>
</compile_context>

<pallas_src>
import numpy as np
import jax
import jax.numpy as jnp
from jax.experimental import pallas as pl
from jax.experimental.pallas import tpu as pltpu


CIN = 192
C0 = 96                        # branch0: 1x1
C1A, C1B = 48, 64              # branch1: 1x1 -> 5x5 (pad 2)
C2A, C2B, C2C = 64, 96, 96     # branch2: 1x1 -> 3x3 (pad 1) -> 3x3 (pad 1)
C3 = 64                        # branch3: avgpool3x3 s1 p1 (no pad count) -> 1x1
COUT = C0 + C1B + C2C + C3     # 320
OFF = 8                        # aligned low-edge offset of the image inside the
                               # padded f32 VMEM scratch (sublane tile = 8)


# ----------------------------------------------------------------------------
# Fused Pallas kernel (one grid step == one image, all 4 branches)
# ----------------------------------------------------------------------------
def _make_mixed_5b_kernel(H, W):
    M = H * W

    def kernel(x_ref,
               w0_ref, b0_ref,
               w10_ref, b10_ref, w11_ref, b11_ref,
               w20_ref, b20_ref, w21_ref, b21_ref, w22_ref, b22_ref,
               w3_ref, b3_ref, invc_ref,
               o0_ref, o1_ref, o2_ref, o3_ref,
               q1_ref, q2a_ref, q2b_ref, q3_ref):
        # x_ref : (H, W, CIN) bf16          o*_ref: (M, C_branch) f32
        # q*_ref: f32 VMEM scratch holding a zero-padded copy of an intermediate
        #         activation; the image interior lives at offset (OFF, OFF).

        x2d = x_ref[...].reshape(M, CIN)                    # (M, CIN) bf16

        def matmul_bias_relu(x2d_bf16, w_ref, b_ref):
            acc = jnp.dot(x2d_bf16, w_ref[...],
                          preferred_element_type=jnp.float32)
            return jnp.maximum(acc + b_ref[...], 0.0)

        def pad_to_scratch(q_ref, t2d, c):
            # zero the padded buffer, drop the (H, W, c) image at (OFF, OFF)
            q_ref[...] = jnp.zeros_like(q_ref)
            q_ref[OFF:OFF + H, OFF:OFF + W, :] = t2d.reshape(H, W, c)

        def conv_kxk_relu(q_ref, w_ref, b_ref, k, cin, cout, pad):
            # out = relu( sum_{kh,kw} window(kh,kw) @ W[kh,kw] + b )
            acc = jnp.zeros((M, cout), jnp.float32)
            for kh in range(k):
                for kw in range(k):
                    h0 = OFF - pad + kh
                    w0 = OFF - pad + kw
                    xs = q_ref[h0:h0 + H, w0:w0 + W, :].reshape(M, cin)
                    wk = w_ref[(kh * k + kw) * cin:(kh * k + kw + 1) * cin, :]
                    acc = acc + jnp.dot(xs.astype(jnp.bfloat16), wk,
                                        preferred_element_type=jnp.float32)
            return jnp.maximum(acc + b_ref[...], 0.0)

        # ---- branch0: 1x1 (192 -> 96) ---------------------------------------
        y0 = matmul_bias_relu(x2d, w0_ref, b0_ref)
        o0_ref[...] = y0.astype(o0_ref.dtype)

        # ---- branch1: 1x1 (192 -> 48) -> 5x5 p2 (48 -> 64) -------------------
        t1 = matmul_bias_relu(x2d, w10_ref, b10_ref)        # (M, 48) f32
        pad_to_scratch(q1_ref, t1, C1A)
        y1 = conv_kxk_relu(q1_ref, w11_ref, b11_ref, 5, C1A, C1B, 2)
        o1_ref[...] = y1.astype(o1_ref.dtype)

        # ---- branch2: 1x1 (192->64) -> 3x3 p1 (64->96) -> 3x3 p1 (96->96) ----
        t2 = matmul_bias_relu(x2d, w20_ref, b20_ref)        # (M, 64)
        pad_to_scratch(q2a_ref, t2, C2A)
        t2 = conv_kxk_relu(q2a_ref, w21_ref, b21_ref, 3, C2A, C2B, 1)  # (M, 96)
        pad_to_scratch(q2b_ref, t2, C2B)
        y2 = conv_kxk_relu(q2b_ref, w22_ref, b22_ref, 3, C2B, C2C, 1)
        o2_ref[...] = y2.astype(o2_ref.dtype)

        # ---- branch3: avgpool 3x3 s1 p1 (count_include_pad=False) -> 1x1 -----
        # avgpool(x) @ W == sumpool(x @ W) * (1 / valid_count): do the 1x1
        # matmul first (192 -> 64 channels) and sum-pool the small result.
        u3 = jnp.dot(x2d, w3_ref[...], preferred_element_type=jnp.float32)
        pad_to_scratch(q3_ref, u3, C3)
        sp = jnp.zeros((M, C3), jnp.float32)
        for kh in range(3):
            for kw in range(3):
                h0 = OFF - 1 + kh
                w0 = OFF - 1 + kw
                sp = sp + q3_ref[h0:h0 + H, w0:w0 + W, :].reshape(M, C3)
        y3 = jnp.maximum(sp * invc_ref[...] + b3_ref[...], 0.0)
        o3_ref[...] = y3.astype(o3_ref.dtype)

    return kernel


# ----------------------------------------------------------------------------
# Wrapper (layout plumbing + BN folding is glue; all compute is in-kernel)
# ----------------------------------------------------------------------------
def _fold_bn(p, eps=1e-3):
    """Fold eval-mode BatchNorm into (bf16 scaled weight matrix, f32 bias)."""
    w, gamma, beta, mean, var = p
    cout, cin, kh, kw = w.shape
    inv = gamma / jnp.sqrt(var + eps)
    wmat = jnp.transpose(w, (2, 3, 1, 0)).reshape(kh * kw * cin, cout)
    wmat = (wmat * inv[None, :]).astype(jnp.bfloat16)    # scale folded into W
    bias = (beta - mean * inv).reshape(1, cout).astype(jnp.float32)
    return wmat, bias


def mixed_5b(x_nchw, params):
    """Forward pass of Mixed_5b; input/output in NCHW like the PyTorch module."""
    x = jnp.transpose(x_nchw, (0, 2, 3, 1))              # NCHW -> NHWC
    N, H, W, cin = x.shape
    assert cin == CIN, cin
    assert W % 16 == 0 and H % 8 == 0, (H, W)            # reshape alignment
    M = H * W

    w0, b0 = _fold_bn(params["b0"])
    w10, b10 = _fold_bn(params["b1_0"])
    w11, b11 = _fold_bn(params["b1_1"])
    w20, b20 = _fold_bn(params["b2_0"])
    w21, b21 = _fold_bn(params["b2_1"])
    w22, b22 = _fold_bn(params["b2_2"])
    w3, b3 = _fold_bn(params["b3_1"])

    # Reciprocal of the valid (non-pad) window-element count for
    # AvgPool2d(3, stride=1, padding=1, count_include_pad=False).
    ones = jnp.ones((1, H, W, 1), jnp.float32)
    cnt = jax.lax.reduce_window(ones, 0.0, jax.lax.add, (1, 3, 3, 1),
                                (1, 1, 1, 1),
                                [(0, 0), (1, 1), (1, 1), (0, 0)])
    invc = (1.0 / cnt).reshape(M, 1)

    operands = (x.astype(jnp.bfloat16),
                w0, b0, w10, b10, w11, b11,
                w20, b20, w21, b21, w22, b22, w3, b3, invc)

    def full_spec(arr):
        return pl.BlockSpec(arr.shape, lambda n, _nd=arr.ndim: (0,) * _nd)

    in_specs = [pl.BlockSpec((None, H, W, CIN), lambda n: (n, 0, 0, 0))]
    in_specs += [full_spec(op) for op in operands[1:]]

    out_shape = tuple(jax.ShapeDtypeStruct((N, M, c), jnp.float32)
                      for c in (C0, C1B, C2C, C3))
    out_specs = [pl.BlockSpec((None, M, c), lambda n: (n, 0, 0))
                 for c in (C0, C1B, C2C, C3)]

    kernel = _make_mixed_5b_kernel(H, W)

    o0, o1, o2, o3 = pl.pallas_call(
        kernel,
        out_shape=out_shape,
        grid=(N,),
        in_specs=in_specs,
        out_specs=out_specs,
        scratch_shapes=[
            pltpu.VMEM((H + OFF + 2, W + OFF + 2, C1A), jnp.float32),  # b1, pad 2
            pltpu.VMEM((H + OFF + 1, W + OFF + 1, C2A), jnp.float32),  # b2, pad 1
            pltpu.VMEM((H + OFF + 1, W + OFF + 1, C2B), jnp.float32),  # b2, pad 1
            pltpu.VMEM((H + OFF + 1, W + OFF + 1, C3), jnp.float32),   # b3, pad 1
        ],
        compiler_params=pltpu.CompilerParams(
            dimension_semantics=("parallel",)),
    )(*operands)

    out = jnp.concatenate([o0, o1, o2, o3], axis=-1)      # (N, M, 320)
    out = out.reshape(N, H, W, COUT)
    return jnp.transpose(out, (0, 3, 1, 2))               # NHWC -> NCHW


# ----------------------------------------------------------------------------
# Deterministic parameter init (shapes from Mixed_5b.__init__)
# ----------------------------------------------------------------------------
def init_basic_conv(key, cin, cout, k):
    k1, k2, k3, k4, k5 = jax.random.split(key, 5)
    fan_in = cin * k * k
    w = jax.random.normal(k1, (cout, cin, k, k), jnp.float32) / np.sqrt(fan_in)
    gamma = 1.0 + 0.1 * jax.random.normal(k2, (cout,), jnp.float32)
    beta = 0.1 * jax.random.normal(k3, (cout,), jnp.float32)
    mean = 0.1 * jax.random.normal(k4, (cout,), jnp.float32)
    var = 0.5 + jax.random.uniform(k5, (cout,), jnp.float32)
    return (w, gamma, beta, mean, var)


# ----------------------------------------------------------------------------
# Pure-JAX reference (correctness check)
# ----------------------------------------------------------------------------
def _ref_basic_conv(x_nhwc, p, stride, padding, eps=1e-3):
    w, gamma, beta, mean, var = p
    out = jax.lax.conv_general_dilated(
        x_nhwc, jnp.transpose(w, (2, 3, 1, 0)),
        window_strides=(stride, stride),
        padding=[(padding, padding), (padding, padding)],
        dimension_numbers=("NHWC", "HWIO", "NHWC"))
    inv = gamma / jnp.sqrt(var + eps)
    return jnp.maximum(out * inv + (beta - mean * inv), 0.0)


def _ref_avgpool3x3_s1_p1(x_nhwc):
    s = jax.lax.reduce_window(x_nhwc, 0.0, jax.lax.add, (1, 3, 3, 1),
                              (1, 1, 1, 1), [(0, 0), (1, 1), (1, 1), (0, 0)])
    ones = jnp.ones_like(x_nhwc[..., :1])
    c = jax.lax.reduce_window(ones, 0.0, jax.lax.add, (1, 3, 3, 1),
                              (1, 1, 1, 1), [(0, 0), (1, 1), (1, 1), (0, 0)])
    return s / c


def _ref_mixed_5b(x_nchw, params):
    x = jnp.transpose(x_nchw, (0, 2, 3, 1))
    x0 = _ref_basic_conv(x, params["b0"], 1, 0)
    y = _ref_basic_conv(x, params["b1_0"], 1, 0)
    x1 = _ref_basic_conv(y, params["b1_1"], 1, 2)
    y = _ref_basic_conv(x, params["b2_0"], 1, 0)
    y = _ref_basic_conv(y, params["b2_1"], 1, 1)
    x2 = _ref_basic_conv(y, params["b2_2"], 1, 1)
    y = _ref_avgpool3x3_s1_p1(x)
    x3 = _ref_basic_conv(y, params["b3_1"], 1, 0)
    out = jnp.concatenate([x0, x1, x2, x3], axis=-1)
    return jnp.transpose(out, (0, 3, 1, 2))


# ----------------------------------------------------------------------------
if __name__ == "__main__":
    key = jax.random.PRNGKey(0)
    kx, k0, k1, k2, k3, k4, k5, k6 = jax.random.split(key, 8)

    params = {
        "b0":   init_basic_conv(k0, 192, 96, 1),
        "b1_0": init_basic_conv(k1, 192, 48, 1),
        "b1_1": init_basic_conv(k2, 48, 64, 5),
        "b2_0": init_basic_conv(k3, 192, 64, 1),
        "b2_1": init_basic_conv(k4, 64, 96, 3),
        "b2_2": init_basic_conv(k5, 96, 96, 3),
        "b3_1": init_basic_conv(k6, 192, 64, 1),
    }

    # Small but module-consistent input: N=2, C=192 (fixed by Mixed_5b), 16x16.
    x = jax.random.normal(kx, (2, 192, 16, 16), jnp.float32)

    out = jax.block_until_ready(jax.jit(mixed_5b)(x, params))
    assert out.shape == (2, 320, 16, 16), out.shape

    ref = jax.block_until_ready(jax.jit(_ref_mixed_5b)(x, params))
    err = float(jnp.max(jnp.abs(out - ref)))
    scale = float(jnp.max(jnp.abs(ref))) + 1e-6
    assert err / scale < 5e-2, f"relative error too large: {err / scale} (abs {err})"

    print("KERNEL_OK")
</pallas_src>

<mosaic_0001>
module attributes {stable_mosaic.version = 11 : i64} {
  func.func @kernel(%arg0: i32, %arg1: memref<1x16x16x192xbf16, #tpu.memory_space<vmem>>, %arg2: memref<192x96xbf16, #tpu.memory_space<vmem>>, %arg3: memref<1x96xf32, #tpu.memory_space<vmem>>, %arg4: memref<192x48xbf16, #tpu.memory_space<vmem>>, %arg5: memref<1x48xf32, #tpu.memory_space<vmem>>, %arg6: memref<1200x64xbf16, #tpu.memory_space<vmem>>, %arg7: memref<1x64xf32, #tpu.memory_space<vmem>>, %arg8: memref<192x64xbf16, #tpu.memory_space<vmem>>, %arg9: memref<1x64xf32, #tpu.memory_space<vmem>>, %arg10: memref<576x96xbf16, #tpu.memory_space<vmem>>, %arg11: memref<1x96xf32, #tpu.memory_space<vmem>>, %arg12: memref<864x96xbf16, #tpu.memory_space<vmem>>, %arg13: memref<1x96xf32, #tpu.memory_space<vmem>>, %arg14: memref<192x64xbf16, #tpu.memory_space<vmem>>, %arg15: memref<1x64xf32, #tpu.memory_space<vmem>>, %arg16: memref<256x1xf32, #tpu.memory_space<vmem>>, %arg17: memref<1x256x96xf32, #tpu.memory_space<vmem>>, %arg18: memref<1x256x64xf32, #tpu.memory_space<vmem>>, %arg19: memref<1x256x96xf32, #tpu.memory_space<vmem>>, %arg20: memref<1x256x64xf32, #tpu.memory_space<vmem>>, %arg21: memref<26x26x48xf32, #tpu.memory_space<vmem>>, %arg22: memref<25x25x64xf32, #tpu.memory_space<vmem>>, %arg23: memref<25x25x96xf32, #tpu.memory_space<vmem>>, %arg24: memref<25x25x64xf32, #tpu.memory_space<vmem>>) attributes {dimension_semantics = [#tpu.dimension_semantics<parallel>], iteration_bounds = array<i64: 2>, scalar_prefetch = 0 : i64, scratch_operands = 4 : i64, tpu.core_type = #tpu.core_type<tc>, window_params = [{transform_indices = @transform_0, window_bounds = array<i64: 1, 16, 16, 192>}, {pipeline_mode = #tpu.pipeline_mode<synchronous>, transform_indices = @transform_1, window_bounds = array<i64: 192, 96>}, {pipeline_mode = #tpu.pipeline_mode<synchronous>, transform_indices = @transform_2, window_bounds = array<i64: 1, 96>}, {pipeline_mode = #tpu.pipeline_mode<synchronous>, transform_indices = @transform_3, window_bounds = array<i64: 192, 48>}, {pipeline_mode = #tpu.pipeline_mode<synchronous>, transform_indices = @transform_4, window_bounds = array<i64: 1, 48>}, {pipeline_mode = #tpu.pipeline_mode<synchronous>, transform_indices = @transform_5, window_bounds = array<i64: 1200, 64>}, {pipeline_mode = #tpu.pipeline_mode<synchronous>, transform_indices = @transform_6, window_bounds = array<i64: 1, 64>}, {pipeline_mode = #tpu.pipeline_mode<synchronous>, transform_indices = @transform_7, window_bounds = array<i64: 192, 64>}, {pipeline_mode = #tpu.pipeline_mode<synchronous>, transform_indices = @transform_8, window_bounds = array<i64: 1, 64>}, {pipeline_mode = #tpu.pipeline_mode<synchronous>, transform_indices = @transform_9, window_bounds = array<i64: 576, 96>}, {pipeline_mode = #tpu.pipeline_mode<synchronous>, transform_indices = @transform_10, window_bounds = array<i64: 1, 96>}, {pipeline_mode = #tpu.pipeline_mode<synchronous>, transform_indices = @transform_11, window_bounds = array<i64: 864, 96>}, {pipeline_mode = #tpu.pipeline_mode<synchronous>, transform_indices = @transform_12, window_bounds = array<i64: 1, 96>}, {pipeline_mode = #tpu.pipeline_mode<synchronous>, transform_indices = @transform_13, window_bounds = array<i64: 192, 64>}, {pipeline_mode = #tpu.pipeline_mode<synchronous>, transform_indices = @transform_14, window_bounds = array<i64: 1, 64>}, {pipeline_mode = #tpu.pipeline_mode<synchronous>, transform_indices = @transform_15, window_bounds = array<i64: 256, 1>}, {transform_indices = @transform_16, window_bounds = array<i64: 1, 256, 96>}, {transform_indices = @transform_17, window_bounds = array<i64: 1, 256, 64>}, {transform_indices = @transform_18, window_bounds = array<i64: 1, 256, 96>}, {transform_indices = @transform_19, window_bounds = array<i64: 1, 256, 64>}]} {
    %c0 = arith.constant 0 : index
    %c0_0 = arith.constant 0 : index
    %c0_1 = arith.constant 0 : index
    %c0_2 = arith.constant 0 : index
    %0 = vector.load %arg1[%c0, %c0_0, %c0_1, %c0_2] : memref<1x16x16x192xbf16, #tpu.memory_space<vmem>>, vector<1x16x16x192xbf16>
    %1 = vector.shape_cast %0 : vector<1x16x16x192xbf16> to vector<16x16x192xbf16>
    %2 = vector.shape_cast %1 : vector<16x16x192xbf16> to vector<256x192xbf16>
    %c0_3 = arith.constant 0 : index
    %c0_4 = arith.constant 0 : index
    %3 = vector.load %arg2[%c0_3, %c0_4] : memref<192x96xbf16, #tpu.memory_space<vmem>>, vector<192x96xbf16>
    %cst = arith.constant dense<0.000000e+00> : vector<256x96xf32>
    %4 = tpu.matmul %2, %3, %cst {dimension_numbers = #tpu.dot_dimension_numbers<[1], [0], [0], [1], [0, 0, 1, 1], [], []>} : vector<256x192xbf16>, vector<192x96xbf16>, vector<256x96xf32> -> vector<256x96xf32>
    %c0_5 = arith.constant 0 : index
    %c0_6 = arith.constant 0 : index
    %5 = vector.load %arg3[%c0_5, %c0_6] : memref<1x96xf32, #tpu.memory_space<vmem>>, vector<1x96xf32>
    %6 = vector.broadcast %5 : vector<1x96xf32> to vector<256x96xf32>
    %7 = arith.addf %4, %6 : vector<256x96xf32>
    %cst_7 = arith.constant 0.000000e+00 : f32
    %8 = vector.broadcast %cst_7 : f32 to vector<256x96xf32>
    %9 = arith.maximumf %7, %8 : vector<256x96xf32>
    %c0_8 = arith.constant 0 : index
    %c0_9 = arith.constant 0 : index
    %c0_10 = arith.constant 0 : index
    %10 = vector.load %arg17[%c0_8, %c0_9, %c0_10] : memref<1x256x96xf32, #tpu.memory_space<vmem>>, vector<1x256x96xf32>
    %11 = vector.shape_cast %10 : vector<1x256x96xf32> to vector<256x96xf32>
    %12 = vector.shape_cast %9 : vector<256x96xf32> to vector<1x256x96xf32>
    tpu.vector_store %arg17[%c0_8, %c0_9, %c0_10], %12 {strides = array<i32>} : memref<1x256x96xf32, #tpu.memory_space<vmem>>, vector<1x256x96xf32>,
    %c0_11 = arith.constant 0 : index
    %c0_12 = arith.constant 0 : index
    %13 = vector.load %arg4[%c0_11, %c0_12] : memref<192x48xbf16, #tpu.memory_space<vmem>>, vector<192x48xbf16>
    %cst_13 = arith.constant dense<0.000000e+00> : vector<256x48xf32>
    %14 = tpu.matmul %2, %13, %cst_13 {dimension_numbers = #tpu.dot_dimension_numbers<[1], [0], [0], [1], [0, 0, 1, 1], [], []>} : vector<256x192xbf16>, vector<192x48xbf16>, vector<256x48xf32> -> vector<256x48xf32>
    %c0_14 = arith.constant 0 : index
    %c0_15 = arith.constant 0 : index
    %15 = vector.load %arg5[%c0_14, %c0_15] : memref<1x48xf32, #tpu.memory_space<vmem>>, vector<1x48xf32>
    %16 = vector.broadcast %15 : vector<1x48xf32> to vector<256x48xf32>
    %17 = arith.addf %14, %16 : vector<256x48xf32>
    %cst_16 = arith.constant 0.000000e+00 : f32
    %18 = vector.broadcast %cst_16 : f32 to vector<256x48xf32>
    %19 = arith.maximumf %17, %18 : vector<256x48xf32>
    %cst_17 = arith.constant 0.000000e+00 : f32
    %20 = vector.broadcast %cst_17 : f32 to vector<26x26x48xf32>
    %c0_18 = arith.constant 0 : index
    %c0_19 = arith.constant 0 : index
    %c0_20 = arith.constant 0 : index
    %21 = vector.load %arg21[%c0_18, %c0_19, %c0_20] : memref<26x26x48xf32, #tpu.memory_space<vmem>>, vector<26x26x48xf32>
    tpu.vector_store %arg21[%c0_18, %c0_19, %c0_20], %20 {strides = array<i32>} : memref<26x26x48xf32, #tpu.memory_space<vmem>>, vector<26x26x48xf32>,
    %22 = vector.shape_cast %19 : vector<256x48xf32> to vector<16x16x48xf32>
    %c8 = arith.constant 8 : index
    %c8_21 = arith.constant 8 : index
    %c0_22 = arith.constant 0 : index
    %23 = vector.load %arg21[%c8, %c8_21, %c0_22] : memref<26x26x48xf32, #tpu.memory_space<vmem>>, vector<16x16x48xf32>
    tpu.vector_store %arg21[%c8, %c8_21, %c0_22], %22 {strides = array<i32>} : memref<26x26x48xf32, #tpu.memory_space<vmem>>, vector<16x16x48xf32>,
    %cst_23 = arith.constant 0.000000e+00 : f32
    %24 = vector.broadcast %cst_23 : f32 to vector<256x64xf32>
    %c6 = arith.constant 6 : index
    %c6_24 = arith.constant 6 : index
    %c0_25 = arith.constant 0 : index
    %25 = vector.load %arg21[%c6, %c6_24, %c0_25] : memref<26x26x48xf32, #tpu.memory_space<vmem>>, vector<16x16x48xf32>
    %26 = vector.shape_cast %25 : vector<16x16x48xf32> to vector<256x48xf32>
    %c0_26 = arith.constant 0 : index
    %c0_27 = arith.constant 0 : index
    %27 = vector.load %arg6[%c0_26, %c0_27] : memref<1200x64xbf16, #tpu.memory_space<vmem>>, vector<48x64xbf16>
    %28 = arith.truncf %26 : vector<256x48xf32> to vector<256x48xbf16>
    %cst_28 = arith.constant dense<0.000000e+00> : vector<256x64xf32>
    %29 = tpu.matmul %28, %27, %cst_28 {dimension_numbers = #tpu.dot_dimension_numbers<[1], [0], [0], [1], [0, 0, 1, 1], [], []>} : vector<256x48xbf16>, vector<48x64xbf16>, vector<256x64xf32> -> vector<256x64xf32>
    %30 = arith.addf %24, %29 : vector<256x64xf32>
    %c6_29 = arith.constant 6 : index
    %c7 = arith.constant 7 : index
    %c0_30 = arith.constant 0 : index
    %31 = vector.load %arg21[%c6_29, %c7, %c0_30] : memref<26x26x48xf32, #tpu.memory_space<vmem>>, vector<16x16x48xf32>
    %32 = vector.shape_cast %31 : vector<16x16x48xf32> to vector<256x48xf32>
    %c48 = arith.constant 48 : index
    %c0_31 = arith.constant 0 : index
    %33 = vector.load %arg6[%c48, %c0_31] : memref<1200x64xbf16, #tpu.memory_space<vmem>>, vector<48x64xbf16>
    %34 = arith.truncf %32 : vector<256x48xf32> to vector<256x48xbf16>
    %cst_32 = arith.constant dense<0.000000e+00> : vector<256x64xf32>
    %35 = tpu.matmul %34, %33, %cst_32 {dimension_numbers = #tpu.dot_dimension_numbers<[1], [0], [0], [1], [0, 0, 1, 1], [], []>} : vector<256x48xbf16>, vector<48x64xbf16>, vector<256x64xf32> -> vector<256x64xf32>
    %36 = arith.addf %30, %35 : vector<256x64xf32>
    %c6_33 = arith.constant 6 : index
    %c8_34 = arith.constant 8 : index
    %c0_35 = arith.constant 0 : index
    %37 = vector.load %arg21[%c6_33, %c8_34, %c0_35] : memref<26x26x48xf32, #tpu.memory_space<vmem>>, vector<16x16x48xf32>
    %38 = vector.shape_cast %37 : vector<16x16x48xf32> to vector<256x48xf32>
    %c96 = arith.constant 96 : index
    %c0_36 = arith.constant 0 : index
    %39 = vector.load %arg6[%c96, %c0_36] : memref<1200x64xbf16, #tpu.memory_space<vmem>>, vector<48x64xbf16>
    %40 = arith.truncf %38 : vector<256x48xf32> to vector<256x48xbf16>
    %cst_37 = arith.constant dense<0.000000e+00> : vector<256x64xf32>
    %41 = tpu.matmul %40, %39, %cst_37 {dimension_numbers = #tpu.dot_dimension_numbers<[1], [0], [0], [1], [0, 0, 1, 1], [], []>} : vector<256x48xbf16>, vector<48x64xbf16>, vector<256x64xf32> -> vector<256x64xf32>
    %42 = arith.addf %36, %41 : vector<256x64xf32>
    %c6_38 = arith.constant 6 : index
    %c9 = arith.constant 9 : index
    %c0_39 = arith.constant 0 : index
    %43 = vector.load %arg21[%c6_38, %c9, %c0_39] : memref<26x26x48xf32, #tpu.memory_space<vmem>>, vector<16x16x48xf32>
    %44 = vector.shape_cast %43 : vector<16x16x48xf32> to vector<256x48xf32>
    %c144 = arith.constant 144 : index
    %c0_40 = arith.constant 0 : index
    %45 = vector.load %arg6[%c144, %c0_40] : memref<1200x64xbf16, #tpu.memory_space<vmem>>, vector<48x64xbf16>
    %46 = arith.truncf %44 : vector<256x48xf32> to vector<256x48xbf16>
    %cst_41 = arith.constant dense<0.000000e+00> : vector<256x64xf32>
    %47 = tpu.matmul %46, %45, %cst_41 {dimension_numbers = #tpu.dot_dimension_numbers<[1], [0], [0], [1], [0, 0, 1, 1], [], []>} : vector<256x48xbf16>, vector<48x64xbf16>, vector<256x64xf32> -> vector<256x64xf32>
    %48 = arith.addf %42, %47 : vector<256x64xf32>
    %c6_42 = arith.constant 6 : index
    %c10 = arith.constant 10 : index
    %c0_43 = arith.constant 0 : index
    %49 = vector.load %arg21[%c6_42, %c10, %c0_43] : memref<26x26x48xf32, #tpu.memory_space<vmem>>, vector<16x16x48xf32>
    %50 = vector.shape_cast %49 : vector<16x16x48xf32> to vector<256x48xf32>
    %c192 = arith.constant 192 : index
    %c0_44 = arith.constant 0 : index
    %51 = vector.load %arg6[%c192, %c0_44] : memref<1200x64xbf16, #tpu.memory_space<vmem>>, vector<48x64xbf16>
    %52 = arith.truncf %50 : vector<256x48xf32> to vector<256x48xbf16>
    %cst_45 = arith.constant dense<0.000000e+00> : vector<256x64xf32>
    %53 = tpu.matmul %52, %51, %cst_45 {dimension_numbers = #tpu.dot_dimension_numbers<[1], [0], [0], [1], [0, 0, 1, 1], [], []>} : vector<256x48xbf16>, vector<48x64xbf16>, vector<256x64xf32> -> vector<256x64xf32>
    %54 = arith.addf %48, %53 : vector<256x64xf32>
    %c7_46 = arith.constant 7 : index
    %c6_47 = arith.constant 6 : index
    %c0_48 = arith.constant 0 : index
    %55 = vector.load %arg21[%c7_46, %c6_47, %c0_48] : memref<26x26x48xf32, #tpu.memory_space<vmem>>, vector<16x16x48xf32>
    %56 = vector.shape_cast %55 : vector<16x16x48xf32> to vector<256x48xf32>
    %c240 = arith.constant 240 : index
    %c0_49 = arith.constant 0 : index
    %57 = vector.load %arg6[%c240, %c0_49] : memref<1200x64xbf16, #tpu.memory_space<vmem>>, vector<48x64xbf16>
    %58 = arith.truncf %56 : vector<256x48xf32> to vector<256x48xbf16>
    %cst_50 = arith.constant dense<0.000000e+00> : vector<256x64xf32>
    %59 = tpu.matmul %58, %57, %cst_50 {dimension_numbers = #tpu.dot_dimension_numbers<[1], [0], [0], [1], [0, 0, 1, 1], [], []>} : vector<256x48xbf16>, vector<48x64xbf16>, vector<256x64xf32> -> vector<256x64xf32>
    %60 = arith.addf %54, %59 : vector<256x64xf32>
    %c7_51 = arith.constant 7 : index
    %c7_52 = arith.constant 7 : index
    %c0_53 = arith.constant 0 : index
    %61 = vector.load %arg21[%c7_51, %c7_52, %c0_53] : memref<26x26x48xf32, #tpu.memory_space<vmem>>, vector<16x16x48xf32>
    %62 = vector.shape_cast %61 : vector<16x16x48xf32> to vector<256x48xf32>
    %c288 = arith.constant 288 : index
    %c0_54 = arith.constant 0 : index
    %63 = vector.load %arg6[%c288, %c0_54] : memref<1200x64xbf16, #tpu.memory_space<vmem>>, vector<48x64xbf16>
    %64 = arith.truncf %62 : vector<256x48xf32> to vector<256x48xbf16>
    %cst_55 = arith.constant dense<0.000000e+00> : vector<256x64xf32>
    %65 = tpu.matmul %64, %63, %cst_55 {dimension_numbers = #tpu.dot_dimension_numbers<[1], [0], [0], [1], [0, 0, 1, 1], [], []>} : vector<256x48xbf16>, vector<48x64xbf16>, vector<256x64xf32> -> vector<256x64xf32>
    %66 = arith.addf %60, %65 : vector<256x64xf32>
    %c7_56 = arith.constant 7 : index
    %c8_57 = arith.constant 8 : index
    %c0_58 = arith.constant 0 : index
    %67 = vector.load %arg21[%c7_56, %c8_57, %c0_58] : memref<26x26x48xf32, #tpu.memory_space<vmem>>, vector<16x16x48xf32>
    %68 = vector.shape_cast %67 : vector<16x16x48xf32> to vector<256x48xf32>
    %c336 = arith.constant 336 : index
    %c0_59 = arith.constant 0 : index
    %69 = vector.load %arg6[%c336, %c0_59] : memref<1200x64xbf16, #tpu.memory_space<vmem>>, vector<48x64xbf16>
    %70 = arith.truncf %68 : vector<256x48xf32> to vector<256x48xbf16>
    %cst_60 = arith.constant dense<0.000000e+00> : vector<256x64xf32>
    %71 = tpu.matmul %70, %69, %cst_60 {dimension_numbers = #tpu.dot_dimension_numbers<[1], [0], [0], [1], [0, 0, 1, 1], [], []>} : vector<256x48xbf16>, vector<48x64xbf16>, vector<256x64xf32> -> vector<256x64xf32>
    %72 = arith.addf %66, %71 : vector<256x64xf32>
    %c7_61 = arith.constant 7 : index
    %c9_62 = arith.constant 9 : index
    %c0_63 = arith.constant 0 : index
    %73 = vector.load %arg21[%c7_61, %c9_62, %c0_63] : memref<26x26x48xf32, #tpu.memory_space<vmem>>, vector<16x16x48xf32>
    %74 = vector.shape_cast %73 : vector<16x16x48xf32> to vector<256x48xf32>
    %c384 = arith.constant 384 : index
    %c0_64 = arith.constant 0 : index
    %75 = vector.load %arg6[%c384, %c0_64] : memref<1200x64xbf16, #tpu.memory_space<vmem>>, vector<48x64xbf16>
    %76 = arith.truncf %74 : vector<256x48xf32> to vector<256x48xbf16>
    %cst_65 = arith.constant dense<0.000000e+00> : vector<256x64xf32>
    %77 = tpu.matmul %76, %75, %cst_65 {dimension_numbers = #tpu.dot_dimension_numbers<[1], [0], [0], [1], [0, 0, 1, 1], [], []>} : vector<256x48xbf16>, vector<48x64xbf16>, vector<256x64xf32> -> vector<256x64xf32>
    %78 = arith.addf %72, %77 : vector<256x64xf32>
    %c7_66 = arith.constant 7 : index
    %c10_67 = arith.constant 10 : index
    %c0_68 = arith.constant 0 : index
    %79 = vector.load %arg21[%c7_66, %c10_67, %c0_68] : memref<26x26x48xf32, #tpu.memory_space<vmem>>, vector<16x16x48xf32>
    %80 = vector.shape_cast %79 : vector<16x16x48xf32> to vector<256x48xf32>
    %c432 = arith.constant 432 : index
    %c0_69 = arith.constant 0 : index
    %81 = vector.load %arg6[%c432, %c0_69] : memref<1200x64xbf16, #tpu.memory_space<vmem>>, vector<48x64xbf16>
    %82 = arith.truncf %80 : vector<256x48xf32> to vector<256x48xbf16>
    %cst_70 = arith.constant dense<0.000000e+00> : vector<256x64xf32>
    %83 = tpu.matmul %82, %81, %cst_70 {dimension_numbers = #tpu.dot_dimension_numbers<[1], [0], [0], [1], [0, 0, 1, 1], [], []>} : vector<256x48xbf16>, vector<48x64xbf16>, vector<256x64xf32> -> vector<256x64xf32>
    %84 = arith.addf %78, %83 : vector<256x64xf32>
    %c8_71 = arith.constant 8 : index
    %c6_72 = arith.constant 6 : index
    %c0_73 = arith.constant 0 : index
    %85 = vector.load %arg21[%c8_71, %c6_72, %c0_73] : memref<26x26x48xf32, #tpu.memory_space<vmem>>, vector<16x16x48xf32>
    %86 = vector.shape_cast %85 : vector<16x16x48xf32> to vector<256x48xf32>
    %c480 = arith.constant 480 : index
    %c0_74 = arith.constant 0 : index
    %87 = vector.load %arg6[%c480, %c0_74] : memref<1200x64xbf16, #tpu.memory_space<vmem>>, vector<48x64xbf16>
    %88 = arith.truncf %86 : vector<256x48xf32> to vector<256x48xbf16>
    %cst_75 = arith.constant dense<0.000000e+00> : vector<256x64xf32>
    %89 = tpu.matmul %88, %87, %cst_75 {dimension_numbers = #tpu.dot_dimension_numbers<[1], [0], [0], [1], [0, 0, 1, 1], [], []>} : vector<256x48xbf16>, vector<48x64xbf16>, vector<256x64xf32> -> vector<256x64xf32>
    %90 = arith.addf %84, %89 : vector<256x64xf32>
    %c8_76 = arith.constant 8 : index
    %c7_77 = arith.constant 7 : index
    %c0_78 = arith.constant 0 : index
    %91 = vector.load %arg21[%c8_76, %c7_77, %c0_78] : memref<26x26x48xf32, #tpu.memory_space<vmem>>, vector<16x16x48xf32>
    %92 = vector.shape_cast %91 : vector<16x16x48xf32> to vector<256x48xf32>
    %c528 = arith.constant 528 : index
    %c0_79 = arith.constant 0 : index
    %93 = vector.load %arg6[%c528, %c0_79] : memref<1200x64xbf16, #tpu.memory_space<vmem>>, vector<48x64xbf16>
    %94 = arith.truncf %92 : vector<256x48xf32> to vector<256x48xbf16>
    %cst_80 = arith.constant dense<0.000000e+00> : vector<256x64xf32>
    %95 = tpu.matmul %94, %93, %cst_80 {dimension_numbers = #tpu.dot_dimension_numbers<[1], [0], [0], [1], [0, 0, 1, 1], [], []>} : vector<256x48xbf16>, vector<48x64xbf16>, vector<256x64xf32> -> vector<256x64xf32>
    %96 = arith.addf %90, %95 : vector<256x64xf32>
    %c8_81 = arith.constant 8 : index
    %c8_82 = arith.constant 8 : index
    %c0_83 = arith.constant 0 : index
    %97 = vector.load %arg21[%c8_81, %c8_82, %c0_83] : memref<26x26x48xf32, #tpu.memory_space<vmem>>, vector<16x16x48xf32>
    %98 = vector.shape_cast %97 : vector<16x16x48xf32> to vector<256x48xf32>
    %c576 = arith.constant 576 : index
    %c0_84 = arith.constant 0 : index
    %99 = vector.load %arg6[%c576, %c0_84] : memref<1200x64xbf16, #tpu.memory_space<vmem>>, vector<48x64xbf16>
    %100 = arith.truncf %98 : vector<256x48xf32> to vector<256x48xbf16>
    %cst_85 = arith.constant dense<0.000000e+00> : vector<256x64xf32>
    %101 = tpu.matmul %100, %99, %cst_85 {dimension_numbers = #tpu.dot_dimension_numbers<[1], [0], [0], [1], [0, 0, 1, 1], [], []>} : vector<256x48xbf16>, vector<48x64xbf16>, vector<256x64xf32> -> vector<256x64xf32>
    %102 = arith.addf %96, %101 : vector<256x64xf32>
    %c8_86 = arith.constant 8 : index
    %c9_87 = arith.constant 9 : index
    %c0_88 = arith.constant 0 : index
    %103 = vector.load %arg21[%c8_86, %c9_87, %c0_88] : memref<26x26x48xf32, #tpu.memory_space<vmem>>, vector<16x16x48xf32>
    %104 = vector.shape_cast %103 : vector<16x16x48xf32> to vector<256x48xf32>
    %c624 = arith.constant 624 : index
    %c0_89 = arith.constant 0 : index
    %105 = vector.load %arg6[%c624, %c0_89] : memref<1200x64xbf16, #tpu.memory_space<vmem>>, vector<48x64xbf16>
    %106 = arith.truncf %104 : vector<256x48xf32> to vector<256x48xbf16>
    %cst_90 = arith.constant dense<0.000000e+00> : vector<256x64xf32>
    %107 = tpu.matmul %106, %105, %cst_90 {dimension_numbers = #tpu.dot_dimension_numbers<[1], [0], [0], [1], [0, 0, 1, 1], [], []>} : vector<256x48xbf16>, vector<48x64xbf16>, vector<256x64xf32> -> vector<256x64xf32>
    %108 = arith.addf %102, %107 : vector<256x64xf32>
    %c8_91 = arith.constant 8 : index
    %c10_92 = arith.constant 10 : index
    %c0_93 = arith.constant 0 : index
    %109 = vector.load %arg21[%c8_91, %c10_92, %c0_93] : memref<26x26x48xf32, #tpu.memory_space<vmem>>, vector<16x16x48xf32>
    %110 = vector.shape_cast %109 : vector<16x16x48xf32> to vector<256x48xf32>
    %c672 = arith.constant 672 : index
    %c0_94 = arith.constant 0 : index
    %111 = vector.load %arg6[%c672, %c0_94] : memref<1200x64xbf16, #tpu.memory_space<vmem>>, vector<48x64xbf16>
    %112 = arith.truncf %110 : vector<256x48xf32> to vector<256x48xbf16>
    %cst_95 = arith.constant dense<0.000000e+00> : vector<256x64xf32>
    %113 = tpu.matmul %112, %111, %cst_95 {dimension_numbers = #tpu.dot_dimension_numbers<[1], [0], [0], [1], [0, 0, 1, 1], [], []>} : vector<256x48xbf16>, vector<48x64xbf16>, vector<256x64xf32> -> vector<256x64xf32>
    %114 = arith.addf %108, %113 : vector<256x64xf32>
    %c9_96 = arith.constant 9 : index
    %c6_97 = arith.constant 6 : index
    %c0_98 = arith.constant 0 : index
    %115 = vector.load %arg21[%c9_96, %c6_97, %c0_98] : memref<26x26x48xf32, #tpu.memory_space<vmem>>, vector<16x16x48xf32>
    %116 = vector.shape_cast %115 : vector<16x16x48xf32> to vector<256x48xf32>
    %c720 = arith.constant 720 : index
    %c0_99 = arith.constant 0 : index
    %117 = vector.load %arg6[%c720, %c0_99] : memref<1200x64xbf16, #tpu.memory_space<vmem>>, vector<48x64xbf16>
    %118 = arith.truncf %116 : vector<256x48xf32> to vector<256x48xbf16>
    %cst_100 = arith.constant dense<0.000000e+00> : vector<256x64xf32>
    %119 = tpu.matmul %118, %117, %cst_100 {dimension_numbers = #tpu.dot_dimension_numbers<[1], [0], [0], [1], [0, 0, 1, 1], [], []>} : vector<256x48xbf16>, vector<48x64xbf16>, vector<256x64xf32> -> vector<256x64xf32>
    %120 = arith.addf %114, %119 : vector<256x64xf32>
    %c9_101 = arith.constant 9 : index
    %c7_102 = arith.constant 7 : index
    %c0_103 = arith.constant 0 : index
    %121 = vector.load %arg21[%c9_101, %c7_102, %c0_103] : memref<26x26x48xf32, #tpu.memory_space<vmem>>, vector<16x16x48xf32>
    %122 = vector.shape_cast %121 : vector<16x16x48xf32> to vector<256x48xf32>
    %c768 = arith.constant 768 : index
    %c0_104 = arith.constant 0 : index
    %123 = vector.load %arg6[%c768, %c0_104] : memref<1200x64xbf16, #tpu.memory_space<vmem>>, vector<48x64xbf16>
    %124 = arith.truncf %122 : vector<256x48xf32> to vector<256x48xbf16>
    %cst_105 = arith.constant dense<0.000000e+00> : vector<256x64xf32>
    %125 = tpu.matmul %124, %123, %cst_105 {dimension_numbers = #tpu.dot_dimension_numbers<[1], [0], [0], [1], [0, 0, 1, 1], [], []>} : vector<256x48xbf16>, vector<48x64xbf16>, vector<256x64xf32> -> vector<256x64xf32>
    %126 = arith.addf %120, %125 : vector<256x64xf32>
    %c9_106 = arith.constant 9 : index
    %c8_107 = arith.constant 8 : index
    %c0_108 = arith.constant 0 : index
    %127 = vector.load %arg21[%c9_106, %c8_107, %c0_108] : memref<26x26x48xf32, #tpu.memory_space<vmem>>, vector<16x16x48xf32>
    %128 = vector.shape_cast %127 : vector<16x16x48xf32> to vector<256x48xf32>
    %c816 = arith.constant 816 : index
    %c0_109 = arith.constant 0 : index
    %129 = vector.load %arg6[%c816, %c0_109] : memref<1200x64xbf16, #tpu.memory_space<vmem>>, vector<48x64xbf16>
    %130 = arith.truncf %128 : vector<256x48xf32> to vector<256x48xbf16>
    %cst_110 = arith.constant dense<0.000000e+00> : vector<256x64xf32>
    %131 = tpu.matmul %130, %129, %cst_110 {dimension_numbers = #tpu.dot_dimension_numbers<[1], [0], [0], [1], [0, 0, 1, 1], [], []>} : vector<256x48xbf16>, vector<48x64xbf16>, vector<256x64xf32> -> vector<256x64xf32>
    %132 = arith.addf %126, %131 : vector<256x64xf32>
    %c9_111 = arith.constant 9 : index
    %c9_112 = arith.constant 9 : index
    %c0_113 = arith.constant 0 : index
    %133 = vector.load %arg21[%c9_111, %c9_112, %c0_113] : memref<26x26x48xf32, #tpu.memory_space<vmem>>, vector<16x16x48xf32>
    %134 = vector.shape_cast %133 : vector<16x16x48xf32> to vector<256x48xf32>
    %c864 = arith.constant 864 : index
    %c0_114 = arith.constant 0 : index
    %135 = vector.load %arg6[%c864, %c0_114] : memref<1200x64xbf16, #tpu.memory_space<vmem>>, vector<48x64xbf16>
    %136 = arith.truncf %134 : vector<256x48xf32> to vector<256x48xbf16>
    %cst_115 = arith.constant dense<0.000000e+00> : vector<256x64xf32>
    %137 = tpu.matmul %136, %135, %cst_115 {dimension_numbers = #tpu.dot_dimension_numbers<[1], [0], [0], [1], [0, 0, 1, 1], [], []>} : vector<256x48xbf16>, vector<48x64xbf16>, vector<256x64xf32> -> vector<256x64xf32>
    %138 = arith.addf %132, %137 : vector<256x64xf32>
    %c9_116 = arith.constant 9 : index
    %c10_117 = arith.constant 10 : index
    %c0_118 = arith.constant 0 : index
    %139 = vector.load %arg21[%c9_116, %c10_117, %c0_118] : memref<26x26x48xf32, #tpu.memory_space<vmem>>, vector<16x16x48xf32>
    %140 = vector.shape_cast %139 : vector<16x16x48xf32> to vector<256x48xf32>
    %c912 = arith.constant 912 : index
    %c0_119 = arith.constant 0 : index
    %141 = vector.load %arg6[%c912, %c0_119] : memref<1200x64xbf16, #tpu.memory_space<vmem>>, vector<48x64xbf16>
    %142 = arith.truncf %140 : vector<256x48xf32> to vector<256x48xbf16>
    %cst_120 = arith.constant dense<0.000000e+00> : vector<256x64xf32>
    %143 = tpu.matmul %142, %141, %cst_120 {dimension_numbers = #tpu.dot_dimension_numbers<[1], [0], [0], [1], [0, 0, 1, 1], [], []>} : vector<256x48xbf16>, vector<48x64xbf16>, vector<256x64xf32> -> vector<256x64xf32>
    %144 = arith.addf %138, %143 : vector<256x64xf32>
    %c10_121 = arith.constant 10 : index
    %c6_122 = arith.constant 6 : index
    %c0_123 = arith.constant 0 : index
    %145 = vector.load %arg21[%c10_121, %c6_122, %c0_123] : memref<26x26x48xf32, #tpu.memory_space<vmem>>, vector<16x16x48xf32>
    %146 = vector.shape_cast %145 : vector<16x16x48xf32> to vector<256x48xf32>
    %c960 = arith.constant 960 : index
    %c0_124 = arith.constant 0 : index
    %147 = vector.load %arg6[%c960, %c0_124] : memref<1200x64xbf16, #tpu.memory_space<vmem>>, vector<48x64xbf16>
    %148 = arith.truncf %146 : vector<256x48xf32> to vector<256x48xbf16>
    %cst_125 = arith.constant dense<0.000000e+00> : vector<256x64xf32>
    %149 = tpu.matmul %148, %147, %cst_125 {dimension_numbers = #tpu.dot_dimension_numbers<[1], [0], [0], [1], [0, 0, 1, 1], [], []>} : vector<256x48xbf16>, vector<48x64xbf16>, vector<256x64xf32> -> vector<256x64xf32>
    %150 = arith.addf %144, %149 : vector<256x64xf32>
    %c10_126 = arith.constant 10 : index
    %c7_127 = arith.constant 7 : index
    %c0_128 = arith.constant 0 : index
    %151 = vector.load %arg21[%c10_126, %c7_127, %c0_128] : memref<26x26x48xf32, #tpu.memory_space<vmem>>, vector<16x16x48xf32>
    %152 = vector.shape_cast %151 : vector<16x16x48xf32> to vector<256x48xf32>
    %c1008 = arith.constant 1008 : index
    %c0_129 = arith.constant 0 : index
    %153 = vector.load %arg6[%c1008, %c0_129] : memref<1200x64xbf16, #tpu.memory_space<vmem>>, vector<48x64xbf16>
    %154 = arith.truncf %152 : vector<256x48xf32> to vector<256x48xbf16>
    %cst_130 = arith.constant dense<0.000000e+00> : vector<256x64xf32>
    %155 = tpu.matmul %154, %153, %cst_130 {dimension_numbers = #tpu.dot_dimension_numbers<[1], [0], [0], [1], [0, 0, 1, 1], [], []>} : vector<256x48xbf16>, vector<48x64xbf16>, vector<256x64xf32> -> vector<256x64xf32>
    %156 = arith.addf %150, %155 : vector<256x64xf32>
    %c10_131 = arith.constant 10 : index
    %c8_132 = arith.constant 8 : index
    %c0_133 = arith.constant 0 : index
    %157 = vector.load %arg21[%c10_131, %c8_132, %c0_133] : memref<26x26x48xf32, #tpu.memory_space<vmem>>, vector<16x16x48xf32>
    %158 = vector.shape_cast %157 : vector<16x16x48xf32> to vector<256x48xf32>
    %c1056 = arith.constant 1056 : index
    %c0_134 = arith.constant 0 : index
    %159 = vector.load %arg6[%c1056, %c0_134] : memref<1200x64xbf16, #tpu.memory_space<vmem>>, vector<48x64xbf16>
    %160 = arith.truncf %158 : vector<256x48xf32> to vector<256x48xbf16>
    %cst_135 = arith.constant dense<0.000000e+00> : vector<256x64xf32>
    %161 = tpu.matmul %160, %159, %cst_135 {dimension_numbers = #tpu.dot_dimension_numbers<[1], [0], [0], [1], [0, 0, 1, 1], [], []>} : vector<256x48xbf16>, vector<48x64xbf16>, vector<256x64xf32> -> vector<256x64xf32>
    %162 = arith.addf %156, %161 : vector<256x64xf32>
    %c10_136 = arith.constant 10 : index
    %c9_137 = arith.constant 9 : index
    %c0_138 = arith.constant 0 : index
    %163 = vector.load %arg21[%c10_136, %c9_137, %c0_138] : memref<26x26x48xf32, #tpu.memory_space<vmem>>, vector<16x16x48xf32>
    %164 = vector.shape_cast %163 : vector<16x16x48xf32> to vector<256x48xf32>
    %c1104 = arith.constant 1104 : index
    %c0_139 = arith.constant 0 : index
    %165 = vector.load %arg6[%c1104, %c0_139] : memref<1200x64xbf16, #tpu.memory_space<vmem>>, vector<48x64xbf16>
    %166 = arith.truncf %164 : vector<256x48xf32> to vector<256x48xbf16>
    %cst_140 = arith.constant dense<0.000000e+00> : vector<256x64xf32>
    %167 = tpu.matmul %166, %165, %cst_140 {dimension_numbers = #tpu.dot_dimension_numbers<[1], [0], [0], [1], [0, 0, 1, 1], [], []>} : vector<256x48xbf16>, vector<48x64xbf16>, vector<256x64xf32> -> vector<256x64xf32>
    %168 = arith.addf %162, %167 : vector<256x64xf32>
    %c10_141 = arith.constant 10 : index
    %c10_142 = arith.constant 10 : index
    %c0_143 = arith.constant 0 : index
    %169 = vector.load %arg21[%c10_141, %c10_142, %c0_143] : memref<26x26x48xf32, #tpu.memory_space<vmem>>, vector<16x16x48xf32>
    %170 = vector.shape_cast %169 : vector<16x16x48xf32> to vector<256x48xf32>
    %c1152 = arith.constant 1152 : index
    %c0_144 = arith.constant 0 : index
    %171 = vector.load %arg6[%c1152, %c0_144] : memref<1200x64xbf16, #tpu.memory_space<vmem>>, vector<48x64xbf16>
    %172 = arith.truncf %170 : vector<256x48xf32> to vector<256x48xbf16>
    %cst_145 = arith.constant dense<0.000000e+00> : vector<256x64xf32>
    %173 = tpu.matmul %172, %171, %cst_145 {dimension_numbers = #tpu.dot_dimension_numbers<[1], [0], [0], [1], [0, 0, 1, 1], [], []>} : vector<256x48xbf16>, vector<48x64xbf16>, vector<256x64xf32> -> vector<256x64xf32>
    %174 = arith.addf %168, %173 : vector<256x64xf32>
    %c0_146 = arith.constant 0 : index
    %c0_147 = arith.constant 0 : index
    %175 = vector.load %arg7[%c0_146, %c0_147] : memref<1x64xf32, #tpu.memory_space<vmem>>, vector<1x64xf32>
    %176 = vector.broadcast %175 : vector<1x64xf32> to vector<256x64xf32>
    %177 = arith.addf %174, %176 : vector<256x64xf32>
    %cst_148 = arith.constant 0.000000e+00 : f32
    %178 = vector.broadcast %cst_148 : f32 to vector<256x64xf32>
    %179 = arith.maximumf %177, %178 : vector<256x64xf32>
    %c0_149 = arith.constant 0 : index
    %c0_150 = arith.constant 0 : index
    %c0_151 = arith.constant 0 : index
    %180 = vector.load %arg18[%c0_149, %c0_150, %c0_151] : memref<1x256x64xf32, #tpu.memory_space<vmem>>, vector<1x256x64xf32>
    %181 = vector.shape_cast %180 : vector<1x256x64xf32> to vector<256x64xf32>
    %182 = vector.shape_cast %179 : vector<256x64xf32> to vector<1x256x64xf32>
    tpu.vector_store %arg18[%c0_149, %c0_150, %c0_151], %182 {strides = array<i32>} : memref<1x256x64xf32, #tpu.memory_space<vmem>>, vector<1x256x64xf32>,
    %c0_152 = arith.constant 0 : index
    %c0_153 = arith.constant 0 : index
    %183 = vector.load %arg8[%c0_152, %c0_153] : memref<192x64xbf16, #tpu.memory_space<vmem>>, vector<192x64xbf16>
    %cst_154 = arith.constant dense<0.000000e+00> : vector<256x64xf32>
    %184 = tpu.matmul %2, %183, %cst_154 {dimension_numbers = #tpu.dot_dimension_numbers<[1], [0], [0], [1], [0, 0, 1, 1], [], []>} : vector<256x192xbf16>, vector<192x64xbf16>, vector<256x64xf32> -> vector<256x64xf32>
    %c0_155 = arith.constant 0 : index
    %c0_156 = arith.constant 0 : index
    %185 = vector.load %arg9[%c0_155, %c0_156] : memref<1x64xf32, #tpu.memory_space<vmem>>, vector<1x64xf32>
    %186 = vector.broadcast %185 : vector<1x64xf32> to vector<256x64xf32>
    %187 = arith.addf %184, %186 : vector<256x64xf32>
    %cst_157 = arith.constant 0.000000e+00 : f32
    %188 = vector.broadcast %cst_157 : f32 to vector<256x64xf32>
    %189 = arith.maximumf %187, %188 : vector<256x64xf32>
    %cst_158 = arith.constant 0.000000e+00 : f32
    %190 = vector.broadcast %cst_158 : f32 to vector<25x25x64xf32>
    %c0_159 = arith.constant 0 : index
    %c0_160 = arith.constant 0 : index
    %c0_161 = arith.constant 0 : index
    %191 = vector.load %arg22[%c0_159, %c0_160, %c0_161] : memref<25x25x64xf32, #tpu.memory_space<vmem>>, vector<25x25x64xf32>
    tpu.vector_store %arg22[%c0_159, %c0_160, %c0_161], %190 {strides = array<i32>} : memref<25x25x64xf32, #tpu.memory_space<vmem>>, vector<25x25x64xf32>,
    %192 = vector.shape_cast %189 : vector<256x64xf32> to vector<16x16x64xf32>
    %c8_162 = arith.constant 8 : index
    %c8_163 = arith.constant 8 : index
    %c0_164 = arith.constant 0 : index
    %193 = vector.load %arg22[%c8_162, %c8_163, %c0_164] : memref<25x25x64xf32, #tpu.memory_space<vmem>>, vector<16x16x64xf32>
    tpu.vector_store %arg22[%c8_162, %c8_163, %c0_164], %192 {strides = array<i32>} : memref<25x25x64xf32, #tpu.memory_space<vmem>>, vector<16x16x64xf32>,
    %cst_165 = arith.constant 0.000000e+00 : f32
    %194 = vector.broadcast %cst_165 : f32 to vector<256x96xf32>
    %c7_166 = arith.constant 7 : index
    %c7_167 = arith.constant 7 : index
    %c0_168 = arith.constant 0 : index
    %195 = vector.load %arg22[%c7_166, %c7_167, %c0_168] : memref<25x25x64xf32, #tpu.memory_space<vmem>>, vector<16x16x64xf32>
    %196 = vector.shape_cast %195 : vector<16x16x64xf32> to vector<256x64xf32>
    %c0_169 = arith.constant 0 : index
    %c0_170 = arith.constant 0 : index
    %197 = vector.load %arg10[%c0_169, %c0_170] : memref<576x96xbf16, #tpu.memory_space<vmem>>, vector<64x96xbf16>
    %198 = arith.truncf %196 : vector<256x64xf32> to vector<256x64xbf16>
    %cst_171 = arith.constant dense<0.000000e+00> : vector<256x96xf32>
    %199 = tpu.matmul %198, %197, %cst_171 {dimension_numbers = #tpu.dot_dimension_numbers<[1], [0], [0], [1], [0, 0, 1, 1], [], []>} : vector<256x64xbf16>, vector<64x96xbf16>, vector<256x96xf32> -> vector<256x96xf32>
    %200 = arith.addf %194, %199 : vector<256x96xf32>
    %c7_172 = arith.constant 7 : index
    %c8_173 = arith.constant 8 : index
    %c0_174 = arith.constant 0 : index
    %201 = vector.load %arg22[%c7_172, %c8_173, %c0_174] : memref<25x25x64xf32, #tpu.memory_space<vmem>>, vector<16x16x64xf32>
    %202 = vector.shape_cast %201 : vector<16x16x64xf32> to vector<256x64xf32>
    %c64 = arith.constant 64 : index
    %c0_175 = arith.constant 0 : index
    %203 = vector.load %arg10[%c64, %c0_175] : memref<576x96xbf16, #tpu.memory_space<vmem>>, vector<64x96xbf16>
    %204 = arith.truncf %202 : vector<256x64xf32> to vector<256x64xbf16>
    %cst_176 = arith.constant dense<0.000000e+00> : vector<256x96xf32>
    %205 = tpu.matmul %204, %203, %cst_176 {dimension_numbers = #tpu.dot_dimension_numbers<[1], [0], [0], [1], [0, 0, 1, 1], [], []>} : vector<256x64xbf16>, vector<64x96xbf16>, vector<256x96xf32> -> vector<256x96xf32>
    %206 = arith.addf %200, %205 : vector<256x96xf32>
    %c7_177 = arith.constant 7 : index
    %c9_178 = arith.constant 9 : index
    %c0_179 = arith.constant 0 : index
    %207 = vector.load %arg22[%c7_177, %c9_178, %c0_179] : memref<25x25x64xf32, #tpu.memory_space<vmem>>, vector<16x16x64xf32>
    %208 = vector.shape_cast %207 : vector<16x16x64xf32> to vector<256x64xf32>
    %c128 = arith.constant 128 : index
    %c0_180 = arith.constant 0 : index
    %209 = vector.load %arg10[%c128, %c0_180] : memref<576x96xbf16, #tpu.memory_space<vmem>>, vector<64x96xbf16>
    %210 = arith.truncf %208 : vector<256x64xf32> to vector<256x64xbf16>
    %cst_181 = arith.constant dense<0.000000e+00> : vector<256x96xf32>
    %211 = tpu.matmul %210, %209, %cst_181 {dimension_numbers = #tpu.dot_dimension_numbers<[1], [0], [0], [1], [0, 0, 1, 1], [], []>} : vector<256x64xbf16>, vector<64x96xbf16>, vector<256x96xf32> -> vector<256x96xf32>
    %212 = arith.addf %206, %211 : vector<256x96xf32>
    %c8_182 = arith.constant 8 : index
    %c7_183 = arith.constant 7 : index
    %c0_184 = arith.constant 0 : index
    %213 = vector.load %arg22[%c8_182, %c7_183, %c0_184] : memref<25x25x64xf32, #tpu.memory_space<vmem>>, vector<16x16x64xf32>
    %214 = vector.shape_cast %213 : vector<16x16x64xf32> to vector<256x64xf32>
    %c192_185 = arith.constant 192 : index
    %c0_186 = arith.constant 0 : index
    %215 = vector.load %arg10[%c192_185, %c0_186] : memref<576x96xbf16, #tpu.memory_space<vmem>>, vector<64x96xbf16>
    %216 = arith.truncf %214 : vector<256x64xf32> to vector<256x64xbf16>
    %cst_187 = arith.constant dense<0.000000e+00> : vector<256x96xf32>
    %217 = tpu.matmul %216, %215, %cst_187 {dimension_numbers = #tpu.dot_dimension_numbers<[1], [0], [0], [1], [0, 0, 1, 1], [], []>} : vector<256x64xbf16>, vector<64x96xbf16>, vector<256x96xf32> -> vector<256x96xf32>
    %218 = arith.addf %212, %217 : vector<256x96xf32>
    %c8_188 = arith.constant 8 : index
    %c8_189 = arith.constant 8 : index
    %c0_190 = arith.constant 0 : index
    %219 = vector.load %arg22[%c8_188, %c8_189, %c0_190] : memref<25x25x64xf32, #tpu.memory_space<vmem>>, vector<16x16x64xf32>
    %220 = vector.shape_cast %219 : vector<16x16x64xf32> to vector<256x64xf32>
    %c256 = arith.constant 256 : index
    %c0_191 = arith.constant 0 : index
    %221 = vector.load %arg10[%c256, %c0_191] : memref<576x96xbf16, #tpu.memory_space<vmem>>, vector<64x96xbf16>
    %222 = arith.truncf %220 : vector<256x64xf32> to vector<256x64xbf16>
    %cst_192 = arith.constant dense<0.000000e+00> : vector<256x96xf32>
    %223 = tpu.matmul %222, %221, %cst_192 {dimension_numbers = #tpu.dot_dimension_numbers<[1], [0], [0], [1], [0, 0, 1, 1], [], []>} : vector<256x64xbf16>, vector<64x96xbf16>, vector<256x96xf32> -> vector<256x96xf32>
    %224 = arith.addf %218, %223 : vector<256x96xf32>
    %c8_193 = arith.constant 8 : index
    %c9_194 = arith.constant 9 : index
    %c0_195 = arith.constant 0 : index
    %225 = vector.load %arg22[%c8_193, %c9_194, %c0_195] : memref<25x25x64xf32, #tpu.memory_space<vmem>>, vector<16x16x64xf32>
    %226 = vector.shape_cast %225 : vector<16x16x64xf32> to vector<256x64xf32>
    %c320 = arith.constant 320 : index
    %c0_196 = arith.constant 0 : index
    %227 = vector.load %arg10[%c320, %c0_196] : memref<576x96xbf16, #tpu.memory_space<vmem>>, vector<64x96xbf16>
    %228 = arith.truncf %226 : vector<256x64xf32> to vector<256x64xbf16>
    %cst_197 = arith.constant dense<0.000000e+00> : vector<256x96xf32>
    %229 = tpu.matmul %228, %227, %cst_197 {dimension_numbers = #tpu.dot_dimension_numbers<[1], [0], [0], [1], [0, 0, 1, 1], [], []>} : vector<256x64xbf16>, vector<64x96xbf16>, vector<256x96xf32> -> vector<256x96xf32>
    %230 = arith.addf %224, %229 : vector<256x96xf32>
    %c9_198 = arith.constant 9 : index
    %c7_199 = arith.constant 7 : index
    %c0_200 = arith.constant 0 : index
    %231 = vector.load %arg22[%c9_198, %c7_199, %c0_200] : memref<25x25x64xf32, #tpu.memory_space<vmem>>, vector<16x16x64xf32>
    %232 = vector.shape_cast %231 : vector<16x16x64xf32> to vector<256x64xf32>
    %c384_201 = arith.constant 384 : index
    %c0_202 = arith.constant 0 : index
    %233 = vector.load %arg10[%c384_201, %c0_202] : memref<576x96xbf16, #tpu.memory_space<vmem>>, vector<64x96xbf16>
    %234 = arith.truncf %232 : vector<256x64xf32> to vector<256x64xbf16>
    %cst_203 = arith.constant dense<0.000000e+00> : vector<256x96xf32>
    %235 = tpu.matmul %234, %233, %cst_203 {dimension_numbers = #tpu.dot_dimension_numbers<[1], [0], [0], [1], [0, 0, 1, 1], [], []>} : vector<256x64xbf16>, vector<64x96xbf16>, vector<256x96xf32> -> vector<256x96xf32>
    %236 = arith.addf %230, %235 : vector<256x96xf32>
    %c9_204 = arith.constant 9 : index
    %c8_205 = arith.constant 8 : index
    %c0_206 = arith.constant 0 : index
    %237 = vector.load %arg22[%c9_204, %c8_205, %c0_206] : memref<25x25x64xf32, #tpu.memory_space<vmem>>, vector<16x16x64xf32>
    %238 = vector.shape_cast %237 : vector<16x16x64xf32> to vector<256x64xf32>
    %c448 = arith.constant 448 : index
    %c0_207 = arith.constant 0 : index
    %239 = vector.load %arg10[%c448, %c0_207] : memref<576x96xbf16, #tpu.memory_space<vmem>>, vector<64x96xbf16>
    %240 = arith.truncf %238 : vector<256x64xf32> to vector<256x64xbf16>
    %cst_208 = arith.constant dense<0.000000e+00> : vector<256x96xf32>
    %241 = tpu.matmul %240, %239, %cst_208 {dimension_numbers = #tpu.dot_dimension_numbers<[1], [0], [0], [1], [0, 0, 1, 1], [], []>} : vector<256x64xbf16>, vector<64x96xbf16>, vector<256x96xf32> -> vector<256x96xf32>
    %242 = arith.addf %236, %241 : vector<256x96xf32>
    %c9_209 = arith.constant 9 : index
    %c9_210 = arith.constant 9 : index
    %c0_211 = arith.constant 0 : index
    %243 = vector.load %arg22[%c9_209, %c9_210, %c0_211] : memref<25x25x64xf32, #tpu.memory_space<vmem>>, vector<16x16x64xf32>
    %244 = vector.shape_cast %243 : vector<16x16x64xf32> to vector<256x64xf32>
    %c512 = arith.constant 512 : index
    %c0_212 = arith.constant 0 : index
    %245 = vector.load %arg10[%c512, %c0_212] : memref<576x96xbf16, #tpu.memory_space<vmem>>, vector<64x96xbf16>
    %246 = arith.truncf %244 : vector<256x64xf32> to vector<256x64xbf16>
    %cst_213 = arith.constant dense<0.000000e+00> : vector<256x96xf32>
    %247 = tpu.matmul %246, %245, %cst_213 {dimension_numbers = #tpu.dot_dimension_numbers<[1], [0], [0], [1], [0, 0, 1, 1], [], []>} : vector<256x64xbf16>, vector<64x96xbf16>, vector<256x96xf32> -> vector<256x96xf32>
    %248 = arith.addf %242, %247 : vector<256x96xf32>
    %c0_214 = arith.constant 0 : index
    %c0_215 = arith.constant 0 : index
    %249 = vector.load %arg11[%c0_214, %c0_215] : memref<1x96xf32, #tpu.memory_space<vmem>>, vector<1x96xf32>
    %250 = vector.broadcast %249 : vector<1x96xf32> to vector<256x96xf32>
    %251 = arith.addf %248, %250 : vector<256x96xf32>
    %cst_216 = arith.constant 0.000000e+00 : f32
    %252 = vector.broadcast %cst_216 : f32 to vector<256x96xf32>
    %253 = arith.maximumf %251, %252 : vector<256x96xf32>
    %cst_217 = arith.constant 0.000000e+00 : f32
    %254 = vector.broadcast %cst_217 : f32 to vector<25x25x96xf32>
    %c0_218 = arith.constant 0 : index
    %c0_219 = arith.constant 0 : index
    %c0_220 = arith.constant 0 : index
    %255 = vector.load %arg23[%c0_218, %c0_219, %c0_220] : memref<25x25x96xf32, #tpu.memory_space<vmem>>, vector<25x25x96xf32>
    tpu.vector_store %arg23[%c0_218, %c0_219, %c0_220], %254 {strides = array<i32>} : memref<25x25x96xf32, #tpu.memory_space<vmem>>, vector<25x25x96xf32>,
    %256 = vector.shape_cast %253 : vector<256x96xf32> to vector<16x16x96xf32>
    %c8_221 = arith.constant 8 : index
    %c8_222 = arith.constant 8 : index
    %c0_223 = arith.constant 0 : index
    %257 = vector.load %arg23[%c8_221, %c8_222, %c0_223] : memref<25x25x96xf32, #tpu.memory_space<vmem>>, vector<16x16x96xf32>
    tpu.vector_store %arg23[%c8_221, %c8_222, %c0_223], %256 {strides = array<i32>} : memref<25x25x96xf32, #tpu.memory_space<vmem>>, vector<16x16x96xf32>,
    %cst_224 = arith.constant 0.000000e+00 : f32
    %258 = vector.broadcast %cst_224 : f32 to vector<256x96xf32>
    %c7_225 = arith.constant 7 : index
    %c7_226 = arith.constant 7 : index
    %c0_227 = arith.constant 0 : index
    %259 = vector.load %arg23[%c7_225, %c7_226, %c0_227] : memref<25x25x96xf32, #tpu.memory_space<vmem>>, vector<16x16x96xf32>
    %260 = vector.shape_cast %259 : vector<16x16x96xf32> to vector<256x96xf32>
    %c0_228 = arith.constant 0 : index
    %c0_229 = arith.constant 0 : index
    %261 = vector.load %arg12[%c0_228, %c0_229] : memref<864x96xbf16, #tpu.memory_space<vmem>>, vector<96x96xbf16>
    %262 = arith.truncf %260 : vector<256x96xf32> to vector<256x96xbf16>
    %cst_230 = arith.constant dense<0.000000e+00> : vector<256x96xf32>
    %263 = tpu.matmul %262, %261, %cst_230 {dimension_numbers = #tpu.dot_dimension_numbers<[1], [0], [0], [1], [0, 0, 1, 1], [], []>} : vector<256x96xbf16>, vector<96x96xbf16>, vector<256x96xf32> -> vector<256x96xf32>
    %264 = arith.addf %258, %263 : vector<256x96xf32>
    %c7_231 = arith.constant 7 : index
    %c8_232 = arith.constant 8 : index
    %c0_233 = arith.constant 0 : index
    %265 = vector.load %arg23[%c7_231, %c8_232, %c0_233] : memref<25x25x96xf32, #tpu.memory_space<vmem>>, vector<16x16x96xf32>
    %266 = vector.shape_cast %265 : vector<16x16x96xf32> to vector<256x96xf32>
    %c96_234 = arith.constant 96 : index
    %c0_235 = arith.constant 0 : index
    %267 = vector.load %arg12[%c96_234, %c0_235] : memref<864x96xbf16, #tpu.memory_space<vmem>>, vector<96x96xbf16>
    %268 = arith.truncf %266 : vector<256x96xf32> to vector<256x96xbf16>
    %cst_236 = arith.constant dense<0.000000e+00> : vector<256x96xf32>
    %269 = tpu.matmul %268, %267, %cst_236 {dimension_numbers = #tpu.dot_dimension_numbers<[1], [0], [0], [1], [0, 0, 1, 1], [], []>} : vector<256x96xbf16>, vector<96x96xbf16>, vector<256x96xf32> -> vector<256x96xf32>
    %270 = arith.addf %264, %269 : vector<256x96xf32>
    %c7_237 = arith.constant 7 : index
    %c9_238 = arith.constant 9 : index
    %c0_239 = arith.constant 0 : index
    %271 = vector.load %arg23[%c7_237, %c9_238, %c0_239] : memref<25x25x96xf32, #tpu.memory_space<vmem>>, vector<16x16x96xf32>
    %272 = vector.shape_cast %271 : vector<16x16x96xf32> to vector<256x96xf32>
    %c192_240 = arith.constant 192 : index
    %c0_241 = arith.constant 0 : index
    %273 = vector.load %arg12[%c192_240, %c0_241] : memref<864x96xbf16, #tpu.memory_space<vmem>>, vector<96x96xbf16>
    %274 = arith.truncf %272 : vector<256x96xf32> to vector<256x96xbf16>
    %cst_242 = arith.constant dense<0.000000e+00> : vector<256x96xf32>
    %275 = tpu.matmul %274, %273, %cst_242 {dimension_numbers = #tpu.dot_dimension_numbers<[1], [0], [0], [1], [0, 0, 1, 1], [], []>} : vector<256x96xbf16>, vector<96x96xbf16>, vector<256x96xf32> -> vector<256x96xf32>
    %276 = arith.addf %270, %275 : vector<256x96xf32>
    %c8_243 = arith.constant 8 : index
    %c7_244 = arith.constant 7 : index
    %c0_245 = arith.constant 0 : index
    %277 = vector.load %arg23[%c8_243, %c7_244, %c0_245] : memref<25x25x96xf32, #tpu.memory_space<vmem>>, vector<16x16x96xf32>
    %278 = vector.shape_cast %277 : vector<16x16x96xf32> to vector<256x96xf32>
    %c288_246 = arith.constant 288 : index
    %c0_247 = arith.constant 0 : index
    %279 = vector.load %arg12[%c288_246, %c0_247] : memref<864x96xbf16, #tpu.memory_space<vmem>>, vector<96x96xbf16>
    %280 = arith.truncf %278 : vector<256x96xf32> to vector<256x96xbf16>
    %cst_248 = arith.constant dense<0.000000e+00> : vector<256x96xf32>
    %281 = tpu.matmul %280, %279, %cst_248 {dimension_numbers = #tpu.dot_dimension_numbers<[1], [0], [0], [1], [0, 0, 1, 1], [], []>} : vector<256x96xbf16>, vector<96x96xbf16>, vector<256x96xf32> -> vector<256x96xf32>
    %282 = arith.addf %276, %281 : vector<256x96xf32>
    %c8_249 = arith.constant 8 : index
    %c8_250 = arith.constant 8 : index
    %c0_251 = arith.constant 0 : index
    %283 = vector.load %arg23[%c8_249, %c8_250, %c0_251] : memref<25x25x96xf32, #tpu.memory_space<vmem>>, vector<16x16x96xf32>
    %284 = vector.shape_cast %283 : vector<16x16x96xf32> to vector<256x96xf32>
    %c384_252 = arith.constant 384 : index
    %c0_253 = arith.constant 0 : index
    %285 = vector.load %arg12[%c384_252, %c0_253] : memref<864x96xbf16, #tpu.memory_space<vmem>>, vector<96x96xbf16>
    %286 = arith.truncf %284 : vector<256x96xf32> to vector<256x96xbf16>
    %cst_254 = arith.constant dense<0.000000e+00> : vector<256x96xf32>
    %287 = tpu.matmul %286, %285, %cst_254 {dimension_numbers = #tpu.dot_dimension_numbers<[1], [0], [0], [1], [0, 0, 1, 1], [], []>} : vector<256x96xbf16>, vector<96x96xbf16>, vector<256x96xf32> -> vector<256x96xf32>
    %288 = arith.addf %282, %287 : vector<256x96xf32>
    %c8_255 = arith.constant 8 : index
    %c9_256 = arith.constant 9 : index
    %c0_257 = arith.constant 0 : index
    %289 = vector.load %arg23[%c8_255, %c9_256, %c0_257] : memref<25x25x96xf32, #tpu.memory_space<vmem>>, vector<16x16x96xf32>
    %290 = vector.shape_cast %289 : vector<16x16x96xf32> to vector<256x96xf32>
    %c480_258 = arith.constant 480 : index
    %c0_259 = arith.constant 0 : index
    %291 = vector.load %arg12[%c480_258, %c0_259] : memref<864x96xbf16, #tpu.memory_space<vmem>>, vector<96x96xbf16>
    %292 = arith.truncf %290 : vector<256x96xf32> to vector<256x96xbf16>
    %cst_260 = arith.constant dense<0.000000e+00> : vector<256x96xf32>
    %293 = tpu.matmul %292, %291, %cst_260 {dimension_numbers = #tpu.dot_dimension_numbers<[1], [0], [0], [1], [0, 0, 1, 1], [], []>} : vector<256x96xbf16>, vector<96x96xbf16>, vector<256x96xf32> -> vector<256x96xf32>
    %294 = arith.addf %288, %293 : vector<256x96xf32>
    %c9_261 = arith.constant 9 : index
    %c7_262 = arith.constant 7 : index
    %c0_263 = arith.constant 0 : index
    %295 = vector.load %arg23[%c9_261, %c7_262, %c0_263] : memref<25x25x96xf32, #tpu.memory_space<vmem>>, vector<16x16x96xf32>
    %296 = vector.shape_cast %295 : vector<16x16x96xf32> to vector<256x96xf32>
    %c576_264 = arith.constant 576 : index
    %c0_265 = arith.constant 0 : index
    %297 = vector.load %arg12[%c576_264, %c0_265] : memref<864x96xbf16, #tpu.memory_space<vmem>>, vector<96x96xbf16>
    %298 = arith.truncf %296 : vector<256x96xf32> to vector<256x96xbf16>
    %cst_266 = arith.constant dense<0.000000e+00> : vector<256x96xf32>
    %299 = tpu.matmul %298, %297, %cst_266 {dimension_numbers = #tpu.dot_dimension_numbers<[1], [0], [0], [1], [0, 0, 1, 1], [], []>} : vector<256x96xbf16>, vector<96x96xbf16>, vector<256x96xf32> -> vector<256x96xf32>
    %300 = arith.addf %294, %299 : vector<256x96xf32>
    %c9_267 = arith.constant 9 : index
    %c8_268 = arith.constant 8 : index
    %c0_269 = arith.constant 0 : index
    %301 = vector.load %arg23[%c9_267, %c8_268, %c0_269] : memref<25x25x96xf32, #tpu.memory_space<vmem>>, vector<16x16x96xf32>
    %302 = vector.shape_cast %301 : vector<16x16x96xf32> to vector<256x96xf32>
    %c672_270 = arith.constant 672 : index
    %c0_271 = arith.constant 0 : index
    %303 = vector.load %arg12[%c672_270, %c0_271] : memref<864x96xbf16, #tpu.memory_space<vmem>>, vector<96x96xbf16>
    %304 = arith.truncf %302 : vector<256x96xf32> to vector<256x96xbf16>
    %cst_272 = arith.constant dense<0.000000e+00> : vector<256x96xf32>
    %305 = tpu.matmul %304, %303, %cst_272 {dimension_numbers = #tpu.dot_dimension_numbers<[1], [0], [0], [1], [0, 0, 1, 1], [], []>} : vector<256x96xbf16>, vector<96x96xbf16>, vector<256x96xf32> -> vector<256x96xf32>
    %306 = arith.addf %300, %305 : vector<256x96xf32>
    %c9_273 = arith.constant 9 : index
    %c9_274 = arith.constant 9 : index
    %c0_275 = arith.constant 0 : index
    %307 = vector.load %arg23[%c9_273, %c9_274, %c0_275] : memref<25x25x96xf32, #tpu.memory_space<vmem>>, vector<16x16x96xf32>
    %308 = vector.shape_cast %307 : vector<16x16x96xf32> to vector<256x96xf32>
    %c768_276 = arith.constant 768 : index
    %c0_277 = arith.constant 0 : index
    %309 = vector.load %arg12[%c768_276, %c0_277] : memref<864x96xbf16, #tpu.memory_space<vmem>>, vector<96x96xbf16>
    %310 = arith.truncf %308 : vector<256x96xf32> to vector<256x96xbf16>
    %cst_278 = arith.constant dense<0.000000e+00> : vector<256x96xf32>
    %311 = tpu.matmul %310, %309, %cst_278 {dimension_numbers = #tpu.dot_dimension_numbers<[1], [0], [0], [1], [0, 0, 1, 1], [], []>} : vector<256x96xbf16>, vector<96x96xbf16>, vector<256x96xf32> -> vector<256x96xf32>
    %312 = arith.addf %306, %311 : vector<256x96xf32>
    %c0_279 = arith.constant 0 : index
    %c0_280 = arith.constant 0 : index
    %313 = vector.load %arg13[%c0_279, %c0_280] : memref<1x96xf32, #tpu.memory_space<vmem>>, vector<1x96xf32>
    %314 = vector.broadcast %313 : vector<1x96xf32> to vector<256x96xf32>
    %315 = arith.addf %312, %314 : vector<256x96xf32>
    %cst_281 = arith.constant 0.000000e+00 : f32
    %316 = vector.broadcast %cst_281 : f32 to vector<256x96xf32>
    %317 = arith.maximumf %315, %316 : vector<256x96xf32>
    %c0_282 = arith.constant 0 : index
    %c0_283 = arith.constant 0 : index
    %c0_284 = arith.constant 0 : index
    %318 = vector.load %arg19[%c0_282, %c0_283, %c0_284] : memref<1x256x96xf32, #tpu.memory_space<vmem>>, vector<1x256x96xf32>
    %319 = vector.shape_cast %318 : vector<1x256x96xf32> to vector<256x96xf32>
    %320 = vector.shape_cast %317 : vector<256x96xf32> to vector<1x256x96xf32>
    tpu.vector_store %arg19[%c0_282, %c0_283, %c0_284], %320 {strides = array<i32>} : memref<1x256x96xf32, #tpu.memory_space<vmem>>, vector<1x256x96xf32>,
    %c0_285 = arith.constant 0 : index
    %c0_286 = arith.constant 0 : index
    %321 = vector.load %arg14[%c0_285, %c0_286] : memref<192x64xbf16, #tpu.memory_space<vmem>>, vector<192x64xbf16>
    %cst_287 = arith.constant dense<0.000000e+00> : vector<256x64xf32>
    %322 = tpu.matmul %2, %321, %cst_287 {dimension_numbers = #tpu.dot_dimension_numbers<[1], [0], [0], [1], [0, 0, 1, 1], [], []>} : vector<256x192xbf16>, vector<192x64xbf16>, vector<256x64xf32> -> vector<256x64xf32>
    %cst_288 = arith.constant 0.000000e+00 : f32
    %323 = vector.broadcast %cst_288 : f32 to vector<25x25x64xf32>
    %c0_289 = arith.constant 0 : index
    %c0_290 = arith.constant 0 : index
    %c0_291 = arith.constant 0 : index
    %324 = vector.load %arg24[%c0_289, %c0_290, %c0_291] : memref<25x25x64xf32, #tpu.memory_space<vmem>>, vector<25x25x64xf32>
    tpu.vector_store %arg24[%c0_289, %c0_290, %c0_291], %323 {strides = array<i32>} : memref<25x25x64xf32, #tpu.memory_space<vmem>>, vector<25x25x64xf32>,
    %325 = vector.shape_cast %322 : vector<256x64xf32> to vector<16x16x64xf32>
    %c8_292 = arith.constant 8 : index
    %c8_293 = arith.constant 8 : index
    %c0_294 = arith.constant 0 : index
    %326 = vector.load %arg24[%c8_292, %c8_293, %c0_294] : memref<25x25x64xf32, #tpu.memory_space<vmem>>, vector<16x16x64xf32>
    tpu.vector_store %arg24[%c8_292, %c8_293, %c0_294], %325 {strides = array<i32>} : memref<25x25x64xf32, #tpu.memory_space<vmem>>, vector<16x16x64xf32>,
    %cst_295 = arith.constant 0.000000e+00 : f32
    %327 = vector.broadcast %cst_295 : f32 to vector<256x64xf32>
    %c7_296 = arith.constant 7 : index
    %c7_297 = arith.constant 7 : index
    %c0_298 = arith.constant 0 : index
    %328 = vector.load %arg24[%c7_296, %c7_297, %c0_298] : memref<25x25x64xf32, #tpu.memory_space<vmem>>, vector<16x16x64xf32>
    %329 = vector.shape_cast %328 : vector<16x16x64xf32> to vector<256x64xf32>
    %330 = arith.addf %327, %329 : vector<256x64xf32>
    %c7_299 = arith.constant 7 : index
    %c8_300 = arith.constant 8 : index
    %c0_301 = arith.constant 0 : index
    %331 = vector.load %arg24[%c7_299, %c8_300, %c0_301] : memref<25x25x64xf32, #tpu.memory_space<vmem>>, vector<16x16x64xf32>
    %332 = vector.shape_cast %331 : vector<16x16x64xf32> to vector<256x64xf32>
    %333 = arith.addf %330, %332 : vector<256x64xf32>
    %c7_302 = arith.constant 7 : index
    %c9_303 = arith.constant 9 : index
    %c0_304 = arith.constant 0 : index
    %334 = vector.load %arg24[%c7_302, %c9_303, %c0_304] : memref<25x25x64xf32, #tpu.memory_space<vmem>>, vector<16x16x64xf32>
    %335 = vector.shape_cast %334 : vector<16x16x64xf32> to vector<256x64xf32>
    %336 = arith.addf %333, %335 : vector<256x64xf32>
    %c8_305 = arith.constant 8 : index
    %c7_306 = arith.constant 7 : index
    %c0_307 = arith.constant 0 : index
    %337 = vector.load %arg24[%c8_305, %c7_306, %c0_307] : memref<25x25x64xf32, #tpu.memory_space<vmem>>, vector<16x16x64xf32>
    %338 = vector.shape_cast %337 : vector<16x16x64xf32> to vector<256x64xf32>
    %339 = arith.addf %336, %338 : vector<256x64xf32>
    %c8_308 = arith.constant 8 : index
    %c8_309 = arith.constant 8 : index
    %c0_310 = arith.constant 0 : index
    %340 = vector.load %arg24[%c8_308, %c8_309, %c0_310] : memref<25x25x64xf32, #tpu.memory_space<vmem>>, vector<16x16x64xf32>
    %341 = vector.shape_cast %340 : vector<16x16x64xf32> to vector<256x64xf32>
    %342 = arith.addf %339, %341 : vector<256x64xf32>
    %c8_311 = arith.constant 8 : index
    %c9_312 = arith.constant 9 : index
    %c0_313 = arith.constant 0 : index
    %343 = vector.load %arg24[%c8_311, %c9_312, %c0_313] : memref<25x25x64xf32, #tpu.memory_space<vmem>>, vector<16x16x64xf32>
    %344 = vector.shape_cast %343 : vector<16x16x64xf32> to vector<256x64xf32>
    %345 = arith.addf %342, %344 : vector<256x64xf32>
    %c9_314 = arith.constant 9 : index
    %c7_315 = arith.constant 7 : index
    %c0_316 = arith.constant 0 : index
    %346 = vector.load %arg24[%c9_314, %c7_315, %c0_316] : memref<25x25x64xf32, #tpu.memory_space<vmem>>, vector<16x16x64xf32>
    %347 = vector.shape_cast %346 : vector<16x16x64xf32> to vector<256x64xf32>
    %348 = arith.addf %345, %347 : vector<256x64xf32>
    %c9_317 = arith.constant 9 : index
    %c8_318 = arith.constant 8 : index
    %c0_319 = arith.constant 0 : index
    %349 = vector.load %arg24[%c9_317, %c8_318, %c0_319] : memref<25x25x64xf32, #tpu.memory_space<vmem>>, vector<16x16x64xf32>
    %350 = vector.shape_cast %349 : vector<16x16x64xf32> to vector<256x64xf32>
    %351 = arith.addf %348, %350 : vector<256x64xf32>
    %c9_320 = arith.constant 9 : index
    %c9_321 = arith.constant 9 : index
    %c0_322 = arith.constant 0 : index
    %352 = vector.load %arg24[%c9_320, %c9_321, %c0_322] : memref<25x25x64xf32, #tpu.memory_space<vmem>>, vector<16x16x64xf32>
    %353 = vector.shape_cast %352 : vector<16x16x64xf32> to vector<256x64xf32>
    %354 = arith.addf %351, %353 : vector<256x64xf32>
    %c0_323 = arith.constant 0 : index
    %c0_324 = arith.constant 0 : index
    %355 = vector.load %arg16[%c0_323, %c0_324] : memref<256x1xf32, #tpu.memory_space<vmem>>, vector<256x1xf32>
    %356 = vector.broadcast %355 : vector<256x1xf32> to vector<256x64xf32>
    %357 = arith.mulf %354, %356 : vector<256x64xf32>
    %c0_325 = arith.constant 0 : index
    %c0_326 = arith.constant 0 : index
    %358 = vector.load %arg15[%c0_325, %c0_326] : memref<1x64xf32, #tpu.memory_space<vmem>>, vector<1x64xf32>
    %359 = vector.broadcast %358 : vector<1x64xf32> to vector<256x64xf32>
    %360 = arith.addf %357, %359 : vector<256x64xf32>
    %cst_327 = arith.constant 0.000000e+00 : f32
    %361 = vector.broadcast %cst_327 : f32 to vector<256x64xf32>
    %362 = arith.maximumf %360, %361 : vector<256x64xf32>
    %c0_328 = arith.constant 0 : index
    %c0_329 = arith.constant 0 : index
    %c0_330 = arith.constant 0 : index
    %363 = vector.load %arg20[%c0_328, %c0_329, %c0_330] : memref<1x256x64xf32, #tpu.memory_space<vmem>>, vector<1x256x64xf32>
    %364 = vector.shape_cast %363 : vector<1x256x64xf32> to vector<256x64xf32>
    %365 = vector.shape_cast %362 : vector<256x64xf32> to vector<1x256x64xf32>
    tpu.vector_store %arg20[%c0_328, %c0_329, %c0_330], %365 {strides = array<i32>} : memref<1x256x64xf32, #tpu.memory_space<vmem>>, vector<1x256x64xf32>,
    return
  }
  func.func @transform_0(%arg0: i32) -> (i32, i32, i32, i32) {
    %c0_i32 = arith.constant 0 : i32
    %c0_i32_0 = arith.constant 0 : i32
    %c0_i32_1 = arith.constant 0 : i32
    %c0_i32_2 = arith.constant 0 : i32
    return %arg0, %c0_i32, %c0_i32_0, %c0_i32_1 : i32, i32, i32, i32
  }
  func.func @transform_1(%arg0: i32) -> (i32, i32) {
    %c0_i32 = arith.constant 0 : i32
    %c0_i32_0 = arith.constant 0 : i32
    %c0_i32_1 = arith.constant 0 : i32
    return %c0_i32, %c0_i32_0 : i32, i32
  }
  func.func @transform_2(%arg0: i32) -> (i32, i32) {
    %c0_i32 = arith.constant 0 : i32
    %c0_i32_0 = arith.constant 0 : i32
    %c0_i32_1 = arith.constant 0 : i32
    return %c0_i32, %c0_i32_0 : i32, i32
  }
  func.func @transform_3(%arg0: i32) -> (i32, i32) {
    %c0_i32 = arith.constant 0 : i32
    %c0_i32_0 = arith.constant 0 : i32
    %c0_i32_1 = arith.constant 0 : i32
    return %c0_i32, %c0_i32_0 : i32, i32
  }
  func.func @transform_4(%arg0: i32) -> (i32, i32) {
    %c0_i32 = arith.constant 0 : i32
    %c0_i32_0 = arith.constant 0 : i32
    %c0_i32_1 = arith.constant 0 : i32
    return %c0_i32, %c0_i32_0 : i32, i32
  }
  func.func @transform_5(%arg0: i32) -> (i32, i32) {
    %c0_i32 = arith.constant 0 : i32
    %c0_i32_0 = arith.constant 0 : i32
    %c0_i32_1 = arith.constant 0 : i32
    return %c0_i32, %c0_i32_0 : i32, i32
  }
  func.func @transform_6(%arg0: i32) -> (i32, i32) {
    %c0_i32 = arith.constant 0 : i32
    %c0_i32_0 = arith.constant 0 : i32
    %c0_i32_1 = arith.constant 0 : i32
    return %c0_i32, %c0_i32_0 : i32, i32
  }
  func.func @transform_7(%arg0: i32) -> (i32, i32) {
    %c0_i32 = arith.constant 0 : i32
    %c0_i32_0 = arith.constant 0 : i32
    %c0_i32_1 = arith.constant 0 : i32
    return %c0_i32, %c0_i32_0 : i32, i32
  }
  func.func @transform_8(%arg0: i32) -> (i32, i32) {
    %c0_i32 = arith.constant 0 : i32
    %c0_i32_0 = arith.constant 0 : i32
    %c0_i32_1 = arith.constant 0 : i32
    return %c0_i32, %c0_i32_0 : i32, i32
  }
  func.func @transform_9(%arg0: i32) -> (i32, i32) {
    %c0_i32 = arith.constant 0 : i32
    %c0_i32_0 = arith.constant 0 : i32
    %c0_i32_1 = arith.constant 0 : i32
    return %c0_i32, %c0_i32_0 : i32, i32
  }
  func.func @transform_10(%arg0: i32) -> (i32, i32) {
    %c0_i32 = arith.constant 0 : i32
    %c0_i32_0 = arith.constant 0 : i32
    %c0_i32_1 = arith.constant 0 : i32
    return %c0_i32, %c0_i32_0 : i32, i32
  }
  func.func @transform_11(%arg0: i32) -> (i32, i32) {
    %c0_i32 = arith.constant 0 : i32
    %c0_i32_0 = arith.constant 0 : i32
    %c0_i32_1 = arith.constant 0 : i32
    return %c0_i32, %c0_i32_0 : i32, i32
  }
  func.func @transform_12(%arg0: i32) -> (i32, i32) {
    %c0_i32 = arith.constant 0 : i32
    %c0_i32_0 = arith.constant 0 : i32
    %c0_i32_1 = arith.constant 0 : i32
    return %c0_i32, %c0_i32_0 : i32, i32
  }
  func.func @transform_13(%arg0: i32) -> (i32, i32) {
    %c0_i32 = arith.constant 0 : i32
    %c0_i32_0 = arith.constant 0 : i32
    %c0_i32_1 = arith.constant 0 : i32
    return %c0_i32, %c0_i32_0 : i32, i32
  }
  func.func @transform_14(%arg0: i32) -> (i32, i32) {
    %c0_i32 = arith.constant 0 : i32
    %c0_i32_0 = arith.constant 0 : i32
    %c0_i32_1 = arith.constant 0 : i32
    return %c0_i32, %c0_i32_0 : i32, i32
  }
  func.func @transform_15(%arg0: i32) -> (i32, i32) {
    %c0_i32 = arith.constant 0 : i32
    %c0_i32_0 = arith.constant 0 : i32
    %c0_i32_1 = arith.constant 0 : i32
    return %c0_i32, %c0_i32_0 : i32, i32
  }
  func.func @transform_16(%arg0: i32) -> (i32, i32, i32) {
    %c0_i32 = arith.constant 0 : i32
    %c0_i32_0 = arith.constant 0 : i32
    %c0_i32_1 = arith.constant 0 : i32
    return %arg0, %c0_i32, %c0_i32_0 : i32, i32, i32
  }
  func.func @transform_17(%arg0: i32) -> (i32, i32, i32) {
    %c0_i32 = arith.constant 0 : i32
    %c0_i32_0 = arith.constant 0 : i32
    %c0_i32_1 = arith.constant 0 : i32
    return %arg0, %c0_i32, %c0_i32_0 : i32, i32, i32
  }
  func.func @transform_18(%arg0: i32) -> (i32, i32, i32) {
    %c0_i32 = arith.constant 0 : i32
    %c0_i32_0 = arith.constant 0 : i32
    %c0_i32_1 = arith.constant 0 : i32
    return %arg0, %c0_i32, %c0_i32_0 : i32, i32, i32
  }
  func.func @transform_19(%arg0: i32) -> (i32, i32, i32) {
    %c0_i32 = arith.constant 0 : i32
    %c0_i32_0 = arith.constant 0 : i32
    %c0_i32_1 = arith.constant 0 : i32
    return %arg0, %c0_i32, %c0_i32_0 : i32, i32, i32
  }
}

</mosaic_0001>

<bundles_post_ra>
// kernel: mixed_5b.1
= control target key start
LH: loop header
LB: loop body
LE: loop exit
PB: predicated region body
PF: predicated region fallthrough
CT: control target
= control target key end

     0   :  { %s26386_s0 = inlined_call_operand.vmem [shape: bf16[2,16,16,192], index: 0, kind: input, shape index: {}]   ;;  %s26387_s1 = inlined_call_operand.vmem [shape: bf16[192,96], index: 1, kind: input, shape index: {}]   ;;  %s26388_s2 = inlined_call_operand.vmem [shape: f32[1,96], index: 2, kind: input, shape index: {}]   ;;  %s26389_s3 = inlined_call_operand.vmem [shape: bf16[192,48], index: 3, kind: input, shape index: {}]   ;;  %s26390_s4 = inlined_call_operand.vmem [shape: f32[1,48], index: 4, kind: input, shape index: {}]   ;;  %s26391_s5 = inlined_call_operand.vmem [shape: bf16[1200,64], index: 5, kind: input, shape index: {}]   ;;  %s26392_s6 = inlined_call_operand.vmem [shape: f32[1,64], index: 6, kind: input, shape index: {}]   ;;  %s26393_s7 = inlined_call_operand.vmem [shape: bf16[192,64], index: 7, kind: input, shape index: {}]   ;;  %s26394_s8 = inlined_call_operand.vmem [shape: f32[1,64], index: 8, kind: input, shape index: {}]   ;;  %s26395_s9 = inlined_call_operand.vmem [shape: bf16[576,96], index: 9, kind: input, shape index: {}]   ;;  %s26396_s10 = inlined_call_operand.vmem [shape: f32[1,96], index: 10, kind: input, shape index: {}]   ;;  %s26397_s11 = inlined_call_operand.vmem [shape: bf16[864,96], index: 11, kind: input, shape index: {}]   ;;  %s26398_s12 = inlined_call_operand.vmem [shape: f32[1,96], index: 12, kind: input, shape index: {}]   ;;  %s26399_s13 = inlined_call_operand.vmem [shape: bf16[192,64], index: 13, kind: input, shape index: {}]   ;;  %s26400_s14 = inlined_call_operand.vmem [shape: f32[1,64], index: 14, kind: input, shape index: {}]   ;;  %s26401_s15 = inlined_call_operand.vmem [shape: f32[256,1], index: 15, kind: input, shape index: {}]   ;;  %s26402_s16 = inlined_call_operand.vmem [shape: f32[2,256,96], index: 16, kind: output, shape index: {0}]   ;;  %s26403_s17 = inlined_call_operand.vmem [shape: f32[2,256,64], index: 17, kind: output, shape index: {1}]   ;;  %s26404_s18 = inlined_call_operand.vmem [shape: f32[2,256,96], index: 18, kind: output, shape index: {2}]   ;;  %s26405_s19 = inlined_call_operand.vmem [shape: f32[2,256,64], index: 19, kind: output, shape index: {3}]  }
   0x1   :  { %26409 = sst [smem:[#allocation6_spill]] %s26386_s0  ;;  %s22821_s0 = smov 0  }
   0x2   :  { %26410 = sst [smem:[#allocation7_spill]] %s26387_s1 }
   0x3   :  { %26411 = sst [smem:[#allocation8_spill]] %s26388_s2 }
   0x4   :  { %26412 = sst [smem:[#allocation9_spill]] %s26389_s3 }
   0x5 LB: > { %s17483_s30 = sadd.s32 4294967295, %s22717_s0   ;;  %p17487_p0 = scmp.ge.s32.totalorder %s22717_s0, 1  ;;  %s22717_s0 = sphi %s22821_s0, %s30_s0  }
   0x6   : > { %p544_p1 = scmp.lt.s32.totalorder %s22717_s0, 3 }
   0x8   : > { %p545_p2 = pnand %p17487_p0, %p544_p1 }
   0x9   : > { %s26413_s1 = sld [smem:[#allocation7_spill]] (!%p545_p2)  ;;  %v22719_v1 = vmov (!%p545_p2), 0   ;;  %p615_p3 = scmp.lt.s32.totalorder (!%p545_p2), %s17483_s30, 1  ;;  %vm920_vm0 = vcmask (!%p545_p2), 523264   ;;  %v22447_v57 = vld [vmem:[%s26393_s7] sm:$0xff] (!%p545_p2)   ;;  %v22451_v58 = vld [vmem:[%s26393_s7 + $0x8] sm:$0xff] (!%p545_p2)  }
   0xa   : > { %548 = sbr.rel (%p545_p2) target bundleno = 2249 (0x8c9), region = 84  ;;  %21068 = vmatprep.subr.bf16.mxu1 (!%p545_p2), %v22719_v1  ;;  %969 = vmatprep.subr.bf16.mxu0 (!%p545_p2), %v22719_v1  ;;  %s26414_s27 = sld [smem:[#allocation6_spill]] (!%p545_p2)  ;;  %v22457_v59 = vld [vmem:[%s26393_s7 + $0x10] sm:$0xff] (!%p545_p2)   ;;  %v22459_v60 = vld [vmem:[%s26393_s7 + $0x18] sm:$0xff] (!%p545_p2)   ;;  %v22460_v61 = vld [vmem:[%s26393_s7 + $0x20] sm:$0xff] (!%p545_p2)   ;;  %vm1162_vm1 = vcmask (!%p545_p2), 785408  }
   0xb   : > { %22382 = vset.pattern.permute.xlu0 (!%p545_p2), %v22719_v1  ;;  %22383 = vset.pattern.permute.xlu1 (!%p545_p2), %v22719_v1  ;;  %s26415_s26 = sld [smem:[#allocation9_spill]] (!%p545_p2)  ;;  %v22461_v62 = vld [vmem:[%s26393_s7 + $0x28] sm:$0xff] (!%p545_p2)   ;;  %v22462_v63 = vld [vmem:[%s26393_s7 + $0x30] sm:$0xff] (!%p545_p2)   ;;  %vm1491_vm2 = vcmask (!%p545_p2), 392192   ;;  %vm1495_vm3 = vcmask (!%p545_p2), 386048   ;;  %s26416_s21 = sld [smem:[#allocation8_spill]] (!%p545_p2) }
   0xc   : > { %vm9797_vm4 = vcmask (!%p545_p2), 516096   ;;  %vm12829_vm5 = vcmask (!%p545_p2), 778240  }
   0xf   : > { %v22384_v0 = vld [vmem:[%s26413_s1] sm:$0xff] (!%p545_p2)   ;;  %v22385_v2 = vld [vmem:[%s26413_s1 + $0x8] sm:$0xff] (!%p545_p2)   ;;  %v22386_v3 = vld [vmem:[%s26413_s1 + $0x10] sm:$0xff] (!%p545_p2)  }
  0x10   : > { %21080 = vmatpush1.bf16.msra.mxu1 (!%p545_p2), %v22384_v0  ;;  %970 = vmatpush1.bf16.msra.mxu0 (!%p545_p2), %v22384_v0  ;;  %v22387_v4 = vld [vmem:[%s26413_s1 + $0x18] sm:$0xff] (!%p545_p2)   ;;  %v22388_v6 = vld [vmem:[%s26413_s1 + $0x20] sm:$0xff] (!%p545_p2)   ;;  %v22389_v7 = vld [vmem:[%s26413_s1 + $0x28] sm:$0xff] (!%p545_p2)  }
  0x11   : > { %21069 = vmatprep.subr.bf16.mxu1 %v22719_v1  ;;  %s26418_s30 = smov (!%p615_p3, %s17483_s30), 1  ;;  %971 = vmatprep.subr.bf16.mxu0 %v22719_v1  ;;  %v22390_v8 = vld [vmem:[%s26413_s1 + $0x30] sm:$0xff]   ;;  %v22391_v9 = vld [vmem:[%s26413_s1 + $0x38] sm:$0xff]   ;;  %v22392_v10 = vld [vmem:[%s26413_s1 + $0x40] sm:$0xff]  }
  0x12   : > { %s22844_s25 = sshll.u32 %s26418_s30, 8  ;;  %v22393_v11 = vld [vmem:[%s26413_s1 + $0x48] sm:$0xff]   ;;  %v22394_v12 = vld [vmem:[%s26413_s1 + $0x50] sm:$0xff]   ;;  %v22395_v13 = vld [vmem:[%s26413_s1 + $0x58] sm:$0xff]  }
  0x13   : > { %s22852_s28 = scalar_lea.vmem %s26414_s27, %s22844_s25  ;;  %v22399_v16 = vld [vmem:[%s26415_s26] sm:$0xff]   ;;  %v22403_v18 = vld [vmem:[%s26415_s26 + $0x8] sm:$0xff]   ;;  %v22407_v23 = vld [vmem:[%s26415_s26 + $0x10] sm:$0xff]   ;;  %s23692_s23 = scalar_lea.vmem %s26402_s16, %s22844_s25 }
  0x14   : > { %21081 = vmatpush1.bf16.msra.mxu1 %v22385_v2  ;;  %972 = vmatpush1.bf16.msra.mxu0 %v22385_v2  ;;  %v22396_v5 = vld [vmem:[%s22852_s28 + $0x44] ss:$8 sps:$4 sm:$0xff]   ;;  %v22907_v15 = vld [vmem:[%s22852_s28 + $0x40] ss:$8 sps:$4 sm:$0xff]   ;;  %v22913_v17 = vld [vmem:[%s22852_s28 + $0x54] ss:$8 sps:$4 sm:$0xff]   ;;  %s26035_s29 = scalar_lea.vmem %s26404_s18, %s22844_s25  ;;  %s26149_s24 = scalar_lea.vmem %s26405_s19, %s22844_s25 }
  0x15   : > { %21070 = vmatprep.subr.bf16.mxu1 %v22719_v1  ;;  %973 = vmatprep.subr.bf16.mxu0 %v22719_v1  ;;  %v22900_v14 = vld [vmem:[%s22852_s28 + $0x4] ss:$8 sps:$4 sm:$0xff]   ;;  %v22920_v19 = vld [vmem:[%s22852_s28] ss:$8 sps:$4 sm:$0xff]   ;;  %v22924_v20 = vld [vmem:[%s22852_s28 + $0x14] ss:$8 sps:$4 sm:$0xff]  }
  0x16   : > { %17547 = vmatprep.mubr.msk.bf16.mxu1 %vm920_vm0, %v22396_v5  ;;  %17543 = vmatprep.mubr.msk.bf16.mxu0 %vm920_vm0, %v22900_v14  ;;  %v22929_v21 = vld [vmem:[%s22852_s28 + $0x50] ss:$8 sps:$4 sm:$0xff]   ;;  %v22934_v22 = vld [vmem:[%s22852_s28 + $0x64] ss:$8 sps:$4 sm:$0xff]   ;;  %v22955_v27 = vld [vmem:[%s22852_s28 + $0x60] ss:$8 sps:$4 sm:$0xff]  }
  0x17   : > { %v22943_v24 = vld [vmem:[%s22852_s28 + $0x10] ss:$8 sps:$4 sm:$0xff]   ;;  %v22950_v26 = vld [vmem:[%s22852_s28 + $0x24] ss:$8 sps:$4 sm:$0xff]   ;;  %v22960_v28 = vld [vmem:[%s22852_s28 + $0x74] ss:$8 sps:$4 sm:$0xff]  }
  0x18   : > { %21082 = vmatpush1.bf16.msra.mxu1 %v22386_v3  ;;  %974 = vmatpush1.bf16.msra.mxu0 %v22386_v3  ;;  %v22411_v25 = vld [vmem:[%s26415_s26 + $0x18] sm:$0xff]   ;;  %v22415_v29 = vld [vmem:[%s26415_s26 + $0x20] sm:$0xff]   ;;  %v22419_v31 = vld [vmem:[%s26415_s26 + $0x28] sm:$0xff]  }
  0x19   : > { %21071 = vmatprep.subr.bf16.mxu1 %v22719_v1  ;;  %975 = vmatprep.subr.bf16.mxu0 %v22719_v1  ;;  %v22969_v30 = vld [vmem:[%s22852_s28 + $0x20] ss:$8 sps:$4 sm:$0xff]   ;;  %v22978_v32 = vld [vmem:[%s22852_s28 + $0x34] ss:$8 sps:$4 sm:$0xff]   ;;  %v22981_v33 = vld [vmem:[%s22852_s28 + $0x70] ss:$8 sps:$4 sm:$0xff]  }
  0x1a   : > { %v22986_v34 = vld [vmem:[%s22852_s28 + $0x84] ss:$8 sps:$4 sm:$0xff]   ;;  %v22423_v35 = vld [vmem:[%s26415_s26 + $0x30] sm:$0xff]   ;;  %v22427_v37 = vld [vmem:[%s26415_s26 + $0x38] sm:$0xff]  }
  0x1b   : > { %v22995_v36 = vld [vmem:[%s22852_s28 + $0x30] ss:$8 sps:$4 sm:$0xff]   ;;  %v23004_v38 = vld [vmem:[%s22852_s28 + $0x80] ss:$8 sps:$4 sm:$0xff]   ;;  %v23009_v39 = vld [vmem:[%s22852_s28 + $0x94] ss:$8 sps:$4 sm:$0xff]  }
  0x1c   : > { %21083 = vmatpush1.bf16.msra.mxu1 %v22387_v4  ;;  %976 = vmatpush1.bf16.msra.mxu0 %v22387_v4  ;;  %v22431_v40 = vld [vmem:[%s26415_s26 + $0x40] sm:$0xff]   ;;  %v22435_v41 = vld [vmem:[%s26415_s26 + $0x48] sm:$0xff]   ;;  %v23022_v42 = vld [vmem:[%s22852_s28 + $0x90] ss:$8 sps:$4 sm:$0xff]  }
  0x1d   : > { %21072 = vmatprep.subr.bf16.mxu1 %v22719_v1  ;;  %977 = vmatprep.subr.bf16.mxu0 %v22719_v1  ;;  %v23026_v43 = vld [vmem:[%s22852_s28 + $0xa4] ss:$8 sps:$4 sm:$0xff]   ;;  %v22439_v44 = vld [vmem:[%s26415_s26 + $0x50] sm:$0xff]   ;;  %v22443_v45 = vld [vmem:[%s26415_s26 + $0x58] sm:$0xff]  }
  0x1e   : > { %v23039_v46 = vld [vmem:[%s22852_s28 + $0xa0] ss:$8 sps:$4 sm:$0xff]   ;;  %v23043_v47 = vld [vmem:[%s22852_s28 + $0xb4] ss:$8 sps:$4 sm:$0xff]   ;;  %v22426_v48 = vld [vmem:[%s22852_s28 + $0xb0] ss:$8 sps:$4 sm:$0xff]  }
  0x1f   : > { %v22428_v49 = vld [vmem:[%s22852_s28 + $0xc4] ss:$8 sps:$4 sm:$0xff]   ;;  %v22430_v50 = vld [vmem:[%s22852_s28 + $0xc0] ss:$8 sps:$4 sm:$0xff]   ;;  %v22432_v51 = vld [vmem:[%s22852_s28 + $0xd4] ss:$8 sps:$4 sm:$0xff]  }
  0x20   : > { %21084 = vmatpush1.bf16.msra.mxu1 %v22388_v6  ;;  %978 = vmatpush1.bf16.msra.mxu0 %v22388_v6  ;;  %v22434_v52 = vld [vmem:[%s22852_s28 + $0xd0] ss:$8 sps:$4 sm:$0xff]   ;;  %v22436_v53 = vld [vmem:[%s22852_s28 + $0xe4] ss:$8 sps:$4 sm:$0xff]   ;;  %v22438_v54 = vld [vmem:[%s22852_s28 + $0xe0] ss:$8 sps:$4 sm:$0xff]  }
  0x21   : > { %21073 = vmatprep.subr.bf16.mxu1 %v22719_v1  ;;  %979 = vmatprep.subr.bf16.mxu0 %v22719_v1  ;;  %v22440_v55 = vld [vmem:[%s22852_s28 + $0xf4] ss:$8 sps:$4 sm:$0xff]   ;;  %v22442_v56 = vld [vmem:[%s22852_s28 + $0xf0] ss:$8 sps:$4 sm:$0xff]   ;;  %v23105_v2 = vld [vmem:[%s22852_s28 + $0x44] ss:$8 sps:$4 sm:$0xff]  }
  0x22   : > { %v22463_v0 = vld [vmem:[%s26393_s7 + $0x38] sm:$0xff]   ;;  %v22464_v3 = vld [vmem:[%s26393_s7 + $0x40] sm:$0xff]   ;;  %v22465_v4 = vld [vmem:[%s26393_s7 + $0x48] sm:$0xff]  }
  0x23   : > { %v22466_v5 = vld [vmem:[%s26393_s7 + $0x50] sm:$0xff]   ;;  %v22467_v6 = vld [vmem:[%s26393_s7 + $0x58] sm:$0xff]  }
  0x24   : > { %21085 = vmatpush1.bf16.msra.mxu1 %v22389_v7  ;;  %980 = vmatpush1.bf16.msra.mxu0 %v22389_v7  ;;  %v23150_v7 = vld [vmem:[%s26391_s5 + $0x18] sm:$0xff]  }
  0x25   : > { %21074 = vmatprep.subr.bf16.mxu1 %v22719_v1  ;;  %981 = vmatprep.subr.bf16.mxu0 %v22719_v1 }
  0x28   : > { %21086 = vmatpush1.bf16.msra.mxu1 %v22390_v8  ;;  %982 = vmatpush1.bf16.msra.mxu0 %v22390_v8  ;;  %v22720_v8 = vmov 0.0  }
  0x29   : > { %21075 = vmatprep.subr.bf16.mxu1 %v22719_v1  ;;  %983 = vmatprep.subr.bf16.mxu0 %v22719_v1  ;;  %1526 = vst.msk [vmem:[#allocation2 + $0x108] sm:$0xff] %vm1491_vm2, %v22720_v8  ;;  %1517 = vst.msk [vmem:[#allocation2 + $0xc0] sm:$0xff] %vm1491_vm2, %v22720_v8 }
  0x2a   : > { %1518 = vst.msk [vmem:[#allocation2 + $0xc8] sm:$0xff] %vm1491_vm2, %v22720_v8  ;;  %1519 = vst.msk [vmem:[#allocation2 + $0xd0] sm:$0xff] %vm1491_vm2, %v22720_v8 }
  0x2b   : > { %1521 = vst.msk [vmem:[#allocation2 + $0xe0] sm:$0xff] %vm1491_vm2, %v22720_v8  ;;  %1522 = vst.msk [vmem:[#allocation2 + $0xe8] sm:$0xff] %vm1491_vm2, %v22720_v8 }
  0x2c   : > { %21087 = vmatpush1.bf16.msra.mxu1 %v22391_v9  ;;  %984 = vmatpush1.bf16.msra.mxu0 %v22391_v9  ;;  %1523 = vst.msk [vmem:[#allocation2 + $0xf0] sm:$0xff] %vm1491_vm2, %v22720_v8  ;;  %1525 = vst.msk [vmem:[#allocation2 + $0x100] sm:$0xff] %vm1491_vm2, %v22720_v8  ;;  %v23598_v9 = vld [vmem:[%s22852_s28 + $0xb0] ss:$8 sps:$4 sm:$0xff]  }
  0x2d   : > { %21076 = vmatprep.subr.bf16.mxu1 %v22719_v1  ;;  %985 = vmatprep.subr.bf16.mxu0 %v22719_v1  ;;  %1527 = vst.msk [vmem:[#allocation2 + $0x110] sm:$0xff] %vm1491_vm2, %v22720_v8  ;;  %1529 = vst.msk [vmem:[#allocation2 + $0x120] sm:$0xff] %vm1491_vm2, %v22720_v8 }
  0x2e   : > { %1530 = vst.msk [vmem:[#allocation2 + $0x128] sm:$0xff] %vm1491_vm2, %v22720_v8  ;;  %1531 = vst.msk [vmem:[#allocation2 + $0x130] sm:$0xff] %vm1491_vm2, %v22720_v8 }
  0x2f   : > { %1533 = vst.msk [vmem:[#allocation2 + $0x140] sm:$0xff] %vm1491_vm2, %v22720_v8  ;;  %1534 = vst.msk [vmem:[#allocation2 + $0x148] sm:$0xff] %vm1491_vm2, %v22720_v8 }
  0x30   : > { %21088 = vmatpush1.bf16.msra.mxu1 %v22392_v10  ;;  %986 = vmatpush1.bf16.msra.mxu0 %v22392_v10  ;;  %1535 = vst.msk [vmem:[#allocation2 + $0x150] sm:$0xff] %vm1491_vm2, %v22720_v8  ;;  %1537 = vst.msk [vmem:[#allocation2 + $0x160] sm:$0xff] %vm1491_vm2, %v22720_v8  ;;  %v23603_v10 = vld [vmem:[%s22852_s28 + $0xc4] ss:$8 sps:$4 sm:$0xff]  }
  0x31   : > { %21077 = vmatprep.subr.bf16.mxu1 %v22719_v1  ;;  %987 = vmatprep.subr.bf16.mxu0 %v22719_v1  ;;  %1538 = vst.msk [vmem:[#allocation2 + $0x168] sm:$0xff] %vm1491_vm2, %v22720_v8  ;;  %1539 = vst.msk [vmem:[#allocation2 + $0x170] sm:$0xff] %vm1491_vm2, %v22720_v8 }
  0x32   : > { %1541 = vst.msk [vmem:[#allocation2 + $0x180] sm:$0xff] %vm1491_vm2, %v22720_v8  ;;  %1542 = vst.msk [vmem:[#allocation2 + $0x188] sm:$0xff] %vm1491_vm2, %v22720_v8 }
  0x33   : > { %1543 = vst.msk [vmem:[#allocation2 + $0x190] sm:$0xff] %vm1491_vm2, %v22720_v8  ;;  %1545 = vst.msk [vmem:[#allocation2 + $0x1a0] sm:$0xff] %vm1491_vm2, %v22720_v8 }
  0x34   : > { %21089 = vmatpush1.bf16.msra.mxu1 %v22393_v11  ;;  %988 = vmatpush1.bf16.msra.mxu0 %v22393_v11  ;;  %1546 = vst.msk [vmem:[#allocation2 + $0x1a8] sm:$0xff] %vm1491_vm2, %v22720_v8  ;;  %1547 = vst.msk [vmem:[#allocation2 + $0x1b0] sm:$0xff] %vm1491_vm2, %v22720_v8  ;;  %v22469_v11 = vld [vmem:[%s26391_s5 + $0x20] sm:$0xff]  }
  0x35   : > { %21078 = vmatprep.subr.bf16.mxu1 %v22719_v1  ;;  %989 = vmatprep.subr.bf16.mxu0 %v22719_v1  ;;  %1549 = vst.msk [vmem:[#allocation2 + $0x1c0] sm:$0xff] %vm1491_vm2, %v22720_v8  ;;  %1550 = vst.msk [vmem:[#allocation2 + $0x1c8] sm:$0xff] %vm1491_vm2, %v22720_v8 }
  0x36   : > { %1551 = vst.msk [vmem:[#allocation2 + $0x1d0] sm:$0xff] %vm1491_vm2, %v22720_v8  ;;  %1553 = vst.msk [vmem:[#allocation2 + $0x1e0] sm:$0xff] %vm1491_vm2, %v22720_v8 }
  0x37   : > { %1554 = vst.msk [vmem:[#allocation2 + $0x1e8] sm:$0xff] %vm1491_vm2, %v22720_v8  ;;  %1555 = vst.msk [vmem:[#allocation2 + $0x1f0] sm:$0xff] %vm1491_vm2, %v22720_v8 }
  0x38   : > { %21090 = vmatpush1.bf16.msra.mxu1 %v22394_v12  ;;  %990 = vmatpush1.bf16.msra.mxu0 %v22394_v12  ;;  %1557 = vst.msk [vmem:[#allocation2 + $0x200] sm:$0xff] %vm1491_vm2, %v22720_v8  ;;  %1558 = vst.msk [vmem:[#allocation2 + $0x208] sm:$0xff] %vm1491_vm2, %v22720_v8  ;;  %v22470_v12 = vld [vmem:[%s26391_s5 + $0x28] sm:$0xff]  }
  0x39   : > { %21079 = vmatprep.subr.bf16.mxu1 %v22719_v1  ;;  %991 = vmatprep.subr.bf16.mxu0 %v22719_v1  ;;  %1559 = vst.msk [vmem:[#allocation2 + $0x210] sm:$0xff] %vm1491_vm2, %v22720_v8  ;;  %1561 = vst.msk [vmem:[#allocation2 + $0x220] sm:$0xff] %vm1491_vm2, %v22720_v8 }
  0x3a   : > { %1562 = vst.msk [vmem:[#allocation2 + $0x228] sm:$0xff] %vm1491_vm2, %v22720_v8  ;;  %1563 = vst.msk [vmem:[#allocation2 + $0x230] sm:$0xff] %vm1491_vm2, %v22720_v8 }
  0x3b   : > { %1565 = vst.msk [vmem:[#allocation2 + $0x240] sm:$0xff] %vm1491_vm2, %v22720_v8  ;;  %1566 = vst.msk [vmem:[#allocation2 + $0x248] sm:$0xff] %vm1491_vm2, %v22720_v8 }
  0x3c   : > { %21091 = vmatpush1.bf16.msra.mxu1 %v22395_v13  ;;  %992 = vmatpush1.bf16.msra.mxu0 %v22395_v13  ;;  %1567 = vst.msk [vmem:[#allocation2 + $0x250] sm:$0xff] %vm1491_vm2, %v22720_v8  ;;  %1569 = vst.msk [vmem:[#allocation2 + $0x260] sm:$0xff] %vm1491_vm2, %v22720_v8  ;;  %v1685_v13 = vld [vmem:[#allocation2 + $0xc7] sm:$0xff] }
  0x3d   : > { %1298 = vmatprep.subr.bf16.mxu1 %v22719_v1  ;;  %1570 = vst.msk [vmem:[#allocation2 + $0x268] sm:$0xff] %vm1491_vm2, %v22720_v8  ;;  %1571 = vst.msk [vmem:[#allocation2 + $0x270] sm:$0xff] %vm1491_vm2, %v22720_v8  ;;  %19362 = vmatprep.subr.bf16.mxu0 %v23150_v7 }
  0x3e   : > { %1573 = vst.msk [vmem:[#allocation2 + $0x280] sm:$0xff] %vm1491_vm2, %v22720_v8  ;;  %1574 = vst.msk [vmem:[#allocation2 + $0x288] sm:$0xff] %vm1491_vm2, %v22720_v8 }
  0x3f   : > { %1034 = vmatmul.mubr.bf16.vlgmr.msra.gmra.mrb[0].mxu1 %v22907_v15  ;;  %1002 = vmatmul.mubr.bf16.vlgmr.msra.gmra.mrb[0].mxu0 %v22920_v19  ;;  %1575 = vst.msk [vmem:[#allocation2 + $0x290] sm:$0xff] %vm1491_vm2, %v22720_v8  ;;  %1577 = vst.msk [vmem:[#allocation2 + $0x2a0] sm:$0xff] %vm1491_vm2, %v22720_v8 }
  0x40   : > { %1299 = vmatpush1.bf16.msra.mxu1 %v22399_v16  ;;  %17548 = vmatprep.mubr.msk.bf16.mxu1 %vm920_vm0, %v22913_v17  ;;  %1578 = vst.msk [vmem:[#allocation2 + $0x2a8] sm:$0xff] %vm1491_vm2, %v22720_v8  ;;  %1579 = vst.msk [vmem:[#allocation2 + $0x2b0] sm:$0xff] %vm1491_vm2, %v22720_v8 }
  0x41   : > { %1300 = vmatprep.subr.bf16.mxu1 %v22719_v1  ;;  %17544 = vmatprep.mubr.msk.bf16.mxu0 %vm920_vm0, %v22924_v20  ;;  %1581 = vst.msk [vmem:[#allocation2 + $0x2c0] sm:$0xff] %vm1491_vm2, %v22720_v8  ;;  %1582 = vst.msk [vmem:[#allocation2 + $0x2c8] sm:$0xff] %vm1491_vm2, %v22720_v8 }
  0x42   : > { %1583 = vst.msk [vmem:[#allocation2 + $0x2d0] sm:$0xff] %vm1491_vm2, %v22720_v8  ;;  %1585 = vst.msk [vmem:[#allocation2 + $0x2e0] sm:$0xff] %vm1491_vm2, %v22720_v8  ;;  %19363 = vmatpush3.bf16.msra.mxu0 %v23150_v7 }
  0x43   : > { %1586 = vst.msk [vmem:[#allocation2 + $0x2e8] sm:$0xff] %vm1491_vm2, %v22720_v8  ;;  %1587 = vst.msk [vmem:[#allocation2 + $0x2f0] sm:$0xff] %vm1491_vm2, %v22720_v8  ;;  %19364 = vmatprep.subr.bf16.mxu0 %v22469_v11 }
  0x44   : > { %1301 = vmatpush1.bf16.msra.mxu1 %v22403_v18  ;;  %1589 = vst.msk [vmem:[#allocation2 + $0x300] sm:$0xff] %vm1491_vm2, %v22720_v8  ;;  %1590 = vst.msk [vmem:[#allocation2 + $0x308] sm:$0xff] %vm1491_vm2, %v22720_v8  ;;  %v1688_v18 = vld [vmem:[#allocation2 + $0xef] sm:$0xff] }
  0x45   : > { %1302 = vmatprep.subr.bf16.mxu1 %v22719_v1  ;;  %1591 = vst.msk [vmem:[#allocation2 + $0x310] sm:$0xff] %vm1491_vm2, %v22720_v8  ;;  %1593 = vst.msk [vmem:[#allocation2 + $0x320] sm:$0xff] %vm1491_vm2, %v22720_v8 }
  0x46   : > { %1594 = vst.msk [vmem:[#allocation2 + $0x328] sm:$0xff] %vm1491_vm2, %v22720_v8  ;;  %1595 = vst.msk [vmem:[#allocation2 + $0x330] sm:$0xff] %vm1491_vm2, %v22720_v8  ;;  %19365 = vmatpush3.bf16.msra.mxu0 %v22469_v11 }
  0x47   : > { %1042 = vmatmul.mubr.bf16.gmra.mrb[4].mxu1 %v22929_v21  ;;  %1010 = vmatmul.mubr.bf16.gmra.mrb[4].mxu0 %v22943_v24  ;;  %9823 = vst.msk [vmem:[#allocation3 + $0xe0] sm:$0xff] %vm920_vm0, %v22720_v8  ;;  %9824 = vst.msk [vmem:[#allocation3 + $0xe8] sm:$0xff] %vm920_vm0, %v22720_v8 }
  0x48   : > { %17549 = vmatprep.mubr.msk.bf16.mxu1 %vm920_vm0, %v22934_v22  ;;  %1303 = vmatpush1.bf16.msra.mxu1 %v22407_v23  ;;  %9825 = vst.msk [vmem:[#allocation3 + $0xf0] sm:$0xff] %vm920_vm0, %v22720_v8  ;;  %9827 = vst.msk [vmem:[#allocation3 + $0x100] sm:$0xff] %vm920_vm0, %v22720_v8  ;;  %v23674_v23 = vld [vmem:[%s22852_s28 + $0xe0] ss:$8 sps:$4 sm:$0xff]  }
  0x49   : > { %1304 = vmatprep.subr.bf16.mxu1 %v22719_v1  ;;  %17545 = vmatprep.mubr.msk.bf16.mxu0 %vm920_vm0, %v22950_v26  ;;  %9828 = vst.msk [vmem:[#allocation3 + $0x108] sm:$0xff] %vm920_vm0, %v22720_v8  ;;  %9829 = vst.msk [vmem:[#allocation3 + $0x110] sm:$0xff] %vm920_vm0, %v22720_v8 }
  0x4a   : > { %9831 = vst.msk [vmem:[#allocation3 + $0x120] sm:$0xff] %vm920_vm0, %v22720_v8  ;;  %9832 = vst.msk [vmem:[#allocation3 + $0x128] sm:$0xff] %vm920_vm0, %v22720_v8  ;;  %19366 = vmatprep.subr.bf16.mxu0 %v22470_v12 }
  0x4b   : > { %9833 = vst.msk [vmem:[#allocation3 + $0x130] sm:$0xff] %vm920_vm0, %v22720_v8  ;;  %9835 = vst.msk [vmem:[#allocation3 + $0x140] sm:$0xff] %vm920_vm0, %v22720_v8  ;;  %19367 = vmatpush3.bf16.msra.mxu0 %v22470_v12 }
  0x4c   : > { %1305 = vmatpush1.bf16.msra.mxu1 %v22411_v25  ;;  %9836 = vst.msk [vmem:[#allocation3 + $0x148] sm:$0xff] %vm920_vm0, %v22720_v8  ;;  %9837 = vst.msk [vmem:[#allocation3 + $0x150] sm:$0xff] %vm920_vm0, %v22720_v8  ;;  %v23683_v25 = vld [vmem:[%s22852_s28 + $0xf4] ss:$8 sps:$4 sm:$0xff]  }
  0x4d   : > { %1306 = vmatprep.subr.bf16.mxu1 %v22719_v1  ;;  %9839 = vst.msk [vmem:[#allocation3 + $0x160] sm:$0xff] %vm920_vm0, %v22720_v8  ;;  %9840 = vst.msk [vmem:[#allocation3 + $0x168] sm:$0xff] %vm920_vm0, %v22720_v8 }
  0x4e   : > { %9841 = vst.msk [vmem:[#allocation3 + $0x170] sm:$0xff] %vm920_vm0, %v22720_v8  ;;  %9843 = vst.msk [vmem:[#allocation3 + $0x180] sm:$0xff] %vm920_vm0, %v22720_v8 }
  0x4f   : > { %1050 = vmatmul.mubr.bf16.gmra.mrb[8].mxu1 %v22955_v27  ;;  %1018 = vmatmul.mubr.bf16.gmra.mrb[8].mxu0 %v22969_v30  ;;  %9844 = vst.msk [vmem:[#allocation3 + $0x188] sm:$0xff] %vm920_vm0, %v22720_v8  ;;  %9845 = vst.msk [vmem:[#allocation3 + $0x190] sm:$0xff] %vm920_vm0, %v22720_v8 }
  0x50   : > { %17550 = vmatprep.mubr.msk.bf16.mxu1 %vm920_vm0, %v22960_v28  ;;  %1307 = vmatpush1.bf16.msra.mxu1 %v22415_v29  ;;  %9847 = vst.msk [vmem:[#allocation3 + $0x1a0] sm:$0xff] %vm920_vm0, %v22720_v8  ;;  %9848 = vst.msk [vmem:[#allocation3 + $0x1a8] sm:$0xff] %vm920_vm0, %v22720_v8 }
  0x51   : > { %1308 = vmatprep.subr.bf16.mxu1 %v22719_v1  ;;  %17546 = vmatprep.mubr.msk.bf16.mxu0 %vm920_vm0, %v22978_v32  ;;  %9849 = vst.msk [vmem:[#allocation3 + $0x1b0] sm:$0xff] %vm920_vm0, %v22720_v8  ;;  %9851 = vst.msk [vmem:[#allocation3 + $0x1c0] sm:$0xff] %vm920_vm0, %v22720_v8 }
  0x52   : > { %9852 = vst.msk [vmem:[#allocation3 + $0x1c8] sm:$0xff] %vm920_vm0, %v22720_v8  ;;  %9853 = vst.msk [vmem:[#allocation3 + $0x1d0] sm:$0xff] %vm920_vm0, %v22720_v8 }
  0x53   : > { %9855 = vst.msk [vmem:[#allocation3 + $0x1e0] sm:$0xff] %vm920_vm0, %v22720_v8  ;;  %9856 = vst.msk [vmem:[#allocation3 + $0x1e8] sm:$0xff] %vm920_vm0, %v22720_v8 }
  0x54   : > { %1309 = vmatpush1.bf16.msra.mxu1 %v22419_v31  ;;  %9857 = vst.msk [vmem:[#allocation3 + $0x1f0] sm:$0xff] %vm920_vm0, %v22720_v8  ;;  %9859 = vst.msk [vmem:[#allocation3 + $0x200] sm:$0xff] %vm920_vm0, %v22720_v8 }
  0x55   : > { %1310 = vmatprep.subr.bf16.mxu1 %v22719_v1  ;;  %9860 = vst.msk [vmem:[#allocation3 + $0x208] sm:$0xff] %vm920_vm0, %v22720_v8  ;;  %9861 = vst.msk [vmem:[#allocation3 + $0x210] sm:$0xff] %vm920_vm0, %v22720_v8 }
  0x56   : > { %9863 = vst.msk [vmem:[#allocation3 + $0x220] sm:$0xff] %vm920_vm0, %v22720_v8  ;;  %9864 = vst.msk [vmem:[#allocation3 + $0x228] sm:$0xff] %vm920_vm0, %v22720_v8 }
  0x57   : > { %1058 = vmatmul.mubr.bf16.gmra.mrb[12].mxu1 %v22981_v33  ;;  %1026 = vmatmul.mubr.bf16.gmra.mrb[12].mxu0 %v22995_v36  ;;  %9865 = vst.msk [vmem:[#allocation3 + $0x230] sm:$0xff] %vm920_vm0, %v22720_v8  ;;  %9867 = vst.msk [vmem:[#allocation3 + $0x240] sm:$0xff] %vm920_vm0, %v22720_v8 }
  0x58   : > { %17551 = vmatprep.mubr.msk.bf16.mxu1 %vm920_vm0, %v22986_v34  ;;  %1311 = vmatpush1.bf16.msra.mxu1 %v22423_v35  ;;  %9868 = vst.msk [vmem:[#allocation3 + $0x248] sm:$0xff] %vm920_vm0, %v22720_v8  ;;  %9869 = vst.msk [vmem:[#allocation3 + $0x250] sm:$0xff] %vm920_vm0, %v22720_v8  ;;  %v22655_v35 = vld [vmem:[%s22852_s28 + $0x4] ss:$8 sps:$4 sm:$0xff]  }
  0x59   : > { %1312 = vmatprep.subr.bf16.mxu1 %v22719_v1  ;;  %9871 = vst.msk [vmem:[#allocation3 + $0x260] sm:$0xff] %vm920_vm0, %v22720_v8  ;;  %9872 = vst.msk [vmem:[#allocation3 + $0x268] sm:$0xff] %vm920_vm0, %v22720_v8 }
  0x5a   : > { %9873 = vst.msk [vmem:[#allocation3 + $0x270] sm:$0xff] %vm920_vm0, %v22720_v8  ;;  %9875 = vst.msk [vmem:[#allocation3 + $0x280] sm:$0xff] %vm920_vm0, %v22720_v8 }
  0x5b   : > { %9876 = vst.msk [vmem:[#allocation3 + $0x288] sm:$0xff] %vm920_vm0, %v22720_v8  ;;  %9877 = vst.msk [vmem:[#allocation3 + $0x290] sm:$0xff] %vm920_vm0, %v22720_v8 }
  0x5c   : > { %1313 = vmatpush1.bf16.msra.mxu1 %v22427_v37  ;;  %9879 = vst.msk [vmem:[#allocation3 + $0x2a0] sm:$0xff] %vm920_vm0, %v22720_v8  ;;  %9880 = vst.msk [vmem:[#allocation3 + $0x2a8] sm:$0xff] %vm920_vm0, %v22720_v8 }
  0x5d   : > { %1314 = vmatprep.subr.bf16.mxu1 %v22719_v1  ;;  %9881 = vst.msk [vmem:[#allocation3 + $0x2b0] sm:$0xff] %vm920_vm0, %v22720_v8  ;;  %9883 = vst.msk [vmem:[#allocation3 + $0x2c0] sm:$0xff] %vm920_vm0, %v22720_v8 }
  0x5e   : > { %9884 = vst.msk [vmem:[#allocation3 + $0x2c8] sm:$0xff] %vm920_vm0, %v22720_v8  ;;  %9885 = vst.msk [vmem:[#allocation3 + $0x2d0] sm:$0xff] %vm920_vm0, %v22720_v8 }
  0x5f   : > { %1066 = vmatmul.mubr.bf16.gmra.mrb[16].mxu1 %v23004_v38  ;;  %9887 = vst.msk [vmem:[#allocation3 + $0x2e0] sm:$0xff] %vm920_vm0, %v22720_v8  ;;  %9888 = vst.msk [vmem:[#allocation3 + $0x2e8] sm:$0xff] %vm920_vm0, %v22720_v8 }
  0x60   : > { %17552 = vmatprep.mubr.msk.bf16.mxu1 %vm920_vm0, %v23009_v39  ;;  %1315 = vmatpush1.bf16.msra.mxu1 %v22431_v40  ;;  %9889 = vst.msk [vmem:[#allocation3 + $0x2f0] sm:$0xff] %vm920_vm0, %v22720_v8  ;;  %9891 = vst.msk [vmem:[#allocation3 + $0x300] sm:$0xff] %vm920_vm0, %v22720_v8 }
  0x61   : > { %1316 = vmatprep.subr.bf16.mxu1 %v22719_v1  ;;  %9892 = vst.msk [vmem:[#allocation3 + $0x308] sm:$0xff] %vm920_vm0, %v22720_v8  ;;  %9893 = vst.msk [vmem:[#allocation3 + $0x310] sm:$0xff] %vm920_vm0, %v22720_v8 }
  0x62   : > { %12855 = vst.msk [vmem:[#allocation4 + $0xe0] sm:$0xff] %vm1162_vm1, %v22720_v8  ;;  %12856 = vst.msk [vmem:[#allocation4 + $0xe8] sm:$0xff] %vm1162_vm1, %v22720_v8 }
  0x63   : > { %12857 = vst.msk [vmem:[#allocation4 + $0xf0] sm:$0xff] %vm1162_vm1, %v22720_v8  ;;  %12859 = vst.msk [vmem:[#allocation4 + $0x100] sm:$0xff] %vm1162_vm1, %v22720_v8 }
  0x64   : > { %1317 = vmatpush1.bf16.msra.mxu1 %v22435_v41  ;;  %12860 = vst.msk [vmem:[#allocation4 + $0x108] sm:$0xff] %vm1162_vm1, %v22720_v8  ;;  %12861 = vst.msk [vmem:[#allocation4 + $0x110] sm:$0xff] %vm1162_vm1, %v22720_v8 }
  0x65   : > { %1318 = vmatprep.subr.bf16.mxu1 %v22719_v1  ;;  %12863 = vst.msk [vmem:[#allocation4 + $0x120] sm:$0xff] %vm1162_vm1, %v22720_v8  ;;  %12864 = vst.msk [vmem:[#allocation4 + $0x128] sm:$0xff] %vm1162_vm1, %v22720_v8 }
  0x66   : > { %12865 = vst.msk [vmem:[#allocation4 + $0x130] sm:$0xff] %vm1162_vm1, %v22720_v8  ;;  %12867 = vst.msk [vmem:[#allocation4 + $0x140] sm:$0xff] %vm1162_vm1, %v22720_v8 }
  0x67   : > { %1074 = vmatmul.mubr.bf16.gmra.mrb[20].mxu1 %v23022_v42  ;;  %12868 = vst.msk [vmem:[#allocation4 + $0x148] sm:$0xff] %vm1162_vm1, %v22720_v8  ;;  %12869 = vst.msk [vmem:[#allocation4 + $0x150] sm:$0xff] %vm1162_vm1, %v22720_v8 }
  0x68   : > { %17553 = vmatprep.mubr.msk.bf16.mxu1 %vm920_vm0, %v23026_v43  ;;  %1319 = vmatpush1.bf16.msra.mxu1 %v22439_v44  ;;  %12871 = vst.msk [vmem:[#allocation4 + $0x160] sm:$0xff] %vm1162_vm1, %v22720_v8  ;;  %12872 = vst.msk [vmem:[#allocation4 + $0x168] sm:$0xff] %vm1162_vm1, %v22720_v8  ;;  %v22656_v44 = vld [vmem:[%s22852_s28] ss:$8 sps:$4 sm:$0xff]  }
  0x69   : > { %1320 = vmatprep.subr.bf16.mxu1 %v22719_v1  ;;  %12873 = vst.msk [vmem:[#allocation4 + $0x170] sm:$0xff] %vm1162_vm1, %v22720_v8  ;;  %12875 = vst.msk [vmem:[#allocation4 + $0x180] sm:$0xff] %vm1162_vm1, %v22720_v8 }
  0x6a   : > { %12876 = vst.msk [vmem:[#allocation4 + $0x188] sm:$0xff] %vm1162_vm1, %v22720_v8  ;;  %12877 = vst.msk [vmem:[#allocation4 + $0x190] sm:$0xff] %vm1162_vm1, %v22720_v8 }
  0x6b   : > { %12879 = vst.msk [vmem:[#allocation4 + $0x1a0] sm:$0xff] %vm1162_vm1, %v22720_v8  ;;  %12880 = vst.msk [vmem:[#allocation4 + $0x1a8] sm:$0xff] %vm1162_vm1, %v22720_v8 }
  0x6c   : > { %1321 = vmatpush1.bf16.msra.mxu1 %v22443_v45  ;;  %12881 = vst.msk [vmem:[#allocation4 + $0x1b0] sm:$0xff] %vm1162_vm1, %v22720_v8  ;;  %12883 = vst.msk [vmem:[#allocation4 + $0x1c0] sm:$0xff] %vm1162_vm1, %v22720_v8  ;;  %v22657_v45 = vld [vmem:[%s22852_s28 + $0x14] ss:$8 sps:$4 sm:$0xff]  }
  0x6d   : > { %9601 = vmatprep.subr.bf16.mxu1 %v22719_v1  ;;  %12884 = vst.msk [vmem:[#allocation4 + $0x1c8] sm:$0xff] %vm1162_vm1, %v22720_v8  ;;  %12885 = vst.msk [vmem:[#allocation4 + $0x1d0] sm:$0xff] %vm1162_vm1, %v22720_v8 }
  0x6e   : > { %12887 = vst.msk [vmem:[#allocation4 + $0x1e0] sm:$0xff] %vm1162_vm1, %v22720_v8  ;;  %12888 = vst.msk [vmem:[#allocation4 + $0x1e8] sm:$0xff] %vm1162_vm1, %v22720_v8 }
  0x6f   : > { %1082 = vmatmul.mubr.bf16.gmra.mrb[24].mxu1 %v23039_v46  ;;  %12889 = vst.msk [vmem:[#allocation4 + $0x1f0] sm:$0xff] %vm1162_vm1, %v22720_v8  ;;  %12891 = vst.msk [vmem:[#allocation4 + $0x200] sm:$0xff] %vm1162_vm1, %v22720_v8 }
  0x70   : > { %17554 = vmatprep.mubr.msk.bf16.mxu1 %vm920_vm0, %v23043_v47  ;;  %12892 = vst.msk [vmem:[#allocation4 + $0x208] sm:$0xff] %vm1162_vm1, %v22720_v8  ;;  %12893 = vst.msk [vmem:[#allocation4 + $0x210] sm:$0xff] %vm1162_vm1, %v22720_v8 }
  0x71   : > { %12895 = vst.msk [vmem:[#allocation4 + $0x220] sm:$0xff] %vm1162_vm1, %v22720_v8  ;;  %12896 = vst.msk [vmem:[#allocation4 + $0x228] sm:$0xff] %vm1162_vm1, %v22720_v8 }
  0x72   : > { %12897 = vst.msk [vmem:[#allocation4 + $0x230] sm:$0xff] %vm1162_vm1, %v22720_v8  ;;  %12899 = vst.msk [vmem:[#allocation4 + $0x240] sm:$0xff] %vm1162_vm1, %v22720_v8 }
  0x73   : > { %12900 = vst.msk [vmem:[#allocation4 + $0x248] sm:$0xff] %vm1162_vm1, %v22720_v8  ;;  %12901 = vst.msk [vmem:[#allocation4 + $0x250] sm:$0xff] %vm1162_vm1, %v22720_v8 }
  0x74   : > { %12903 = vst.msk [vmem:[#allocation4 + $0x260] sm:$0xff] %vm1162_vm1, %v22720_v8  ;;  %12904 = vst.msk [vmem:[#allocation4 + $0x268] sm:$0xff] %vm1162_vm1, %v22720_v8 }
  0x75   : > { %12905 = vst.msk [vmem:[#allocation4 + $0x270] sm:$0xff] %vm1162_vm1, %v22720_v8  ;;  %12907 = vst.msk [vmem:[#allocation4 + $0x280] sm:$0xff] %vm1162_vm1, %v22720_v8 }
  0x76   : > { %12908 = vst.msk [vmem:[#allocation4 + $0x288] sm:$0xff] %vm1162_vm1, %v22720_v8  ;;  %12909 = vst.msk [vmem:[#allocation4 + $0x290] sm:$0xff] %vm1162_vm1, %v22720_v8 }
  0x77   : > { %1090 = vmatmul.mubr.bf16.gmra.mrb[28].mxu1 %v22426_v48  ;;  %12911 = vst.msk [vmem:[#allocation4 + $0x2a0] sm:$0xff] %vm1162_vm1, %v22720_v8  ;;  %12912 = vst.msk [vmem:[#allocation4 + $0x2a8] sm:$0xff] %vm1162_vm1, %v22720_v8 }
  0x78   : > { %17555 = vmatprep.mubr.msk.bf16.mxu1 %vm920_vm0, %v22428_v49  ;;  %12913 = vst.msk [vmem:[#allocation4 + $0x2b0] sm:$0xff] %vm1162_vm1, %v22720_v8  ;;  %12915 = vst.msk [vmem:[#allocation4 + $0x2c0] sm:$0xff] %vm1162_vm1, %v22720_v8 }
  0x79   : > { %12916 = vst.msk [vmem:[#allocation4 + $0x2c8] sm:$0xff] %vm1162_vm1, %v22720_v8  ;;  %12917 = vst.msk [vmem:[#allocation4 + $0x2d0] sm:$0xff] %vm1162_vm1, %v22720_v8 }
  0x7a   : > { %12919 = vst.msk [vmem:[#allocation4 + $0x2e0] sm:$0xff] %vm1162_vm1, %v22720_v8  ;;  %12920 = vst.msk [vmem:[#allocation4 + $0x2e8] sm:$0xff] %vm1162_vm1, %v22720_v8 }
  0x7b   : > { %12921 = vst.msk [vmem:[#allocation4 + $0x2f0] sm:$0xff] %vm1162_vm1, %v22720_v8  ;;  %12923 = vst.msk [vmem:[#allocation4 + $0x300] sm:$0xff] %vm1162_vm1, %v22720_v8 }
  0x7c   : > { %12924 = vst.msk [vmem:[#allocation4 + $0x308] sm:$0xff] %vm1162_vm1, %v22720_v8  ;;  %12925 = vst.msk [vmem:[#allocation4 + $0x310] sm:$0xff] %vm1162_vm1, %v22720_v8 }
  0x7d   : > { %16319 = vst.msk [vmem:[#allocation5 + $0xe0] sm:$0xff] %vm920_vm0, %v22720_v8  ;;  %16320 = vst.msk [vmem:[#allocation5 + $0xe8] sm:$0xff] %vm920_vm0, %v22720_v8 }
  0x7e   : > { %16321 = vst.msk [vmem:[#allocation5 + $0xf0] sm:$0xff] %vm920_vm0, %v22720_v8  ;;  %16323 = vst.msk [vmem:[#allocation5 + $0x100] sm:$0xff] %vm920_vm0, %v22720_v8 }
  0x7f   : > { %1098 = vmatmul.mubr.bf16.gmra.mrb[32].mxu1 %v22430_v50  ;;  %16324 = vst.msk [vmem:[#allocation5 + $0x108] sm:$0xff] %vm920_vm0, %v22720_v8  ;;  %16325 = vst.msk [vmem:[#allocation5 + $0x110] sm:$0xff] %vm920_vm0, %v22720_v8 }
  0x80   : > { %17556 = vmatprep.mubr.msk.bf16.mxu1 %vm920_vm0, %v22432_v51  ;;  %16327 = vst.msk [vmem:[#allocation5 + $0x120] sm:$0xff] %vm920_vm0, %v22720_v8  ;;  %16328 = vst.msk [vmem:[#allocation5 + $0x128] sm:$0xff] %vm920_vm0, %v22720_v8 }
  0x81   : > { %16329 = vst.msk [vmem:[#allocation5 + $0x130] sm:$0xff] %vm920_vm0, %v22720_v8  ;;  %16331 = vst.msk [vmem:[#allocation5 + $0x140] sm:$0xff] %vm920_vm0, %v22720_v8 }
  0x82   : > { %16332 = vst.msk [vmem:[#allocation5 + $0x148] sm:$0xff] %vm920_vm0, %v22720_v8  ;;  %16333 = vst.msk [vmem:[#allocation5 + $0x150] sm:$0xff] %vm920_vm0, %v22720_v8 }
  0x83   : > { %16335 = vst.msk [vmem:[#allocation5 + $0x160] sm:$0xff] %vm920_vm0, %v22720_v8  ;;  %16336 = vst.msk [vmem:[#allocation5 + $0x168] sm:$0xff] %vm920_vm0, %v22720_v8 }
  0x84   : > { %16337 = vst.msk [vmem:[#allocation5 + $0x170] sm:$0xff] %vm920_vm0, %v22720_v8  ;;  %16339 = vst.msk [vmem:[#allocation5 + $0x180] sm:$0xff] %vm920_vm0, %v22720_v8 }
  0x85   : > { %16340 = vst.msk [vmem:[#allocation5 + $0x188] sm:$0xff] %vm920_vm0, %v22720_v8  ;;  %16341 = vst.msk [vmem:[#allocation5 + $0x190] sm:$0xff] %vm920_vm0, %v22720_v8 }
  0x86   : > { %16343 = vst.msk [vmem:[#allocation5 + $0x1a0] sm:$0xff] %vm920_vm0, %v22720_v8  ;;  %16344 = vst.msk [vmem:[#allocation5 + $0x1a8] sm:$0xff] %vm920_vm0, %v22720_v8 }
  0x87   : > { %1106 = vmatmul.mubr.bf16.gmra.mrb[36].mxu1 %v22434_v52  ;;  %16345 = vst.msk [vmem:[#allocation5 + $0x1b0] sm:$0xff] %vm920_vm0, %v22720_v8  ;;  %16347 = vst.msk [vmem:[#allocation5 + $0x1c0] sm:$0xff] %vm920_vm0, %v22720_v8 }
  0x88   : > { %17557 = vmatprep.mubr.msk.bf16.mxu1 %vm920_vm0, %v22436_v53  ;;  %16348 = vst.msk [vmem:[#allocation5 + $0x1c8] sm:$0xff] %vm920_vm0, %v22720_v8  ;;  %16349 = vst.msk [vmem:[#allocation5 + $0x1d0] sm:$0xff] %vm920_vm0, %v22720_v8 }
  0x89   : > { %16351 = vst.msk [vmem:[#allocation5 + $0x1e0] sm:$0xff] %vm920_vm0, %v22720_v8  ;;  %16352 = vst.msk [vmem:[#allocation5 + $0x1e8] sm:$0xff] %vm920_vm0, %v22720_v8 }
  0x8a   : > { %16353 = vst.msk [vmem:[#allocation5 + $0x1f0] sm:$0xff] %vm920_vm0, %v22720_v8  ;;  %16355 = vst.msk [vmem:[#allocation5 + $0x200] sm:$0xff] %vm920_vm0, %v22720_v8 }
  0x8b   : > { %16356 = vst.msk [vmem:[#allocation5 + $0x208] sm:$0xff] %vm920_vm0, %v22720_v8  ;;  %16357 = vst.msk [vmem:[#allocation5 + $0x210] sm:$0xff] %vm920_vm0, %v22720_v8 }
  0x8c   : > { %16359 = vst.msk [vmem:[#allocation5 + $0x220] sm:$0xff] %vm920_vm0, %v22720_v8  ;;  %16360 = vst.msk [vmem:[#allocation5 + $0x228] sm:$0xff] %vm920_vm0, %v22720_v8 }
  0x8d   : > { %16361 = vst.msk [vmem:[#allocation5 + $0x230] sm:$0xff] %vm920_vm0, %v22720_v8  ;;  %16363 = vst.msk [vmem:[#allocation5 + $0x240] sm:$0xff] %vm920_vm0, %v22720_v8 }
  0x8e   : > { %16364 = vst.msk [vmem:[#allocation5 + $0x248] sm:$0xff] %vm920_vm0, %v22720_v8  ;;  %16365 = vst.msk [vmem:[#allocation5 + $0x250] sm:$0xff] %vm920_vm0, %v22720_v8 }
  0x8f   : > { %1114 = vmatmul.mubr.bf16.gmra.mrb[40].mxu1 %v22438_v54  ;;  %16367 = vst.msk [vmem:[#allocation5 + $0x260] sm:$0xff] %vm920_vm0, %v22720_v8  ;;  %16368 = vst.msk [vmem:[#allocation5 + $0x268] sm:$0xff] %vm920_vm0, %v22720_v8  ;;  %v22658_v54 = vld [vmem:[%s22852_s28 + $0x10] ss:$8 sps:$4 sm:$0xff]  }
  0x90   : > { %17558 = vmatprep.mubr.msk.bf16.mxu1 %vm920_vm0, %v22440_v55  ;;  %16369 = vst.msk [vmem:[#allocation5 + $0x270] sm:$0xff] %vm920_vm0, %v22720_v8  ;;  %16371 = vst.msk [vmem:[#allocation5 + $0x280] sm:$0xff] %vm920_vm0, %v22720_v8  ;;  %v22659_v55 = vld [vmem:[%s22852_s28 + $0x24] ss:$8 sps:$4 sm:$0xff]  }
  0x91   : > { %16372 = vst.msk [vmem:[#allocation5 + $0x288] sm:$0xff] %vm920_vm0, %v22720_v8  ;;  %16373 = vst.msk [vmem:[#allocation5 + $0x290] sm:$0xff] %vm920_vm0, %v22720_v8 }
  0x92   : > { %16375 = vst.msk [vmem:[#allocation5 + $0x2a0] sm:$0xff] %vm920_vm0, %v22720_v8  ;;  %16376 = vst.msk [vmem:[#allocation5 + $0x2a8] sm:$0xff] %vm920_vm0, %v22720_v8 }
  0x93   : > { %16377 = vst.msk [vmem:[#allocation5 + $0x2b0] sm:$0xff] %vm920_vm0, %v22720_v8  ;;  %16379 = vst.msk [vmem:[#allocation5 + $0x2c0] sm:$0xff] %vm920_vm0, %v22720_v8 }
  0x94   : > { %16380 = vst.msk [vmem:[#allocation5 + $0x2c8] sm:$0xff] %vm920_vm0, %v22720_v8  ;;  %16381 = vst.msk [vmem:[#allocation5 + $0x2d0] sm:$0xff] %vm920_vm0, %v22720_v8 }
  0x95   : > { %16383 = vst.msk [vmem:[#allocation5 + $0x2e0] sm:$0xff] %vm920_vm0, %v22720_v8  ;;  %16384 = vst.msk [vmem:[#allocation5 + $0x2e8] sm:$0xff] %vm920_vm0, %v22720_v8 }
  0x96   : > { %16385 = vst.msk [vmem:[#allocation5 + $0x2f0] sm:$0xff] %vm920_vm0, %v22720_v8  ;;  %16387 = vst.msk [vmem:[#allocation5 + $0x300] sm:$0xff] %vm920_vm0, %v22720_v8 }
  0x97   : > { %1122 = vmatmul.mubr.bf16.gmra.mrb[44].mxu1 %v22442_v56  ;;  %16388 = vst.msk [vmem:[#allocation5 + $0x308] sm:$0xff] %vm920_vm0, %v22720_v8  ;;  %16389 = vst.msk [vmem:[#allocation5 + $0x310] sm:$0xff] %vm920_vm0, %v22720_v8 }
  0x98   : > { %17572 = vmatprep.mubr.msk.bf16.mxu1 %vm920_vm0, %v22900_v14  ;;  %1520 = vst.msk [vmem:[#allocation2 + $0xd8] sm:$0x3] %vm1495_vm3, %v22720_v8  ;;  %1524 = vst.msk [vmem:[#allocation2 + $0xf8] sm:$0x3] %vm1495_vm3, %v22720_v8  ;;  %v1686_v14 = vld [vmem:[#allocation2 + $0xcf] sm:$0xff] }
  0x99   : > { %1528 = vst.msk [vmem:[#allocation2 + $0x118] sm:$0x3] %vm1495_vm3, %v22720_v8  ;;  %1532 = vst.msk [vmem:[#allocation2 + $0x138] sm:$0x3] %vm1495_vm3, %v22720_v8  ;;  %v1723_v16 = vpack.c.bf16 %v1686_v14, %v1685_v13 }
  0x9a   : > { %1536 = vst.msk [vmem:[#allocation2 + $0x158] sm:$0x3] %vm1495_vm3, %v22720_v8  ;;  %1540 = vst.msk [vmem:[#allocation2 + $0x178] sm:$0x3] %vm1495_vm3, %v22720_v8 }
  0x9b   : > { %1544 = vst.msk [vmem:[#allocation2 + $0x198] sm:$0x3] %vm1495_vm3, %v22720_v8  ;;  %1548 = vst.msk [vmem:[#allocation2 + $0x1b8] sm:$0x3] %vm1495_vm3, %v22720_v8  ;;  %19368 = vmatprep.mubr.msk.bf16.mxu0 %vm1491_vm2, %v1723_v16  ;;  %v22662_v16 = vld [vmem:[%s22852_s28 + $0x30] ss:$8 sps:$4 sm:$0xff]  }
  0x9c   : > { %1552 = vst.msk [vmem:[#allocation2 + $0x1d8] sm:$0x3] %vm1495_vm3, %v22720_v8  ;;  %1556 = vst.msk [vmem:[#allocation2 + $0x1f8] sm:$0x3] %vm1495_vm3, %v22720_v8 }
  0x9d   : > { %1560 = vst.msk [vmem:[#allocation2 + $0x218] sm:$0x3] %vm1495_vm3, %v22720_v8  ;;  %1564 = vst.msk [vmem:[#allocation2 + $0x238] sm:$0x3] %vm1495_vm3, %v22720_v8 }
  0x9e   : > { %1568 = vst.msk [vmem:[#allocation2 + $0x258] sm:$0x3] %vm1495_vm3, %v22720_v8  ;;  %1572 = vst.msk [vmem:[#allocation2 + $0x278] sm:$0x3] %vm1495_vm3, %v22720_v8 }
  0x9f   : > { %1331 = vmatmul.mubr.bf16.vlgmr.msra.gmra.mrb[48].mxu1 %v22920_v19  ;;  %1576 = vst.msk [vmem:[#allocation2 + $0x298] sm:$0x3] %vm1495_vm3, %v22720_v8  ;;  %1580 = vst.msk [vmem:[#allocation2 + $0x2b8] sm:$0x3] %vm1495_vm3, %v22720_v8  ;;  %v23658_v19 = vld [vmem:[%s22852_s28 + $0xd4] ss:$8 sps:$4 sm:$0xff]  }
  0xa0   : > { %9602 = vmatpush1.bf16.msra.mxu1 %v22447_v57  ;;  %17573 = vmatprep.mubr.msk.bf16.mxu1 %vm920_vm0, %v22924_v20  ;;  %1584 = vst.msk [vmem:[#allocation2 + $0x2d8] sm:$0x3] %vm1495_vm3, %v22720_v8  ;;  %1588 = vst.msk [vmem:[#allocation2 + $0x2f8] sm:$0x3] %vm1495_vm3, %v22720_v8 }
  0xa1   : > { %9603 = vmatprep.subr.bf16.mxu1 %v22719_v1  ;;  %1592 = vst.msk [vmem:[#allocation2 + $0x318] sm:$0x3] %vm1495_vm3, %v22720_v8  ;;  %1596 = vst.msk [vmem:[#allocation2 + $0x338] sm:$0x3] %vm1495_vm3, %v22720_v8 }
  0xa2   : > { %9826 = vst.msk [vmem:[#allocation3 + $0xf8] sm:$0x1] %vm9797_vm4, %v22720_v8  ;;  %9830 = vst.msk [vmem:[#allocation3 + $0x118] sm:$0x1] %vm9797_vm4, %v22720_v8 }
  0xa3   : > { %9834 = vst.msk [vmem:[#allocation3 + $0x138] sm:$0x1] %vm9797_vm4, %v22720_v8  ;;  %9838 = vst.msk [vmem:[#allocation3 + $0x158] sm:$0x1] %vm9797_vm4, %v22720_v8 }
  0xa4   : > { %9604 = vmatpush1.bf16.msra.mxu1 %v22451_v58  ;;  %9842 = vst.msk [vmem:[#allocation3 + $0x178] sm:$0x1] %vm9797_vm4, %v22720_v8  ;;  %9846 = vst.msk [vmem:[#allocation3 + $0x198] sm:$0x1] %vm9797_vm4, %v22720_v8 }
  0xa5   : > { %9605 = vmatprep.subr.bf16.mxu1 %v22719_v1  ;;  %9850 = vst.msk [vmem:[#allocation3 + $0x1b8] sm:$0x1] %vm9797_vm4, %v22720_v8  ;;  %9854 = vst.msk [vmem:[#allocation3 + $0x1d8] sm:$0x1] %vm9797_vm4, %v22720_v8 }
  0xa6   : > { %9858 = vst.msk [vmem:[#allocation3 + $0x1f8] sm:$0x1] %vm9797_vm4, %v22720_v8  ;;  %9862 = vst.msk [vmem:[#allocation3 + $0x218] sm:$0x1] %vm9797_vm4, %v22720_v8 }
  0xa7   : > { %1339 = vmatmul.mubr.bf16.gmra.mrb[52].mxu1 %v22943_v24  ;;  %v23680_v24 = vld [vmem:[%s26416_s21] ss:$0 sm:$0xff]  ;;  %9866 = vst.msk [vmem:[#allocation3 + $0x238] sm:$0x1] %vm9797_vm4, %v22720_v8  ;;  %9870 = vst.msk [vmem:[#allocation3 + $0x258] sm:$0x1] %vm9797_vm4, %v22720_v8 }
  0xa8   : > { %17574 = vmatprep.mubr.msk.bf16.mxu1 %vm920_vm0, %v22950_v26  ;;  %9606 = vmatpush1.bf16.msra.mxu1 %v22457_v59  ;;  %9874 = vst.msk [vmem:[#allocation3 + $0x278] sm:$0x1] %vm9797_vm4, %v22720_v8  ;;  %9878 = vst.msk [vmem:[#allocation3 + $0x298] sm:$0x1] %vm9797_vm4, %v22720_v8 }
  0xa9   : > { %9607 = vmatprep.subr.bf16.mxu1 %v22719_v1  ;;  %9882 = vst.msk [vmem:[#allocation3 + $0x2b8] sm:$0x1] %vm9797_vm4, %v22720_v8  ;;  %9886 = vst.msk [vmem:[#allocation3 + $0x2d8] sm:$0x1] %vm9797_vm4, %v22720_v8 }
  0xaa   : > { %9890 = vst.msk [vmem:[#allocation3 + $0x2f8] sm:$0x1] %vm9797_vm4, %v22720_v8  ;;  %9894 = vst.msk [vmem:[#allocation3 + $0x318] sm:$0x1] %vm9797_vm4, %v22720_v8 }
  0xab   : > { %16322 = vst.msk [vmem:[#allocation5 + $0xf8] sm:$0x1] %vm9797_vm4, %v22720_v8  ;;  %16326 = vst.msk [vmem:[#allocation5 + $0x118] sm:$0x1] %vm9797_vm4, %v22720_v8 }
  0xac   : > { %9608 = vmatpush1.bf16.msra.mxu1 %v22459_v60  ;;  %16330 = vst.msk [vmem:[#allocation5 + $0x138] sm:$0x1] %vm9797_vm4, %v22720_v8  ;;  %16334 = vst.msk [vmem:[#allocation5 + $0x158] sm:$0x1] %vm9797_vm4, %v22720_v8 }
  0xad   : > { %9609 = vmatprep.subr.bf16.mxu1 %v22719_v1  ;;  %16338 = vst.msk [vmem:[#allocation5 + $0x178] sm:$0x1] %vm9797_vm4, %v22720_v8  ;;  %16342 = vst.msk [vmem:[#allocation5 + $0x198] sm:$0x1] %vm9797_vm4, %v22720_v8 }
  0xae   : > { %16346 = vst.msk [vmem:[#allocation5 + $0x1b8] sm:$0x1] %vm9797_vm4, %v22720_v8  ;;  %16350 = vst.msk [vmem:[#allocation5 + $0x1d8] sm:$0x1] %vm9797_vm4, %v22720_v8 }
  0xaf   : > { %1347 = vmatmul.mubr.bf16.gmra.mrb[56].mxu1 %v22969_v30  ;;  %16354 = vst.msk [vmem:[#allocation5 + $0x1f8] sm:$0x1] %vm9797_vm4, %v22720_v8  ;;  %16358 = vst.msk [vmem:[#allocation5 + $0x218] sm:$0x1] %vm9797_vm4, %v22720_v8 }
  0xb0   : > { %17575 = vmatprep.mubr.msk.bf16.mxu1 %vm920_vm0, %v22978_v32  ;;  %9610 = vmatpush1.bf16.msra.mxu1 %v22460_v61  ;;  %16362 = vst.msk [vmem:[#allocation5 + $0x238] sm:$0x1] %vm9797_vm4, %v22720_v8  ;;  %16366 = vst.msk [vmem:[#allocation5 + $0x258] sm:$0x1] %vm9797_vm4, %v22720_v8 }
  0xb1   : > { %9611 = vmatprep.subr.bf16.mxu1 %v22719_v1  ;;  %16370 = vst.msk [vmem:[#allocation5 + $0x278] sm:$0x1] %vm9797_vm4, %v22720_v8  ;;  %16374 = vst.msk [vmem:[#allocation5 + $0x298] sm:$0x1] %vm9797_vm4, %v22720_v8 }
  0xb2   : > { %16378 = vst.msk [vmem:[#allocation5 + $0x2b8] sm:$0x1] %vm9797_vm4, %v22720_v8  ;;  %16382 = vst.msk [vmem:[#allocation5 + $0x2d8] sm:$0x1] %vm9797_vm4, %v22720_v8 }
  0xb3   : > { %16386 = vst.msk [vmem:[#allocation5 + $0x2f8] sm:$0x1] %vm9797_vm4, %v22720_v8  ;;  %16390 = vst.msk [vmem:[#allocation5 + $0x318] sm:$0x1] %vm9797_vm4, %v22720_v8 }
  0xb4   : > { %9612 = vmatpush1.bf16.msra.mxu1 %v22461_v62  ;;  %12858 = vst.msk [vmem:[#allocation4 + $0xf8] sm:$0x1] %vm12829_vm5, %v22720_v8  ;;  %12862 = vst.msk [vmem:[#allocation4 + $0x118] sm:$0x1] %vm12829_vm5, %v22720_v8 }
  0xb5   : > { %9613 = vmatprep.subr.bf16.mxu1 %v22719_v1  ;;  %12866 = vst.msk [vmem:[#allocation4 + $0x138] sm:$0x1] %vm12829_vm5, %v22720_v8  ;;  %12870 = vst.msk [vmem:[#allocation4 + $0x158] sm:$0x1] %vm12829_vm5, %v22720_v8 }
  0xb6   : > { %12874 = vst.msk [vmem:[#allocation4 + $0x178] sm:$0x1] %vm12829_vm5, %v22720_v8  ;;  %12878 = vst.msk [vmem:[#allocation4 + $0x198] sm:$0x1] %vm12829_vm5, %v22720_v8 }
  0xb7   : > { %1355 = vmatmul.mubr.bf16.gmra.mrb[60].mxu1 %v22995_v36  ;;  %12882 = vst.msk [vmem:[#allocation4 + $0x1b8] sm:$0x1] %vm12829_vm5, %v22720_v8  ;;  %12886 = vst.msk [vmem:[#allocation4 + $0x1d8] sm:$0x1] %vm12829_vm5, %v22720_v8 }
  0xb8   : > { %17576 = vmatprep.mubr.msk.bf16.mxu1 %vm920_vm0, %v23105_v2  ;;  %9614 = vmatpush1.bf16.msra.mxu1 %v22462_v63  ;;  %12890 = vst.msk [vmem:[#allocation4 + $0x1f8] sm:$0x1] %vm12829_vm5, %v22720_v8  ;;  %12894 = vst.msk [vmem:[#allocation4 + $0x218] sm:$0x1] %vm12829_vm5, %v22720_v8 }
  0xb9   : > { %9615 = vmatprep.subr.bf16.mxu1 %v22719_v1  ;;  %12898 = vst.msk [vmem:[#allocation4 + $0x238] sm:$0x1] %vm12829_vm5, %v22720_v8  ;;  %12902 = vst.msk [vmem:[#allocation4 + $0x258] sm:$0x1] %vm12829_vm5, %v22720_v8 }
  0xba   : > { %12906 = vst.msk [vmem:[#allocation4 + $0x278] sm:$0x1] %vm12829_vm5, %v22720_v8  ;;  %12910 = vst.msk [vmem:[#allocation4 + $0x298] sm:$0x1] %vm12829_vm5, %v22720_v8 }
  0xbb   : > { %12914 = vst.msk [vmem:[#allocation4 + $0x2b8] sm:$0x1] %vm12829_vm5, %v22720_v8  ;;  %12918 = vst.msk [vmem:[#allocation4 + $0x2d8] sm:$0x1] %vm12829_vm5, %v22720_v8 }
  0xbc   : > { %9616 = vmatpush1.bf16.msra.mxu1 %v22463_v0  ;;  %v22660_v0 = vld [vmem:[%s22852_s28 + $0x20] ss:$8 sps:$4 sm:$0xff]   ;;  %12922 = vst.msk [vmem:[#allocation4 + $0x2f8] sm:$0x1] %vm12829_vm5, %v22720_v8  ;;  %12926 = vst.msk [vmem:[#allocation4 + $0x318] sm:$0x1] %vm12829_vm5, %v22720_v8 }
  0xbd   : > { %9617 = vmatprep.subr.bf16.mxu1 %v22719_v1 }
  0xbf   : > { %1363 = vmatmul.mubr.bf16.gmra.mrb[64].mxu1 %v22907_v15  ;;  %v23654_v15 = vld [vmem:[%s22852_s28 + $0xc0] ss:$8 sps:$4 sm:$0xff]  }
  0xc0   : > { %17577 = vmatprep.mubr.msk.bf16.mxu1 %vm920_vm0, %v22913_v17  ;;  %9618 = vmatpush1.bf16.msra.mxu1 %v22464_v3  ;;  %v1687_v17 = vld [vmem:[#allocation2 + $0xe7] sm:$0xff]  ;;  %v22661_v3 = vld [vmem:[%s22852_s28 + $0x34] ss:$8 sps:$4 sm:$0xff]  }
  0xc1   : > { %9619 = vmatprep.subr.bf16.mxu1 %v22719_v1  ;;  %v1724_v20 = vpack.c.bf16 %v1688_v18, %v1687_v17  ;;  %v22471_v17 = vld [vmem:[%s26391_s5] sm:$0xff]  }
  0xc2   : > { %19400 = vmatprep.subr.bf16.mxu0 %v22471_v17 }
  0xc3   : > { %19369 = vmatmul.mubr.msk.bf16.vlgmr.msra.gmra.mrb[16].mxu0 %vm1491_vm2, %v1724_v20 }
  0xc4   : > { %9620 = vmatpush1.bf16.msra.mxu1 %v22465_v4  ;;  %19401 = vmatpush3.bf16.msra.mxu0 %v22471_v17  ;;  %v22474_v17 = vld [vmem:[%s26395_s9 + $0x28] sm:$0xff]  }
  0xc5   : > { %9621 = vmatprep.subr.bf16.mxu1 %v22719_v1 }
  0xc7   : > { %1371 = vmatmul.mubr.bf16.gmra.mrb[68].mxu1 %v22929_v21  ;;  %v23665_v21 = vld [vmem:[%s22852_s28 + $0xd0] ss:$8 sps:$4 sm:$0xff]  }
  0xc8   : > { %17578 = vmatprep.mubr.msk.bf16.mxu1 %vm920_vm0, %v22934_v22  ;;  %9622 = vmatpush1.bf16.msra.mxu1 %v22466_v5  ;;  %v23669_v22 = vld [vmem:[%s22852_s28 + $0xe4] ss:$8 sps:$4 sm:$0xff]  }
  0xc9   : > { %9623 = vmatprep.subr.bf16.mxu1 %v22719_v1 }
  0xcc   : > { %9624 = vmatpush1.bf16.msra.mxu1 %v22467_v6 }
  0xcf   : > { %1379 = vmatmul.mubr.bf16.gmra.mrb[72].mxu1 %v22955_v27 }
  0xd0   : > { %17579 = vmatprep.mubr.msk.bf16.mxu1 %vm920_vm0, %v22960_v28 }
  0xd7   : > { %1387 = vmatmul.mubr.bf16.gmra.mrb[76].mxu1 %v22981_v33 }
  0xd8   : > { %17580 = vmatprep.mubr.msk.bf16.mxu1 %vm920_vm0, %v22986_v34  ;;  %v23698_v34 = vld [vmem:[%s22852_s28 + $0xf0] ss:$8 sps:$4 sm:$0xff]  }
  0xdf   : > { %1395 = vmatmul.mubr.bf16.gmra.mrb[80].mxu1 %v23004_v38 }
  0xe0   : > { %17581 = vmatprep.mubr.msk.bf16.mxu1 %vm920_vm0, %v23009_v39 }
  0xe7   : > { %1403 = vmatmul.mubr.bf16.gmra.mrb[84].mxu1 %v23022_v42 }
  0xe8   : > { %17582 = vmatprep.mubr.msk.bf16.mxu1 %vm920_vm0, %v23026_v43 }
  0xef   : > { %1411 = vmatmul.mubr.bf16.gmra.mrb[88].mxu1 %v23039_v46 }
  0xf0   : > { %17583 = vmatprep.mubr.msk.bf16.mxu1 %vm920_vm0, %v23043_v47 }
  0xf7   : > { %1419 = vmatmul.mubr.bf16.gmra.mrb[92].mxu1 %v23598_v9 }
  0xf8   : > { %17584 = vmatprep.mubr.msk.bf16.mxu1 %vm920_vm0, %v23603_v10 }
  0xff   : > { %1427 = vmatmul.mubr.bf16.gmra.mrb[96].mxu1 %v23654_v15 }
 0x100   : > { %17585 = vmatprep.mubr.msk.bf16.mxu1 %vm920_vm0, %v23658_v19 }
 0x107   : > { %1435 = vmatmul.mubr.bf16.gmra.mrb[100].mxu1 %v23665_v21 }
 0x108   : > { %17586 = vmatprep.mubr.msk.bf16.mxu1 %vm920_vm0, %v23669_v22 }
 0x10f   : > { %1443 = vmatmul.mubr.bf16.gmra.mrb[104].mxu1 %v23674_v23 }
 0x110   : > { %17587 = vmatprep.mubr.msk.bf16.mxu1 %vm920_vm0, %v23683_v25 }
 0x112   : > { %v1035_v26 = vpop.f32.mrb[0].mxu1 }
 0x113   : > { %v1036_v27 = vadd.f32 %v23680_v24, %v1035_v26  ;;  %v1037_v28 = vpop.f32.mrb[1].mxu1 }
 0x114   : > { %v1038_v29 = vpop.f32.mrb[2].mxu1 }
 0x115   : > { %v1138_v30 = vmax.f32 %v1036_v27, 0.0  ;;  %v1039_v31 = vadd.f32 %v23680_v24, %v1038_v29  ;;  %v1040_v32 = vpop.f32.mrb[3].mxu1 }
 0x116   : > { %v22472_v32 = vld [vmem:[%s26395_s9 + $0x20] sm:$0xff]  }
 0x117   : > { %1171 = vst.msk [vmem:[%s23692_s23 + $0x40] sm:$0xff] %vm1162_vm1, %v1138_v30  ;;  %v1139_v33 = vmax.f32 %v1039_v31, 0.0  ;;  %1451 = vmatmul.mubr.bf16.gmra.mrb[108].mxu1 %v23698_v34  ;;  %v22663_v31 = vld [vmem:[%s22852_s28 + $0x40] ss:$8 sps:$4 sm:$0xff]   ;;  %20312 = vmatprep.subr.bf16.mxu1 %v22472_v32 }
 0x118   : > { %18077 = vmatprep.mubr.msk.bf16.mxu1 %vm920_vm0, %v22655_v35 }
 0x119   : > { %1172 = vst.msk [vmem:[%s23692_s23 + $0x48] sm:$0xff] %vm1162_vm1, %v1139_v33  ;;  %v22664_v33 = vld [vmem:[%s22852_s28 + $0x54] ss:$8 sps:$4 sm:$0xff]  }
 0x11a   : > { %v1043_v36 = vpop.f32.mrb[4].mxu1 }
 0x11b   : > { %v1044_v37 = vadd.f32 %v23680_v24, %v1043_v36  ;;  %v1045_v38 = vpop.f32.mrb[5].mxu1 }
 0x11c   : > { %v1046_v39 = vpop.f32.mrb[6].mxu1 }
 0x11d   : > { %v1140_v40 = vmax.f32 %v1044_v37, 0.0  ;;  %v1047_v41 = vadd.f32 %v23680_v24, %v1046_v39  ;;  %v1048_v42 = vpop.f32.mrb[7].mxu1 }
 0x11f   : > { %1173 = vst.msk [vmem:[%s23692_s23 + $0x50] sm:$0xff] %vm1162_vm1, %v1140_v40  ;;  %v1141_v43 = vmax.f32 %v1047_v41, 0.0  ;;  %9634 = vmatmul.mubr.bf16.vlgmr.msra.gmra.mrb[112].mxu1 %v22656_v44  ;;  %v22666_v44 = vld [vmem:[%s22852_s28 + $0x64] ss:$8 sps:$4 sm:$0xff]  }
 0x120   : > { %18078 = vmatprep.mubr.msk.bf16.mxu1 %vm920_vm0, %v22657_v45  ;;  %20313 = vmatpush3.bf16.msra.mxu1 %v22472_v32 }
 0x121   : > { %1174 = vst.msk [vmem:[%s23692_s23 + $0x58] sm:$0xff] %vm1162_vm1, %v1141_v43  ;;  %v22665_v43 = vld [vmem:[%s22852_s28 + $0x50] ss:$8 sps:$4 sm:$0xff]   ;;  %20314 = vmatprep.subr.bf16.mxu1 %v22474_v17 }
 0x122   : > { %v1051_v46 = vpop.f32.mrb[8].mxu1 }
 0x123   : > { %v1052_v47 = vadd.f32 %v23680_v24, %v1051_v46  ;;  %v1053_v48 = vpop.f32.mrb[9].mxu1 }
 0x124   : > { %v1054_v49 = vpop.f32.mrb[10].mxu1  ;;  %20315 = vmatpush3.bf16.msra.mxu1 %v22474_v17 }
 0x125   : > { %v1142_v50 = vmax.f32 %v1052_v47, 0.0  ;;  %v1055_v51 = vadd.f32 %v23680_v24, %v1054_v49  ;;  %v1056_v52 = vpop.f32.mrb[11].mxu1 }
 0x127   : > { %1175 = vst.msk [vmem:[%s23692_s23 + $0x60] sm:$0xff] %vm1162_vm1, %v1142_v50  ;;  %v1143_v53 = vmax.f32 %v1055_v51, 0.0  ;;  %9642 = vmatmul.mubr.bf16.gmra.mrb[116].mxu1 %v22658_v54  ;;  %v22473_v54 = vld [vmem:[%s26391_s5 + $0x8] sm:$0xff]  }
 0x128   : > { %18079 = vmatprep.mubr.msk.bf16.mxu1 %vm920_vm0, %v22659_v55  ;;  %v22668_v55 = vld [vmem:[%s22852_s28 + $0x74] ss:$8 sps:$4 sm:$0xff]   ;;  %19402 = vmatprep.subr.bf16.mxu0 %v22473_v54 }
 0x129   : > { %1176 = vst.msk [vmem:[%s23692_s23 + $0x68] sm:$0xff] %vm1162_vm1, %v1143_v53  ;;  %v22667_v53 = vld [vmem:[%s22852_s28 + $0x60] ss:$8 sps:$4 sm:$0xff]   ;;  %19403 = vmatpush3.bf16.msra.mxu0 %v22473_v54 }
 0x12a   : > { %v1059_v56 = vpop.f32.mrb[12].mxu1 }
 0x12b   : > { %v1060_v57 = vadd.f32 %v23680_v24, %v1059_v56  ;;  %v1061_v58 = vpop.f32.mrb[13].mxu1 }
 0x12c   : > { %v1062_v59 = vpop.f32.mrb[14].mxu1 }
 0x12d   : > { %v1144_v60 = vmax.f32 %v1060_v57, 0.0  ;;  %v1063_v61 = vadd.f32 %v23680_v24, %v1062_v59  ;;  %v1064_v62 = vpop.f32.mrb[15].mxu1 }
 0x12f   : > { %1177 = vst.msk [vmem:[%s23692_s23 + $0x70] sm:$0xff] %vm1162_vm1, %v1144_v60  ;;  %v1145_v63 = vmax.f32 %v1063_v61, 0.0  ;;  %9650 = vmatmul.mubr.bf16.gmra.mrb[120].mxu1 %v22660_v0  ;;  %v22669_v0 = vld [vmem:[%s22852_s28 + $0x70] ss:$8 sps:$4 sm:$0xff]  }
 0x130   : > { %18080 = vmatprep.mubr.msk.bf16.mxu1 %vm920_vm0, %v22661_v3  ;;  %v22670_v3 = vld [vmem:[%s22852_s28 + $0x84] ss:$8 sps:$4 sm:$0xff]  }
 0x131   : > { %1178 = vst.msk [vmem:[%s23692_s23 + $0x78] sm:$0xff] %vm1162_vm1, %v1145_v63 }
 0x132   : > { %v1067_v4 = vpop.f32.mrb[16].mxu1 }
 0x133   : > { %v1068_v5 = vadd.f32 %v23680_v24, %v1067_v4  ;;  %v1069_v6 = vpop.f32.mrb[17].mxu1 }
 0x134   : > { %v1070_v7 = vpop.f32.mrb[18].mxu1 }
 0x135   : > { %v1146_v11 = vmax.f32 %v1068_v5, 0.0  ;;  %v1071_v12 = vadd.f32 %v23680_v24, %v1070_v7  ;;  %v1072_v13 = vpop.f32.mrb[19].mxu1 }
 0x137   : > { %1179 = vst.msk [vmem:[%s23692_s23 + $0x80] sm:$0xff] %vm1162_vm1, %v1146_v11  ;;  %v1147_v14 = vmax.f32 %v1071_v12, 0.0  ;;  %9658 = vmatmul.mubr.bf16.gmra.mrb[124].mxu1 %v22662_v16  ;;  %v22671_v16 = vld [vmem:[%s22852_s28 + $0x80] ss:$8 sps:$4 sm:$0xff]  }
 0x138   : > { %18081 = vmatprep.mubr.msk.bf16.mxu1 %vm920_vm0, %v23105_v2 }
 0x139   : > { %1180 = vst.msk [vmem:[%s23692_s23 + $0x88] sm:$0xff] %vm1162_vm1, %v1147_v14 }
 0x13a   : > { %v1075_v18 = vpop.f32.mrb[20].mxu1 }
 0x13b   : > { %v1076_v20 = vadd.f32 %v23680_v24, %v1075_v18  ;;  %v1077_v26 = vpop.f32.mrb[21].mxu1  ;;  %v22672_v18 = vld [vmem:[%s22852_s28 + $0x94] ss:$8 sps:$4 sm:$0xff]  }
 0x13c   : > { %v1078_v27 = vpop.f32.mrb[22].mxu1 }
 0x13d   : > { %v1148_v28 = vmax.f32 %v1076_v20, 0.0  ;;  %v1079_v29 = vadd.f32 %v23680_v24, %v1078_v27  ;;  %v1080_v30 = vpop.f32.mrb[23].mxu1  ;;  %v22475_v20 = vld [vmem:[%s26391_s5 + $0x10] sm:$0xff]  }
 0x13e   : > { %19404 = vmatprep.subr.bf16.mxu0 %v22475_v20 }
 0x13f   : > { %1181 = vst.msk [vmem:[%s23692_s23 + $0x90] sm:$0xff] %vm1162_vm1, %v1148_v28  ;;  %v1149_v2 = vmax.f32 %v1079_v29, 0.0  ;;  %9666 = vmatmul.mubr.bf16.gmra.mrb[128].mxu1 %v22663_v31  ;;  %19405 = vmatpush3.bf16.msra.mxu0 %v22475_v20 }
 0x140   : > { %18082 = vmatprep.mubr.msk.bf16.mxu1 %vm920_vm0, %v22664_v33  ;;  %v22673_v33 = vld [vmem:[%s22852_s28 + $0x90] ss:$8 sps:$4 sm:$0xff]  }
 0x141   : > { %1182 = vst.msk [vmem:[%s23692_s23 + $0x98] sm:$0xff] %vm1162_vm1, %v1149_v2 }
 0x142   : > { %v1083_v35 = vpop.f32.mrb[24].mxu1 }
 0x143   : > { %v1084_v36 = vadd.f32 %v23680_v24, %v1083_v35  ;;  %v1085_v37 = vpop.f32.mrb[25].mxu1  ;;  %v22674_v35 = vld [vmem:[%s22852_s28 + $0xa4] ss:$8 sps:$4 sm:$0xff]  }
 0x144   : > { %v1086_v38 = vpop.f32.mrb[26].mxu1 }
 0x145   : > { %v1150_v39 = vmax.f32 %v1084_v36, 0.0  ;;  %v1087_v40 = vadd.f32 %v23680_v24, %v1086_v38  ;;  %v1088_v41 = vpop.f32.mrb[27].mxu1 }
 0x147   : > { %1183 = vst.msk [vmem:[%s23692_s23 + $0xa0] sm:$0xff] %vm1162_vm1, %v1150_v39  ;;  %v1151_v42 = vmax.f32 %v1087_v40, 0.0  ;;  %9674 = vmatmul.mubr.bf16.gmra.mrb[132].mxu1 %v22665_v43 }
 0x148   : > { %18083 = vmatprep.mubr.msk.bf16.mxu1 %vm920_vm0, %v22666_v44  ;;  %v22675_v44 = vld [vmem:[%s22852_s28 + $0xa0] ss:$8 sps:$4 sm:$0xff]  }
 0x149   : > { %1184 = vst.msk [vmem:[%s23692_s23 + $0xa8] sm:$0xff] %vm1162_vm1, %v1151_v42 }
 0x14a   : > { %v1091_v45 = vpop.f32.mrb[28].mxu1 }
 0x14b   : > { %v1092_v46 = vadd.f32 %v23680_v24, %v1091_v45  ;;  %v1093_v47 = vpop.f32.mrb[29].mxu1  ;;  %v23818_v45 = vld [vmem:[%s26390_s4] ss:$0 sm:$0xff] }
 0x14c   : > { %v1094_v48 = vpop.f32.mrb[30].mxu1 }
 0x14d   : > { %v1152_v49 = vmax.f32 %v1092_v46, 0.0  ;;  %v1095_v50 = vadd.f32 %v23680_v24, %v1094_v48  ;;  %v1096_v51 = vpop.f32.mrb[31].mxu1  ;;  %v22676_v46 = vld [vmem:[%s22852_s28 + $0xb4] ss:$8 sps:$4 sm:$0xff]  }
 0x14f   : > { %1185 = vst.msk [vmem:[%s23692_s23 + $0xb0] sm:$0xff] %vm1162_vm1, %v1152_v49  ;;  %v1153_v52 = vmax.f32 %v1095_v50, 0.0  ;;  %9682 = vmatmul.mubr.bf16.gmra.mrb[136].mxu1 %v22667_v53 }
 0x150   : > { %18084 = vmatprep.mubr.msk.bf16.mxu1 %vm920_vm0, %v22668_v55  ;;  %v23834_v55 = vld [vmem:[%s26391_s5 + $0x30] sm:$0xff]  }
 0x151   : > { %1186 = vst.msk [vmem:[%s23692_s23 + $0xb8] sm:$0xff] %vm1162_vm1, %v1153_v52  ;;  %19438 = vmatprep.subr.bf16.mxu0 %v23834_v55 }
 0x152   : > { %v1099_v56 = vpop.f32.mrb[32].mxu1 }
 0x153   : > { %v1100_v57 = vadd.f32 %v23680_v24, %v1099_v56  ;;  %v1101_v58 = vpop.f32.mrb[33].mxu1  ;;  %v22477_v56 = vld [vmem:[%s26395_s9 + $0x30] sm:$0xff]  }
 0x154   : > { %v1102_v59 = vpop.f32.mrb[34].mxu1  ;;  %20316 = vmatprep.subr.bf16.mxu1 %v22477_v56 }
 0x155   : > { %v1154_v60 = vmax.f32 %v1100_v57, 0.0  ;;  %v1103_v61 = vadd.f32 %v23680_v24, %v1102_v59  ;;  %v1104_v62 = vpop.f32.mrb[35].mxu1  ;;  %20317 = vmatpush3.bf16.msra.mxu1 %v22477_v56 }
 0x156   : > { %v22478_v62 = vld [vmem:[%s26395_s9 + $0x38] sm:$0xff]  }
 0x157   : > { %1187 = vst.msk [vmem:[%s23692_s23 + $0xc0] sm:$0xff] %vm1162_vm1, %v1154_v60  ;;  %v1155_v63 = vmax.f32 %v1103_v61, 0.0  ;;  %9690 = vmatmul.mubr.bf16.gmra.mrb[140].mxu1 %v22669_v0  ;;  %20318 = vmatprep.subr.bf16.mxu1 %v22478_v62 }
 0x158   : > { %18085 = vmatprep.mubr.msk.bf16.mxu1 %vm920_vm0, %v22670_v3 }
 0x159   : > { %1188 = vst.msk [vmem:[%s23692_s23 + $0xc8] sm:$0xff] %vm1162_vm1, %v1155_v63  ;;  %20319 = vmatpush3.bf16.msra.mxu1 %v22478_v62 }
 0x15a   : > { %v1107_v4 = vpop.f32.mrb[36].mxu1 }
 0x15b   : > { %v1108_v5 = vadd.f32 %v23680_v24, %v1107_v4  ;;  %v1109_v6 = vpop.f32.mrb[37].mxu1 }
 0x15c   : > { %v1110_v7 = vpop.f32.mrb[38].mxu1 }
 0x15d   : > { %v1156_v11 = vmax.f32 %v1108_v5, 0.0  ;;  %v1111_v12 = vadd.f32 %v23680_v24, %v1110_v7  ;;  %v1112_v13 = vpop.f32.mrb[39].mxu1 }
 0x15f   : > { %1189 = vst.msk [vmem:[%s23692_s23 + $0xd0] sm:$0xff] %vm1162_vm1, %v1156_v11  ;;  %v1157_v14 = vmax.f32 %v1111_v12, 0.0  ;;  %9698 = vmatmul.mubr.bf16.gmra.mrb[144].mxu1 %v22671_v16 }
 0x160   : > { %18086 = vmatprep.mubr.msk.bf16.mxu1 %vm920_vm0, %v22672_v18 }
 0x161   : > { %1190 = vst.msk [vmem:[%s23692_s23 + $0xd8] sm:$0xff] %vm1162_vm1, %v1157_v14 }
 0x162   : > { %v1115_v26 = vpop.f32.mrb[40].mxu1 }
 0x163   : > { %v1116_v27 = vadd.f32 %v23680_v24, %v1115_v26  ;;  %v1117_v28 = vpop.f32.mrb[41].mxu1 }
 0x164   : > { %v1118_v29 = vpop.f32.mrb[42].mxu1 }
 0x165   : > { %v1158_v30 = vmax.f32 %v1116_v27, 0.0  ;;  %v1119_v2 = vadd.f32 %v23680_v24, %v1118_v29  ;;  %v1120_v31 = vpop.f32.mrb[43].mxu1 }
 0x167   : > { %1191 = vst.msk [vmem:[%s23692_s23 + $0xe0] sm:$0xff] %vm1162_vm1, %v1158_v30  ;;  %v1159_v32 = vmax.f32 %v1119_v2, 0.0  ;;  %9706 = vmatmul.mubr.bf16.gmra.mrb[148].mxu1 %v22673_v33  ;;  %v9986_v33 = vld [vmem:[#allocation3 + $0xf0] sm:$0xff] }
 0x168   : > { %18087 = vmatprep.mubr.msk.bf16.mxu1 %vm920_vm0, %v22674_v35 }
 0x169   : > { %1192 = vst.msk [vmem:[%s23692_s23 + $0xe8] sm:$0xff] %vm1162_vm1, %v1159_v32  ;;  %v9985_v32 = vld [vmem:[#allocation3 + $0xe8] sm:$0xff] }
 0x16a   : > { %v1123_v36 = vpop.f32.mrb[44].mxu1 }
 0x16b   : > { %v1124_v37 = vadd.f32 %v23680_v24, %v1123_v36  ;;  %v1125_v38 = vpop.f32.mrb[45].mxu1 }
 0x16c   : > { %v1126_v39 = vpop.f32.mrb[46].mxu1 }
 0x16d   : > { %v1160_v40 = vmax.f32 %v1124_v37, 0.0  ;;  %v1127_v41 = vadd.f32 %v23680_v24, %v1126_v39  ;;  %v1128_v42 = vpop.f32.mrb[47].mxu1  ;;  %v10025_v39 = vpack.c.bf16 %v9986_v33, %v9985_v32 }
 0x16f   : > { %1193 = vst.msk [vmem:[%s23692_s23 + $0xf0] sm:$0xff] %vm1162_vm1, %v1160_v40  ;;  %v1161_v43 = vmax.f32 %v1127_v41, 0.0  ;;  %9714 = vmatmul.mubr.bf16.gmra.mrb[152].mxu1 %v22675_v44 }
 0x170   : > { %18088 = vmatprep.mubr.msk.bf16.mxu1 %vm920_vm0, %v22676_v46 }
 0x171   : > { %1194 = vst.msk [vmem:[%s23692_s23 + $0xf8] sm:$0xff] %vm1162_vm1, %v1161_v43 }
 0x172   : > { %v1332_v47 = vpop.f32.mrb[48].mxu1 }
 0x173   : > { %v1333_v48 = vadd.f32 %v23818_v45, %v1332_v47  ;;  %v1334_v49 = vpop.f32.mrb[49].mxu1 }
 0x174   : > { %v1335_v50 = vpop.f32.mrb[50].mxu1 }
 0x175   : > { %v1459_v51 = vmax.f32 %v1333_v48, 0.0  ;;  %v1336_v52 = vadd.f32 %v23818_v45, %v1335_v50  ;;  %v1337_v53 = vpop.f32.mrb[51].mxu1 }
 0x177   : > { %1598 = vst.msk [vmem:[#allocation2 + $0x108] sm:$0xff] %vm1491_vm2, %v1459_v51  ;;  %v1460_v54 = vmax.f32 %v1336_v52, 0.0  ;;  %9722 = vmatmul.mubr.bf16.gmra.mrb[156].mxu1 %v23598_v9 }
 0x178   : > { %18089 = vmatprep.mubr.msk.bf16.mxu1 %vm920_vm0, %v23603_v10 }
 0x179   : > { %1599 = vst.msk [vmem:[#allocation2 + $0x110] sm:$0xff] %vm1491_vm2, %v1460_v54 }
 0x17a   : > { %v1340_v57 = vpop.f32.mrb[52].mxu1 }
 0x17b   : > { %v1341_v58 = vadd.f32 %v23818_v45, %v1340_v57  ;;  %v1342_v59 = vpop.f32.mrb[53].mxu1 }
 0x17c   : > { %v1343_v9 = vpop.f32.mrb[54].mxu1 }
 0x17d   : > { %v1461_v10 = vmax.f32 %v1341_v58, 0.0  ;;  %v1344_v60 = vadd.f32 %v23818_v45, %v1343_v9  ;;  %v1345_v61 = vpop.f32.mrb[55].mxu1 }
 0x17e   : > { %v1689_v0 = vld [vmem:[#allocation2 + $0x107] sm:$0xff] }
 0x17f   : > { %1600 = vst.msk [vmem:[#allocation2 + $0x128] sm:$0xff] %vm1491_vm2, %v1461_v10  ;;  %v1462_v63 = vmax.f32 %v1344_v60, 0.0  ;;  %9730 = vmatmul.mubr.bf16.gmra.mrb[160].mxu1 %v23654_v15 }
 0x180   : > { %v1690_v3 = vld [vmem:[#allocation2 + $0x10f] sm:$0xff]  ;;  %18090 = vmatprep.mubr.msk.bf16.mxu1 %vm920_vm0, %v23658_v19 }
 0x181   : > { %1601 = vst.msk [vmem:[#allocation2 + $0x130] sm:$0xff] %vm1491_vm2, %v1462_v63  ;;  %v1725_v4 = vpack.c.bf16 %v1690_v3, %v1689_v0 }
 0x182   : > { %v1348_v5 = vpop.f32.mrb[56].mxu1 }
 0x183   : > { %v1349_v6 = vadd.f32 %v23818_v45, %v1348_v5  ;;  %v1350_v7 = vpop.f32.mrb[57].mxu1  ;;  %19372 = vmatprep.mubr.msk.bf16.mxu0 %vm1491_vm2, %v1725_v4 }
 0x184   : > { %v1351_v11 = vpop.f32.mrb[58].mxu1 }
 0x185   : > { %v1463_v12 = vmax.f32 %v1349_v6, 0.0  ;;  %v1352_v15 = vadd.f32 %v23818_v45, %v1351_v11  ;;  %v1353_v13 = vpop.f32.mrb[59].mxu1 }
 0x186   : > { %v1691_v19 = vld [vmem:[#allocation2 + $0x127] sm:$0xff] }
 0x187   : > { %1602 = vst.msk [vmem:[#allocation2 + $0x148] sm:$0xff] %vm1491_vm2, %v1463_v12  ;;  %v1464_v14 = vmax.f32 %v1352_v15, 0.0  ;;  %9738 = vmatmul.mubr.bf16.gmra.mrb[164].mxu1 %v23665_v21 }
 0x188   : > { %v1692_v16 = vld [vmem:[#allocation2 + $0x12f] sm:$0xff]  ;;  %18091 = vmatprep.mubr.msk.bf16.mxu1 %vm920_vm0, %v23669_v22 }
 0x189   : > { %1603 = vst.msk [vmem:[#allocation2 + $0x150] sm:$0xff] %vm1491_vm2, %v1464_v14  ;;  %v1726_v17 = vpack.c.bf16 %v1692_v16, %v1691_v19 }
 0x18a   : > { %v1356_v18 = vpop.f32.mrb[60].mxu1 }
 0x18b   : > { %v1357_v20 = vadd.f32 %v23818_v45, %v1356_v18  ;;  %v1358_v26 = vpop.f32.mrb[61].mxu1  ;;  %19373 = vmatmul.mubr.msk.bf16.gmra.mrb[20].mxu0 %vm1491_vm2, %v1726_v17 }
 0x18c   : > { %v1359_v27 = vpop.f32.mrb[62].mxu1 }
 0x18d   : > { %v1465_v28 = vmax.f32 %v1357_v20, 0.0  ;;  %v1360_v29 = vadd.f32 %v23818_v45, %v1359_v27  ;;  %v1361_v30 = vpop.f32.mrb[63].mxu1 }
 0x18e   : > { %v1693_v22 = vld [vmem:[#allocation2 + $0x147] sm:$0xff] }
 0x18f   : > { %1604 = vst.msk [vmem:[#allocation2 + $0x168] sm:$0xff] %vm1491_vm2, %v1465_v28  ;;  %v1466_v21 = vmax.f32 %v1360_v29, 0.0  ;;  %9746 = vmatmul.mubr.bf16.gmra.mrb[168].mxu1 %v23674_v23 }
 0x190   : > { %v1694_v2 = vld [vmem:[#allocation2 + $0x14f] sm:$0xff]  ;;  %18092 = vmatprep.mubr.msk.bf16.mxu1 %vm920_vm0, %v23683_v25 }
 0x191   : > { %1605 = vst.msk [vmem:[#allocation2 + $0x170] sm:$0xff] %vm1491_vm2, %v1466_v21  ;;  %v1727_v31 = vpack.c.bf16 %v1694_v2, %v1693_v22 }
 0x192   : > { %v1364_v35 = vpop.f32.mrb[64].mxu1 }
 0x193   : > { %v1365_v36 = vadd.f32 %v23818_v45, %v1364_v35  ;;  %v1366_v37 = vpop.f32.mrb[65].mxu1  ;;  %19376 = vmatprep.mubr.msk.bf16.mxu0 %vm1491_vm2, %v1727_v31 }
 0x194   : > { %v1367_v38 = vpop.f32.mrb[66].mxu1 }
 0x195   : > { %v1467_v40 = vmax.f32 %v1365_v36, 0.0  ;;  %v1368_v23 = vadd.f32 %v23818_v45, %v1367_v38  ;;  %v1369_v41 = vpop.f32.mrb[67].mxu1 }
 0x196   : > { %v1695_v42 = vld [vmem:[#allocation2 + $0x167] sm:$0xff] }
 0x197   : > { %1606 = vst.msk [vmem:[#allocation2 + $0x188] sm:$0xff] %vm1491_vm2, %v1467_v40  ;;  %v1468_v25 = vmax.f32 %v1368_v23, 0.0  ;;  %9754 = vmatmul.mubr.bf16.gmra.mrb[172].mxu1 %v23698_v34  ;;  %v23972_v40 = vld [vmem:[%s26395_s9] sm:$0xff]  }
 0x198   : > { %v1696_v43 = vld [vmem:[#allocation2 + $0x16f] sm:$0xff]  ;;  %20320 = vmatprep.mubr.msk.bf16.mxu1 %vm920_vm0, %v10025_v39  ;;  %20352 = vmatprep.subr.bf16.mxu1 %v23972_v40 }
 0x199   : > { %1607 = vst.msk [vmem:[#allocation2 + $0x190] sm:$0xff] %vm1491_vm2, %v1468_v25  ;;  %v1728_v44 = vpack.c.bf16 %v1696_v43, %v1695_v42 }
 0x19a   : > { %v1372_v46 = vpop.f32.mrb[68].mxu1 }
 0x19b   : > { %v1373_v47 = vadd.f32 %v23818_v45, %v1372_v46  ;;  %v1374_v48 = vpop.f32.mrb[69].mxu1  ;;  %19377 = vmatmul.mubr.msk.bf16.gmra.mrb[24].mxu0 %vm1491_vm2, %v1728_v44 }
 0x19c   : > { %v1375_v49 = vpop.f32.mrb[70].mxu1 }
 0x19d   : > { %v1469_v50 = vmax.f32 %v1373_v47, 0.0  ;;  %v1376_v51 = vadd.f32 %v23818_v45, %v1375_v49  ;;  %v1377_v52 = vpop.f32.mrb[71].mxu1 }
 0x19e   : > { %v1697_v53 = vld [vmem:[#allocation2 + $0x187] sm:$0xff] }
 0x19f   : > { %1608 = vst.msk [vmem:[#allocation2 + $0x1a8] sm:$0xff] %vm1491_vm2, %v1469_v50  ;;  %v1470_v34 = vmax.f32 %v1376_v51, 0.0 }
 0x1a0   : > { %v1698_v54 = vld [vmem:[#allocation2 + $0x18f] sm:$0xff] }
 0x1a1   : > { %1609 = vst.msk [vmem:[#allocation2 + $0x1b0] sm:$0xff] %vm1491_vm2, %v1470_v34  ;;  %v1729_v56 = vpack.c.bf16 %v1698_v54, %v1697_v53 }
 0x1a2   : > { %v1380_v57 = vpop.f32.mrb[72].mxu1 }
 0x1a3   : > { %v1381_v58 = vadd.f32 %v23818_v45, %v1380_v57  ;;  %v1382_v59 = vpop.f32.mrb[73].mxu1  ;;  %19380 = vmatprep.mubr.msk.bf16.mxu0 %vm1491_vm2, %v1729_v56 }
 0x1a4   : > { %v1383_v9 = vpop.f32.mrb[74].mxu1 }
 0x1a5   : > { %v1471_v10 = vmax.f32 %v1381_v58, 0.0  ;;  %v1384_v60 = vadd.f32 %v23818_v45, %v1383_v9  ;;  %v1385_v61 = vpop.f32.mrb[75].mxu1 }
 0x1a6   : > { %v1699_v63 = vld [vmem:[#allocation2 + $0x1a7] sm:$0xff] }
 0x1a7   : > { %1610 = vst.msk [vmem:[#allocation2 + $0x1c8] sm:$0xff] %vm1491_vm2, %v1471_v10  ;;  %v1472_v62 = vmax.f32 %v1384_v60, 0.0 }
 0x1a8   : > { %v1700_v0 = vld [vmem:[#allocation2 + $0x1af] sm:$0xff] }
 0x1a9   : > { %1611 = vst.msk [vmem:[#allocation2 + $0x1d0] sm:$0xff] %vm1491_vm2, %v1472_v62  ;;  %v1730_v3 = vpack.c.bf16 %v1700_v0, %v1699_v63 }
 0x1aa   : > { %v1388_v4 = vpop.f32.mrb[76].mxu1 }
 0x1ab   : > { %v1389_v5 = vadd.f32 %v23818_v45, %v1388_v4  ;;  %v1390_v6 = vpop.f32.mrb[77].mxu1  ;;  %19381 = vmatmul.mubr.msk.bf16.gmra.mrb[28].mxu0 %vm1491_vm2, %v1730_v3 }
 0x1ac   : > { %v1391_v7 = vpop.f32.mrb[78].mxu1 }
 0x1ad   : > { %v1473_v11 = vmax.f32 %v1389_v5, 0.0  ;;  %v1392_v12 = vadd.f32 %v23818_v45, %v1391_v7  ;;  %v1393_v15 = vpop.f32.mrb[79].mxu1 }
 0x1ae   : > { %v1701_v14 = vld [vmem:[#allocation2 + $0x1c7] sm:$0xff] }
 0x1af   : > { %1612 = vst.msk [vmem:[#allocation2 + $0x1e8] sm:$0xff] %vm1491_vm2, %v1473_v11  ;;  %v1474_v13 = vmax.f32 %v1392_v12, 0.0 }
 0x1b0   : > { %v1702_v19 = vld [vmem:[#allocation2 + $0x1cf] sm:$0xff] }
 0x1b1   : > { %1613 = vst.msk [vmem:[#allocation2 + $0x1f0] sm:$0xff] %vm1491_vm2, %v1474_v13  ;;  %v1731_v16 = vpack.c.bf16 %v1702_v19, %v1701_v14 }
 0x1b2   : > { %v1396_v17 = vpop.f32.mrb[80].mxu1 }
 0x1b3   : > { %v1397_v18 = vadd.f32 %v23818_v45, %v1396_v17  ;;  %v1398_v20 = vpop.f32.mrb[81].mxu1  ;;  %19384 = vmatprep.mubr.msk.bf16.mxu0 %vm1491_vm2, %v1731_v16 }
 0x1b4   : > { %v1399_v26 = vpop.f32.mrb[82].mxu1 }
 0x1b5   : > { %v1475_v27 = vmax.f32 %v1397_v18, 0.0  ;;  %v1400_v28 = vadd.f32 %v23818_v45, %v1399_v26  ;;  %v1401_v29 = vpop.f32.mrb[83].mxu1 }
 0x1b6   : > { %v1703_v21 = vld [vmem:[#allocation2 + $0x1e7] sm:$0xff] }
 0x1b7   : > { %1614 = vst.msk [vmem:[#allocation2 + $0x208] sm:$0xff] %vm1491_vm2, %v1475_v27  ;;  %v1476_v30 = vmax.f32 %v1400_v28, 0.0 }
 0x1b8   : > { %v1704_v22 = vld [vmem:[#allocation2 + $0x1ef] sm:$0xff] }
 0x1b9   : > { %1615 = vst.msk [vmem:[#allocation2 + $0x210] sm:$0xff] %vm1491_vm2, %v1476_v30  ;;  %v1732_v2 = vpack.c.bf16 %v1704_v22, %v1703_v21 }
 0x1ba   : > { %v1404_v31 = vpop.f32.mrb[84].mxu1 }
 0x1bb   : > { %v1405_v32 = vadd.f32 %v23818_v45, %v1404_v31  ;;  %v1406_v33 = vpop.f32.mrb[85].mxu1  ;;  %19385 = vmatmul.mubr.msk.bf16.gmra.mrb[32].mxu0 %vm1491_vm2, %v1732_v2 }
 0x1bc   : > { %v1407_v35 = vpop.f32.mrb[86].mxu1 }
 0x1bd   : > { %v1477_v36 = vmax.f32 %v1405_v32, 0.0  ;;  %v1408_v37 = vadd.f32 %v23818_v45, %v1407_v35  ;;  %v1409_v38 = vpop.f32.mrb[87].mxu1 }
 0x1be   : > { %v1705_v23 = vld [vmem:[#allocation2 + $0x207] sm:$0xff]  ;;  %v1003_v38 = vpop.f32.mrb[0].mxu0 }
 0x1bf   : > { %1616 = vst.msk [vmem:[#allocation2 + $0x228] sm:$0xff] %vm1491_vm2, %v1477_v36  ;;  %v1478_v39 = vmax.f32 %v1408_v37, 0.0  ;;  %v1631_v36 = vld [vmem:[#allocation2 + $0xc6] sm:$0xff]  ;;  %v1632_v37 = vld [vmem:[#allocation2 + $0xce] sm:$0xff] }
 0x1c0   : > { %v1706_v41 = vld [vmem:[#allocation2 + $0x20f] sm:$0xff] }
 0x1c1   : > { %1617 = vst.msk [vmem:[#allocation2 + $0x230] sm:$0xff] %vm1491_vm2, %v1478_v39  ;;  %v1733_v25 = vpack.c.bf16 %v1706_v41, %v1705_v23  ;;  %v1005_v23 = vpop.f32.mrb[1].mxu0 }
 0x1c2   : > { %v1412_v42 = vpop.f32.mrb[88].mxu1 }
 0x1c3   : > { %v1413_v43 = vadd.f32 %v23818_v45, %v1412_v42  ;;  %v1414_v44 = vpop.f32.mrb[89].mxu1  ;;  %19388 = vmatprep.mubr.msk.bf16.mxu0 %vm1491_vm2, %v1733_v25  ;;  %v1669_v42 = vpack.c.bf16 %v1632_v37, %v1631_v36  ;;  %v24042_v36 = vld [vmem:[%s26391_s5 + $0x48] sm:$0xff]  }
 0x1c4   : > { %v1415_v46 = vpop.f32.mrb[90].mxu1 }
 0x1c5   : > { %v1479_v47 = vmax.f32 %v1413_v43, 0.0  ;;  %v1416_v48 = vadd.f32 %v23818_v45, %v1415_v46  ;;  %v1417_v49 = vpop.f32.mrb[91].mxu1  ;;  %v1006_v43 = vpop.f32.mrb[2].mxu0  ;;  %v1004_v46 = vadd.f32 %v23680_v24, %v1003_v38 }
 0x1c6   : > { %v1707_v51 = vld [vmem:[#allocation2 + $0x227] sm:$0xff] }
 0x1c7   : > { %1618 = vst.msk [vmem:[#allocation2 + $0x248] sm:$0xff] %vm1491_vm2, %v1479_v47  ;;  %v1480_v50 = vmax.f32 %v1416_v48, 0.0  ;;  %v1007_v47 = vadd.f32 %v23680_v24, %v1006_v43  ;;  %v1008_v48 = vpop.f32.mrb[3].mxu0 }
 0x1c8   : > { %v1708_v52 = vld [vmem:[#allocation2 + $0x22f] sm:$0xff] }
 0x1c9   : > { %1619 = vst.msk [vmem:[#allocation2 + $0x250] sm:$0xff] %vm1491_vm2, %v1480_v50  ;;  %v1734_v34 = vpack.c.bf16 %v1708_v52, %v1707_v51  ;;  %v1130_v52 = vmax.f32 %v1004_v46, 0.0  ;;  %v1642_v46 = vld [vmem:[#allocation2 + $0x16e] sm:$0xff] }
 0x1ca   : > { %v1420_v53 = vpop.f32.mrb[92].mxu1 }
 0x1cb   : > { %v1421_v54 = vadd.f32 %v23818_v45, %v1420_v53  ;;  %v1422_v56 = vpop.f32.mrb[93].mxu1  ;;  %19389 = vmatmul.mubr.msk.bf16.gmra.mrb[36].mxu0 %vm1491_vm2, %v1734_v34  ;;  %v1131_v34 = vmax.f32 %v1007_v47, 0.0  ;;  %v1011_v53 = vpop.f32.mrb[4].mxu0  ;;  %1163 = vst.msk [vmem:[%s23692_s23] sm:$0xff] %vm1162_vm1, %v1130_v52  ;;  %v22677_v47 = vld [vmem:[%s26416_s21] ss:$0 sm:$0xff] }
 0x1cc   : > { %v1423_v57 = vpop.f32.mrb[94].mxu1  ;;  %v1633_v56 = vld [vmem:[#allocation2 + $0xe6] sm:$0xff] }
 0x1cd   : > { %v1481_v58 = vmax.f32 %v1421_v54, 0.0  ;;  %v1424_v59 = vadd.f32 %v23818_v45, %v1423_v57  ;;  %v1425_v9 = vpop.f32.mrb[95].mxu1  ;;  %v1634_v57 = vld [vmem:[#allocation2 + $0xee] sm:$0xff]  ;;  %1164 = vst.msk [vmem:[%s23692_s23 + $0x8] sm:$0xff] %vm1162_vm1, %v1131_v34  ;;  %v1641_v34 = vld [vmem:[#allocation2 + $0x166] sm:$0xff] }
 0x1ce   : > { %v1709_v60 = vld [vmem:[#allocation2 + $0x247] sm:$0xff] }
 0x1cf   : > { %1620 = vst.msk [vmem:[#allocation2 + $0x268] sm:$0xff] %vm1491_vm2, %v1481_v58  ;;  %v1482_v10 = vmax.f32 %v1424_v59, 0.0  ;;  %v1012_v58 = vadd.f32 %v23680_v24, %v1011_v53  ;;  %v1013_v59 = vpop.f32.mrb[5].mxu0 }
 0x1d0   : > { %v1710_v61 = vld [vmem:[#allocation2 + $0x24f] sm:$0xff]  ;;  %v1674_v59 = vpack.c.bf16 %v1642_v46, %v1641_v34 }
 0x1d1   : > { %1621 = vst.msk [vmem:[#allocation2 + $0x270] sm:$0xff] %vm1491_vm2, %v1482_v10  ;;  %v1735_v62 = vpack.c.bf16 %v1710_v61, %v1709_v60  ;;  %v1014_v61 = vpop.f32.mrb[6].mxu0 }
 0x1d2   : > { %v1428_v63 = vpop.f32.mrb[96].mxu1 }
 0x1d3   : > { %v1429_v0 = vadd.f32 %v23818_v45, %v1428_v63  ;;  %v1430_v3 = vpop.f32.mrb[97].mxu1  ;;  %19392 = vmatprep.mubr.msk.bf16.mxu0 %vm1491_vm2, %v1735_v62  ;;  %v1132_v62 = vmax.f32 %v1012_v58, 0.0  ;;  %v1015_v63 = vadd.f32 %v23680_v24, %v1014_v61 }
 0x1d4   : > { %v1431_v4 = vpop.f32.mrb[98].mxu1 }
 0x1d5   : > { %v1483_v5 = vmax.f32 %v1429_v0, 0.0  ;;  %v1432_v6 = vadd.f32 %v23818_v45, %v1431_v4  ;;  %v1433_v7 = vpop.f32.mrb[99].mxu1  ;;  %v1016_v0 = vpop.f32.mrb[7].mxu0  ;;  %v1670_v4 = vpack.c.bf16 %v1634_v57, %v1633_v56  ;;  %1165 = vst.msk [vmem:[%s23692_s23 + $0x10] sm:$0xff] %vm1162_vm1, %v1132_v62 }
 0x1d6   : > { %v1711_v12 = vld [vmem:[#allocation2 + $0x267] sm:$0xff] }
 0x1d7   : > { %1622 = vst.msk [vmem:[#allocation2 + $0x288] sm:$0xff] %vm1491_vm2, %v1483_v5  ;;  %v1484_v11 = vmax.f32 %v1432_v6, 0.0  ;;  %v1636_v5 = vld [vmem:[#allocation2 + $0x10e] sm:$0xff]  ;;  %v1133_v6 = vmax.f32 %v1015_v63, 0.0  ;;  %v1635_v7 = vld [vmem:[#allocation2 + $0x106] sm:$0xff] }
 0x1d8   : > { %v1712_v15 = vld [vmem:[#allocation2 + $0x26f] sm:$0xff] }
 0x1d9   : > { %1623 = vst.msk [vmem:[#allocation2 + $0x290] sm:$0xff] %vm1491_vm2, %v1484_v11  ;;  %v1736_v13 = vpack.c.bf16 %v1712_v15, %v1711_v12  ;;  %v22479_v11 = vld [vmem:[%s26391_s5 + $0x38] sm:$0xff]   ;;  %v1671_v15 = vpack.c.bf16 %v1636_v5, %v1635_v7 }
 0x1da   : > { %v1436_v14 = vpop.f32.mrb[100].mxu1  ;;  %1166 = vst.msk [vmem:[%s23692_s23 + $0x18] sm:$0xff] %vm1162_vm1, %v1133_v6 }
 0x1db   : > { %v1437_v19 = vadd.f32 %v23818_v45, %v1436_v14  ;;  %v1438_v16 = vpop.f32.mrb[101].mxu1  ;;  %19393 = vmatmul.mubr.msk.bf16.gmra.mrb[40].mxu0 %vm1491_vm2, %v1736_v13 }
 0x1dc   : > { %v1439_v17 = vpop.f32.mrb[102].mxu1  ;;  %v1019_v16 = vpop.f32.mrb[8].mxu0 }
 0x1dd   : > { %v1485_v18 = vmax.f32 %v1437_v19, 0.0  ;;  %v1440_v20 = vadd.f32 %v23818_v45, %v1439_v17  ;;  %v1441_v26 = vpop.f32.mrb[103].mxu1 }
 0x1de   : > { %v1713_v28 = vld [vmem:[#allocation2 + $0x287] sm:$0xff] }
 0x1df   : > { %1624 = vst.msk [vmem:[#allocation2 + $0x2a8] sm:$0xff] %vm1491_vm2, %v1485_v18  ;;  %v1486_v27 = vmax.f32 %v1440_v20, 0.0  ;;  %v22480_v26 = vld [vmem:[%s26391_s5 + $0x40] sm:$0xff]  }
 0x1e0   : > { %v1714_v29 = vld [vmem:[#allocation2 + $0x28f] sm:$0xff] }
 0x1e1   : > { %1625 = vst.msk [vmem:[#allocation2 + $0x2b0] sm:$0xff] %vm1491_vm2, %v1486_v27  ;;  %v1737_v30 = vpack.c.bf16 %v1714_v29, %v1713_v28  ;;  %v1020_v27 = vadd.f32 %v23680_v24, %v1019_v16  ;;  %v1021_v28 = vpop.f32.mrb[9].mxu0  ;;  %v1638_v29 = vld [vmem:[#allocation2 + $0x12e] sm:$0xff] }
 0x1e2   : > { %v1444_v21 = vpop.f32.mrb[104].mxu1 }
 0x1e3   : > { %v1445_v22 = vadd.f32 %v23818_v45, %v1444_v21  ;;  %v1446_v2 = vpop.f32.mrb[105].mxu1  ;;  %19396 = vmatprep.mubr.msk.bf16.mxu0 %vm1491_vm2, %v1737_v30  ;;  %v1022_v30 = vpop.f32.mrb[10].mxu0 }
 0x1e4   : > { %v1447_v31 = vpop.f32.mrb[106].mxu1  ;;  %v1023_v2 = vadd.f32 %v23680_v24, %v1022_v30 }
 0x1e5   : > { %v1487_v32 = vmax.f32 %v1445_v22, 0.0  ;;  %v1448_v33 = vadd.f32 %v23818_v45, %v1447_v31  ;;  %v1449_v35 = vpop.f32.mrb[107].mxu1  ;;  %v1134_v22 = vmax.f32 %v1020_v27, 0.0  ;;  %v1024_v31 = vpop.f32.mrb[11].mxu0 }
 0x1e6   : > { %v1715_v41 = vld [vmem:[#allocation2 + $0x2a7] sm:$0xff]  ;;  %v1135_v37 = vmax.f32 %v1023_v2, 0.0 }
 0x1e7   : > { %1626 = vst.msk [vmem:[#allocation2 + $0x2c8] sm:$0xff] %vm1491_vm2, %v1487_v32  ;;  %v1488_v39 = vmax.f32 %v1448_v33, 0.0  ;;  %v1637_v32 = vld [vmem:[#allocation2 + $0x126] sm:$0xff]  ;;  %v1650_v31 = vld [vmem:[#allocation2 + $0x1ee] sm:$0xff] }
 0x1e8   : > { %v1716_v25 = vld [vmem:[#allocation2 + $0x2af] sm:$0xff]  ;;  %v1672_v33 = vpack.c.bf16 %v1638_v29, %v1637_v32  ;;  %v1639_v35 = vld [vmem:[#allocation2 + $0x146] sm:$0xff]  ;;  %1167 = vst.msk [vmem:[%s23692_s23 + $0x20] sm:$0xff] %vm1162_vm1, %v1134_v22  ;;  %1168 = vst.msk [vmem:[%s23692_s23 + $0x28] sm:$0xff] %vm1162_vm1, %v1135_v37 }
 0x1e9   : > { %1627 = vst.msk [vmem:[#allocation2 + $0x2d0] sm:$0xff] %vm1491_vm2, %v1488_v39  ;;  %v1738_v44 = vpack.c.bf16 %v1716_v25, %v1715_v41  ;;  %v24087_v2 = vld [vmem:[%s26395_s9 + $0x40] sm:$0xff]  }
 0x1ea   : > { %v1452_v49 = vpop.f32.mrb[108].mxu1 }
 0x1eb   : > { %v1453_v50 = vadd.f32 %v23818_v45, %v1452_v49  ;;  %v1454_v51 = vpop.f32.mrb[109].mxu1  ;;  %19397 = vmatmul.mubr.msk.bf16.gmra.mrb[44].mxu0 %vm1491_vm2, %v1738_v44  ;;  %v1027_v44 = vpop.f32.mrb[12].mxu0 }
 0x1ec   : > { %v1455_v54 = vpop.f32.mrb[110].mxu1  ;;  %19406 = vmatprep.mubr.msk.bf16.mxu0 %vm1491_vm2, %v1669_v42  ;;  %v1028_v48 = vadd.f32 %v22677_v47, %v1027_v44  ;;  %v1029_v49 = vpop.f32.mrb[13].mxu0  ;;  %v1644_v51 = vld [vmem:[#allocation2 + $0x18e] sm:$0xff] }
 0x1ed   : > { %v1489_v9 = vmax.f32 %v1453_v50, 0.0  ;;  %v1456_v10 = vadd.f32 %v23818_v45, %v1455_v54  ;;  %v1457_v60 = vpop.f32.mrb[111].mxu1  ;;  %v24017_v45 = vld [vmem:[%s26394_s8] ss:$0 sm:$0xff]  ;;  %v1030_v52 = vpop.f32.mrb[14].mxu0  ;;  %v1654_v49 = vld [vmem:[#allocation2 + $0x22e] sm:$0xff] }
 0x1ee   : > { %v1136_v56 = vmax.f32 %v1028_v48, 0.0  ;;  %v1031_v57 = vadd.f32 %v22677_v47, %v1030_v52  ;;  %v1032_v58 = vpop.f32.mrb[15].mxu0  ;;  %v22484_v60 = vld [vmem:[%s26395_s9 + $0x8] sm:$0xff]  }
 0x1ef   : > { %1628 = vst.msk [vmem:[#allocation2 + $0x2e8] sm:$0xff] %vm1491_vm2, %v1489_v9  ;;  %v1490_v3 = vmax.f32 %v1456_v10, 0.0  ;;  %v1643_v10 = vld [vmem:[#allocation2 + $0x186] sm:$0xff] }
 0x1f0   : > { %v1675_v62 = vpack.c.bf16 %v1644_v51, %v1643_v10  ;;  %1169 = vst.msk [vmem:[%s23692_s23 + $0x30] sm:$0xff] %vm1162_vm1, %v1136_v56  ;;  %v1137_v63 = vmax.f32 %v1031_v57, 0.0  ;;  %v1656_v51 = vld [vmem:[#allocation2 + $0x24e] sm:$0xff]  ;;  %v1653_v52 = vld [vmem:[#allocation2 + $0x226] sm:$0xff] }
 0x1f1   : > { %1629 = vst.msk [vmem:[#allocation2 + $0x2f0] sm:$0xff] %vm1491_vm2, %v1490_v3  ;;  %v1655_v57 = vld [vmem:[#allocation2 + $0x246] sm:$0xff] }
 0x1f2   : > { %v9635_v12 = vpop.f32.mrb[112].mxu1  ;;  %1170 = vst.msk [vmem:[%s23692_s23 + $0x38] sm:$0xff] %vm1162_vm1, %v1137_v63 }
 0x1f3   : > { %v9636_v13 = vadd.f32 %v24017_v45, %v9635_v12  ;;  %19407 = vmatmul.mubr.msk.bf16.vlgmr.msra.gmra.mrb[16].mxu0 %vm1491_vm2, %v1670_v4  ;;  %v9637_v14 = vpop.f32.mrb[113].mxu1  ;;  %v1646_v12 = vld [vmem:[#allocation2 + $0x1ae] sm:$0xff] }
 0x1f4   : > { %19410 = vmatprep.mubr.msk.bf16.mxu0 %vm1491_vm2, %v1671_v15  ;;  %v9638_v19 = vpop.f32.mrb[114].mxu1  ;;  %19439 = vmatpush3.bf16.msra.mxu0 %v23834_v55  ;;  %v1640_v55 = vld [vmem:[#allocation2 + $0x14e] sm:$0xff]  ;;  %v1645_v14 = vld [vmem:[#allocation2 + $0x1a6] sm:$0xff] }
 0x1f5   : > { %v9762_v17 = vmax.f32 %v9636_v13, 0.0  ;;  %v9639_v18 = vadd.f32 %v24017_v45, %v9638_v19  ;;  %v9640_v20 = vpop.f32.mrb[115].mxu1  ;;  %19440 = vmatprep.subr.bf16.mxu0 %v22479_v11  ;;  %v1673_v39 = vpack.c.bf16 %v1640_v55, %v1639_v35  ;;  %v1648_v13 = vld [vmem:[#allocation2 + $0x1ce] sm:$0xff]  ;;  %v1649_v35 = vld [vmem:[#allocation2 + $0x1e6] sm:$0xff] }
 0x1f6   : > { %v22487_v20 = vld [vmem:[%s26395_s9 + $0x18] sm:$0xff]  }
 0x1f7   : > { %9896 = vst.msk [vmem:[#allocation3 + $0x108] sm:$0xff] %vm920_vm0, %v9762_v17  ;;  %v9763_v21 = vmax.f32 %v9639_v18, 0.0  ;;  %v1647_v18 = vld [vmem:[#allocation2 + $0x1c6] sm:$0xff] }
 0x1f8   : > { %19441 = vmatpush3.bf16.msra.mxu0 %v22479_v11  ;;  %v22485_v11 = vld [vmem:[%s26395_s9 + $0x10] sm:$0xff]   ;;  %v1677_v27 = vpack.c.bf16 %v1648_v13, %v1647_v18 }
 0x1f9   : > { %9897 = vst.msk [vmem:[#allocation3 + $0x110] sm:$0xff] %vm920_vm0, %v9763_v21  ;;  %19442 = vmatprep.subr.bf16.mxu0 %v22480_v26 }
 0x1fa   : > { %v9643_v38 = vpop.f32.mrb[116].mxu1 }
 0x1fb   : > { %v9644_v24 = vadd.f32 %v24017_v45, %v9643_v38  ;;  %19411 = vmatmul.mubr.msk.bf16.gmra.mrb[20].mxu0 %vm1491_vm2, %v1672_v33  ;;  %v9645_v23 = vpop.f32.mrb[117].mxu1  ;;  %v1652_v33 = vld [vmem:[#allocation2 + $0x20e] sm:$0xff] }
 0x1fc   : > { %19414 = vmatprep.mubr.msk.bf16.mxu0 %vm1491_vm2, %v1673_v39  ;;  %v9646_v41 = vpop.f32.mrb[118].mxu1  ;;  %19443 = vmatpush3.bf16.msra.mxu0 %v22480_v26  ;;  %v1678_v39 = vpack.c.bf16 %v1650_v31, %v1649_v35  ;;  %v1651_v23 = vld [vmem:[#allocation2 + $0x206] sm:$0xff] }
 0x1fd   : > { %v9764_v25 = vmax.f32 %v9644_v24, 0.0  ;;  %v9647_v42 = vadd.f32 %v24017_v45, %v9646_v41  ;;  %v9648_v43 = vpop.f32.mrb[119].mxu1  ;;  %19476 = vmatprep.subr.bf16.mxu0 %v24042_v36 }
 0x1fe   : > { %v9987_v53 = vld [vmem:[#allocation3 + $0x108] sm:$0xff] }
 0x1ff   : > { %9898 = vst.msk [vmem:[#allocation3 + $0x128] sm:$0xff] %vm920_vm0, %v9764_v25  ;;  %v9765_v50 = vmax.f32 %v9647_v42, 0.0  ;;  %v1679_v25 = vpack.c.bf16 %v1652_v33, %v1651_v23 }
 0x200   : > { %v9988_v54 = vld [vmem:[#allocation3 + $0x110] sm:$0xff] }
 0x201   : > { %9899 = vst.msk [vmem:[#allocation3 + $0x130] sm:$0xff] %vm920_vm0, %v9765_v50  ;;  %v10026_v9 = vpack.c.bf16 %v9988_v54, %v9987_v53  ;;  %v1680_v54 = vpack.c.bf16 %v1654_v49, %v1653_v52  ;;  %v2197_v49 = vld [vmem:[#allocation2 + $0x108] sm:$0xff] }
 0x202   : > { %v9651_v61 = vpop.f32.mrb[120].mxu1 }
 0x203   : > { %v9652_v0 = vadd.f32 %v24017_v45, %v9651_v61  ;;  %19415 = vmatmul.mubr.msk.bf16.gmra.mrb[24].mxu0 %vm1491_vm2, %v1674_v59  ;;  %v9653_v3 = vpop.f32.mrb[121].mxu1  ;;  %20321 = vmatmul.mubr.msk.bf16.vlgmr.msra.gmra.mrb[176].mxu1 %vm920_vm0, %v10026_v9  ;;  %v1681_v59 = vpack.c.bf16 %v1656_v51, %v1655_v57 }
 0x204   : > { %19418 = vmatprep.mubr.msk.bf16.mxu0 %vm1491_vm2, %v1675_v62  ;;  %v9654_v4 = vpop.f32.mrb[122].mxu1  ;;  %20353 = vmatpush3.bf16.msra.mxu1 %v23972_v40  ;;  %v1676_v40 = vpack.c.bf16 %v1646_v12, %v1645_v14 }
 0x205   : > { %v9766_v5 = vmax.f32 %v9652_v0, 0.0  ;;  %v9655_v6 = vadd.f32 %v24017_v45, %v9654_v4  ;;  %v9656_v7 = vpop.f32.mrb[123].mxu1  ;;  %20354 = vmatprep.subr.bf16.mxu1 %v22484_v60  ;;  %v1658_v0 = vld [vmem:[#allocation2 + $0x26e] sm:$0xff] }
 0x206   : > { %v9989_v19 = vld [vmem:[#allocation3 + $0x128] sm:$0xff] }
 0x207   : > { %9900 = vst.msk [vmem:[#allocation3 + $0x148] sm:$0xff] %vm920_vm0, %v9766_v5  ;;  %v9767_v15 = vmax.f32 %v9655_v6, 0.0  ;;  %v1660_v4 = vld [vmem:[#allocation2 + $0x28e] sm:$0xff]  ;;  %v1657_v5 = vld [vmem:[#allocation2 + $0x266] sm:$0xff] }
 0x208   : > { %v9990_v16 = vld [vmem:[#allocation3 + $0x130] sm:$0xff]  ;;  %20355 = vmatpush3.bf16.msra.mxu1 %v22484_v60 }
 0x209   : > { %9901 = vst.msk [vmem:[#allocation3 + $0x150] sm:$0xff] %vm920_vm0, %v9767_v15  ;;  %v10027_v17 = vpack.c.bf16 %v9990_v16, %v9989_v19  ;;  %20356 = vmatprep.subr.bf16.mxu1 %v22485_v11  ;;  %v1659_v15 = vld [vmem:[#allocation2 + $0x286] sm:$0xff] }
 0x20a   : > { %v9659_v26 = vpop.f32.mrb[124].mxu1  ;;  %v1683_v14 = vpack.c.bf16 %v1660_v4, %v1659_v15  ;;  %v24137_v4 = vld [vmem:[%s26391_s5 + $0x60] sm:$0xff]  }
 0x20b   : > { %v9660_v28 = vadd.f32 %v24017_v45, %v9659_v26  ;;  %19419 = vmatmul.mubr.msk.bf16.gmra.mrb[28].mxu0 %vm1491_vm2, %v1676_v40  ;;  %v9661_v29 = vpop.f32.mrb[125].mxu1  ;;  %20324 = vmatprep.mubr.msk.bf16.mxu1 %vm920_vm0, %v10027_v17  ;;  %v2193_v26 = vld [vmem:[#allocation2 + $0xc8] sm:$0xff] }
 0x20c   : > { %19422 = vmatprep.mubr.msk.bf16.mxu0 %vm1491_vm2, %v1677_v27  ;;  %v9662_v30 = vpop.f32.mrb[126].mxu1  ;;  %20357 = vmatpush3.bf16.msra.mxu1 %v22485_v11  ;;  %v1682_v11 = vpack.c.bf16 %v1658_v0, %v1657_v5  ;;  %v2194_v27 = vld [vmem:[#allocation2 + $0xd0] sm:$0xff] }
 0x20d   : > { %v9768_v21 = vmax.f32 %v9660_v28, 0.0  ;;  %v9663_v55 = vadd.f32 %v24017_v45, %v9662_v30  ;;  %v9664_v22 = vpop.f32.mrb[127].mxu1  ;;  %20358 = vmatprep.subr.bf16.mxu1 %v22487_v20  ;;  %v1662_v28 = vld [vmem:[#allocation2 + $0x2ae] sm:$0xff]  ;;  %v1661_v30 = vld [vmem:[#allocation2 + $0x2a6] sm:$0xff] }
 0x20e   : > { %v9991_v37 = vld [vmem:[#allocation3 + $0x148] sm:$0xff]  ;;  %v2231_v22 = vpack.c.bf16 %v2194_v27, %v2193_v26  ;;  %v1684_v31 = vpack.c.bf16 %v1662_v28, %v1661_v30 }
 0x20f   : > { %9902 = vst.msk [vmem:[#allocation3 + $0x168] sm:$0xff] %vm920_vm0, %v9768_v21  ;;  %v9769_v32 = vmax.f32 %v9663_v55, 0.0  ;;  %v2205_v28 = vld [vmem:[#allocation2 + $0x188] sm:$0xff] }
 0x210   : > { %v9992_v38 = vld [vmem:[#allocation3 + $0x150] sm:$0xff]  ;;  %20359 = vmatpush3.bf16.msra.mxu1 %v22487_v20 }
 0x211   : > { %9903 = vst.msk [vmem:[#allocation3 + $0x170] sm:$0xff] %vm920_vm0, %v9769_v32  ;;  %v10028_v24 = vpack.c.bf16 %v9992_v38, %v9991_v37  ;;  %20392 = vmatprep.subr.bf16.mxu1 %v24087_v2 }
 0x212   : > { %v9667_v41 = vpop.f32.mrb[128].mxu1 }
 0x213   : > { %v9668_v42 = vadd.f32 %v24017_v45, %v9667_v41  ;;  %19423 = vmatmul.mubr.msk.bf16.gmra.mrb[32].mxu0 %vm1491_vm2, %v1678_v39  ;;  %v9669_v43 = vpop.f32.mrb[129].mxu1  ;;  %20325 = vmatmul.mubr.msk.bf16.gmra.mrb[180].mxu1 %vm920_vm0, %v10028_v24  ;;  %v2195_v39 = vld [vmem:[#allocation2 + $0xe8] sm:$0xff]  ;;  %v2196_v24 = vld [vmem:[#allocation2 + $0xf0] sm:$0xff] }
 0x214   : > { %19426 = vmatprep.mubr.msk.bf16.mxu0 %vm1491_vm2, %v1679_v25  ;;  %v9670_v44 = vpop.f32.mrb[130].mxu1  ;;  %v2232_v43 = vpack.c.bf16 %v2196_v24, %v2195_v39  ;;  %v2207_v39 = vld [vmem:[#allocation2 + $0x1a8] sm:$0xff] }
 0x215   : > { %v9770_v46 = vmax.f32 %v9668_v42, 0.0  ;;  %v9671_v47 = vadd.f32 %v24017_v45, %v9670_v44  ;;  %v9672_v48 = vpop.f32.mrb[131].mxu1  ;;  %v2198_v44 = vld [vmem:[#allocation2 + $0x110] sm:$0xff] }
 0x216   : > { %v9993_v34 = vld [vmem:[#allocation3 + $0x168] sm:$0xff]  ;;  %v2233_v52 = vpack.c.bf16 %v2198_v44, %v2197_v49 }
 0x217   : > { %9904 = vst.msk [vmem:[#allocation3 + $0x188] sm:$0xff] %vm920_vm0, %v9770_v46  ;;  %v9771_v50 = vmax.f32 %v9671_v47, 0.0 }
 0x218   : > { %v9994_v53 = vld [vmem:[#allocation3 + $0x170] sm:$0xff] }
 0x219   : > { %9905 = vst.msk [vmem:[#allocation3 + $0x190] sm:$0xff] %vm920_vm0, %v9771_v50  ;;  %v10029_v56 = vpack.c.bf16 %v9994_v53, %v9993_v34  ;;  %v22483_v50 = vld [vmem:[%s26391_s5 + $0x50] sm:$0xff]  }
 0x21a   : > { %v9675_v58 = vpop.f32.mrb[132].mxu1 }
 0x21b   : > { %v9676_v9 = vadd.f32 %v24017_v45, %v9675_v58  ;;  %19427 = vmatmul.mubr.msk.bf16.gmra.mrb[36].mxu0 %vm1491_vm2, %v1680_v54  ;;  %v9677_v10 = vpop.f32.mrb[133].mxu1  ;;  %20328 = vmatprep.mubr.msk.bf16.mxu1 %vm920_vm0, %v10029_v56 }
 0x21c   : > { %19430 = vmatprep.mubr.msk.bf16.mxu0 %vm1491_vm2, %v1681_v59  ;;  %v9678_v60 = vpop.f32.mrb[134].mxu1  ;;  %v22486_v59 = vld [vmem:[%s26391_s5 + $0x58] sm:$0xff]  }
 0x21d   : > { %v9772_v61 = vmax.f32 %v9676_v9, 0.0  ;;  %v9679_v62 = vadd.f32 %v24017_v45, %v9678_v60  ;;  %v9680_v63 = vpop.f32.mrb[135].mxu1  ;;  %v2200_v9 = vld [vmem:[#allocation2 + $0x130] sm:$0xff] }
 0x21e   : > { %v9995_v6 = vld [vmem:[#allocation3 + $0x188] sm:$0xff]  ;;  %v2202_v60 = vld [vmem:[#allocation2 + $0x150] sm:$0xff] }
 0x21f   : > { %9906 = vst.msk [vmem:[#allocation3 + $0x1a8] sm:$0xff] %vm920_vm0, %v9772_v61  ;;  %v9773_v3 = vmax.f32 %v9679_v62, 0.0  ;;  %v2199_v61 = vld [vmem:[#allocation2 + $0x128] sm:$0xff] }
 0x220   : > { %v9996_v7 = vld [vmem:[#allocation3 + $0x190] sm:$0xff] }
 0x221   : > { %9907 = vst.msk [vmem:[#allocation3 + $0x1b0] sm:$0xff] %vm920_vm0, %v9773_v3  ;;  %v10030_v12 = vpack.c.bf16 %v9996_v7, %v9995_v6  ;;  %v2201_v3 = vld [vmem:[#allocation2 + $0x148] sm:$0xff] }
 0x222   : > { %v9683_v13 = vpop.f32.mrb[136].mxu1  ;;  %v2235_v6 = vpack.c.bf16 %v2202_v60, %v2201_v3 }
 0x223   : > { %v9684_v19 = vadd.f32 %v24017_v45, %v9683_v13  ;;  %19431 = vmatmul.mubr.msk.bf16.gmra.mrb[40].mxu0 %vm1491_vm2, %v1682_v11  ;;  %v9685_v16 = vpop.f32.mrb[137].mxu1  ;;  %20329 = vmatmul.mubr.msk.bf16.gmra.mrb[184].mxu1 %vm920_vm0, %v10030_v12 }
 0x224   : > { %19434 = vmatprep.mubr.msk.bf16.mxu0 %vm1491_vm2, %v1683_v14  ;;  %v9686_v40 = vpop.f32.mrb[138].mxu1 }
 0x225   : > { %v9774_v17 = vmax.f32 %v9684_v19, 0.0  ;;  %v9687_v18 = vadd.f32 %v24017_v45, %v9686_v40  ;;  %v9688_v20 = vpop.f32.mrb[139].mxu1  ;;  %v2204_v19 = vld [vmem:[#allocation2 + $0x170] sm:$0xff] }
 0x226   : > { %v9997_v21 = vld [vmem:[#allocation3 + $0x1a8] sm:$0xff]  ;;  %v2206_v40 = vld [vmem:[#allocation2 + $0x190] sm:$0xff] }
 0x227   : > { %9908 = vst.msk [vmem:[#allocation3 + $0x1c8] sm:$0xff] %vm920_vm0, %v9774_v17  ;;  %v9775_v29 = vmax.f32 %v9687_v18, 0.0  ;;  %v2203_v17 = vld [vmem:[#allocation2 + $0x168] sm:$0xff]  ;;  %v2237_v30 = vpack.c.bf16 %v2206_v40, %v2205_v28 }
 0x228   : > { %v9998_v55 = vld [vmem:[#allocation3 + $0x1b0] sm:$0xff]  ;;  %v2236_v26 = vpack.c.bf16 %v2204_v19, %v2203_v17  ;;  %v2217_v19 = vld [vmem:[#allocation2 + $0x248] sm:$0xff] }
 0x229   : > { %9909 = vst.msk [vmem:[#allocation3 + $0x1d0] sm:$0xff] %vm920_vm0, %v9775_v29  ;;  %v10031_v32 = vpack.c.bf16 %v9998_v55, %v9997_v21 }
 0x22a   : > { %v9691_v33 = vpop.f32.mrb[140].mxu1 }
 0x22b   : > { %v9692_v35 = vadd.f32 %v24017_v45, %v9691_v33  ;;  %19435 = vmatmul.mubr.msk.bf16.gmra.mrb[44].mxu0 %vm1491_vm2, %v1684_v31  ;;  %v9693_v37 = vpop.f32.mrb[141].mxu1  ;;  %20332 = vmatprep.mubr.msk.bf16.mxu1 %vm920_vm0, %v10031_v32 }
 0x22c   : > { %v9694_v38 = vpop.f32.mrb[142].mxu1  ;;  %19444 = vmatprep.mubr.msk.bf16.mxu0 %vm1491_vm2, %v2231_v22 }
 0x22d   : > { %v9776_v23 = vmax.f32 %v9692_v35, 0.0  ;;  %v9695_v41 = vadd.f32 %v24017_v45, %v9694_v38  ;;  %v9696_v25 = vpop.f32.mrb[143].mxu1  ;;  %v2208_v35 = vld [vmem:[#allocation2 + $0x1b0] sm:$0xff] }
 0x22e   : > { %v9999_v46 = vld [vmem:[#allocation3 + $0x1c8] sm:$0xff]  ;;  %v2210_v38 = vld [vmem:[#allocation2 + $0x1d0] sm:$0xff] }
 0x22f   : > { %9910 = vst.msk [vmem:[#allocation3 + $0x1e8] sm:$0xff] %vm920_vm0, %v9776_v23  ;;  %v9777_v42 = vmax.f32 %v9695_v41, 0.0  ;;  %v2238_v41 = vpack.c.bf16 %v2208_v35, %v2207_v39  ;;  %v2221_v35 = vld [vmem:[#allocation2 + $0x288] sm:$0xff] }
 0x230   : > { %v10000_v47 = vld [vmem:[#allocation3 + $0x1d0] sm:$0xff] }
 0x231   : > { %9911 = vst.msk [vmem:[#allocation3 + $0x1f0] sm:$0xff] %vm920_vm0, %v9777_v42  ;;  %v10032_v48 = vpack.c.bf16 %v10000_v47, %v9999_v46  ;;  %v2209_v42 = vld [vmem:[#allocation2 + $0x1c8] sm:$0xff] }
 0x232   : > { %v9699_v51 = vpop.f32.mrb[144].mxu1  ;;  %v2239_v44 = vpack.c.bf16 %v2210_v38, %v2209_v42 }
 0x233   : > { %v9700_v34 = vadd.f32 %v24017_v45, %v9699_v51  ;;  %19445 = vmatmul.mubr.msk.bf16.vlgmr.msra.gmra.mrb[16].mxu0 %vm1491_vm2, %v2232_v43  ;;  %v9701_v53 = vpop.f32.mrb[145].mxu1  ;;  %20333 = vmatmul.mubr.msk.bf16.gmra.mrb[188].mxu1 %vm920_vm0, %v10032_v48 }
 0x234   : > { %19448 = vmatprep.mubr.msk.bf16.mxu0 %vm1491_vm2, %v2233_v52  ;;  %v9702_v54 = vpop.f32.mrb[146].mxu1  ;;  %19477 = vmatpush3.bf16.msra.mxu0 %v24042_v36  ;;  %v2234_v36 = vpack.c.bf16 %v2200_v9, %v2199_v61  ;;  %v2212_v52 = vld [vmem:[#allocation2 + $0x1f0] sm:$0xff]  ;;  %v2213_v9 = vld [vmem:[#allocation2 + $0x208] sm:$0xff] }
 0x235   : > { %v9778_v56 = vmax.f32 %v9700_v34, 0.0  ;;  %v9703_v57 = vadd.f32 %v24017_v45, %v9702_v54  ;;  %v9704_v58 = vpop.f32.mrb[147].mxu1  ;;  %19478 = vmatprep.subr.bf16.mxu0 %v22483_v50  ;;  %v2214_v53 = vld [vmem:[#allocation2 + $0x210] sm:$0xff]  ;;  %v2211_v54 = vld [vmem:[#allocation2 + $0x1e8] sm:$0xff] }
 0x236   : > { %v10001_v62 = vld [vmem:[#allocation3 + $0x1e8] sm:$0xff]  ;;  %v2240_v58 = vpack.c.bf16 %v2212_v52, %v2211_v54  ;;  %v2241_v60 = vpack.c.bf16 %v2214_v53, %v2213_v9  ;;  %v2509_v54 = vld [vmem:[#allocation2 + $0xf1] sm:$0xff] }
 0x237   : > { %9912 = vst.msk [vmem:[#allocation3 + $0x208] sm:$0xff] %vm920_vm0, %v9778_v56  ;;  %v9779_v10 = vmax.f32 %v9703_v57, 0.0  ;;  %v2508_v53 = vld [vmem:[#allocation2 + $0xe9] sm:$0xff]  ;;  %v2511_v9 = vld [vmem:[#allocation2 + $0x111] sm:$0xff] }
 0x238   : > { %v10002_v63 = vld [vmem:[#allocation3 + $0x1f0] sm:$0xff]  ;;  %19479 = vmatpush3.bf16.msra.mxu0 %v22483_v50 }
 0x239   : > { %9913 = vst.msk [vmem:[#allocation3 + $0x210] sm:$0xff] %vm920_vm0, %v9779_v10  ;;  %v10033_v0 = vpack.c.bf16 %v10002_v63, %v10001_v62  ;;  %19480 = vmatprep.subr.bf16.mxu0 %v22486_v59 }
 0x23a   : > { %v9707_v5 = vpop.f32.mrb[148].mxu1 }
 0x23b   : > { %v9708_v7 = vadd.f32 %v24017_v45, %v9707_v5  ;;  %19449 = vmatmul.mubr.msk.bf16.gmra.mrb[20].mxu0 %vm1491_vm2, %v2234_v36  ;;  %v9709_v11 = vpop.f32.mrb[149].mxu1  ;;  %20336 = vmatprep.mubr.msk.bf16.mxu1 %vm920_vm0, %v10033_v0  ;;  %v2216_v5 = vld [vmem:[#allocation2 + $0x230] sm:$0xff] }
 0x23c   : > { %19452 = vmatprep.mubr.msk.bf16.mxu0 %vm1491_vm2, %v2235_v6  ;;  %v9710_v12 = vpop.f32.mrb[150].mxu1  ;;  %19481 = vmatpush3.bf16.msra.mxu0 %v22486_v59  ;;  %v2215_v11 = vld [vmem:[#allocation2 + $0x228] sm:$0xff] }
 0x23d   : > { %v9780_v15 = vmax.f32 %v9708_v7, 0.0  ;;  %v9711_v13 = vadd.f32 %v24017_v45, %v9710_v12  ;;  %v9712_v14 = vpop.f32.mrb[151].mxu1  ;;  %19514 = vmatprep.subr.bf16.mxu0 %v24137_v4  ;;  %v2218_v7 = vld [vmem:[#allocation2 + $0x250] sm:$0xff] }
 0x23e   : > { %v10003_v18 = vld [vmem:[#allocation3 + $0x208] sm:$0xff]  ;;  %v2243_v40 = vpack.c.bf16 %v2218_v7, %v2217_v19 }
 0x23f   : > { %9914 = vst.msk [vmem:[#allocation3 + $0x228] sm:$0xff] %vm920_vm0, %v9780_v15  ;;  %v9781_v16 = vmax.f32 %v9711_v13, 0.0  ;;  %v2242_v13 = vpack.c.bf16 %v2216_v5, %v2215_v11  ;;  %v2513_v5 = vld [vmem:[#allocation2 + $0x131] sm:$0xff]  ;;  %v2514_v7 = vld [vmem:[#allocation2 + $0x149] sm:$0xff] }
 0x240   : > { %v10004_v20 = vld [vmem:[#allocation3 + $0x210] sm:$0xff]  ;;  %v9933_v19 = vld [vmem:[#allocation3 + $0x127] sm:$0xff] }
 0x241   : > { %9915 = vst.msk [vmem:[#allocation3 + $0x230] sm:$0xff] %vm920_vm0, %v9781_v16  ;;  %v10034_v27 = vpack.c.bf16 %v10004_v20, %v10003_v18  ;;  %v2515_v11 = vld [vmem:[#allocation2 + $0x151] sm:$0xff] }
 0x242   : > { %v9715_v29 = vpop.f32.mrb[152].mxu1 }
 0x243   : > { %v9716_v21 = vadd.f32 %v24017_v45, %v9715_v29  ;;  %19453 = vmatmul.mubr.msk.bf16.gmra.mrb[24].mxu0 %vm1491_vm2, %v2236_v26  ;;  %v9717_v55 = vpop.f32.mrb[153].mxu1  ;;  %20337 = vmatmul.mubr.msk.bf16.gmra.mrb[192].mxu1 %vm920_vm0, %v10034_v27  ;;  %v2220_v29 = vld [vmem:[#allocation2 + $0x270] sm:$0xff] }
 0x244   : > { %19456 = vmatprep.mubr.msk.bf16.mxu0 %vm1491_vm2, %v2237_v30  ;;  %v9718_v22 = vpop.f32.mrb[154].mxu1  ;;  %v2219_v55 = vld [vmem:[#allocation2 + $0x268] sm:$0xff] }
 0x245   : > { %v9782_v31 = vmax.f32 %v9716_v21, 0.0  ;;  %v9719_v32 = vadd.f32 %v24017_v45, %v9718_v22  ;;  %v9720_v33 = vpop.f32.mrb[155].mxu1  ;;  %v2222_v21 = vld [vmem:[#allocation2 + $0x290] sm:$0xff] }
 0x246   : > { %v10005_v24 = vld [vmem:[#allocation3 + $0x228] sm:$0xff]  ;;  %v2245_v38 = vpack.c.bf16 %v2222_v21, %v2221_v35 }
 0x247   : > { %9916 = vst.msk [vmem:[#allocation3 + $0x248] sm:$0xff] %vm920_vm0, %v9782_v31  ;;  %v9783_v37 = vmax.f32 %v9719_v32, 0.0  ;;  %v2244_v32 = vpack.c.bf16 %v2220_v29, %v2219_v55  ;;  %v2519_v29 = vld [vmem:[#allocation2 + $0x191] sm:$0xff]  ;;  %v9935_v21 = vld [vmem:[#allocation3 + $0x147] sm:$0xff] }
 0x248   : > { %v10006_v23 = vld [vmem:[#allocation3 + $0x230] sm:$0xff] }
 0x249   : > { %9917 = vst.msk [vmem:[#allocation3 + $0x250] sm:$0xff] %vm920_vm0, %v9783_v37  ;;  %v10035_v25 = vpack.c.bf16 %v10006_v23, %v10005_v24 }
 0x24a   : > { %v9723_v43 = vpop.f32.mrb[156].mxu1 }
 0x24b   : > { %v9724_v46 = vadd.f32 %v24017_v45, %v9723_v43  ;;  %19457 = vmatmul.mubr.msk.bf16.gmra.mrb[28].mxu0 %vm1491_vm2, %v2238_v41  ;;  %v9725_v47 = vpop.f32.mrb[157].mxu1  ;;  %20340 = vmatprep.mubr.msk.bf16.mxu1 %vm920_vm0, %v10035_v25  ;;  %v2506_v43 = vld [vmem:[#allocation2 + $0xc9] sm:$0xff] }
 0x24c   : > { %19460 = vmatprep.mubr.msk.bf16.mxu0 %vm1491_vm2, %v2239_v44  ;;  %v9726_v48 = vpop.f32.mrb[158].mxu1  ;;  %v2507_v44 = vld [vmem:[#allocation2 + $0xd1] sm:$0xff] }
 0x24d   : > { %v9784_v49 = vmax.f32 %v9724_v46, 0.0  ;;  %v9727_v50 = vadd.f32 %v24017_v45, %v9726_v48  ;;  %v9728_v51 = vpop.f32.mrb[159].mxu1  ;;  %v2224_v46 = vld [vmem:[#allocation2 + $0x2b0] sm:$0xff]  ;;  %v2223_v48 = vld [vmem:[#allocation2 + $0x2a8] sm:$0xff] }
 0x24e   : > { %v10007_v56 = vld [vmem:[#allocation3 + $0x248] sm:$0xff]  ;;  %v2544_v51 = vpack.c.bf16 %v2507_v44, %v2506_v43  ;;  %v2246_v52 = vpack.c.bf16 %v2224_v46, %v2223_v48  ;;  %v2523_v43 = vld [vmem:[#allocation2 + $0x1d1] sm:$0xff] }
 0x24f   : > { %9918 = vst.msk [vmem:[#allocation3 + $0x268] sm:$0xff] %vm920_vm0, %v9784_v49  ;;  %v9785_v34 = vmax.f32 %v9727_v50, 0.0  ;;  %v9942_v44 = vld [vmem:[#allocation3 + $0x1af] sm:$0xff] }
 0x250   : > { %v10008_v57 = vld [vmem:[#allocation3 + $0x250] sm:$0xff] }
 0x251   : > { %9919 = vst.msk [vmem:[#allocation3 + $0x270] sm:$0xff] %vm920_vm0, %v9785_v34  ;;  %v10036_v59 = vpack.c.bf16 %v10008_v57, %v10007_v56  ;;  %v9929_v56 = vld [vmem:[#allocation3 + $0xe7] sm:$0xff]  ;;  %v9930_v57 = vld [vmem:[#allocation3 + $0xef] sm:$0xff] }
 0x252   : > { %v9731_v10 = vpop.f32.mrb[160].mxu1 }
 0x253   : > { %v9732_v61 = vadd.f32 %v24017_v45, %v9731_v10  ;;  %19461 = vmatmul.mubr.msk.bf16.gmra.mrb[32].mxu0 %vm1491_vm2, %v2240_v58  ;;  %v9733_v62 = vpop.f32.mrb[161].mxu1  ;;  %20341 = vmatmul.mubr.msk.bf16.gmra.mrb[196].mxu1 %vm920_vm0, %v10036_v59  ;;  %v2545_v58 = vpack.c.bf16 %v2509_v54, %v2508_v53  ;;  %v2510_v59 = vld [vmem:[#allocation2 + $0x109] sm:$0xff] }
 0x254   : > { %19464 = vmatprep.mubr.msk.bf16.mxu0 %vm1491_vm2, %v2241_v60  ;;  %v9734_v63 = vpop.f32.mrb[162].mxu1  ;;  %v9969_v62 = vpack.c.bf16 %v9930_v57, %v9929_v56  ;;  %v2525_v56 = vld [vmem:[#allocation2 + $0x1f1] sm:$0xff] }
 0x255   : > { %v9786_v36 = vmax.f32 %v9732_v61, 0.0  ;;  %v9735_v0 = vadd.f32 %v24017_v45, %v9734_v63  ;;  %v9736_v3 = vpop.f32.mrb[163].mxu1  ;;  %v22490_v63 = vld [vmem:[%s26391_s5 + $0x68] sm:$0xff]  }
 0x256   : > { %v10009_v12 = vld [vmem:[#allocation3 + $0x268] sm:$0xff] }
 0x257   : > { %9920 = vst.msk [vmem:[#allocation3 + $0x288] sm:$0xff] %vm920_vm0, %v9786_v36  ;;  %v9787_v6 = vmax.f32 %v9735_v0, 0.0  ;;  %v2546_v36 = vpack.c.bf16 %v2511_v9, %v2510_v59  ;;  %v22493_v0 = vld [vmem:[%s26391_s5 + $0x70] sm:$0xff]  }
 0x258   : > { %v10010_v15 = vld [vmem:[#allocation3 + $0x270] sm:$0xff] }
 0x259   : > { %9921 = vst.msk [vmem:[#allocation3 + $0x290] sm:$0xff] %vm920_vm0, %v9787_v6  ;;  %v10037_v14 = vpack.c.bf16 %v10010_v15, %v10009_v12  ;;  %v2512_v3 = vld [vmem:[#allocation2 + $0x129] sm:$0xff]  ;;  %v2527_v59 = vld [vmem:[#allocation2 + $0x211] sm:$0xff] }
 0x25a   : > { %v9739_v16 = vpop.f32.mrb[164].mxu1  ;;  %v9932_v6 = vld [vmem:[#allocation3 + $0x10f] sm:$0xff]  ;;  %v9931_v15 = vld [vmem:[#allocation3 + $0x107] sm:$0xff] }
 0x25b   : > { %v9740_v17 = vadd.f32 %v24017_v45, %v9739_v16  ;;  %19465 = vmatmul.mubr.msk.bf16.gmra.mrb[36].mxu0 %vm1491_vm2, %v2242_v13  ;;  %v9741_v18 = vpop.f32.mrb[165].mxu1  ;;  %20344 = vmatprep.mubr.msk.bf16.mxu1 %vm920_vm0, %v10037_v14  ;;  %v9934_v12 = vld [vmem:[#allocation3 + $0x12f] sm:$0xff]  ;;  %v2547_v13 = vpack.c.bf16 %v2513_v5, %v2512_v3  ;;  %v24196_v14 = vpack.c.bf16 %v9932_v6, %v9931_v15 }
 0x25c   : > { %19468 = vmatprep.mubr.msk.bf16.mxu0 %vm1491_vm2, %v2243_v40  ;;  %v9742_v20 = vpop.f32.mrb[166].mxu1  ;;  %v24198_v16 = vpack.c.bf16 %v9934_v12, %v9933_v19  ;;  %v22491_v40 = vld [vmem:[%s26395_s9 + $0x48] sm:$0xff]   ;;  %v2529_v3 = vld [vmem:[#allocation2 + $0x231] sm:$0xff] }
 0x25d   : > { %v9788_v26 = vmax.f32 %v9740_v17, 0.0  ;;  %v9743_v27 = vadd.f32 %v24017_v45, %v9742_v20  ;;  %v9744_v28 = vpop.f32.mrb[167].mxu1  ;;  %v24206_v17 = vld [vmem:[%s26391_s5 + $0x78] sm:$0xff]   ;;  %v2516_v18 = vld [vmem:[#allocation2 + $0x169] sm:$0xff] }
 0x25e   : > { %v10011_v22 = vld [vmem:[#allocation3 + $0x288] sm:$0xff]  ;;  %v2517_v20 = vld [vmem:[#allocation2 + $0x171] sm:$0xff] }
 0x25f   : > { %9922 = vst.msk [vmem:[#allocation3 + $0x2a8] sm:$0xff] %vm920_vm0, %v9788_v26  ;;  %v9789_v30 = vmax.f32 %v9743_v27, 0.0  ;;  %v9936_v26 = vld [vmem:[#allocation3 + $0x14f] sm:$0xff]  ;;  %v2549_v55 = vpack.c.bf16 %v2517_v20, %v2516_v18  ;;  %v9947_v12 = vld [vmem:[#allocation3 + $0x207] sm:$0xff] }
 0x260   : > { %v10012_v31 = vld [vmem:[#allocation3 + $0x290] sm:$0xff]  ;;  %v9949_v19 = vld [vmem:[#allocation3 + $0x227] sm:$0xff] }
 0x261   : > { %9923 = vst.msk [vmem:[#allocation3 + $0x2b0] sm:$0xff] %vm920_vm0, %v9789_v30  ;;  %v10038_v33 = vpack.c.bf16 %v10012_v31, %v10011_v22  ;;  %v22492_v27 = vld [vmem:[%s26395_s9 + $0x50] sm:$0xff]   ;;  %v24219_v22 = vpack.c.bf16 %v9936_v26, %v9935_v21  ;;  %v9937_v31 = vld [vmem:[#allocation3 + $0x167] sm:$0xff] }
 0x262   : > { %v9747_v37 = vpop.f32.mrb[168].mxu1  ;;  %v2518_v28 = vld [vmem:[#allocation2 + $0x189] sm:$0xff]  ;;  %v2533_v20 = vld [vmem:[#allocation2 + $0x271] sm:$0xff] }
 0x263   : > { %v9748_v39 = vadd.f32 %v24017_v45, %v9747_v37  ;;  %19469 = vmatmul.mubr.msk.bf16.gmra.mrb[40].mxu0 %vm1491_vm2, %v2244_v32  ;;  %v9749_v24 = vpop.f32.mrb[169].mxu1  ;;  %20345 = vmatmul.mubr.msk.bf16.gmra.mrb[200].mxu1 %vm920_vm0, %v10038_v33  ;;  %v9938_v30 = vld [vmem:[#allocation3 + $0x16f] sm:$0xff]  ;;  %v22494_v33 = vld [vmem:[%s26395_s9 + $0x58] sm:$0xff]  }
 0x264   : > { %19472 = vmatprep.mubr.msk.bf16.mxu0 %vm1491_vm2, %v2245_v38  ;;  %v9750_v23 = vpop.f32.mrb[170].mxu1  ;;  %v24221_v32 = vpack.c.bf16 %v9938_v30, %v9937_v31  ;;  %v2520_v37 = vld [vmem:[#allocation2 + $0x1a9] sm:$0xff]  ;;  %v2521_v24 = vld [vmem:[#allocation2 + $0x1b1] sm:$0xff] }
 0x265   : > { %v9790_v41 = vmax.f32 %v9748_v39, 0.0  ;;  %v9751_v25 = vadd.f32 %v24017_v45, %v9750_v23  ;;  %v9752_v42 = vpop.f32.mrb[171].mxu1  ;;  %v9940_v23 = vld [vmem:[#allocation3 + $0x18f] sm:$0xff]  ;;  %v9951_v30 = vld [vmem:[#allocation3 + $0x247] sm:$0xff] }
 0x266   : > { %v10013_v49 = vld [vmem:[#allocation3 + $0x2a8] sm:$0xff] }
 0x267   : > { %9924 = vst.msk [vmem:[#allocation3 + $0x2c8] sm:$0xff] %vm920_vm0, %v9790_v41  ;;  %v9791_v47 = vmax.f32 %v9751_v25, 0.0  ;;  %v24236_v41 = vld [vmem:[%s26395_s9 + $0x60] sm:$0xff]   ;;  %v2522_v42 = vld [vmem:[#allocation2 + $0x1c9] sm:$0xff] }
 0x268   : > { %v10014_v50 = vld [vmem:[#allocation3 + $0x2b0] sm:$0xff]  ;;  %v2552_v53 = vpack.c.bf16 %v2523_v43, %v2522_v42  ;;  %v9953_v31 = vld [vmem:[#allocation3 + $0x267] sm:$0xff] }
 0x269   : > { %9925 = vst.msk [vmem:[#allocation3 + $0x2d0] sm:$0xff] %vm920_vm0, %v9791_v47  ;;  %v10039_v34 = vpack.c.bf16 %v10014_v50, %v10013_v49  ;;  %v9939_v49 = vld [vmem:[#allocation3 + $0x187] sm:$0xff]  ;;  %v2551_v50 = vpack.c.bf16 %v2521_v24, %v2520_v37  ;;  %v9944_v57 = vld [vmem:[#allocation3 + $0x1cf] sm:$0xff] }
 0x26a   : > { %v9755_v35 = vpop.f32.mrb[172].mxu1  ;;  %v9946_v9 = vld [vmem:[#allocation3 + $0x1ef] sm:$0xff] }
 0x26b   : > { %19473 = vmatmul.mubr.msk.bf16.gmra.mrb[44].mxu0 %vm1491_vm2, %v2246_v52  ;;  %20348 = vmatprep.mubr.msk.bf16.mxu1 %vm920_vm0, %v10039_v34  ;;  %v9756_v38 = vadd.f32 %v24017_v45, %v9755_v35  ;;  %v9757_v39 = vpop.f32.mrb[173].mxu1  ;;  %v9941_v52 = vld [vmem:[#allocation3 + $0x1a7] sm:$0xff]  ;;  %v9948_v5 = vld [vmem:[#allocation3 + $0x20f] sm:$0xff] }
 0x26c   : > { %19482 = vmatprep.mubr.msk.bf16.mxu0 %vm1491_vm2, %v2544_v51  ;;  %v9758_v25 = vpop.f32.mrb[174].mxu1  ;;  %v24239_v51 = vpack.c.bf16 %v9940_v23, %v9939_v49  ;;  %v24242_v54 = vpack.c.bf16 %v9942_v44, %v9941_v52  ;;  %v2530_v6 = vld [vmem:[#allocation2 + $0x249] sm:$0xff]  ;;  %v2820_v37 = vld [vmem:[#allocation2 + $0xd2] sm:$0xff] }
 0x26d   : > { %v9792_v46 = vmax.f32 %v9756_v38, 0.0  ;;  %v9759_v47 = vadd.f32 %v24017_v45, %v9758_v25  ;;  %v9760_v48 = vpop.f32.mrb[175].mxu1  ;;  %v2524_v45 = vld [vmem:[#allocation2 + $0x1e9] sm:$0xff]  ;;  %v2537_v39 = vld [vmem:[#allocation2 + $0x2b1] sm:$0xff] }
 0x26e   : > { %v10015_v10 = vld [vmem:[#allocation3 + $0x2c8] sm:$0xff]  ;;  %v2822_v49 = vld [vmem:[#allocation2 + $0xf2] sm:$0xff] }
 0x26f   : > { %9926 = vst.msk [vmem:[#allocation3 + $0x2e8] sm:$0xff] %vm920_vm0, %v9792_v46  ;;  %v9793_v34 = vmax.f32 %v9759_v47, 0.0  ;;  %v2532_v18 = vld [vmem:[#allocation2 + $0x269] sm:$0xff] }
 0x270   : > { %v10016_v60 = vld [vmem:[#allocation3 + $0x2d0] sm:$0xff]  ;;  %v2557_v21 = vpack.c.bf16 %v2533_v20, %v2532_v18  ;;  %v9955_v25 = vld [vmem:[#allocation3 + $0x287] sm:$0xff] }
 0x271   : > { %v10040_v61 = vpack.c.bf16 %v10016_v60, %v10015_v10  ;;  %9927 = vst.msk [vmem:[#allocation3 + $0x2f0] sm:$0xff] %vm920_vm0, %v9793_v34  ;;  %v9943_v10 = vld [vmem:[#allocation3 + $0x1c7] sm:$0xff]  ;;  %v2553_v60 = vpack.c.bf16 %v2525_v56, %v2524_v45  ;;  %v9952_v26 = vld [vmem:[#allocation3 + $0x24f] sm:$0xff] }
 0x272   : > { %v2819_v35 = vld [vmem:[#allocation2 + $0xca] sm:$0xff]  ;;  %v2824_v56 = vld [vmem:[#allocation2 + $0x112] sm:$0xff] }
 0x273   : > { %19483 = vmatmul.mubr.msk.bf16.vlgmr.msra.gmra.mrb[16].mxu0 %vm1491_vm2, %v2545_v58  ;;  %20349 = vmatmul.mubr.msk.bf16.gmra.mrb[204].mxu1 %vm920_vm0, %v10040_v61  ;;  %v2526_v58 = vld [vmem:[#allocation2 + $0x209] sm:$0xff]  ;;  %v24252_v61 = vpack.c.bf16 %v9944_v57, %v9943_v10  ;;  %v2857_v42 = vpack.c.bf16 %v2820_v37, %v2819_v35  ;;  %v10508_v34 = vld [vmem:[#allocation3 + $0xf1] sm:$0xff] }
 0x274   : > { %19486 = vmatprep.mubr.msk.bf16.mxu0 %vm1491_vm2, %v2546_v36  ;;  %19515 = vmatpush3.bf16.msra.mxu0 %v24137_v4  ;;  %v2548_v4 = vpack.c.bf16 %v2515_v11, %v2514_v7  ;;  %v2531_v7 = vld [vmem:[#allocation2 + $0x251] sm:$0xff]  ;;  %v2536_v38 = vld [vmem:[#allocation2 + $0x2a9] sm:$0xff] }
 0x275   : > { %20360 = vmatprep.mubr.msk.bf16.mxu1 %vm920_vm0, %v9969_v62  ;;  %19516 = vmatprep.subr.bf16.mxu0 %v22490_v63  ;;  %v9945_v62 = vld [vmem:[#allocation3 + $0x1e7] sm:$0xff]  ;;  %v9950_v11 = vld [vmem:[#allocation3 + $0x22f] sm:$0xff]  ;;  %v2559_v43 = vpack.c.bf16 %v2537_v39, %v2536_v38  ;;  %v22501_v39 = vld [vmem:[%s26395_s9 + $0x78] sm:$0xff]  }
 0x276   : > { %v24254_v36 = vpack.c.bf16 %v9946_v9, %v9945_v62  ;;  %v9956_v24 = vld [vmem:[#allocation3 + $0x28f] sm:$0xff]  ;;  %v9957_v46 = vld [vmem:[#allocation3 + $0x2a7] sm:$0xff] }
 0x277   : > { %v9958_v23 = vld [vmem:[#allocation3 + $0x2af] sm:$0xff]  ;;  %v24282_v44 = vpack.c.bf16 %v9956_v24, %v9955_v25  ;;  %v9959_v57 = vld [vmem:[#allocation3 + $0x2c7] sm:$0xff] }
 0x278   : > { %19517 = vmatpush3.bf16.msra.mxu0 %v22490_v63  ;;  %v2554_v63 = vpack.c.bf16 %v2527_v59, %v2526_v58  ;;  %v24284_v47 = vpack.c.bf16 %v9958_v23, %v9957_v46  ;;  %v2821_v48 = vld [vmem:[#allocation2 + $0xea] sm:$0xff]  ;;  %v22497_v9 = vld [vmem:[%s26391_s5 + $0x80] sm:$0xff]   ;;  %v2826_v62 = vld [vmem:[#allocation2 + $0x132] sm:$0xff] }
 0x279   : > { %19518 = vmatprep.subr.bf16.mxu0 %v22493_v0  ;;  %v10507_v52 = vld [vmem:[#allocation3 + $0xe9] sm:$0xff]  ;;  %v2834_v23 = vld [vmem:[#allocation2 + $0x1b2] sm:$0xff]  ;;  %v24345_v46 = vld [vmem:[%s26395_s9 + $0x80] sm:$0xff]  }
 0x27a   : > { %v2823_v45 = vld [vmem:[#allocation2 + $0x10a] sm:$0xff]  ;;  %v10547_v59 = vpack.c.bf16 %v10508_v34, %v10507_v52 }
 0x27b   : > { %19487 = vmatmul.mubr.msk.bf16.gmra.mrb[20].mxu0 %vm1491_vm2, %v2547_v13  ;;  %20361 = vmatmul.mubr.msk.bf16.vlgmr.msra.gmra.mrb[176].mxu1 %vm920_vm0, %v24196_v14  ;;  %v24262_v13 = vpack.c.bf16 %v9948_v5, %v9947_v12  ;;  %v2859_v10 = vpack.c.bf16 %v2824_v56, %v2823_v45  ;;  %v2827_v5 = vld [vmem:[#allocation2 + $0x14a] sm:$0xff] }
 0x27c   : > { %19490 = vmatprep.mubr.msk.bf16.mxu0 %vm1491_vm2, %v2548_v4  ;;  %20364 = vmatprep.mubr.msk.bf16.mxu1 %vm920_vm0, %v24198_v16  ;;  %v2556_v4 = vpack.c.bf16 %v2531_v7, %v2530_v6  ;;  %v2828_v6 = vld [vmem:[#allocation2 + $0x152] sm:$0xff]  ;;  %v10511_v7 = vld [vmem:[#allocation3 + $0x129] sm:$0xff] }
 0x27d   : > { %20393 = vmatpush3.bf16.msra.mxu1 %v24087_v2  ;;  %19519 = vmatpush3.bf16.msra.mxu0 %v22493_v0  ;;  %v2550_v2 = vpack.c.bf16 %v2519_v29, %v2518_v28  ;;  %v2528_v0 = vld [vmem:[#allocation2 + $0x229] sm:$0xff]  ;;  %v2535_v28 = vld [vmem:[#allocation2 + $0x291] sm:$0xff] }
 0x27e   : > { %20394 = vmatprep.subr.bf16.mxu1 %v22491_v40  ;;  %19552 = vmatprep.subr.bf16.mxu0 %v24206_v17  ;;  %v2555_v15 = vpack.c.bf16 %v2529_v3, %v2528_v0  ;;  %v9954_v29 = vld [vmem:[#allocation3 + $0x26f] sm:$0xff] }
 0x27f   : > { %v10509_v0 = vld [vmem:[#allocation3 + $0x109] sm:$0xff]  ;;  %v10510_v3 = vld [vmem:[#allocation3 + $0x111] sm:$0xff] }
 0x280   : > { %v24316_v18 = vld [vmem:[%s26391_s5 + $0x90] sm:$0xff]  }
 0x281   : > { %20395 = vmatpush3.bf16.msra.mxu1 %v22491_v40  ;;  %v24264_v40 = vpack.c.bf16 %v9950_v11, %v9949_v19  ;;  %v10512_v11 = vld [vmem:[#allocation3 + $0x131] sm:$0xff] }
 0x282   : > { %20396 = vmatprep.subr.bf16.mxu1 %v22492_v27  ;;  %v24308_v19 = vpack.c.bf16 %v10512_v11, %v10511_v7  ;;  %v2829_v20 = vld [vmem:[#allocation2 + $0x16a] sm:$0xff]  ;;  %v2842_v11 = vld [vmem:[#allocation2 + $0x232] sm:$0xff] }
 0x283   : > { %19491 = vmatmul.mubr.msk.bf16.gmra.mrb[24].mxu0 %vm1491_vm2, %v2549_v55  ;;  %20365 = vmatmul.mubr.msk.bf16.gmra.mrb[180].mxu1 %vm920_vm0, %v24219_v22  ;;  %v24272_v55 = vpack.c.bf16 %v9952_v26, %v9951_v30  ;;  %v2830_v26 = vld [vmem:[#allocation2 + $0x172] sm:$0xff]  ;;  %v2833_v24 = vld [vmem:[#allocation2 + $0x1aa] sm:$0xff] }
 0x284   : > { %19494 = vmatprep.mubr.msk.bf16.mxu0 %vm1491_vm2, %v2550_v2  ;;  %20368 = vmatprep.mubr.msk.bf16.mxu1 %vm920_vm0, %v24221_v32  ;;  %v22499_v30 = vld [vmem:[%s26395_s9 + $0x70] sm:$0xff]   ;;  %v2862_v35 = vpack.c.bf16 %v2830_v26, %v2829_v20  ;;  %v2864_v52 = vpack.c.bf16 %v2834_v23, %v2833_v24 }
 0x285   : > { %20397 = vmatpush3.bf16.msra.mxu1 %v22492_v27  ;;  %v2534_v27 = vld [vmem:[#allocation2 + $0x289] sm:$0xff]  ;;  %v2844_v20 = vld [vmem:[#allocation2 + $0x252] sm:$0xff] }
 0x286   : > { %20398 = vmatprep.subr.bf16.mxu1 %v22494_v33  ;;  %v2558_v2 = vpack.c.bf16 %v2535_v28, %v2534_v27  ;;  %v2831_v27 = vld [vmem:[#allocation2 + $0x18a] sm:$0xff]  ;;  %v2848_v24 = vld [vmem:[#allocation2 + $0x292] sm:$0xff] }
 0x287   : > { %v10513_v28 = vld [vmem:[#allocation3 + $0x149] sm:$0xff] }
 0x288   : > { %v2835_v25 = vld [vmem:[#allocation2 + $0x1ca] sm:$0xff] }
 0x289   : > { %20399 = vmatpush3.bf16.msra.mxu1 %v22494_v33  ;;  %v24274_v33 = vpack.c.bf16 %v9954_v29, %v9953_v31  ;;  %v10514_v29 = vld [vmem:[#allocation3 + $0x151] sm:$0xff]  ;;  %v10515_v31 = vld [vmem:[#allocation3 + $0x169] sm:$0xff] }
 0x28a   : > { %20432 = vmatprep.subr.bf16.mxu1 %v24236_v41  ;;  %v24329_v37 = vpack.c.bf16 %v10514_v29, %v10513_v28  ;;  %v2837_v56 = vld [vmem:[#allocation2 + $0x1ea] sm:$0xff] }
 0x28b   : > { %19495 = vmatmul.mubr.msk.bf16.gmra.mrb[28].mxu0 %vm1491_vm2, %v2551_v50  ;;  %20369 = vmatmul.mubr.msk.bf16.gmra.mrb[184].mxu1 %vm920_vm0, %v24239_v51  ;;  %v9960_v50 = vld [vmem:[#allocation3 + $0x2cf] sm:$0xff] }
 0x28c   : > { %19498 = vmatprep.mubr.msk.bf16.mxu0 %vm1491_vm2, %v2552_v53  ;;  %20372 = vmatprep.mubr.msk.bf16.mxu1 %vm920_vm0, %v24242_v54  ;;  %v2858_v53 = vpack.c.bf16 %v2822_v49, %v2821_v48  ;;  %v24292_v58 = vpack.c.bf16 %v9960_v50, %v9959_v57  ;;  %v2836_v48 = vld [vmem:[#allocation2 + $0x1d2] sm:$0xff]  ;;  %v10519_v49 = vld [vmem:[#allocation3 + $0x1a9] sm:$0xff] }
 0x28d   : > { %v10520_v50 = vld [vmem:[#allocation3 + $0x1b1] sm:$0xff]  ;;  %v10527_v26 = vld [vmem:[#allocation3 + $0x229] sm:$0xff] }
 0x28e   : > { %v24349_v45 = vpack.c.bf16 %v10520_v50, %v10519_v49  ;;  %v2838_v57 = vld [vmem:[#allocation2 + $0x1f2] sm:$0xff]  ;;  %v2841_v7 = vld [vmem:[#allocation2 + $0x22a] sm:$0xff] }
 0x28f   : > { %v2868_v28 = vpack.c.bf16 %v2842_v11, %v2841_v7  ;;  %v10531_v23 = vld [vmem:[#allocation3 + $0x269] sm:$0xff]  ;;  %v10538_v11 = vld [vmem:[#allocation3 + $0x2d1] sm:$0xff] }
 0x290   : > { %v2849_v50 = vld [vmem:[#allocation2 + $0x2aa] sm:$0xff] }
 0x291   : > { %v10537_v7 = vld [vmem:[#allocation3 + $0x2c9] sm:$0xff] }
 0x293   : > { %19499 = vmatmul.mubr.msk.bf16.gmra.mrb[32].mxu0 %vm1491_vm2, %v2553_v60  ;;  %20373 = vmatmul.mubr.msk.bf16.gmra.mrb[188].mxu1 %vm920_vm0, %v24252_v61  ;;  %v2825_v60 = vld [vmem:[#allocation2 + $0x12a] sm:$0xff] }
 0x294   : > { %19502 = vmatprep.mubr.msk.bf16.mxu0 %vm1491_vm2, %v2554_v63  ;;  %20376 = vmatprep.mubr.msk.bf16.mxu1 %vm920_vm0, %v24254_v36  ;;  %v22500_v63 = vld [vmem:[%s26391_s5 + $0x88] sm:$0xff]   ;;  %v2860_v12 = vpack.c.bf16 %v2826_v62, %v2825_v60  ;;  %v2840_v60 = vld [vmem:[#allocation2 + $0x212] sm:$0xff] }
 0x295   : > { %v10523_v62 = vld [vmem:[#allocation3 + $0x1e9] sm:$0xff] }
 0x29b   : > { %19503 = vmatmul.mubr.msk.bf16.gmra.mrb[36].mxu0 %vm1491_vm2, %v2555_v15  ;;  %20377 = vmatmul.mubr.msk.bf16.gmra.mrb[192].mxu1 %vm920_vm0, %v24262_v13  ;;  %v24306_v15 = vpack.c.bf16 %v10510_v3, %v10509_v0  ;;  %v2866_v0 = vpack.c.bf16 %v2838_v57, %v2837_v56  ;;  %v2850_v56 = vld [vmem:[#allocation2 + $0x2b2] sm:$0xff]  ;;  %v10533_v57 = vld [vmem:[#allocation3 + $0x289] sm:$0xff] }
 0x29c   : > { %19506 = vmatprep.mubr.msk.bf16.mxu0 %vm1491_vm2, %v2556_v4  ;;  %20380 = vmatprep.mubr.msk.bf16.mxu1 %vm920_vm0, %v24264_v40  ;;  %v22498_v4 = vld [vmem:[%s26395_s9 + $0x68] sm:$0xff]  }
 0x2a3   : > { %19507 = vmatmul.mubr.msk.bf16.gmra.mrb[40].mxu0 %vm1491_vm2, %v2557_v21  ;;  %20381 = vmatmul.mubr.msk.bf16.gmra.mrb[196].mxu1 %vm920_vm0, %v24272_v55  ;;  %v2832_v21 = vld [vmem:[#allocation2 + $0x192] sm:$0xff] }
 0x2a4   : > { %19510 = vmatprep.mubr.msk.bf16.mxu0 %vm1491_vm2, %v2558_v2  ;;  %20384 = vmatprep.mubr.msk.bf16.mxu1 %vm920_vm0, %v24274_v33  ;;  %v10516_v2 = vld [vmem:[#allocation3 + $0x171] sm:$0xff] }
 0x2a5   : > { %v24331_v38 = vpack.c.bf16 %v10516_v2, %v10515_v31  ;;  %v2845_v31 = vld [vmem:[#allocation2 + $0x26a] sm:$0xff]  ;;  %v2846_v2 = vld [vmem:[#allocation2 + $0x272] sm:$0xff] }
 0x2ab   : > { %19511 = vmatmul.mubr.msk.bf16.gmra.mrb[44].mxu0 %vm1491_vm2, %v2559_v43  ;;  %20385 = vmatmul.mubr.msk.bf16.gmra.mrb[200].mxu1 %vm920_vm0, %v24282_v44  ;;  %v10518_v43 = vld [vmem:[#allocation3 + $0x191] sm:$0xff] }
 0x2ac   : > { %20388 = vmatprep.mubr.msk.bf16.mxu1 %vm920_vm0, %v24284_v47  ;;  %19520 = vmatprep.mubr.msk.bf16.mxu0 %vm1491_vm2, %v2857_v42  ;;  %v10517_v42 = vld [vmem:[#allocation3 + $0x189] sm:$0xff] }
 0x2ad   : > { %v24347_v34 = vpack.c.bf16 %v10518_v43, %v10517_v42  ;;  %v2870_v42 = vpack.c.bf16 %v2846_v2, %v2845_v31  ;;  %v22507_v31 = vld [vmem:[%s26391_s5 + $0xa0] sm:$0xff]   ;;  %v3142_v2 = vld [vmem:[#allocation2 + $0x16e] sm:$0xff] }
 0x2b3   : > { %19521 = vmatmul.mubr.msk.bf16.vlgmr.msra.gmra.mrb[16].mxu0 %vm1491_vm2, %v2858_v53  ;;  %20389 = vmatmul.mubr.msk.bf16.gmra.mrb[204].mxu1 %vm920_vm0, %v24292_v58  ;;  %v2865_v53 = vpack.c.bf16 %v2836_v48, %v2835_v25  ;;  %v10532_v25 = vld [vmem:[#allocation3 + $0x271] sm:$0xff] }
 0x2b4   : > { %19524 = vmatprep.mubr.msk.bf16.mxu0 %vm1491_vm2, %v2859_v10  ;;  %19553 = vmatpush3.bf16.msra.mxu0 %v24206_v17  ;;  %v2861_v17 = vpack.c.bf16 %v2828_v6, %v2827_v5  ;;  %v2839_v10 = vld [vmem:[#allocation2 + $0x20a] sm:$0xff]  ;;  %v24380_v49 = vpack.c.bf16 %v10532_v25, %v10531_v23 }
 0x2b5   : > { %20400 = vmatprep.mubr.msk.bf16.mxu1 %vm920_vm0, %v10547_v59  ;;  %19554 = vmatprep.subr.bf16.mxu0 %v22497_v9  ;;  %v10521_v59 = vld [vmem:[#allocation3 + $0x1c9] sm:$0xff]  ;;  %v2867_v5 = vpack.c.bf16 %v2840_v60, %v2839_v10  ;;  %v10536_v10 = vld [vmem:[#allocation3 + $0x2b1] sm:$0xff] }
 0x2b6   : > { %v22505_v23 = vld [vmem:[%s26395_s9 + $0x88] sm:$0xff]   ;;  %v22506_v25 = vld [vmem:[%s26395_s9 + $0x90] sm:$0xff]  }
 0x2b8   : > { %19555 = vmatpush3.bf16.msra.mxu0 %v22497_v9  ;;  %v10522_v9 = vld [vmem:[#allocation3 + $0x1d1] sm:$0xff] }
 0x2b9   : > { %19556 = vmatprep.subr.bf16.mxu0 %v22500_v63  ;;  %v24358_v3 = vpack.c.bf16 %v10522_v9, %v10521_v59  ;;  %v10534_v59 = vld [vmem:[#allocation3 + $0x291] sm:$0xff]  ;;  %v10535_v9 = vld [vmem:[#allocation3 + $0x2a9] sm:$0xff] }
 0x2bb   : > { %19525 = vmatmul.mubr.msk.bf16.gmra.mrb[20].mxu0 %vm1491_vm2, %v2860_v12  ;;  %20401 = vmatmul.mubr.msk.bf16.vlgmr.msra.gmra.mrb[176].mxu1 %vm920_vm0, %v24306_v15  ;;  %v10525_v12 = vld [vmem:[#allocation3 + $0x209] sm:$0xff] }
 0x2bc   : > { %19528 = vmatprep.mubr.msk.bf16.mxu0 %vm1491_vm2, %v2861_v17  ;;  %20404 = vmatprep.mubr.msk.bf16.mxu1 %vm920_vm0, %v24308_v19  ;;  %v10526_v17 = vld [vmem:[#allocation3 + $0x211] sm:$0xff] }
 0x2bd   : > { %20433 = vmatpush3.bf16.msra.mxu1 %v24236_v41  ;;  %19557 = vmatpush3.bf16.msra.mxu0 %v22500_v63  ;;  %v2863_v41 = vpack.c.bf16 %v2832_v21, %v2831_v27  ;;  %v10524_v63 = vld [vmem:[#allocation3 + $0x1f1] sm:$0xff]  ;;  %v24368_v29 = vpack.c.bf16 %v10526_v17, %v10525_v12  ;;  %v3135_v17 = vld [vmem:[#allocation2 + $0x106] sm:$0xff] }
 0x2be   : > { %20434 = vmatprep.subr.bf16.mxu1 %v22498_v4  ;;  %19590 = vmatprep.subr.bf16.mxu0 %v24316_v18  ;;  %v24360_v6 = vpack.c.bf16 %v10524_v63, %v10523_v62  ;;  %v10528_v27 = vld [vmem:[#allocation3 + $0x231] sm:$0xff]  ;;  %v2872_v62 = vpack.c.bf16 %v2850_v56, %v2849_v50  ;;  %v24388_v63 = vpack.c.bf16 %v10534_v59, %v10533_v57  ;;  %v3147_v57 = vld [vmem:[#allocation2 + $0x1c6] sm:$0xff] }
 0x2bf   : > { %v24370_v21 = vpack.c.bf16 %v10528_v27, %v10527_v26  ;;  %v3138_v12 = vld [vmem:[#allocation2 + $0x12e] sm:$0xff]  ;;  %v3137_v26 = vld [vmem:[#allocation2 + $0x126] sm:$0xff] }
 0x2c0   : > { %v3173_v27 = vpack.c.bf16 %v3138_v12, %v3137_v26  ;;  %v3150_v56 = vld [vmem:[#allocation2 + $0x1ee] sm:$0xff]  ;;  %v3155_v12 = vld [vmem:[#allocation2 + $0x246] sm:$0xff] }
 0x2c1   : > { %20435 = vmatpush3.bf16.msra.mxu1 %v22498_v4  ;;  %v2843_v4 = vld [vmem:[#allocation2 + $0x24a] sm:$0xff] }
 0x2c2   : > { %20436 = vmatprep.subr.bf16.mxu1 %v22499_v30  ;;  %v3162_v26 = vld [vmem:[#allocation2 + $0x2ae] sm:$0xff] }
 0x2c3   : > { %19529 = vmatmul.mubr.msk.bf16.gmra.mrb[24].mxu0 %vm1491_vm2, %v2862_v35  ;;  %20405 = vmatmul.mubr.msk.bf16.gmra.mrb[180].mxu1 %vm920_vm0, %v24329_v37  ;;  %v10529_v35 = vld [vmem:[#allocation3 + $0x249] sm:$0xff] }
 0x2c4   : > { %19532 = vmatprep.mubr.msk.bf16.mxu0 %vm1491_vm2, %v2863_v41  ;;  %20408 = vmatprep.mubr.msk.bf16.mxu1 %vm920_vm0, %v24331_v38  ;;  %v10530_v41 = vld [vmem:[#allocation3 + $0x251] sm:$0xff] }
 0x2c5   : > { %20437 = vmatpush3.bf16.msra.mxu1 %v22499_v30  ;;  %v2869_v30 = vpack.c.bf16 %v2844_v20, %v2843_v4  ;;  %v24378_v43 = vpack.c.bf16 %v10530_v41, %v10529_v35  ;;  %v24398_v20 = vpack.c.bf16 %v10538_v11, %v10537_v7  ;;  %v3139_v35 = vld [vmem:[#allocation2 + $0x146] sm:$0xff]  ;;  %v3158_v11 = vld [vmem:[#allocation2 + $0x26e] sm:$0xff] }
 0x2c6   : > { %20438 = vmatprep.subr.bf16.mxu1 %v22501_v39 }
 0x2c9   : > { %20439 = vmatpush3.bf16.msra.mxu1 %v22501_v39  ;;  %v2847_v39 = vld [vmem:[#allocation2 + $0x28a] sm:$0xff] }
 0x2ca   : > { %20472 = vmatprep.subr.bf16.mxu1 %v24345_v46  ;;  %v2871_v48 = vpack.c.bf16 %v2848_v24, %v2847_v39  ;;  %v3141_v39 = vld [vmem:[#allocation2 + $0x166] sm:$0xff] }
 0x2cb   : > { %19533 = vmatmul.mubr.msk.bf16.gmra.mrb[28].mxu0 %vm1491_vm2, %v2864_v52  ;;  %20409 = vmatmul.mubr.msk.bf16.gmra.mrb[184].mxu1 %vm920_vm0, %v24347_v34  ;;  %v3133_v52 = vld [vmem:[#allocation2 + $0xe6] sm:$0xff]  ;;  %v3175_v24 = vpack.c.bf16 %v3142_v2, %v3141_v39  ;;  %v3164_v2 = vld [vmem:[#allocation2 + $0x2ce] sm:$0xff] }
 0x2cc   : > { %19536 = vmatprep.mubr.msk.bf16.mxu0 %vm1491_vm2, %v2865_v53  ;;  %20412 = vmatprep.mubr.msk.bf16.mxu1 %vm920_vm0, %v24349_v45  ;;  %v3134_v53 = vld [vmem:[#allocation2 + $0xee] sm:$0xff] }
 0x2cd   : > { %v3171_v60 = vpack.c.bf16 %v3134_v53, %v3133_v52  ;;  %v24444_v53 = vld [vmem:[%s26395_s9 + $0xa0] sm:$0xff]  }
 0x2ce   : > { %v10858_v39 = vld [vmem:[#allocation3 + $0x2e7] sm:$0xff] }
 0x2d3   : > { %19537 = vmatmul.mubr.msk.bf16.gmra.mrb[32].mxu0 %vm1491_vm2, %v2866_v0  ;;  %20413 = vmatmul.mubr.msk.bf16.gmra.mrb[188].mxu1 %vm920_vm0, %v24358_v3  ;;  %v24390_v0 = vpack.c.bf16 %v10536_v10, %v10535_v9  ;;  %v3149_v9 = vld [vmem:[#allocation2 + $0x1e6] sm:$0xff] }
 0x2d4   : > { %19540 = vmatprep.mubr.msk.bf16.mxu0 %vm1491_vm2, %v2867_v5  ;;  %20416 = vmatprep.mubr.msk.bf16.mxu1 %vm920_vm0, %v24360_v6  ;;  %v3136_v5 = vld [vmem:[#allocation2 + $0x10e] sm:$0xff]  ;;  %v3179_v10 = vpack.c.bf16 %v3150_v56, %v3149_v9 }
 0x2d5   : > { %v3172_v4 = vpack.c.bf16 %v3136_v5, %v3135_v17  ;;  %v3153_v5 = vld [vmem:[#allocation2 + $0x226] sm:$0xff]  ;;  %v3455_v56 = vld [vmem:[#allocation2 + $0x16f] sm:$0xff] }
 0x2d6   : > { %v3157_v17 = vld [vmem:[#allocation2 + $0x266] sm:$0xff] }
 0x2d7   : > { %v11151_v9 = vld [vmem:[#allocation3 + $0x128] sm:$0xff] }
 0x2db   : > { %19541 = vmatmul.mubr.msk.bf16.gmra.mrb[36].mxu0 %vm1491_vm2, %v2868_v28  ;;  %20417 = vmatmul.mubr.msk.bf16.gmra.mrb[192].mxu1 %vm920_vm0, %v24368_v29  ;;  %v22504_v28 = vld [vmem:[%s26391_s5 + $0x98] sm:$0xff]  }
 0x2dc   : > { %19544 = vmatprep.mubr.msk.bf16.mxu0 %vm1491_vm2, %v2869_v30  ;;  %20420 = vmatprep.mubr.msk.bf16.mxu1 %vm920_vm0, %v24370_v21  ;;  %v3140_v30 = vld [vmem:[#allocation2 + $0x14e] sm:$0xff] }
 0x2dd   : > { %v3174_v41 = vpack.c.bf16 %v3140_v30, %v3139_v35 }
 0x2e3   : > { %19545 = vmatmul.mubr.msk.bf16.gmra.mrb[40].mxu0 %vm1491_vm2, %v2870_v42  ;;  %20421 = vmatmul.mubr.msk.bf16.gmra.mrb[196].mxu1 %vm920_vm0, %v24378_v43  ;;  %v3146_v42 = vld [vmem:[#allocation2 + $0x1ae] sm:$0xff] }
 0x2e4   : > { %19548 = vmatprep.mubr.msk.bf16.mxu0 %vm1491_vm2, %v2871_v48  ;;  %20424 = vmatprep.mubr.msk.bf16.mxu1 %vm920_vm0, %v24380_v49  ;;  %v3143_v48 = vld [vmem:[#allocation2 + $0x186] sm:$0xff] }
 0x2eb   : > { %19549 = vmatmul.mubr.msk.bf16.gmra.mrb[44].mxu0 %vm1491_vm2, %v2872_v62  ;;  %20425 = vmatmul.mubr.msk.bf16.gmra.mrb[200].mxu1 %vm920_vm0, %v24388_v63 }
 0x2ec   : > { %20428 = vmatprep.mubr.msk.bf16.mxu1 %vm920_vm0, %v24390_v0  ;;  %19558 = vmatprep.mubr.msk.bf16.mxu0 %vm1491_vm2, %v3171_v60  ;;  %v3151_v60 = vld [vmem:[#allocation2 + $0x206] sm:$0xff] }
 0x2f3   : > { %19559 = vmatmul.mubr.msk.bf16.vlgmr.msra.gmra.mrb[16].mxu0 %vm1491_vm2, %v3172_v4  ;;  %20429 = vmatmul.mubr.msk.bf16.gmra.mrb[204].mxu1 %vm920_vm0, %v24398_v20  ;;  %v3183_v4 = vpack.c.bf16 %v3158_v11, %v3157_v17  ;;  %v11156_v11 = vld [vmem:[#allocation3 + $0x170] sm:$0xff] }
 0x2f4   : > { %19562 = vmatprep.mubr.msk.bf16.mxu0 %vm1491_vm2, %v3173_v27  ;;  %20440 = vmatprep.mubr.msk.bf16.mxu1 %vm920_vm0, %v24196_v14  ;;  %v24419_v14 = vld [vmem:[%s26391_s5 + $0xa8] sm:$0xff]   ;;  %v11158_v17 = vld [vmem:[#allocation3 + $0x190] sm:$0xff] }
 0x2f5   : > { %19591 = vmatpush3.bf16.msra.mxu0 %v24316_v18  ;;  %v3144_v18 = vld [vmem:[#allocation2 + $0x18e] sm:$0xff]  ;;  %v3159_v27 = vld [vmem:[#allocation2 + $0x286] sm:$0xff] }
 0x2f6   : > { %19592 = vmatprep.subr.bf16.mxu0 %v22504_v28  ;;  %v3176_v50 = vpack.c.bf16 %v3144_v18, %v3143_v48  ;;  %v3448_v18 = vld [vmem:[#allocation2 + $0x107] sm:$0xff] }
 0x2f7   : > { %v3450_v48 = vld [vmem:[#allocation2 + $0x127] sm:$0xff] }
 0x2f9   : > { %19593 = vmatpush3.bf16.msra.mxu0 %v22504_v28  ;;  %v3161_v28 = vld [vmem:[#allocation2 + $0x2a6] sm:$0xff] }
 0x2fa   : > { %19594 = vmatprep.subr.bf16.mxu0 %v22507_v31  ;;  %v3185_v30 = vpack.c.bf16 %v3162_v26, %v3161_v28  ;;  %v11157_v28 = vld [vmem:[#allocation3 + $0x188] sm:$0xff] }
 0x2fb   : > { %19563 = vmatmul.mubr.msk.bf16.gmra.mrb[20].mxu0 %vm1491_vm2, %v3174_v41  ;;  %20441 = vmatmul.mubr.msk.bf16.vlgmr.msra.gmra.mrb[176].mxu1 %vm920_vm0, %v24198_v16  ;;  %v3145_v16 = vld [vmem:[#allocation2 + $0x1a6] sm:$0xff] }
 0x2fc   : > { %19566 = vmatprep.mubr.msk.bf16.mxu0 %vm1491_vm2, %v3175_v24  ;;  %20444 = vmatprep.mubr.msk.bf16.mxu1 %vm920_vm0, %v24219_v22  ;;  %v3177_v52 = vpack.c.bf16 %v3146_v42, %v3145_v16  ;;  %v22508_v22 = vld [vmem:[%s26395_s9 + $0x98] sm:$0xff]   ;;  %v10859_v24 = vld [vmem:[#allocation3 + $0x2ef] sm:$0xff] }
 0x2fd   : > { %20473 = vmatpush3.bf16.msra.mxu1 %v24345_v46  ;;  %19595 = vmatpush3.bf16.msra.mxu0 %v22507_v31  ;;  %v3148_v46 = vld [vmem:[#allocation2 + $0x1ce] sm:$0xff]  ;;  %v24477_v42 = vpack.c.bf16 %v10859_v24, %v10858_v39 }
 0x2fe   : > { %20474 = vmatprep.subr.bf16.mxu1 %v22505_v23  ;;  %19628 = vmatprep.subr.bf16.mxu0 %v24419_v14  ;;  %v3178_v59 = vpack.c.bf16 %v3148_v46, %v3147_v57  ;;  %v3447_v31 = vld [vmem:[#allocation2 + $0xef] sm:$0xff]  ;;  %v22514_v46 = vld [vmem:[%s26391_s5 + $0xb8] sm:$0xff]  }
 0x2ff   : > { %v11154_v57 = vld [vmem:[#allocation3 + $0x150] sm:$0xff]  ;;  %v11159_v39 = vld [vmem:[#allocation3 + $0x1a8] sm:$0xff] }
 0x301   : > { %20475 = vmatpush3.bf16.msra.mxu1 %v22505_v23  ;;  %v11150_v23 = vld [vmem:[#allocation3 + $0x110] sm:$0xff] }
 0x302   : > { %20476 = vmatprep.subr.bf16.mxu1 %v22506_v25 }
 0x303   : > { %19567 = vmatmul.mubr.msk.bf16.gmra.mrb[24].mxu0 %vm1491_vm2, %v3176_v50  ;;  %20445 = vmatmul.mubr.msk.bf16.gmra.mrb[180].mxu1 %vm920_vm0, %v24221_v32  ;;  %v3152_v32 = vld [vmem:[#allocation2 + $0x20e] sm:$0xff] }
 0x304   : > { %19570 = vmatprep.mubr.msk.bf16.mxu0 %vm1491_vm2, %v3177_v52  ;;  %20448 = vmatprep.mubr.msk.bf16.mxu1 %vm920_vm0, %v24239_v51  ;;  %v3154_v51 = vld [vmem:[#allocation2 + $0x22e] sm:$0xff]  ;;  %v3180_v62 = vpack.c.bf16 %v3152_v32, %v3151_v60 }
 0x305   : > { %20477 = vmatpush3.bf16.msra.mxu1 %v22506_v25  ;;  %v3181_v7 = vpack.c.bf16 %v3154_v51, %v3153_v5  ;;  %v11149_v50 = vld [vmem:[#allocation3 + $0x108] sm:$0xff] }
 0x306   : > { %20478 = vmatprep.subr.bf16.mxu1 %v22508_v22  ;;  %v11189_v52 = vpack.c.bf16 %v11150_v23, %v11149_v50  ;;  %v3454_v51 = vld [vmem:[#allocation2 + $0x167] sm:$0xff]  ;;  %v3465_v50 = vld [vmem:[#allocation2 + $0x20f] sm:$0xff] }
 0x307   : > { %v11153_v60 = vld [vmem:[#allocation3 + $0x148] sm:$0xff] }
 0x308   : > { %v24493_v5 = vpack.c.bf16 %v11154_v57, %v11153_v60  ;;  %v3462_v23 = vld [vmem:[#allocation2 + $0x1e7] sm:$0xff]  ;;  %v11168_v60 = vld [vmem:[#allocation3 + $0x230] sm:$0xff] }
 0x309   : > { %20479 = vmatpush3.bf16.msra.mxu1 %v22508_v22  ;;  %v11152_v22 = vld [vmem:[#allocation3 + $0x130] sm:$0xff]  ;;  %v3466_v57 = vld [vmem:[#allocation2 + $0x227] sm:$0xff] }
 0x30a   : > { %20512 = vmatprep.subr.bf16.mxu1 %v24444_v53  ;;  %v24491_v32 = vpack.c.bf16 %v11152_v22, %v11151_v9  ;;  %v11163_v22 = vld [vmem:[#allocation3 + $0x1e8] sm:$0xff] }
 0x30b   : > { %19571 = vmatmul.mubr.msk.bf16.gmra.mrb[28].mxu0 %vm1491_vm2, %v3178_v59  ;;  %20449 = vmatmul.mubr.msk.bf16.gmra.mrb[184].mxu1 %vm920_vm0, %v24242_v54  ;;  %v3156_v54 = vld [vmem:[#allocation2 + $0x24e] sm:$0xff] }
 0x30c   : > { %19574 = vmatprep.mubr.msk.bf16.mxu0 %vm1491_vm2, %v3179_v10  ;;  %20452 = vmatprep.mubr.msk.bf16.mxu1 %vm920_vm0, %v24252_v61  ;;  %v3182_v61 = vpack.c.bf16 %v3156_v54, %v3155_v12  ;;  %v3452_v59 = vld [vmem:[#allocation2 + $0x147] sm:$0xff]  ;;  %v3457_v54 = vld [vmem:[#allocation2 + $0x18f] sm:$0xff] }
 0x30d   : > { %v22513_v12 = vld [vmem:[%s26395_s9 + $0xb0] sm:$0xff]  }
 0x313   : > { %19575 = vmatmul.mubr.msk.bf16.gmra.mrb[32].mxu0 %vm1491_vm2, %v3180_v62  ;;  %20453 = vmatmul.mubr.msk.bf16.gmra.mrb[188].mxu1 %vm920_vm0, %v24254_v36  ;;  %v3160_v36 = vld [vmem:[#allocation2 + $0x28e] sm:$0xff]  ;;  %v3488_v62 = vpack.c.bf16 %v3455_v56, %v3454_v51 }
 0x314   : > { %19578 = vmatprep.mubr.msk.bf16.mxu0 %vm1491_vm2, %v3181_v7  ;;  %20456 = vmatprep.mubr.msk.bf16.mxu1 %vm920_vm0, %v24262_v13  ;;  %v3184_v13 = vpack.c.bf16 %v3160_v36, %v3159_v27  ;;  %v24501_v7 = vld [vmem:[%s26391_s5 + $0xc0] sm:$0xff]   ;;  %v11155_v36 = vld [vmem:[#allocation3 + $0x168] sm:$0xff] }
 0x315   : > { %v24514_v27 = vpack.c.bf16 %v11156_v11, %v11155_v36  ;;  %v3469_v51 = vld [vmem:[#allocation2 + $0x24f] sm:$0xff] }
 0x316   : > { %v11167_v11 = vld [vmem:[#allocation3 + $0x228] sm:$0xff] }
 0x31b   : > { %19579 = vmatmul.mubr.msk.bf16.gmra.mrb[36].mxu0 %vm1491_vm2, %v3182_v61  ;;  %20457 = vmatmul.mubr.msk.bf16.gmra.mrb[192].mxu1 %vm920_vm0, %v24264_v40  ;;  %v3446_v40 = vld [vmem:[#allocation2 + $0xe7] sm:$0xff]  ;;  %v3459_v61 = vld [vmem:[#allocation2 + $0x1af] sm:$0xff] }
 0x31c   : > { %19582 = vmatprep.mubr.msk.bf16.mxu0 %vm1491_vm2, %v3183_v4  ;;  %20460 = vmatprep.mubr.msk.bf16.mxu1 %vm920_vm0, %v24272_v55  ;;  %v3163_v55 = vld [vmem:[#allocation2 + $0x2c6] sm:$0xff]  ;;  %v3484_v35 = vpack.c.bf16 %v3447_v31, %v3446_v40  ;;  %v22515_v40 = vld [vmem:[%s26395_s9 + $0xb8] sm:$0xff]   ;;  %v3461_v31 = vld [vmem:[#allocation2 + $0x1cf] sm:$0xff] }
 0x31d   : > { %v3186_v41 = vpack.c.bf16 %v3164_v2, %v3163_v55  ;;  %v3456_v4 = vld [vmem:[#allocation2 + $0x187] sm:$0xff]  ;;  %v11160_v2 = vld [vmem:[#allocation3 + $0x1b0] sm:$0xff] }
 0x31e   : > { %v3489_v26 = vpack.c.bf16 %v3457_v54, %v3456_v4  ;;  %v24530_v55 = vld [vmem:[%s26395_s9 + $0xc0] sm:$0xff]   ;;  %v11169_v4 = vld [vmem:[#allocation3 + $0x248] sm:$0xff] }
 0x31f   : > { %v3468_v54 = vld [vmem:[#allocation2 + $0x247] sm:$0xff] }
 0x323   : > { %19583 = vmatmul.mubr.msk.bf16.gmra.mrb[40].mxu0 %vm1491_vm2, %v3184_v13  ;;  %20461 = vmatmul.mubr.msk.bf16.gmra.mrb[196].mxu1 %vm920_vm0, %v24274_v33  ;;  %v3449_v33 = vld [vmem:[#allocation2 + $0x10f] sm:$0xff]  ;;  %v3458_v13 = vld [vmem:[#allocation2 + $0x1a7] sm:$0xff] }
 0x324   : > { %19586 = vmatprep.mubr.msk.bf16.mxu0 %vm1491_vm2, %v3185_v30  ;;  %20464 = vmatprep.mubr.msk.bf16.mxu1 %vm920_vm0, %v24282_v44  ;;  %v3451_v44 = vld [vmem:[#allocation2 + $0x12f] sm:$0xff]  ;;  %v3485_v25 = vpack.c.bf16 %v3449_v33, %v3448_v18  ;;  %v24516_v30 = vpack.c.bf16 %v11158_v17, %v11157_v28  ;;  %v3460_v33 = vld [vmem:[#allocation2 + $0x1c7] sm:$0xff] }
 0x325   : > { %v3486_v16 = vpack.c.bf16 %v3451_v44, %v3450_v48  ;;  %v3491_v24 = vpack.c.bf16 %v3461_v31, %v3460_v33  ;;  %v24532_v44 = vpack.c.bf16 %v11160_v2, %v11159_v39  ;;  %v11161_v18 = vld [vmem:[#allocation3 + $0x1c8] sm:$0xff]  ;;  %v11172_v28 = vld [vmem:[#allocation3 + $0x270] sm:$0xff] }
 0x326   : > { %v3470_v17 = vld [vmem:[#allocation2 + $0x267] sm:$0xff] }
 0x327   : > { %v3472_v31 = vld [vmem:[#allocation2 + $0x287] sm:$0xff] }
 0x328   : > { %v11171_v2 = vld [vmem:[#allocation3 + $0x268] sm:$0xff] }
 0x329   : > { %v3474_v33 = vld [vmem:[#allocation2 + $0x2a7] sm:$0xff] }
 0x32a   : > { %v11173_v39 = vld [vmem:[#allocation3 + $0x288] sm:$0xff] }
 0x32b   : > { %19587 = vmatmul.mubr.msk.bf16.gmra.mrb[44].mxu0 %vm1491_vm2, %v3186_v41  ;;  %20465 = vmatmul.mubr.msk.bf16.gmra.mrb[200].mxu1 %vm920_vm0, %v24284_v47  ;;  %v22511_v47 = vld [vmem:[%s26391_s5 + $0xb0] sm:$0xff]  }
 0x32c   : > { %20468 = vmatprep.mubr.msk.bf16.mxu1 %vm920_vm0, %v24292_v58  ;;  %19596 = vmatprep.mubr.msk.bf16.mxu0 %vm1491_vm2, %v3484_v35  ;;  %v3453_v58 = vld [vmem:[#allocation2 + $0x14f] sm:$0xff] }
 0x32d   : > { %v3487_v10 = vpack.c.bf16 %v3453_v58, %v3452_v59  ;;  %v3463_v35 = vld [vmem:[#allocation2 + $0x1ef] sm:$0xff]  ;;  %v3464_v58 = vld [vmem:[#allocation2 + $0x207] sm:$0xff] }
 0x32e   : > { %v11162_v41 = vld [vmem:[#allocation3 + $0x1d0] sm:$0xff]  ;;  %v11165_v59 = vld [vmem:[#allocation3 + $0x208] sm:$0xff] }
 0x32f   : > { %v24534_v48 = vpack.c.bf16 %v11162_v41, %v11161_v18  ;;  %v24563_v41 = vpack.c.bf16 %v11172_v28, %v11171_v2  ;;  %v3759_v18 = vld [vmem:[#allocation2 + $0xe8] sm:$0xff]  ;;  %v22521_v28 = vld [vmem:[%s26391_s5 + $0xd0] sm:$0xff]  }
 0x330   : > { %v3767_v2 = vld [vmem:[#allocation2 + $0x168] sm:$0xff] }
 0x333   : > { %19597 = vmatmul.mubr.msk.bf16.vlgmr.msra.gmra.mrb[16].mxu0 %vm1491_vm2, %v3485_v25  ;;  %20469 = vmatmul.mubr.msk.bf16.gmra.mrb[204].mxu1 %vm920_vm0, %v24477_v42  ;;  %v3492_v25 = vpack.c.bf16 %v3463_v35, %v3462_v23 }
 0x334   : > { %19600 = vmatprep.mubr.msk.bf16.mxu0 %vm1491_vm2, %v3486_v16  ;;  %20480 = vmatprep.mubr.msk.bf16.mxu1 %vm920_vm0, %v11189_v52  ;;  %v11164_v16 = vld [vmem:[#allocation3 + $0x1f0] sm:$0xff] }
 0x335   : > { %19629 = vmatpush3.bf16.msra.mxu0 %v24419_v14  ;;  %v22512_v14 = vld [vmem:[%s26395_s9 + $0xa8] sm:$0xff]   ;;  %v24543_v56 = vpack.c.bf16 %v11164_v16, %v11163_v22  ;;  %v11176_v16 = vld [vmem:[#allocation3 + $0x2b0] sm:$0xff] }
 0x336   : > { %19630 = vmatprep.subr.bf16.mxu0 %v22511_v47  ;;  %v3467_v52 = vld [vmem:[#allocation2 + $0x22f] sm:$0xff] }
 0x337   : > { %v3494_v9 = vpack.c.bf16 %v3467_v52, %v3466_v57  ;;  %v11178_v52 = vld [vmem:[#allocation3 + $0x2d0] sm:$0xff] }
 0x339   : > { %19631 = vmatpush3.bf16.msra.mxu0 %v22511_v47  ;;  %v11166_v47 = vld [vmem:[#allocation3 + $0x210] sm:$0xff] }
 0x33a   : > { %19632 = vmatprep.subr.bf16.mxu0 %v22514_v46 }
 0x33b   : > { %19601 = vmatmul.mubr.msk.bf16.gmra.mrb[20].mxu0 %vm1491_vm2, %v3487_v10  ;;  %20481 = vmatmul.mubr.msk.bf16.vlgmr.msra.gmra.mrb[176].mxu1 %vm920_vm0, %v24491_v32  ;;  %v24545_v10 = vpack.c.bf16 %v11166_v47, %v11165_v59  ;;  %v3476_v47 = vld [vmem:[#allocation2 + $0x2c7] sm:$0xff] }
 0x33c   : > { %19604 = vmatprep.mubr.msk.bf16.mxu0 %vm1491_vm2, %v3488_v62  ;;  %20484 = vmatprep.mubr.msk.bf16.mxu1 %vm920_vm0, %v24493_v5  ;;  %v3471_v62 = vld [vmem:[#allocation2 + $0x26f] sm:$0xff] }
 0x33d   : > { %20513 = vmatpush3.bf16.msra.mxu1 %v24444_v53  ;;  %19633 = vmatpush3.bf16.msra.mxu0 %v22514_v46  ;;  %v3490_v53 = vpack.c.bf16 %v3459_v61, %v3458_v13  ;;  %v3493_v46 = vpack.c.bf16 %v3465_v50, %v3464_v58  ;;  %v24553_v61 = vpack.c.bf16 %v11168_v60, %v11167_v11  ;;  %v3473_v13 = vld [vmem:[#allocation2 + $0x28f] sm:$0xff] }
 0x33e   : > { %20514 = vmatprep.subr.bf16.mxu1 %v22512_v14  ;;  %19666 = vmatprep.subr.bf16.mxu0 %v24501_v7  ;;  %v3496_v36 = vpack.c.bf16 %v3471_v62, %v3470_v17  ;;  %v3497_v35 = vpack.c.bf16 %v3473_v13, %v3472_v31  ;;  %v3477_v50 = vld [vmem:[#allocation2 + $0x2cf] sm:$0xff] }
 0x33f   : > { %v11175_v58 = vld [vmem:[#allocation3 + $0x2a8] sm:$0xff]  ;;  %v11180_v62 = vld [vmem:[#allocation3 + $0x2f0] sm:$0xff] }
 0x340   : > { %v24573_v57 = vpack.c.bf16 %v11176_v16, %v11175_v58  ;;  %v11177_v59 = vld [vmem:[#allocation3 + $0x2c8] sm:$0xff]  ;;  %v3766_v13 = vld [vmem:[#allocation2 + $0x150] sm:$0xff]  ;;  %v24629_v16 = vld [vmem:[%s26395_s9 + $0xe0] sm:$0xff]  }
 0x341   : > { %20515 = vmatpush3.bf16.msra.mxu1 %v22512_v14  ;;  %v11170_v14 = vld [vmem:[#allocation3 + $0x250] sm:$0xff]  ;;  %v11179_v60 = vld [vmem:[#allocation3 + $0x2e8] sm:$0xff] }
 0x342   : > { %20516 = vmatprep.subr.bf16.mxu1 %v22513_v12  ;;  %v3763_v17 = vld [vmem:[#allocation2 + $0x128] sm:$0xff] }
 0x343   : > { %19605 = vmatmul.mubr.msk.bf16.gmra.mrb[24].mxu0 %vm1491_vm2, %v3489_v26  ;;  %20485 = vmatmul.mubr.msk.bf16.gmra.mrb[180].mxu1 %vm920_vm0, %v24514_v27  ;;  %v24555_v26 = vpack.c.bf16 %v11170_v14, %v11169_v4  ;;  %v3764_v14 = vld [vmem:[#allocation2 + $0x130] sm:$0xff] }
 0x344   : > { %19608 = vmatprep.mubr.msk.bf16.mxu0 %vm1491_vm2, %v3490_v53  ;;  %20488 = vmatprep.mubr.msk.bf16.mxu1 %vm920_vm0, %v24516_v30  ;;  %v3475_v53 = vld [vmem:[#allocation2 + $0x2af] sm:$0xff]  ;;  %v3799_v4 = vpack.c.bf16 %v3764_v14, %v3763_v17 }
 0x345   : > { %20517 = vmatpush3.bf16.msra.mxu1 %v22513_v12  ;;  %v3495_v12 = vpack.c.bf16 %v3469_v51, %v3468_v54  ;;  %v3762_v51 = vld [vmem:[#allocation2 + $0x110] sm:$0xff]  ;;  %v3761_v54 = vld [vmem:[#allocation2 + $0x108] sm:$0xff] }
 0x346   : > { %20518 = vmatprep.subr.bf16.mxu1 %v22515_v40  ;;  %v3798_v11 = vpack.c.bf16 %v3762_v51, %v3761_v54  ;;  %v3784_v14 = vld [vmem:[#allocation2 + $0x270] sm:$0xff]  ;;  %v3781_v54 = vld [vmem:[#allocation2 + $0x248] sm:$0xff] }
 0x349   : > { %20519 = vmatpush3.bf16.msra.mxu1 %v22515_v40  ;;  %v11174_v40 = vld [vmem:[#allocation3 + $0x290] sm:$0xff] }
 0x34a   : > { %20552 = vmatprep.subr.bf16.mxu1 %v24530_v55  ;;  %v24565_v23 = vpack.c.bf16 %v11174_v40, %v11173_v39  ;;  %v3765_v40 = vld [vmem:[#allocation2 + $0x148] sm:$0xff]  ;;  %v22520_v39 = vld [vmem:[%s26395_s9 + $0xd0] sm:$0xff]  }
 0x34b   : > { %19609 = vmatmul.mubr.msk.bf16.gmra.mrb[28].mxu0 %vm1491_vm2, %v3491_v24  ;;  %20489 = vmatmul.mubr.msk.bf16.gmra.mrb[184].mxu1 %vm920_vm0, %v24532_v44  ;;  %v3498_v24 = vpack.c.bf16 %v3475_v53, %v3474_v33  ;;  %v3768_v53 = vld [vmem:[#allocation2 + $0x170] sm:$0xff]  ;;  %v3800_v31 = vpack.c.bf16 %v3766_v13, %v3765_v40  ;;  %v22519_v33 = vld [vmem:[%s26395_s9 + $0xc8] sm:$0xff]  }
 0x34c   : > { %19612 = vmatprep.mubr.msk.bf16.mxu0 %vm1491_vm2, %v3492_v25  ;;  %20492 = vmatprep.mubr.msk.bf16.mxu1 %vm920_vm0, %v24534_v48  ;;  %v3760_v25 = vld [vmem:[#allocation2 + $0xf0] sm:$0xff]  ;;  %v3787_v13 = vld [vmem:[#allocation2 + $0x2a8] sm:$0xff] }
 0x34d   : > { %v3797_v22 = vpack.c.bf16 %v3760_v25, %v3759_v18  ;;  %v3769_v18 = vld [vmem:[#allocation2 + $0x188] sm:$0xff]  ;;  %v3790_v40 = vld [vmem:[#allocation2 + $0x2d0] sm:$0xff] }
 0x353   : > { %19613 = vmatmul.mubr.msk.bf16.gmra.mrb[32].mxu0 %vm1491_vm2, %v3493_v46  ;;  %20493 = vmatmul.mubr.msk.bf16.gmra.mrb[188].mxu1 %vm920_vm0, %v24543_v56  ;;  %v3499_v46 = vpack.c.bf16 %v3477_v50, %v3476_v47  ;;  %v3773_v47 = vld [vmem:[#allocation2 + $0x1c8] sm:$0xff] }
 0x354   : > { %19616 = vmatprep.mubr.msk.bf16.mxu0 %vm1491_vm2, %v3494_v9  ;;  %20496 = vmatprep.mubr.msk.bf16.mxu1 %vm920_vm0, %v24545_v10  ;;  %v24575_v9 = vpack.c.bf16 %v11178_v52, %v11177_v59  ;;  %v3776_v52 = vld [vmem:[#allocation2 + $0x1f0] sm:$0xff]  ;;  %v3777_v59 = vld [vmem:[#allocation2 + $0x208] sm:$0xff] }
 0x35b   : > { %19617 = vmatmul.mubr.msk.bf16.gmra.mrb[36].mxu0 %vm1491_vm2, %v3495_v12  ;;  %20497 = vmatmul.mubr.msk.bf16.gmra.mrb[192].mxu1 %vm920_vm0, %v24553_v61  ;;  %v24583_v12 = vpack.c.bf16 %v11180_v62, %v11179_v60  ;;  %v3779_v60 = vld [vmem:[#allocation2 + $0x228] sm:$0xff] }
 0x35c   : > { %19620 = vmatprep.mubr.msk.bf16.mxu0 %vm1491_vm2, %v3496_v36  ;;  %20500 = vmatprep.mubr.msk.bf16.mxu1 %vm920_vm0, %v24555_v26  ;;  %v22518_v36 = vld [vmem:[%s26391_s5 + $0xc8] sm:$0xff]  }
 0x363   : > { %19621 = vmatmul.mubr.msk.bf16.gmra.mrb[40].mxu0 %vm1491_vm2, %v3497_v35  ;;  %20501 = vmatmul.mubr.msk.bf16.gmra.mrb[196].mxu1 %vm920_vm0, %v24563_v41  ;;  %v3801_v35 = vpack.c.bf16 %v3768_v53, %v3767_v2  ;;  %v4073_v53 = vld [vmem:[#allocation2 + $0xf1] sm:$0xff] }
 0x364   : > { %19624 = vmatprep.mubr.msk.bf16.mxu0 %vm1491_vm2, %v3498_v24  ;;  %20504 = vmatprep.mubr.msk.bf16.mxu1 %vm920_vm0, %v24565_v23  ;;  %v3772_v24 = vld [vmem:[#allocation2 + $0x1b0] sm:$0xff] }
 0x36b   : > { %19625 = vmatmul.mubr.msk.bf16.gmra.mrb[44].mxu0 %vm1491_vm2, %v3499_v46  ;;  %20505 = vmatmul.mubr.msk.bf16.gmra.mrb[200].mxu1 %vm920_vm0, %v24573_v57 }
 0x36c   : > { %20508 = vmatprep.mubr.msk.bf16.mxu1 %vm920_vm0, %v24575_v9  ;;  %19634 = vmatprep.mubr.msk.bf16.mxu0 %vm1491_vm2, %v3797_v22  ;;  %v3775_v22 = vld [vmem:[#allocation2 + $0x1e8] sm:$0xff] }
 0x36d   : > { %v3805_v46 = vpack.c.bf16 %v3776_v52, %v3775_v22  ;;  %v11795_v52 = vld [vmem:[#allocation3 + $0x14f] sm:$0xff] }
 0x36e   : > { %v4081_v22 = vld [vmem:[#allocation2 + $0x171] sm:$0xff] }
 0x373   : > { %19635 = vmatmul.mubr.msk.bf16.vlgmr.msra.gmra.mrb[16].mxu0 %vm1491_vm2, %v3798_v11  ;;  %20509 = vmatmul.mubr.msk.bf16.gmra.mrb[204].mxu1 %vm920_vm0, %v24583_v12  ;;  %v3783_v11 = vld [vmem:[#allocation2 + $0x268] sm:$0xff] }
 0x374   : > { %19638 = vmatprep.mubr.msk.bf16.mxu0 %vm1491_vm2, %v3799_v4  ;;  %20520 = vmatprep.mubr.msk.bf16.mxu1 %vm920_vm0, %v24306_v15  ;;  %v24604_v15 = vld [vmem:[%s26391_s5 + $0xd8] sm:$0xff]   ;;  %v3809_v17 = vpack.c.bf16 %v3784_v14, %v3783_v11  ;;  %v3788_v4 = vld [vmem:[#allocation2 + $0x2b0] sm:$0xff] }
 0x375   : > { %19667 = vmatpush3.bf16.msra.mxu0 %v24501_v7  ;;  %v3770_v7 = vld [vmem:[#allocation2 + $0x190] sm:$0xff] }
 0x376   : > { %19668 = vmatprep.subr.bf16.mxu0 %v22518_v36  ;;  %v3802_v25 = vpack.c.bf16 %v3770_v7, %v3769_v18  ;;  %v4076_v7 = vld [vmem:[#allocation2 + $0x129] sm:$0xff] }
 0x377   : > { %v4082_v14 = vld [vmem:[#allocation2 + $0x189] sm:$0xff] }
 0x378   : > { %v22527_v11 = vld [vmem:[%s26395_s9 + $0xf0] sm:$0xff]  }
 0x379   : > { %19669 = vmatpush3.bf16.msra.mxu0 %v22518_v36  ;;  %v3785_v36 = vld [vmem:[#allocation2 + $0x288] sm:$0xff] }
 0x37a   : > { %19670 = vmatprep.subr.bf16.mxu0 %v22521_v28 }
 0x37b   : > { %19639 = vmatmul.mubr.msk.bf16.gmra.mrb[20].mxu0 %vm1491_vm2, %v3800_v31  ;;  %20521 = vmatmul.mubr.msk.bf16.vlgmr.msra.gmra.mrb[176].mxu1 %vm920_vm0, %v24308_v19  ;;  %v3771_v19 = vld [vmem:[#allocation2 + $0x1a8] sm:$0xff] }
 0x37c   : > { %19642 = vmatprep.mubr.msk.bf16.mxu0 %vm1491_vm2, %v3801_v35  ;;  %20524 = vmatprep.mubr.msk.bf16.mxu1 %vm920_vm0, %v24329_v37  ;;  %v3803_v50 = vpack.c.bf16 %v3772_v24, %v3771_v19  ;;  %v22522_v37 = vld [vmem:[%s26395_s9 + $0xd8] sm:$0xff]   ;;  %v11793_v24 = vld [vmem:[#allocation3 + $0x12f] sm:$0xff]  ;;  %v11792_v19 = vld [vmem:[#allocation3 + $0x127] sm:$0xff] }
 0x37d   : > { %20553 = vmatpush3.bf16.msra.mxu1 %v24530_v55  ;;  %19671 = vmatpush3.bf16.msra.mxu0 %v22521_v28  ;;  %v3774_v55 = vld [vmem:[#allocation2 + $0x1d0] sm:$0xff]  ;;  %v3811_v28 = vpack.c.bf16 %v3788_v4, %v3787_v13 }
 0x37e   : > { %20554 = vmatprep.subr.bf16.mxu1 %v22519_v33  ;;  %19704 = vmatprep.subr.bf16.mxu0 %v24604_v15  ;;  %v3804_v58 = vpack.c.bf16 %v3774_v55, %v3773_v47  ;;  %v4075_v35 = vld [vmem:[#allocation2 + $0x111] sm:$0xff]  ;;  %v22528_v47 = vld [vmem:[%s26391_s5 + $0xe8] sm:$0xff]  }
 0x37f   : > { %v4079_v55 = vld [vmem:[#allocation2 + $0x151] sm:$0xff] }
 0x380   : > { %v11801_v4 = vld [vmem:[#allocation3 + $0x1af] sm:$0xff] }
 0x381   : > { %20555 = vmatpush3.bf16.msra.mxu1 %v22519_v33  ;;  %v11500_v33 = vld [vmem:[#allocation3 + $0x2e9] sm:$0xff] }
 0x382   : > { %20556 = vmatprep.subr.bf16.mxu1 %v22520_v39 }
 0x383   : > { %19643 = vmatmul.mubr.msk.bf16.gmra.mrb[24].mxu0 %vm1491_vm2, %v3802_v25  ;;  %20525 = vmatmul.mubr.msk.bf16.gmra.mrb[180].mxu1 %vm920_vm0, %v24331_v38  ;;  %v3778_v38 = vld [vmem:[#allocation2 + $0x210] sm:$0xff] }
 0x384   : > { %19646 = vmatprep.mubr.msk.bf16.mxu0 %vm1491_vm2, %v3803_v50  ;;  %20528 = vmatprep.mubr.msk.bf16.mxu1 %vm920_vm0, %v24347_v34  ;;  %v3780_v34 = vld [vmem:[#allocation2 + $0x230] sm:$0xff]  ;;  %v3806_v51 = vpack.c.bf16 %v3778_v38, %v3777_v59  ;;  %v11794_v38 = vld [vmem:[#allocation3 + $0x147] sm:$0xff] }
 0x385   : > { %20557 = vmatpush3.bf16.msra.mxu1 %v22520_v39  ;;  %v3807_v62 = vpack.c.bf16 %v3780_v34, %v3779_v60  ;;  %v4077_v39 = vld [vmem:[#allocation2 + $0x131] sm:$0xff]  ;;  %v11833_v59 = vpack.c.bf16 %v11795_v52, %v11794_v38 }
 0x386   : > { %20558 = vmatprep.subr.bf16.mxu1 %v22522_v37  ;;  %v4112_v50 = vpack.c.bf16 %v4077_v39, %v4076_v7  ;;  %v11809_v52 = vld [vmem:[#allocation3 + $0x22f] sm:$0xff] }
 0x389   : > { %20559 = vmatpush3.bf16.msra.mxu1 %v22522_v37  ;;  %v11832_v37 = vpack.c.bf16 %v11793_v24, %v11792_v19  ;;  %v11804_v24 = vld [vmem:[#allocation3 + $0x1e7] sm:$0xff] }
 0x38a   : > { %20592 = vmatprep.subr.bf16.mxu1 %v24629_v16 }
 0x38b   : > { %19647 = vmatmul.mubr.msk.bf16.gmra.mrb[28].mxu0 %vm1491_vm2, %v3804_v58  ;;  %20529 = vmatmul.mubr.msk.bf16.gmra.mrb[184].mxu1 %vm920_vm0, %v24349_v45  ;;  %v3782_v45 = vld [vmem:[#allocation2 + $0x250] sm:$0xff] }
 0x38c   : > { %19650 = vmatprep.mubr.msk.bf16.mxu0 %vm1491_vm2, %v3805_v46  ;;  %20532 = vmatprep.mubr.msk.bf16.mxu1 %vm920_vm0, %v24358_v3  ;;  %v3808_v3 = vpack.c.bf16 %v3782_v45, %v3781_v54  ;;  %v4080_v58 = vld [vmem:[#allocation2 + $0x169] sm:$0xff]  ;;  %v4083_v54 = vld [vmem:[#allocation2 + $0x191] sm:$0xff] }
 0x38d   : > { %v11797_v46 = vld [vmem:[#allocation3 + $0x16f] sm:$0xff]  ;;  %v4114_v60 = vpack.c.bf16 %v4081_v22, %v4080_v58 }
 0x38e   : > { %v24682_v45 = vld [vmem:[%s26391_s5 + $0xf0] sm:$0xff]  }
 0x393   : > { %19651 = vmatmul.mubr.msk.bf16.gmra.mrb[32].mxu0 %vm1491_vm2, %v3806_v51  ;;  %20533 = vmatmul.mubr.msk.bf16.gmra.mrb[188].mxu1 %vm920_vm0, %v24360_v6  ;;  %v3786_v6 = vld [vmem:[#allocation2 + $0x290] sm:$0xff]  ;;  %v11796_v51 = vld [vmem:[#allocation3 + $0x167] sm:$0xff] }
 0x394   : > { %19654 = vmatprep.mubr.msk.bf16.mxu0 %vm1491_vm2, %v3807_v62  ;;  %20536 = vmatprep.mubr.msk.bf16.mxu1 %vm920_vm0, %v24368_v29  ;;  %v3810_v29 = vpack.c.bf16 %v3786_v6, %v3785_v36  ;;  %v11834_v62 = vpack.c.bf16 %v11797_v46, %v11796_v51  ;;  %v4085_v6 = vld [vmem:[#allocation2 + $0x1b1] sm:$0xff]  ;;  %v11798_v36 = vld [vmem:[#allocation3 + $0x187] sm:$0xff] }
 0x395   : > { %v11808_v46 = vld [vmem:[#allocation3 + $0x227] sm:$0xff]  ;;  %v4095_v51 = vld [vmem:[#allocation2 + $0x251] sm:$0xff] }
 0x39b   : > { %19655 = vmatmul.mubr.msk.bf16.gmra.mrb[36].mxu0 %vm1491_vm2, %v3808_v3  ;;  %20537 = vmatmul.mubr.msk.bf16.gmra.mrb[192].mxu1 %vm920_vm0, %v24370_v21  ;;  %v4072_v21 = vld [vmem:[#allocation2 + $0xe9] sm:$0xff] }
 0x39c   : > { %19658 = vmatprep.mubr.msk.bf16.mxu0 %vm1491_vm2, %v3809_v17  ;;  %20540 = vmatprep.mubr.msk.bf16.mxu1 %vm920_vm0, %v24378_v43  ;;  %v3789_v43 = vld [vmem:[#allocation2 + $0x2c8] sm:$0xff]  ;;  %v4110_v31 = vpack.c.bf16 %v4073_v53, %v4072_v21  ;;  %v22529_v53 = vld [vmem:[%s26395_s9 + $0xf8] sm:$0xff]  }
 0x39d   : > { %v3812_v2 = vpack.c.bf16 %v3790_v40, %v3789_v43  ;;  %v11799_v3 = vld [vmem:[#allocation3 + $0x18f] sm:$0xff] }
 0x39e   : > { %v4084_v17 = vld [vmem:[#allocation2 + $0x1a9] sm:$0xff]  ;;  %v11835_v13 = vpack.c.bf16 %v11799_v3, %v11798_v36  ;;  %v4087_v43 = vld [vmem:[#allocation2 + $0x1d1] sm:$0xff] }
 0x39f   : > { %v4086_v40 = vld [vmem:[#allocation2 + $0x1c9] sm:$0xff] }
 0x3a0   : > { %v4117_v7 = vpack.c.bf16 %v4087_v43, %v4086_v40  ;;  %v4098_v36 = vld [vmem:[#allocation2 + $0x289] sm:$0xff] }
 0x3a3   : > { %19659 = vmatmul.mubr.msk.bf16.gmra.mrb[40].mxu0 %vm1491_vm2, %v3810_v29  ;;  %20541 = vmatmul.mubr.msk.bf16.gmra.mrb[196].mxu1 %vm920_vm0, %v24380_v49  ;;  %v4074_v49 = vld [vmem:[#allocation2 + $0x109] sm:$0xff]  ;;  %v4115_v29 = vpack.c.bf16 %v4083_v54, %v4082_v14 }
 0x3a4   : > { %19662 = vmatprep.mubr.msk.bf16.mxu0 %vm1491_vm2, %v3811_v28  ;;  %20544 = vmatprep.mubr.msk.bf16.mxu1 %vm920_vm0, %v24388_v63  ;;  %v11501_v63 = vld [vmem:[#allocation3 + $0x2f1] sm:$0xff]  ;;  %v4111_v18 = vpack.c.bf16 %v4075_v35, %v4074_v49  ;;  %v11800_v28 = vld [vmem:[#allocation3 + $0x1a7] sm:$0xff] }
 0x3a5   : > { %v24662_v25 = vpack.c.bf16 %v11501_v63, %v11500_v33  ;;  %v11836_v21 = vpack.c.bf16 %v11801_v4, %v11800_v28  ;;  %v4088_v49 = vld [vmem:[#allocation2 + $0x1e9] sm:$0xff]  ;;  %v4089_v35 = vld [vmem:[#allocation2 + $0x1f1] sm:$0xff] }
 0x3a6   : > { %v11805_v33 = vld [vmem:[#allocation3 + $0x1ef] sm:$0xff]  ;;  %v11802_v63 = vld [vmem:[#allocation3 + $0x1c7] sm:$0xff] }
 0x3a7   : > { %v11838_v19 = vpack.c.bf16 %v11805_v33, %v11804_v24  ;;  %v11813_v14 = vld [vmem:[#allocation3 + $0x26f] sm:$0xff]  ;;  %v11810_v54 = vld [vmem:[#allocation3 + $0x247] sm:$0xff] }
 0x3a8   : > { %v4100_v28 = vld [vmem:[#allocation2 + $0x2a9] sm:$0xff] }
 0x3a9   : > { %v4385_v33 = vld [vmem:[#allocation2 + $0xea] sm:$0xff] }
 0x3aa   : > { %v11819_v24 = vld [vmem:[#allocation3 + $0x2cf] sm:$0xff] }
 0x3ab   : > { %19663 = vmatmul.mubr.msk.bf16.gmra.mrb[44].mxu0 %vm1491_vm2, %v3812_v2  ;;  %20545 = vmatmul.mubr.msk.bf16.gmra.mrb[200].mxu1 %vm920_vm0, %v24390_v0  ;;  %v22525_v0 = vld [vmem:[%s26391_s5 + $0xe0] sm:$0xff]  }
 0x3ac   : > { %20548 = vmatprep.mubr.msk.bf16.mxu1 %vm920_vm0, %v24398_v20  ;;  %19672 = vmatprep.mubr.msk.bf16.mxu0 %vm1491_vm2, %v4110_v31  ;;  %v4078_v20 = vld [vmem:[#allocation2 + $0x149] sm:$0xff]  ;;  %v24703_v2 = vld [vmem:[%s26395_s9 + $0x100] sm:$0xff]  }
 0x3ad   : > { %v4113_v34 = vpack.c.bf16 %v4079_v55, %v4078_v20  ;;  %v11803_v31 = vld [vmem:[#allocation3 + $0x1cf] sm:$0xff] }
 0x3ae   : > { %v11837_v39 = vpack.c.bf16 %v11803_v31, %v11802_v63  ;;  %v4092_v20 = vld [vmem:[#allocation2 + $0x229] sm:$0xff]  ;;  %v4093_v55 = vld [vmem:[#allocation2 + $0x231] sm:$0xff] }
 0x3af   : > { %v4120_v38 = vpack.c.bf16 %v4093_v55, %v4092_v20  ;;  %v11816_v31 = vld [vmem:[#allocation3 + $0x2a7] sm:$0xff]  ;;  %v4386_v63 = vld [vmem:[#allocation2 + $0xf2] sm:$0xff] }
 0x3b0   : > { %v11823_v20 = vld [vmem:[#allocation3 + $0x30f] sm:$0xff] }
 0x3b1   : > { %v4387_v55 = vld [vmem:[#allocation2 + $0x10a] sm:$0xff] }
 0x3b3   : > { %19673 = vmatmul.mubr.msk.bf16.vlgmr.msra.gmra.mrb[16].mxu0 %vm1491_vm2, %v4111_v18  ;;  %20549 = vmatmul.mubr.msk.bf16.gmra.mrb[204].mxu1 %vm920_vm0, %v24662_v25  ;;  %v4118_v18 = vpack.c.bf16 %v4089_v35, %v4088_v49 }
 0x3b4   : > { %19676 = vmatprep.mubr.msk.bf16.mxu0 %vm1491_vm2, %v4112_v50  ;;  %20560 = vmatprep.mubr.msk.bf16.mxu1 %vm920_vm0, %v11832_v37  ;;  %v4090_v50 = vld [vmem:[#allocation2 + $0x209] sm:$0xff]  ;;  %v4091_v37 = vld [vmem:[#allocation2 + $0x211] sm:$0xff] }
 0x3b5   : > { %19705 = vmatpush3.bf16.msra.mxu0 %v24604_v15  ;;  %v22526_v15 = vld [vmem:[%s26395_s9 + $0xe8] sm:$0xff]   ;;  %v4119_v58 = vpack.c.bf16 %v4091_v37, %v4090_v50 }
 0x3b6   : > { %19706 = vmatprep.subr.bf16.mxu0 %v22525_v0 }
 0x3b9   : > { %19707 = vmatpush3.bf16.msra.mxu0 %v22525_v0  ;;  %v11807_v0 = vld [vmem:[#allocation3 + $0x20f] sm:$0xff] }
 0x3ba   : > { %19708 = vmatprep.subr.bf16.mxu0 %v22528_v47 }
 0x3bb   : > { %19677 = vmatmul.mubr.msk.bf16.gmra.mrb[20].mxu0 %vm1491_vm2, %v4113_v34  ;;  %20561 = vmatmul.mubr.msk.bf16.vlgmr.msra.gmra.mrb[176].mxu1 %vm920_vm0, %v11833_v59  ;;  %v11840_v34 = vpack.c.bf16 %v11809_v52, %v11808_v46  ;;  %v4094_v59 = vld [vmem:[#allocation2 + $0x249] sm:$0xff]  ;;  %v4388_v52 = vld [vmem:[#allocation2 + $0x112] sm:$0xff] }
 0x3bc   : > { %19680 = vmatprep.mubr.msk.bf16.mxu0 %vm1491_vm2, %v4114_v60  ;;  %20564 = vmatprep.mubr.msk.bf16.mxu1 %vm920_vm0, %v11834_v62  ;;  %v11811_v60 = vld [vmem:[#allocation3 + $0x24f] sm:$0xff]  ;;  %v4121_v3 = vpack.c.bf16 %v4095_v51, %v4094_v59  ;;  %v4424_v46 = vpack.c.bf16 %v4388_v52, %v4387_v55  ;;  %v22535_v51 = vld [vmem:[%s26391_s5 + $0x100] sm:$0xff]  }
 0x3bd   : > { %20593 = vmatpush3.bf16.msra.mxu1 %v24629_v16  ;;  %19709 = vmatpush3.bf16.msra.mxu0 %v22528_v47  ;;  %v4116_v16 = vpack.c.bf16 %v4085_v6, %v4084_v17  ;;  %v11806_v47 = vld [vmem:[#allocation3 + $0x207] sm:$0xff]  ;;  %v4392_v59 = vld [vmem:[#allocation2 + $0x152] sm:$0xff] }
 0x3be   : > { %20594 = vmatprep.subr.bf16.mxu1 %v22526_v15  ;;  %19742 = vmatprep.subr.bf16.mxu0 %v24682_v45  ;;  %v11839_v22 = vpack.c.bf16 %v11807_v0, %v11806_v47  ;;  %v4096_v62 = vld [vmem:[#allocation2 + $0x269] sm:$0xff] }
 0x3bf   : > { %v11812_v17 = vld [vmem:[#allocation3 + $0x267] sm:$0xff] }
 0x3c0   : > { %v11842_v4 = vpack.c.bf16 %v11813_v14, %v11812_v17  ;;  %v11822_v0 = vld [vmem:[#allocation3 + $0x307] sm:$0xff] }
 0x3c1   : > { %20595 = vmatpush3.bf16.msra.mxu1 %v22526_v15  ;;  %v4097_v15 = vld [vmem:[#allocation2 + $0x271] sm:$0xff]  ;;  %v11847_v47 = vpack.c.bf16 %v11823_v20, %v11822_v0  ;;  %v12434_v52 = vld [vmem:[#allocation3 + $0x129] sm:$0xff] }
 0x3c2   : > { %20596 = vmatprep.subr.bf16.mxu1 %v22527_v11  ;;  %v4122_v6 = vpack.c.bf16 %v4097_v15, %v4096_v62  ;;  %v4394_v62 = vld [vmem:[#allocation2 + $0x172] sm:$0xff]  ;;  %v4397_v17 = vld [vmem:[#allocation2 + $0x1aa] sm:$0xff] }
 0x3c3   : > { %19681 = vmatmul.mubr.msk.bf16.gmra.mrb[24].mxu0 %vm1491_vm2, %v4115_v29  ;;  %20565 = vmatmul.mubr.msk.bf16.gmra.mrb[180].mxu1 %vm920_vm0, %v11835_v13  ;;  %v4099_v29 = vld [vmem:[#allocation2 + $0x291] sm:$0xff] }
 0x3c4   : > { %19684 = vmatprep.mubr.msk.bf16.mxu0 %vm1491_vm2, %v4116_v16  ;;  %20568 = vmatprep.mubr.msk.bf16.mxu1 %vm920_vm0, %v11836_v21  ;;  %v11815_v13 = vld [vmem:[#allocation3 + $0x28f] sm:$0xff]  ;;  %v4123_v40 = vpack.c.bf16 %v4099_v29, %v4098_v36 }
 0x3c5   : > { %20597 = vmatpush3.bf16.msra.mxu1 %v22527_v11  ;;  %v11841_v11 = vpack.c.bf16 %v11811_v60, %v11810_v54  ;;  %v4101_v16 = vld [vmem:[#allocation2 + $0x2b1] sm:$0xff]  ;;  %v22533_v54 = vld [vmem:[%s26395_s9 + $0x108] sm:$0xff]  }
 0x3c6   : > { %20598 = vmatprep.subr.bf16.mxu1 %v22529_v53  ;;  %v11817_v21 = vld [vmem:[#allocation3 + $0x2af] sm:$0xff]  ;;  %v4124_v49 = vpack.c.bf16 %v4101_v16, %v4100_v28 }
 0x3c7   : > { %v11844_v35 = vpack.c.bf16 %v11817_v21, %v11816_v31  ;;  %v4393_v60 = vld [vmem:[#allocation2 + $0x16a] sm:$0xff]  ;;  %v4400_v36 = vld [vmem:[#allocation2 + $0x1d2] sm:$0xff] }
 0x3c8   : > { %v4427_v14 = vpack.c.bf16 %v4394_v62, %v4393_v60  ;;  %v4401_v29 = vld [vmem:[#allocation2 + $0x1ea] sm:$0xff]  ;;  %v4408_v31 = vld [vmem:[#allocation2 + $0x252] sm:$0xff] }
 0x3c9   : > { %20599 = vmatpush3.bf16.msra.mxu1 %v22529_v53  ;;  %v11814_v53 = vld [vmem:[#allocation3 + $0x287] sm:$0xff]  ;;  %v12144_v0 = vld [vmem:[#allocation3 + $0x310] sm:$0xff] }
 0x3ca   : > { %20632 = vmatprep.subr.bf16.mxu1 %v24703_v2  ;;  %v11843_v43 = vpack.c.bf16 %v11815_v13, %v11814_v53  ;;  %v4402_v13 = vld [vmem:[#allocation2 + $0x1f2] sm:$0xff]  ;;  %v4405_v21 = vld [vmem:[#allocation2 + $0x22a] sm:$0xff] }
 0x3cb   : > { %19685 = vmatmul.mubr.msk.bf16.gmra.mrb[28].mxu0 %vm1491_vm2, %v4117_v7  ;;  %20569 = vmatmul.mubr.msk.bf16.gmra.mrb[184].mxu1 %vm920_vm0, %v11837_v39  ;;  %v4102_v7 = vld [vmem:[#allocation2 + $0x2c9] sm:$0xff]  ;;  %v4103_v39 = vld [vmem:[#allocation2 + $0x2d1] sm:$0xff]  ;;  %v4431_v16 = vpack.c.bf16 %v4402_v13, %v4401_v29 }
 0x3cc   : > { %19688 = vmatprep.mubr.msk.bf16.mxu0 %vm1491_vm2, %v4118_v18  ;;  %20572 = vmatprep.mubr.msk.bf16.mxu1 %vm920_vm0, %v11838_v19  ;;  %v11818_v18 = vld [vmem:[#allocation3 + $0x2c7] sm:$0xff]  ;;  %v4423_v19 = vpack.c.bf16 %v4386_v63, %v4385_v33  ;;  %v4125_v50 = vpack.c.bf16 %v4103_v39, %v4102_v7  ;;  %v4406_v53 = vld [vmem:[#allocation2 + $0x232] sm:$0xff] }
 0x3cd   : > { %v11845_v37 = vpack.c.bf16 %v11819_v24, %v11818_v18  ;;  %v4412_v63 = vld [vmem:[#allocation2 + $0x292] sm:$0xff]  ;;  %v4413_v7 = vld [vmem:[#allocation2 + $0x2aa] sm:$0xff] }
 0x3ce   : > { %v4416_v18 = vld [vmem:[#allocation2 + $0x2d2] sm:$0xff]  ;;  %v12438_v62 = vld [vmem:[#allocation3 + $0x169] sm:$0xff] }
 0x3cf   : > { %v4701_v20 = vld [vmem:[#allocation2 + $0x12e] sm:$0xff]  ;;  %v4708_v29 = vld [vmem:[#allocation2 + $0x1a6] sm:$0xff] }
 0x3d0   : > { %v4703_v55 = vld [vmem:[#allocation2 + $0x14e] sm:$0xff] }
 0x3d1   : > { %v4707_v60 = vld [vmem:[#allocation2 + $0x18e] sm:$0xff] }
 0x3d3   : > { %19689 = vmatmul.mubr.msk.bf16.gmra.mrb[32].mxu0 %vm1491_vm2, %v4119_v58  ;;  %20573 = vmatmul.mubr.msk.bf16.gmra.mrb[188].mxu1 %vm920_vm0, %v11839_v22  ;;  %v4389_v58 = vld [vmem:[#allocation2 + $0x12a] sm:$0xff]  ;;  %v4390_v22 = vld [vmem:[#allocation2 + $0x132] sm:$0xff] }
 0x3d4   : > { %19692 = vmatprep.mubr.msk.bf16.mxu0 %vm1491_vm2, %v4120_v38  ;;  %20576 = vmatprep.mubr.msk.bf16.mxu1 %vm920_vm0, %v11840_v34  ;;  %v4425_v38 = vpack.c.bf16 %v4390_v22, %v4389_v58  ;;  %v22532_v34 = vld [vmem:[%s26391_s5 + $0xf8] sm:$0xff]   ;;  %v4700_v58 = vld [vmem:[#allocation2 + $0x126] sm:$0xff] }
 0x3d5   : > { %v4737_v22 = vpack.c.bf16 %v4701_v20, %v4700_v58  ;;  %v4721_v20 = vld [vmem:[#allocation2 + $0x26e] sm:$0xff] }
 0x3d6   : > { %v12455_v58 = vld [vmem:[#allocation3 + $0x271] sm:$0xff] }
 0x3db   : > { %19693 = vmatmul.mubr.msk.bf16.gmra.mrb[36].mxu0 %vm1491_vm2, %v4121_v3  ;;  %20577 = vmatmul.mubr.msk.bf16.gmra.mrb[192].mxu1 %vm920_vm0, %v11841_v11  ;;  %v4396_v3 = vld [vmem:[#allocation2 + $0x192] sm:$0xff] }
 0x3dc   : > { %19696 = vmatprep.mubr.msk.bf16.mxu0 %vm1491_vm2, %v4122_v6  ;;  %20580 = vmatprep.mubr.msk.bf16.mxu1 %vm920_vm0, %v11842_v4  ;;  %v22534_v11 = vld [vmem:[%s26395_s9 + $0x110] sm:$0xff]  }
 0x3dd   : > { %v4398_v6 = vld [vmem:[#allocation2 + $0x1b2] sm:$0xff] }
 0x3de   : > { %v4429_v4 = vpack.c.bf16 %v4398_v6, %v4397_v17  ;;  %v4709_v6 = vld [vmem:[#allocation2 + $0x1ae] sm:$0xff] }
 0x3df   : > { %v4741_v13 = vpack.c.bf16 %v4709_v6, %v4708_v29 }
 0x3e3   : > { %19697 = vmatmul.mubr.msk.bf16.gmra.mrb[40].mxu0 %vm1491_vm2, %v4123_v40  ;;  %20581 = vmatmul.mubr.msk.bf16.gmra.mrb[196].mxu1 %vm920_vm0, %v11843_v43  ;;  %v4433_v43 = vpack.c.bf16 %v4406_v53, %v4405_v21  ;;  %v4713_v21 = vld [vmem:[#allocation2 + $0x1ee] sm:$0xff] }
 0x3e4   : > { %19700 = vmatprep.mubr.msk.bf16.mxu0 %vm1491_vm2, %v4124_v49  ;;  %20584 = vmatprep.mubr.msk.bf16.mxu1 %vm920_vm0, %v11844_v35  ;;  %v4409_v49 = vld [vmem:[#allocation2 + $0x26a] sm:$0xff] }
 0x3e5   : > { %v12444_v53 = vld [vmem:[#allocation3 + $0x1c9] sm:$0xff] }
 0x3eb   : > { %19701 = vmatmul.mubr.msk.bf16.gmra.mrb[44].mxu0 %vm1491_vm2, %v4125_v50  ;;  %20585 = vmatmul.mubr.msk.bf16.gmra.mrb[200].mxu1 %vm920_vm0, %v11845_v37  ;;  %v4698_v50 = vld [vmem:[#allocation2 + $0x106] sm:$0xff] }
 0x3ec   : > { %20588 = vmatprep.mubr.msk.bf16.mxu1 %vm920_vm0, %v24477_v42  ;;  %19710 = vmatprep.mubr.msk.bf16.mxu0 %vm1491_vm2, %v4423_v19  ;;  %v4391_v42 = vld [vmem:[#allocation2 + $0x14a] sm:$0xff] }
 0x3ed   : > { %v4426_v15 = vpack.c.bf16 %v4392_v59, %v4391_v42  ;;  %v4699_v19 = vld [vmem:[#allocation2 + $0x10e] sm:$0xff] }
 0x3ee   : > { %v4736_v37 = vpack.c.bf16 %v4699_v19, %v4698_v50  ;;  %v12436_v42 = vld [vmem:[#allocation3 + $0x149] sm:$0xff]  ;;  %v12437_v59 = vld [vmem:[#allocation3 + $0x151] sm:$0xff] }
 0x3ef   : > { %v4716_v19 = vld [vmem:[#allocation2 + $0x226] sm:$0xff] }
 0x3f3   : > { %19711 = vmatmul.mubr.msk.bf16.vlgmr.msra.gmra.mrb[16].mxu0 %vm1491_vm2, %v4424_v46  ;;  %20589 = vmatmul.mubr.msk.bf16.gmra.mrb[204].mxu1 %vm920_vm0, %v11847_v47  ;;  %v12435_v47 = vld [vmem:[#allocation3 + $0x131] sm:$0xff]  ;;  %v4702_v46 = vld [vmem:[#allocation2 + $0x146] sm:$0xff] }
 0x3f4   : > { %19714 = vmatprep.mubr.msk.bf16.mxu0 %vm1491_vm2, %v4425_v38  ;;  %20600 = vmatprep.mubr.msk.bf16.mxu1 %vm920_vm0, %v24491_v32  ;;  %v24745_v32 = vld [vmem:[%s26391_s5 + $0x108] sm:$0xff]   ;;  %v4738_v38 = vpack.c.bf16 %v4703_v55, %v4702_v46  ;;  %v12453_v55 = vld [vmem:[#allocation3 + $0x251] sm:$0xff] }
 0x3f5   : > { %19743 = vmatpush3.bf16.msra.mxu0 %v24682_v45  ;;  %v4395_v45 = vld [vmem:[#allocation2 + $0x18a] sm:$0xff] }
 0x3f6   : > { %19744 = vmatprep.subr.bf16.mxu0 %v22532_v34 }
 0x3f9   : > { %19745 = vmatpush3.bf16.msra.mxu0 %v22532_v34  ;;  %v12474_v34 = vpack.c.bf16 %v12435_v47, %v12434_v52  ;;  %v4723_v52 = vld [vmem:[#allocation2 + $0x28e] sm:$0xff] }
 0x3fa   : > { %19746 = vmatprep.subr.bf16.mxu0 %v22535_v51  ;;  %v12454_v47 = vld [vmem:[#allocation3 + $0x269] sm:$0xff] }
 0x3fb   : > { %19715 = vmatmul.mubr.msk.bf16.gmra.mrb[20].mxu0 %vm1491_vm2, %v4426_v15  ;;  %20601 = vmatmul.mubr.msk.bf16.vlgmr.msra.gmra.mrb[176].mxu1 %vm920_vm0, %v24493_v5  ;;  %v4428_v5 = vpack.c.bf16 %v4396_v3, %v4395_v45  ;;  %v12439_v15 = vld [vmem:[#allocation3 + $0x171] sm:$0xff]  ;;  %v12475_v45 = vpack.c.bf16 %v12437_v59, %v12436_v42  ;;  %v4706_v3 = vld [vmem:[#allocation2 + $0x186] sm:$0xff] }
 0x3fc   : > { %19718 = vmatprep.mubr.msk.bf16.mxu0 %vm1491_vm2, %v4427_v14  ;;  %20604 = vmatprep.mubr.msk.bf16.mxu1 %vm920_vm0, %v24514_v27  ;;  %v22536_v27 = vld [vmem:[%s26395_s9 + $0x118] sm:$0xff]   ;;  %v4704_v14 = vld [vmem:[#allocation2 + $0x166] sm:$0xff]  ;;  %v12476_v17 = vpack.c.bf16 %v12439_v15, %v12438_v62  ;;  %v22546_v42 = vld [vmem:[%s26397_s11 + $0x30] sm:$0xff]  }
 0x3fd   : > { %20633 = vmatpush3.bf16.msra.mxu1 %v24703_v2  ;;  %19747 = vmatpush3.bf16.msra.mxu0 %v22535_v51  ;;  %v4399_v2 = vld [vmem:[#allocation2 + $0x1ca] sm:$0xff]  ;;  %v22539_v51 = vld [vmem:[%s26391_s5 + $0x118] sm:$0xff]  }
 0x3fe   : > { %20634 = vmatprep.subr.bf16.mxu1 %v22533_v54  ;;  %19780 = vmatprep.subr.bf16.mxu0 %v24745_v32  ;;  %v4430_v28 = vpack.c.bf16 %v4400_v36, %v4399_v2  ;;  %v12442_v2 = vld [vmem:[#allocation3 + $0x1a9] sm:$0xff]  ;;  %v12443_v36 = vld [vmem:[#allocation3 + $0x1b1] sm:$0xff] }
 0x3ff   : > { %v4725_v59 = vld [vmem:[#allocation2 + $0x2ae] sm:$0xff] }
 0x400   : > { %v4727_v62 = vld [vmem:[#allocation2 + $0x2ce] sm:$0xff] }
 0x401   : > { %20635 = vmatpush3.bf16.msra.mxu1 %v22533_v54  ;;  %v12458_v15 = vld [vmem:[#allocation3 + $0x2a9] sm:$0xff] }
 0x402   : > { %20636 = vmatprep.subr.bf16.mxu1 %v22534_v11 }
 0x403   : > { %19719 = vmatmul.mubr.msk.bf16.gmra.mrb[24].mxu0 %vm1491_vm2, %v4428_v5  ;;  %20605 = vmatmul.mubr.msk.bf16.gmra.mrb[180].mxu1 %vm920_vm0, %v24516_v30  ;;  %v4403_v30 = vld [vmem:[#allocation2 + $0x20a] sm:$0xff] }
 0x404   : > { %19722 = vmatprep.mubr.msk.bf16.mxu0 %vm1491_vm2, %v4429_v4  ;;  %20608 = vmatprep.mubr.msk.bf16.mxu1 %vm920_vm0, %v24532_v44  ;;  %v4404_v44 = vld [vmem:[#allocation2 + $0x212] sm:$0xff]  ;;  %v12440_v5 = vld [vmem:[#allocation3 + $0x189] sm:$0xff] }
 0x405   : > { %20637 = vmatpush3.bf16.msra.mxu1 %v22534_v11  ;;  %v4432_v40 = vpack.c.bf16 %v4404_v44, %v4403_v30  ;;  %v4740_v11 = vpack.c.bf16 %v4707_v60, %v4706_v3  ;;  %v12441_v4 = vld [vmem:[#allocation3 + $0x191] sm:$0xff]  ;;  %v12478_v44 = vpack.c.bf16 %v12443_v36, %v12442_v2  ;;  %v4728_v36 = vld [vmem:[#allocation2 + $0x2e6] sm:$0xff] }
 0x406   : > { %20638 = vmatprep.subr.bf16.mxu1 %v22536_v27  ;;  %v12457_v60 = vld [vmem:[#allocation3 + $0x291] sm:$0xff] }
 0x407   : > { %v5012_v2 = vld [vmem:[#allocation2 + $0x10f] sm:$0xff] }
 0x409   : > { %20639 = vmatpush3.bf16.msra.mxu1 %v22536_v27  ;;  %v4711_v27 = vld [vmem:[#allocation2 + $0x1ce] sm:$0xff] }
 0x40a   : > { %20672 = vmatprep.subr.bf16.mxu1 %v22546_v42 }
 0x40b   : > { %19723 = vmatmul.mubr.msk.bf16.gmra.mrb[28].mxu0 %vm1491_vm2, %v4430_v28  ;;  %20609 = vmatmul.mubr.msk.bf16.gmra.mrb[184].mxu1 %vm920_vm0, %v24534_v48  ;;  %v4407_v48 = vld [vmem:[#allocation2 + $0x24a] sm:$0xff]  ;;  %v12477_v28 = vpack.c.bf16 %v12441_v4, %v12440_v5 }
 0x40c   : > { %19726 = vmatprep.mubr.msk.bf16.mxu0 %vm1491_vm2, %v4431_v16  ;;  %20612 = vmatprep.mubr.msk.bf16.mxu1 %vm920_vm0, %v24543_v56  ;;  %v4410_v56 = vld [vmem:[#allocation2 + $0x272] sm:$0xff]  ;;  %v4434_v35 = vpack.c.bf16 %v4408_v31, %v4407_v48  ;;  %v4710_v16 = vld [vmem:[#allocation2 + $0x1c6] sm:$0xff] }
 0x40d   : > { %v4435_v33 = vpack.c.bf16 %v4410_v56, %v4409_v49  ;;  %v4742_v30 = vpack.c.bf16 %v4711_v27, %v4710_v16  ;;  %v12446_v48 = vld [vmem:[#allocation3 + $0x1e9] sm:$0xff]  ;;  %v12447_v31 = vld [vmem:[#allocation3 + $0x1f1] sm:$0xff] }
 0x40e   : > { %v4712_v49 = vld [vmem:[#allocation2 + $0x1e6] sm:$0xff]  ;;  %v4729_v5 = vld [vmem:[#allocation2 + $0x2ee] sm:$0xff] }
 0x40f   : > { %v4743_v56 = vpack.c.bf16 %v4713_v21, %v4712_v49  ;;  %v12460_v4 = vld [vmem:[#allocation3 + $0x2c9] sm:$0xff]  ;;  %v12461_v27 = vld [vmem:[#allocation3 + $0x2d1] sm:$0xff]  ;;  %v4751_v29 = vpack.c.bf16 %v4729_v5, %v4728_v36 }
 0x410   : > { %v12465_v21 = vld [vmem:[#allocation3 + $0x311] sm:$0xff]  ;;  %v5015_v49 = vld [vmem:[#allocation2 + $0x147] sm:$0xff] }
 0x411   : > { %v13021_v5 = vld [vmem:[#allocation4 + $0xe8] sm:$0xff] }
 0x412   : > { %v5042_v36 = vld [vmem:[#allocation2 + $0x2ef] sm:$0xff] }
 0x413   : > { %19727 = vmatmul.mubr.msk.bf16.gmra.mrb[32].mxu0 %vm1491_vm2, %v4432_v40  ;;  %20613 = vmatmul.mubr.msk.bf16.gmra.mrb[188].mxu1 %vm920_vm0, %v24545_v10  ;;  %v4411_v10 = vld [vmem:[#allocation2 + $0x28a] sm:$0xff] }
 0x414   : > { %19730 = vmatprep.mubr.msk.bf16.mxu0 %vm1491_vm2, %v4433_v43  ;;  %20616 = vmatprep.mubr.msk.bf16.mxu1 %vm920_vm0, %v24553_v61  ;;  %v4414_v61 = vld [vmem:[#allocation2 + $0x2b2] sm:$0xff]  ;;  %v4436_v39 = vpack.c.bf16 %v4412_v63, %v4411_v10  ;;  %v12480_v63 = vpack.c.bf16 %v12447_v31, %v12446_v48  ;;  %v5013_v48 = vld [vmem:[#allocation2 + $0x127] sm:$0xff] }
 0x415   : > { %v4437_v24 = vpack.c.bf16 %v4414_v61, %v4413_v7  ;;  %v12445_v40 = vld [vmem:[#allocation3 + $0x1d1] sm:$0xff]  ;;  %v12448_v61 = vld [vmem:[#allocation3 + $0x209] sm:$0xff] }
 0x416   : > { %v4715_v43 = vld [vmem:[#allocation2 + $0x20e] sm:$0xff] }
 0x417   : > { %v4717_v7 = vld [vmem:[#allocation2 + $0x22e] sm:$0xff] }
 0x41b   : > { %19731 = vmatmul.mubr.msk.bf16.gmra.mrb[36].mxu0 %vm1491_vm2, %v4434_v35  ;;  %20617 = vmatmul.mubr.msk.bf16.gmra.mrb[192].mxu1 %vm920_vm0, %v24555_v26  ;;  %v4415_v26 = vld [vmem:[#allocation2 + $0x2ca] sm:$0xff]  ;;  %v12479_v35 = vpack.c.bf16 %v12445_v40, %v12444_v53 }
 0x41c   : > { %19734 = vmatprep.mubr.msk.bf16.mxu0 %vm1491_vm2, %v4435_v33  ;;  %20620 = vmatprep.mubr.msk.bf16.mxu1 %vm920_vm0, %v24563_v41  ;;  %v4438_v41 = vpack.c.bf16 %v4416_v18, %v4415_v26  ;;  %v4714_v33 = vld [vmem:[#allocation2 + $0x206] sm:$0xff]  ;;  %v12451_v18 = vld [vmem:[#allocation3 + $0x231] sm:$0xff] }
 0x41d   : > { %v4744_v10 = vpack.c.bf16 %v4715_v43, %v4714_v33  ;;  %v12450_v26 = vld [vmem:[#allocation3 + $0x229] sm:$0xff] }
 0x41e   : > { %v5014_v53 = vld [vmem:[#allocation2 + $0x12f] sm:$0xff] }
 0x41f   : > { %v5016_v43 = vld [vmem:[#allocation2 + $0x14f] sm:$0xff]  ;;  %v5050_v31 = vpack.c.bf16 %v5014_v53, %v5013_v48  ;;  %v22544_v48 = vld [vmem:[%s26391_s5 + $0x140] sm:$0xff]  }
 0x420   : > { %v22542_v33 = vld [vmem:[%s26391_s5 + $0x130] sm:$0xff]   ;;  %v5326_v53 = vld [vmem:[#allocation2 + $0x128] sm:$0xff] }
 0x423   : > { %19735 = vmatmul.mubr.msk.bf16.gmra.mrb[40].mxu0 %vm1491_vm2, %v4436_v39  ;;  %20621 = vmatmul.mubr.msk.bf16.gmra.mrb[196].mxu1 %vm920_vm0, %v24565_v23  ;;  %v12143_v23 = vld [vmem:[#allocation3 + $0x308] sm:$0xff]  ;;  %v12449_v39 = vld [vmem:[#allocation3 + $0x211] sm:$0xff] }
 0x424   : > { %19738 = vmatprep.mubr.msk.bf16.mxu0 %vm1491_vm2, %v4437_v24  ;;  %20624 = vmatprep.mubr.msk.bf16.mxu1 %vm920_vm0, %v24573_v57  ;;  %v12168_v57 = vpack.c.bf16 %v12144_v0, %v12143_v23  ;;  %v4719_v24 = vld [vmem:[#allocation2 + $0x24e] sm:$0xff]  ;;  %v12481_v50 = vpack.c.bf16 %v12449_v39, %v12448_v61  ;;  %v12482_v0 = vpack.c.bf16 %v12451_v18, %v12450_v26 }
 0x425   : > { %v5019_v39 = vld [vmem:[#allocation2 + $0x187] sm:$0xff]  ;;  %v5022_v18 = vld [vmem:[#allocation2 + $0x1af] sm:$0xff] }
 0x426   : > { %v22550_v26 = vld [vmem:[%s26397_s11 + $0x48] sm:$0xff]  }
 0x42b   : > { %19739 = vmatmul.mubr.msk.bf16.gmra.mrb[44].mxu0 %vm1491_vm2, %v4438_v41  ;;  %20625 = vmatmul.mubr.msk.bf16.gmra.mrb[200].mxu1 %vm920_vm0, %v24575_v9  ;;  %v22538_v9 = vld [vmem:[%s26391_s5 + $0x110] sm:$0xff]   ;;  %v4745_v41 = vpack.c.bf16 %v4717_v7, %v4716_v19  ;;  %v5017_v7 = vld [vmem:[#allocation2 + $0x167] sm:$0xff] }
 0x42c   : > { %19748 = vmatprep.mubr.msk.bf16.mxu0 %vm1491_vm2, %v4736_v37  ;;  %20628 = vmatprep.mubr.msk.bf16.mxu1 %vm920_vm0, %v24583_v12  ;;  %v4705_v12 = vld [vmem:[#allocation2 + $0x16e] sm:$0xff]  ;;  %v4718_v37 = vld [vmem:[#allocation2 + $0x246] sm:$0xff] }
 0x42d   : > { %v4739_v54 = vpack.c.bf16 %v4705_v12, %v4704_v14  ;;  %v4746_v23 = vpack.c.bf16 %v4719_v24, %v4718_v37  ;;  %v12484_v12 = vpack.c.bf16 %v12455_v58, %v12454_v47  ;;  %v12459_v14 = vld [vmem:[#allocation3 + $0x2b1] sm:$0xff]  ;;  %v5023_v37 = vld [vmem:[#allocation2 + $0x1c7] sm:$0xff] }
 0x42e   : > { %v12486_v6 = vpack.c.bf16 %v12459_v14, %v12458_v15  ;;  %v5024_v19 = vld [vmem:[#allocation2 + $0x1cf] sm:$0xff]  ;;  %v22553_v14 = vld [vmem:[%s26397_s11 + $0x58] sm:$0xff]  }
 0x42f   : > { %v22552_v58 = vld [vmem:[%s26397_s11 + $0x50] sm:$0xff]  }
 0x433   : > { %19749 = vmatmul.mubr.msk.bf16.vlgmr.msra.gmra.mrb[16].mxu0 %vm1491_vm2, %v4737_v22  ;;  %20629 = vmatmul.mubr.msk.bf16.gmra.mrb[204].mxu1 %vm920_vm0, %v12168_v57  ;;  %v12452_v57 = vld [vmem:[#allocation3 + $0x249] sm:$0xff] }
 0x434   : > { %19752 = vmatprep.mubr.msk.bf16.mxu0 %vm1491_vm2, %v4738_v38  ;;  %20640 = vmatprep.mubr.msk.bf16.mxu1 %vm920_vm0, %v12474_v34  ;;  %v4720_v22 = vld [vmem:[#allocation2 + $0x266] sm:$0xff]  ;;  %v12483_v38 = vpack.c.bf16 %v12453_v55, %v12452_v57 }
 0x435   : > { %19781 = vmatpush3.bf16.msra.mxu0 %v24745_v32  ;;  %v24811_v32 = vld [vmem:[%s26391_s5 + $0x120] sm:$0xff]   ;;  %v4747_v46 = vpack.c.bf16 %v4721_v20, %v4720_v22  ;;  %v5028_v20 = vld [vmem:[#allocation2 + $0x20f] sm:$0xff] }
 0x436   : > { %19782 = vmatprep.subr.bf16.mxu0 %v22538_v9  ;;  %v4722_v34 = vld [vmem:[#allocation2 + $0x286] sm:$0xff]  ;;  %v5030_v22 = vld [vmem:[#allocation2 + $0x22f] sm:$0xff] }
 0x437   : > { %v5025_v57 = vld [vmem:[#allocation2 + $0x1e7] sm:$0xff] }
 0x439   : > { %19783 = vmatpush3.bf16.msra.mxu0 %v22538_v9  ;;  %v4748_v9 = vpack.c.bf16 %v4723_v52, %v4722_v34  ;;  %v5027_v52 = vld [vmem:[#allocation2 + $0x207] sm:$0xff] }
 0x43a   : > { %19784 = vmatprep.subr.bf16.mxu0 %v22539_v51  ;;  %v5057_v47 = vpack.c.bf16 %v5028_v20, %v5027_v52  ;;  %v5343_v20 = vld [vmem:[#allocation2 + $0x230] sm:$0xff] }
 0x43b   : > { %19753 = vmatmul.mubr.msk.bf16.gmra.mrb[20].mxu0 %vm1491_vm2, %v4739_v54  ;;  %20641 = vmatmul.mubr.msk.bf16.vlgmr.msra.gmra.mrb[176].mxu1 %vm920_vm0, %v12475_v45  ;;  %v4724_v54 = vld [vmem:[#allocation2 + $0x2a6] sm:$0xff] }
 0x43c   : > { %19756 = vmatprep.mubr.msk.bf16.mxu0 %vm1491_vm2, %v4740_v11  ;;  %20644 = vmatprep.mubr.msk.bf16.mxu1 %vm920_vm0, %v12476_v17  ;;  %v4749_v45 = vpack.c.bf16 %v4725_v59, %v4724_v54  ;;  %v4726_v11 = vld [vmem:[#allocation2 + $0x2c6] sm:$0xff]  ;;  %v5036_v59 = vld [vmem:[#allocation2 + $0x28f] sm:$0xff] }
 0x43d   : > { %19785 = vmatpush3.bf16.msra.mxu0 %v22539_v51  ;;  %v12456_v51 = vld [vmem:[#allocation3 + $0x289] sm:$0xff]  ;;  %20673 = vmatpush3.bf16.msra.mxu1 %v22546_v42  ;;  %v4750_v17 = vpack.c.bf16 %v4727_v62, %v4726_v11 }
 0x43e   : > { %19818 = vmatprep.subr.bf16.mxu0 %v24811_v32  ;;  %v12485_v3 = vpack.c.bf16 %v12457_v60, %v12456_v51  ;;  %v5034_v42 = vld [vmem:[#allocation2 + $0x26f] sm:$0xff]  ;;  %v5033_v51 = vld [vmem:[#allocation2 + $0x267] sm:$0xff] }
 0x43f   : > { %v5060_v60 = vpack.c.bf16 %v5034_v42, %v5033_v51  ;;  %v5035_v62 = vld [vmem:[#allocation2 + $0x287] sm:$0xff]  ;;  %v5038_v54 = vld [vmem:[#allocation2 + $0x2af] sm:$0xff] }
 0x440   : > { %v5061_v15 = vpack.c.bf16 %v5036_v59, %v5035_v62  ;;  %v5351_v42 = vld [vmem:[#allocation2 + $0x2b0] sm:$0xff]  ;;  %v5350_v51 = vld [vmem:[#allocation2 + $0x2a8] sm:$0xff] }
 0x441   : > { %v5353_v59 = vld [vmem:[#allocation2 + $0x2d0] sm:$0xff]  ;;  %v5352_v62 = vld [vmem:[#allocation2 + $0x2c8] sm:$0xff] }
 0x443   : > { %19757 = vmatmul.mubr.msk.bf16.gmra.mrb[24].mxu0 %vm1491_vm2, %v4741_v13  ;;  %20645 = vmatmul.mubr.msk.bf16.gmra.mrb[180].mxu1 %vm920_vm0, %v12477_v28  ;;  %v12487_v13 = vpack.c.bf16 %v12461_v27, %v12460_v4  ;;  %v5011_v28 = vld [vmem:[#allocation2 + $0x107] sm:$0xff]  ;;  %v13022_v4 = vld [vmem:[#allocation4 + $0xf0] sm:$0xff] }
 0x444   : > { %19760 = vmatprep.mubr.msk.bf16.mxu0 %vm1491_vm2, %v4742_v30  ;;  %20648 = vmatprep.mubr.msk.bf16.mxu1 %vm920_vm0, %v12478_v44  ;;  %v5049_v16 = vpack.c.bf16 %v5012_v2, %v5011_v28  ;;  %v22547_v30 = vld [vmem:[%s26397_s11 + $0x38] sm:$0xff]   ;;  %v12464_v44 = vld [vmem:[#allocation3 + $0x309] sm:$0xff]  ;;  %v13065_v27 = vpack.c.bf16 %v13022_v4, %v13021_v5  ;;  %v24892_v2 = vld [vmem:[%s26397_s11] sm:$0xff]  }
 0x445   : > { %20674 = vmatprep.subr.bf16.mxu1 %v22547_v30  ;;  %v12489_v40 = vpack.c.bf16 %v12465_v21, %v12464_v44  ;;  %v5327_v44 = vld [vmem:[#allocation2 + $0x130] sm:$0xff] }
 0x446   : > { %20675 = vmatpush3.bf16.msra.mxu1 %v22547_v30  ;;  %v5329_v21 = vld [vmem:[#allocation2 + $0x150] sm:$0xff] }
 0x447   : > { %v5640_v5 = vld [vmem:[#allocation2 + $0x131] sm:$0xff]  ;;  %v5641_v4 = vld [vmem:[#allocation2 + $0x149] sm:$0xff] }
 0x44b   : > { %19761 = vmatmul.mubr.msk.bf16.gmra.mrb[28].mxu0 %vm1491_vm2, %v4743_v56  ;;  %20649 = vmatmul.mubr.msk.bf16.gmra.mrb[184].mxu1 %vm920_vm0, %v12479_v35  ;;  %v22541_v56 = vld [vmem:[%s26391_s5 + $0x128] sm:$0xff]   ;;  %v5051_v35 = vpack.c.bf16 %v5016_v43, %v5015_v49 }
 0x44c   : > { %19764 = vmatprep.mubr.msk.bf16.mxu0 %vm1491_vm2, %v4744_v10  ;;  %20652 = vmatprep.mubr.msk.bf16.mxu1 %vm920_vm0, %v12480_v63  ;;  %v5018_v10 = vld [vmem:[#allocation2 + $0x16f] sm:$0xff] }
 0x44d   : > { %v5020_v63 = vld [vmem:[#allocation2 + $0x18f] sm:$0xff]  ;;  %v5052_v61 = vpack.c.bf16 %v5018_v10, %v5017_v7 }
 0x44e   : > { %v5053_v24 = vpack.c.bf16 %v5020_v63, %v5019_v39  ;;  %v5328_v43 = vld [vmem:[#allocation2 + $0x148] sm:$0xff]  ;;  %v24910_v63 = vld [vmem:[%s26391_s5 + $0x150] sm:$0xff]  }
 0x44f   : > { %v22545_v49 = vld [vmem:[%s26391_s5 + $0x148] sm:$0xff]   ;;  %v5337_v39 = vld [vmem:[#allocation2 + $0x1d0] sm:$0xff] }
 0x450   : > { %v5332_v10 = vld [vmem:[#allocation2 + $0x188] sm:$0xff] }
 0x453   : > { %19765 = vmatmul.mubr.msk.bf16.gmra.mrb[32].mxu0 %vm1491_vm2, %v4745_v41  ;;  %20653 = vmatmul.mubr.msk.bf16.gmra.mrb[188].mxu1 %vm920_vm0, %v12481_v50  ;;  %v5021_v41 = vld [vmem:[#allocation2 + $0x1a7] sm:$0xff] }
 0x454   : > { %19768 = vmatprep.mubr.msk.bf16.mxu0 %vm1491_vm2, %v4746_v23  ;;  %20656 = vmatprep.mubr.msk.bf16.mxu1 %vm920_vm0, %v12482_v0  ;;  %v5054_v50 = vpack.c.bf16 %v5022_v18, %v5021_v41  ;;  %v5055_v23 = vpack.c.bf16 %v5024_v19, %v5023_v37  ;;  %v5026_v0 = vld [vmem:[#allocation2 + $0x1ef] sm:$0xff] }
 0x455   : > { %v5056_v55 = vpack.c.bf16 %v5026_v0, %v5025_v57  ;;  %v5339_v19 = vld [vmem:[#allocation2 + $0x1f0] sm:$0xff] }
 0x456   : > { %v5341_v41 = vld [vmem:[#allocation2 + $0x210] sm:$0xff] }
 0x457   : > { %v5345_v57 = vld [vmem:[#allocation2 + $0x250] sm:$0xff] }
 0x45b   : > { %19769 = vmatmul.mubr.msk.bf16.gmra.mrb[36].mxu0 %vm1491_vm2, %v4747_v46  ;;  %20657 = vmatmul.mubr.msk.bf16.gmra.mrb[192].mxu1 %vm920_vm0, %v12483_v38  ;;  %v5032_v46 = vld [vmem:[#allocation2 + $0x24f] sm:$0xff]  ;;  %v5029_v38 = vld [vmem:[#allocation2 + $0x227] sm:$0xff] }
 0x45c   : > { %19772 = vmatprep.mubr.msk.bf16.mxu0 %vm1491_vm2, %v4748_v9  ;;  %20660 = vmatprep.mubr.msk.bf16.mxu1 %vm920_vm0, %v12484_v12  ;;  %v5058_v34 = vpack.c.bf16 %v5030_v22, %v5029_v38  ;;  %v5031_v9 = vld [vmem:[#allocation2 + $0x247] sm:$0xff]  ;;  %v5347_v22 = vld [vmem:[#allocation2 + $0x270] sm:$0xff] }
 0x45d   : > { %v5059_v12 = vpack.c.bf16 %v5032_v46, %v5031_v9  ;;  %v5349_v46 = vld [vmem:[#allocation2 + $0x290] sm:$0xff]  ;;  %v5346_v38 = vld [vmem:[#allocation2 + $0x268] sm:$0xff] }
 0x45e   : > { %v5348_v9 = vld [vmem:[#allocation2 + $0x288] sm:$0xff] }
 0x463   : > { %19773 = vmatmul.mubr.msk.bf16.gmra.mrb[40].mxu0 %vm1491_vm2, %v4749_v45  ;;  %20661 = vmatmul.mubr.msk.bf16.gmra.mrb[196].mxu1 %vm920_vm0, %v12485_v3  ;;  %v5040_v45 = vld [vmem:[#allocation2 + $0x2cf] sm:$0xff]  ;;  %v5037_v3 = vld [vmem:[#allocation2 + $0x2a7] sm:$0xff] }
 0x464   : > { %19776 = vmatprep.mubr.msk.bf16.mxu0 %vm1491_vm2, %v4750_v17  ;;  %20664 = vmatprep.mubr.msk.bf16.mxu1 %vm920_vm0, %v12486_v6  ;;  %v5062_v11 = vpack.c.bf16 %v5038_v54, %v5037_v3  ;;  %v5039_v17 = vld [vmem:[#allocation2 + $0x2c7] sm:$0xff] }
 0x465   : > { %v5063_v6 = vpack.c.bf16 %v5040_v45, %v5039_v17  ;;  %v5637_v54 = vld [vmem:[#allocation2 + $0x109] sm:$0xff]  ;;  %v5638_v45 = vld [vmem:[#allocation2 + $0x111] sm:$0xff] }
 0x466   : > { %v5354_v3 = vld [vmem:[#allocation2 + $0x2e8] sm:$0xff]  ;;  %v5675_v17 = vpack.c.bf16 %v5638_v45, %v5637_v54 }
 0x46b   : > { %19777 = vmatmul.mubr.msk.bf16.gmra.mrb[44].mxu0 %vm1491_vm2, %v4751_v29  ;;  %20665 = vmatmul.mubr.msk.bf16.gmra.mrb[200].mxu1 %vm920_vm0, %v12487_v13  ;;  %v5325_v29 = vld [vmem:[#allocation2 + $0x110] sm:$0xff]  ;;  %v5041_v13 = vld [vmem:[#allocation2 + $0x2e7] sm:$0xff] }
 0x46c   : > { %19786 = vmatprep.mubr.msk.bf16.mxu0 %vm1491_vm2, %v5049_v16  ;;  %20668 = vmatprep.mubr.msk.bf16.mxu1 %vm920_vm0, %v24662_v25  ;;  %v22549_v25 = vld [vmem:[%s26397_s11 + $0x40] sm:$0xff]   ;;  %v5064_v28 = vpack.c.bf16 %v5042_v36, %v5041_v13  ;;  %v5324_v16 = vld [vmem:[#allocation2 + $0x108] sm:$0xff] }
 0x46d   : > { %20676 = vmatprep.subr.bf16.mxu1 %v22549_v25  ;;  %v5362_v30 = vpack.c.bf16 %v5325_v29, %v5324_v16  ;;  %v22551_v29 = vld [vmem:[%s26391_s5 + $0x158] sm:$0xff]   ;;  %v5643_v16 = vld [vmem:[#allocation2 + $0x169] sm:$0xff] }
 0x46e   : > { %20677 = vmatpush3.bf16.msra.mxu1 %v22549_v25  ;;  %v5330_v25 = vld [vmem:[#allocation2 + $0x168] sm:$0xff] }
 0x46f   : > { %20678 = vmatprep.subr.bf16.mxu1 %v22550_v26 }
 0x472   : > { %20679 = vmatpush3.bf16.msra.mxu1 %v22550_v26  ;;  %v5336_v26 = vld [vmem:[#allocation2 + $0x1c8] sm:$0xff] }
 0x473   : > { %19787 = vmatmul.mubr.msk.bf16.vlgmr.msra.gmra.mrb[16].mxu0 %vm1491_vm2, %v5050_v31  ;;  %20669 = vmatmul.mubr.msk.bf16.gmra.mrb[204].mxu1 %vm920_vm0, %v12489_v40  ;;  %v5363_v40 = vpack.c.bf16 %v5327_v44, %v5326_v53  ;;  %v5364_v31 = vpack.c.bf16 %v5329_v21, %v5328_v43  ;;  %v5368_v18 = vpack.c.bf16 %v5337_v39, %v5336_v26  ;;  %v5645_v44 = vld [vmem:[#allocation2 + $0x189] sm:$0xff]  ;;  %v5646_v21 = vld [vmem:[#allocation2 + $0x191] sm:$0xff] }
 0x474   : > { %19790 = vmatprep.mubr.msk.bf16.mxu0 %vm1491_vm2, %v5051_v35  ;;  %19819 = vmatpush3.bf16.msra.mxu0 %v24811_v32  ;;  %v24865_v32 = vld [vmem:[%s26391_s5 + $0x138] sm:$0xff]   ;;  %v5333_v35 = vld [vmem:[#allocation2 + $0x190] sm:$0xff]  ;;  %v5679_v43 = vpack.c.bf16 %v5646_v21, %v5645_v44  ;;  %v22556_v21 = vld [vmem:[%s26397_s11 + $0x8] sm:$0xff]  }
 0x475   : > { %19820 = vmatprep.subr.bf16.mxu0 %v22541_v56  ;;  %20680 = vmatprep.subr.bf16.mxu1 %v22552_v58  ;;  %v5366_v7 = vpack.c.bf16 %v5333_v35, %v5332_v10  ;;  %v5652_v10 = vld [vmem:[#allocation2 + $0x1f1] sm:$0xff]  ;;  %v5655_v26 = vld [vmem:[#allocation2 + $0x229] sm:$0xff] }
 0x476   : > { %20681 = vmatpush3.bf16.msra.mxu1 %v22552_v58  ;;  %20684 = vmatprep.mubr.msk.bf16.mxu1 %vm1162_vm1, %v13065_v27  ;;  %v5642_v27 = vld [vmem:[#allocation2 + $0x151] sm:$0xff] }
 0x477   : > { %20682 = vmatprep.subr.bf16.mxu1 %v22553_v14  ;;  %v5677_v13 = vpack.c.bf16 %v5642_v27, %v5641_v4  ;;  %v5664_v44 = vld [vmem:[#allocation2 + $0x2b1] sm:$0xff] }
 0x478   : > { %19821 = vmatpush3.bf16.msra.mxu0 %v22541_v56  ;;  %v5331_v56 = vld [vmem:[#allocation2 + $0x170] sm:$0xff] }
 0x479   : > { %19822 = vmatprep.subr.bf16.mxu0 %v22542_v33 }
 0x47a   : > { %20683 = vmatpush3.bf16.msra.mxu1 %v22553_v14  ;;  %v5355_v14 = vld [vmem:[#allocation2 + $0x2f0] sm:$0xff] }
 0x47b   : > { %19791 = vmatmul.mubr.msk.bf16.gmra.mrb[20].mxu0 %vm1491_vm2, %v5052_v61  ;;  %20716 = vmatprep.subr.bf16.mxu1 %v24892_v2  ;;  %v5335_v61 = vld [vmem:[#allocation2 + $0x1b0] sm:$0xff] }
 0x47c   : > { %19794 = vmatprep.mubr.msk.bf16.mxu0 %vm1491_vm2, %v5053_v24  ;;  %19823 = vmatpush3.bf16.msra.mxu0 %v22542_v33  ;;  %v5365_v33 = vpack.c.bf16 %v5331_v56, %v5330_v25  ;;  %v5650_v56 = vld [vmem:[#allocation2 + $0x1d1] sm:$0xff] }
 0x47d   : > { %19856 = vmatprep.subr.bf16.mxu0 %v24865_v32 }
 0x483   : > { %19795 = vmatmul.mubr.msk.bf16.gmra.mrb[24].mxu0 %vm1491_vm2, %v5054_v50  ;;  %v5338_v50 = vld [vmem:[#allocation2 + $0x1e8] sm:$0xff] }
 0x484   : > { %19798 = vmatprep.mubr.msk.bf16.mxu0 %vm1491_vm2, %v5055_v23  ;;  %v5369_v37 = vpack.c.bf16 %v5339_v19, %v5338_v50  ;;  %v5340_v23 = vld [vmem:[#allocation2 + $0x208] sm:$0xff] }
 0x485   : > { %v5370_v0 = vpack.c.bf16 %v5341_v41, %v5340_v23  ;;  %v5657_v50 = vld [vmem:[#allocation2 + $0x249] sm:$0xff] }
 0x48b   : > { %19799 = vmatmul.mubr.msk.bf16.gmra.mrb[28].mxu0 %vm1491_vm2, %v5056_v55  ;;  %v5342_v55 = vld [vmem:[#allocation2 + $0x228] sm:$0xff] }
 0x48c   : > { %19802 = vmatprep.mubr.msk.bf16.mxu0 %vm1491_vm2, %v5057_v47  ;;  %v5371_v52 = vpack.c.bf16 %v5343_v20, %v5342_v55  ;;  %v5344_v47 = vld [vmem:[#allocation2 + $0x248] sm:$0xff] }
 0x48d   : > { %v5372_v58 = vpack.c.bf16 %v5345_v57, %v5344_v47 }
 0x493   : > { %19803 = vmatmul.mubr.msk.bf16.gmra.mrb[32].mxu0 %vm1491_vm2, %v5058_v34  ;;  %v5373_v34 = vpack.c.bf16 %v5347_v22, %v5346_v38 }
 0x494   : > { %19806 = vmatprep.mubr.msk.bf16.mxu0 %vm1491_vm2, %v5059_v12  ;;  %v5374_v12 = vpack.c.bf16 %v5349_v46, %v5348_v9  ;;  %v5659_v9 = vld [vmem:[#allocation2 + $0x269] sm:$0xff] }
 0x49b   : > { %19807 = vmatmul.mubr.msk.bf16.gmra.mrb[36].mxu0 %vm1491_vm2, %v5060_v60  ;;  %v5375_v60 = vpack.c.bf16 %v5351_v42, %v5350_v51  ;;  %v5661_v51 = vld [vmem:[#allocation2 + $0x289] sm:$0xff] }
 0x49c   : > { %19810 = vmatprep.mubr.msk.bf16.mxu0 %vm1491_vm2, %v5061_v15  ;;  %v5376_v15 = vpack.c.bf16 %v5353_v59, %v5352_v62 }
 0x4a3   : > { %19811 = vmatmul.mubr.msk.bf16.gmra.mrb[40].mxu0 %vm1491_vm2, %v5062_v11  ;;  %v5377_v11 = vpack.c.bf16 %v5355_v14, %v5354_v3 }
 0x4a4   : > { %19814 = vmatprep.mubr.msk.bf16.mxu0 %vm1491_vm2, %v5063_v6  ;;  %v5639_v6 = vld [vmem:[#allocation2 + $0x129] sm:$0xff] }
 0x4a5   : > { %v5676_v36 = vpack.c.bf16 %v5640_v5, %v5639_v6 }
 0x4ab   : > { %19815 = vmatmul.mubr.msk.bf16.gmra.mrb[44].mxu0 %vm1491_vm2, %v5064_v28  ;;  %v22554_v28 = vld [vmem:[%s26391_s5 + $0x160] sm:$0xff]  }
 0x4ac   : > { %19824 = vmatprep.mubr.msk.bf16.mxu0 %vm1491_vm2, %v5362_v30  ;;  %v5644_v30 = vld [vmem:[#allocation2 + $0x171] sm:$0xff] }
 0x4ad   : > { %v5678_v53 = vpack.c.bf16 %v5644_v30, %v5643_v16 }
 0x4b3   : > { %19825 = vmatmul.mubr.msk.bf16.vlgmr.msra.gmra.mrb[16].mxu0 %vm1491_vm2, %v5363_v40  ;;  %v24939_v40 = vld [vmem:[%s26391_s5 + $0x168] sm:$0xff]  }
 0x4b4   : > { %19828 = vmatprep.mubr.msk.bf16.mxu0 %vm1491_vm2, %v5364_v31  ;;  %19857 = vmatpush3.bf16.msra.mxu0 %v24865_v32  ;;  %v5334_v32 = vld [vmem:[#allocation2 + $0x1a8] sm:$0xff]  ;;  %v5648_v31 = vld [vmem:[#allocation2 + $0x1b1] sm:$0xff] }
 0x4b5   : > { %19858 = vmatprep.subr.bf16.mxu0 %v22544_v48  ;;  %v5367_v24 = vpack.c.bf16 %v5335_v61, %v5334_v32  ;;  %v24951_v32 = vld [vmem:[%s26396_s10] ss:$0 sm:$0xff] }
 0x4b8   : > { %19859 = vmatpush3.bf16.msra.mxu0 %v22544_v48  ;;  %v5647_v48 = vld [vmem:[#allocation2 + $0x1a9] sm:$0xff] }
 0x4b9   : > { %19860 = vmatprep.subr.bf16.mxu0 %v22545_v49  ;;  %v5680_v35 = vpack.c.bf16 %v5648_v31, %v5647_v48  ;;  %v5665_v31 = vld [vmem:[#allocation2 + $0x2c9] sm:$0xff] }
 0x4bb   : > { %19829 = vmatmul.mubr.msk.bf16.gmra.mrb[20].mxu0 %vm1491_vm2, %v5365_v33  ;;  %v5651_v33 = vld [vmem:[#allocation2 + $0x1e9] sm:$0xff] }
 0x4bc   : > { %19832 = vmatprep.mubr.msk.bf16.mxu0 %vm1491_vm2, %v5366_v7  ;;  %19861 = vmatpush3.bf16.msra.mxu0 %v22545_v49  ;;  %v5649_v49 = vld [vmem:[#allocation2 + $0x1c9] sm:$0xff]  ;;  %v5654_v7 = vld [vmem:[#allocation2 + $0x211] sm:$0xff]  ;;  %v5682_v61 = vpack.c.bf16 %v5652_v10, %v5651_v33 }
 0x4bd   : > { %19894 = vmatprep.subr.bf16.mxu0 %v24910_v63  ;;  %v5681_v25 = vpack.c.bf16 %v5650_v56, %v5649_v49  ;;  %v5666_v49 = vld [vmem:[#allocation2 + $0x2d1] sm:$0xff] }
 0x4c3   : > { %19833 = vmatmul.mubr.msk.bf16.gmra.mrb[24].mxu0 %vm1491_vm2, %v5367_v24 }
 0x4c4   : > { %19836 = vmatprep.mubr.msk.bf16.mxu0 %vm1491_vm2, %v5368_v18  ;;  %v5656_v18 = vld [vmem:[#allocation2 + $0x231] sm:$0xff] }
 0x4cb   : > { %19837 = vmatmul.mubr.msk.bf16.gmra.mrb[28].mxu0 %vm1491_vm2, %v5369_v37  ;;  %v5658_v37 = vld [vmem:[#allocation2 + $0x251] sm:$0xff] }
 0x4cc   : > { %19840 = vmatprep.mubr.msk.bf16.mxu0 %vm1491_vm2, %v5370_v0  ;;  %v5685_v22 = vpack.c.bf16 %v5658_v37, %v5657_v50 }
 0x4d3   : > { %19841 = vmatmul.mubr.msk.bf16.gmra.mrb[32].mxu0 %vm1491_vm2, %v5371_v52  ;;  %v5684_v52 = vpack.c.bf16 %v5656_v18, %v5655_v26 }
 0x4d4   : > { %19844 = vmatprep.mubr.msk.bf16.mxu0 %vm1491_vm2, %v5372_v58 }
 0x4db   : > { %19845 = vmatmul.mubr.msk.bf16.gmra.mrb[36].mxu0 %vm1491_vm2, %v5373_v34 }
 0x4dc   : > { %19848 = vmatprep.mubr.msk.bf16.mxu0 %vm1491_vm2, %v5374_v12  ;;  %v5660_v12 = vld [vmem:[#allocation2 + $0x271] sm:$0xff] }
 0x4dd   : > { %v5686_v3 = vpack.c.bf16 %v5660_v12, %v5659_v9 }
 0x4e3   : > { %19849 = vmatmul.mubr.msk.bf16.gmra.mrb[40].mxu0 %vm1491_vm2, %v5375_v60  ;;  %v5662_v60 = vld [vmem:[#allocation2 + $0x291] sm:$0xff] }
 0x4e4   : > { %19852 = vmatprep.mubr.msk.bf16.mxu0 %vm1491_vm2, %v5376_v15  ;;  %v5687_v6 = vpack.c.bf16 %v5662_v60, %v5661_v51  ;;  %v22561_v60 = vld [vmem:[%s26397_s11 + $0x20] sm:$0xff]  }
 0x4eb   : > { %19853 = vmatmul.mubr.msk.bf16.gmra.mrb[44].mxu0 %vm1491_vm2, %v5377_v11 }
 0x4ec   : > { %19862 = vmatprep.mubr.msk.bf16.mxu0 %vm1491_vm2, %v5675_v17 }
 0x4f3   : > { %19863 = vmatmul.mubr.msk.bf16.vlgmr.msra.gmra.mrb[16].mxu0 %vm1491_vm2, %v5676_v36 }
 0x4f4   : > { %19866 = vmatprep.mubr.msk.bf16.mxu0 %vm1491_vm2, %v5677_v13  ;;  %19895 = vmatpush3.bf16.msra.mxu0 %v24910_v63  ;;  %v5653_v63 = vld [vmem:[#allocation2 + $0x209] sm:$0xff] }
 0x4f5   : > { %19896 = vmatprep.subr.bf16.mxu0 %v22551_v29  ;;  %v5683_v39 = vpack.c.bf16 %v5654_v7, %v5653_v63  ;;  %v5663_v13 = vld [vmem:[#allocation2 + $0x2a9] sm:$0xff] }
 0x4f6   : > { %v5688_v10 = vpack.c.bf16 %v5664_v44, %v5663_v13  ;;  %v5954_v13 = vld [vmem:[#allocation2 + $0x14a] sm:$0xff] }
 0x4f8   : > { %19897 = vmatpush3.bf16.msra.mxu0 %v22551_v29 }
 0x4f9   : > { %19898 = vmatprep.subr.bf16.mxu0 %v22554_v28 }
 0x4fb   : > { %19867 = vmatmul.mubr.msk.bf16.gmra.mrb[20].mxu0 %vm1491_vm2, %v5678_v53 }
 0x4fc   : > { %19870 = vmatprep.mubr.msk.bf16.mxu0 %vm1491_vm2, %v5679_v43  ;;  %19899 = vmatpush3.bf16.msra.mxu0 %v22554_v28 }
 0x4fd   : > { %19932 = vmatprep.subr.bf16.mxu0 %v24939_v40 }
 0x503   : > { %19871 = vmatmul.mubr.msk.bf16.gmra.mrb[24].mxu0 %vm1491_vm2, %v5680_v35 }
 0x504   : > { %19874 = vmatprep.mubr.msk.bf16.mxu0 %vm1491_vm2, %v5681_v25 }
 0x50b   : > { %19875 = vmatmul.mubr.msk.bf16.gmra.mrb[28].mxu0 %vm1491_vm2, %v5682_v61  ;;  %v5689_v61 = vpack.c.bf16 %v5666_v49, %v5665_v31 }
 0x50c   : > { %19878 = vmatprep.mubr.msk.bf16.mxu0 %vm1491_vm2, %v5683_v39  ;;  %v22558_v39 = vld [vmem:[%s26397_s11 + $0x10] sm:$0xff]  }
 0x50e   : > { %v20642_v24 = vpop.f32.mrb[176].mxu1 }
 0x50f   : > { %v12764_v19 = vadd.f32 %v20642_v24, %v24951_v32  ;;  %v12596_v41 = vpop.f32.mrb[177].mxu1 }
 0x510   : > { %v12762_v23 = vadd.f32 %v24951_v32, %v12596_v41  ;;  %v20643_v0 = vpop.f32.mrb[178].mxu1  ;;  %v5667_v41 = vld [vmem:[#allocation2 + $0x2e9] sm:$0xff] }
 0x511   : > { %v12796_v20 = vmax.f32 %v12764_v19, 0.0  ;;  %v12765_v57 = vadd.f32 %v20643_v0, %v24951_v32  ;;  %v12599_v55 = vpop.f32.mrb[179].mxu1  ;;  %v5668_v0 = vld [vmem:[#allocation2 + $0x2f1] sm:$0xff] }
 0x512   : > { %v12794_v47 = vmax.f32 %v12762_v23, 0.0  ;;  %v12763_v58 = vadd.f32 %v24951_v32, %v12599_v55  ;;  %v5690_v12 = vpack.c.bf16 %v5668_v0, %v5667_v41  ;;  %v5958_v41 = vld [vmem:[#allocation2 + $0x18a] sm:$0xff] }
 0x513   : > { %12930 = vst.msk [vmem:[#allocation4 + $0x128] sm:$0xff] %vm1162_vm1, %v12796_v20  ;;  %v12797_v46 = vmax.f32 %v12765_v57, 0.0  ;;  %19879 = vmatmul.mubr.msk.bf16.gmra.mrb[32].mxu0 %vm1491_vm2, %v5684_v52  ;;  %v22559_v20 = vld [vmem:[%s26397_s11 + $0x18] sm:$0xff]  }
 0x514   : > { %12928 = vst.msk [vmem:[#allocation4 + $0x108] sm:$0xff] %vm1162_vm1, %v12794_v47  ;;  %v12795_v38 = vmax.f32 %v12763_v58, 0.0  ;;  %19882 = vmatprep.mubr.msk.bf16.mxu0 %vm1491_vm2, %v5685_v22  ;;  %v5950_v47 = vld [vmem:[#allocation2 + $0x10a] sm:$0xff]  ;;  %v5951_v58 = vld [vmem:[#allocation2 + $0x112] sm:$0xff] }
 0x515   : > { %12931 = vst.msk [vmem:[#allocation4 + $0x130] sm:$0xff] %vm1162_vm1, %v12797_v46  ;;  %v5988_v51 = vpack.c.bf16 %v5951_v58, %v5950_v47 }
 0x516   : > { %12929 = vst.msk [vmem:[#allocation4 + $0x110] sm:$0xff] %vm1162_vm1, %v12795_v38  ;;  %v20646_v34 = vpop.f32.mrb[180].mxu1 }
 0x517   : > { %v12768_v42 = vadd.f32 %v20646_v34, %v24951_v32  ;;  %v12612_v59 = vpop.f32.mrb[181].mxu1 }
 0x518   : > { %v12766_v62 = vadd.f32 %v24951_v32, %v12612_v59  ;;  %v20647_v15 = vpop.f32.mrb[182].mxu1 }
 0x519   : > { %v12800_v14 = vmax.f32 %v12768_v42, 0.0  ;;  %v12769_v54 = vadd.f32 %v20647_v15, %v24951_v32  ;;  %v12615_v45 = vpop.f32.mrb[183].mxu1 }
 0x51a   : > { %v12798_v11 = vmax.f32 %v12766_v62, 0.0  ;;  %v12767_v17 = vadd.f32 %v24951_v32, %v12615_v45  ;;  %v13025_v30 = vld [vmem:[#allocation4 + $0x128] sm:$0xff] }
 0x51b   : > { %12934 = vst.msk [vmem:[#allocation4 + $0x168] sm:$0xff] %vm1162_vm1, %v12800_v14  ;;  %v12801_v5 = vmax.f32 %v12769_v54, 0.0  ;;  %19883 = vmatmul.mubr.msk.bf16.gmra.mrb[36].mxu0 %vm1491_vm2, %v5686_v3  ;;  %v13023_v36 = vld [vmem:[#allocation4 + $0x108] sm:$0xff] }
 0x51c   : > { %12932 = vst.msk [vmem:[#allocation4 + $0x148] sm:$0xff] %vm1162_vm1, %v12798_v11  ;;  %v12799_v4 = vmax.f32 %v12767_v17, 0.0  ;;  %19886 = vmatprep.mubr.msk.bf16.mxu0 %vm1491_vm2, %v5687_v6  ;;  %v13026_v27 = vld [vmem:[#allocation4 + $0x130] sm:$0xff] }
 0x51d   : > { %12935 = vst.msk [vmem:[#allocation4 + $0x170] sm:$0xff] %vm1162_vm1, %v12801_v5  ;;  %v13024_v29 = vld [vmem:[#allocation4 + $0x110] sm:$0xff]  ;;  %v13067_v48 = vpack.c.bf16 %v13026_v27, %v13025_v30 }
 0x51e   : > { %12933 = vst.msk [vmem:[#allocation4 + $0x150] sm:$0xff] %vm1162_vm1, %v12799_v4  ;;  %v20650_v28 = vpop.f32.mrb[184].mxu1  ;;  %v13066_v16 = vpack.c.bf16 %v13024_v29, %v13023_v36  ;;  %v5952_v3 = vld [vmem:[#allocation2 + $0x12a] sm:$0xff]  ;;  %v5953_v5 = vld [vmem:[#allocation2 + $0x132] sm:$0xff] }
 0x51f   : > { %v12772_v53 = vadd.f32 %v20650_v28, %v24951_v32  ;;  %v12628_v43 = vpop.f32.mrb[185].mxu1  ;;  %v22562_v4 = vld [vmem:[%s26397_s11 + $0x28] sm:$0xff]   ;;  %v5955_v28 = vld [vmem:[#allocation2 + $0x152] sm:$0xff] }
 0x520   : > { %v12770_v56 = vadd.f32 %v24951_v32, %v12628_v43  ;;  %v20651_v35 = vpop.f32.mrb[186].mxu1  ;;  %20685 = vmatmul.mubr.msk.bf16.vlgmr.msra.gmra.mrb[208].mxu1 %vm1162_vm1, %v13066_v16  ;;  %v5989_v43 = vpack.c.bf16 %v5953_v5, %v5952_v3  ;;  %v5963_v3 = vld [vmem:[#allocation2 + $0x1d2] sm:$0xff] }
 0x521   : > { %v12804_v8 = vmax.f32 %v12772_v53, 0.0  ;;  %v12773_v25 = vadd.f32 %v20651_v35, %v24951_v32  ;;  %v12631_v33 = vpop.f32.mrb[187].mxu1  ;;  %20688 = vmatprep.mubr.msk.bf16.mxu1 %vm1162_vm1, %v13067_v48  ;;  %20717 = vmatpush3.bf16.msra.mxu1 %v24892_v2  ;;  %v22560_v48 = vld [vmem:[%s26391_s5 + $0x170] sm:$0xff]   ;;  %v25061_v35 = vld [vmem:[%s26397_s11 + $0x60] sm:$0xff]  }
 0x522   : > { %v12802_v63 = vmax.f32 %v12770_v56, 0.0  ;;  %v12771_v7 = vadd.f32 %v24951_v32, %v12631_v33  ;;  %20718 = vmatprep.subr.bf16.mxu1 %v22556_v21  ;;  %v13029_v23 = vld [vmem:[#allocation4 + $0x168] sm:$0xff]  ;;  %v5990_v56 = vpack.c.bf16 %v5955_v28, %v5954_v13 }
 0x523   : > { %12938 = vst.msk [vmem:[#allocation4 + $0x1a8] sm:$0xff] %vm1162_vm1, %v12804_v8  ;;  %v12805_v24 = vmax.f32 %v12773_v25, 0.0  ;;  %19887 = vmatmul.mubr.msk.bf16.gmra.mrb[40].mxu0 %vm1491_vm2, %v5688_v10  ;;  %v13027_v18 = vld [vmem:[#allocation4 + $0x148] sm:$0xff] }
 0x524   : > { %12936 = vst.msk [vmem:[#allocation4 + $0x188] sm:$0xff] %vm1162_vm1, %v12802_v63  ;;  %v12803_v26 = vmax.f32 %v12771_v7, 0.0  ;;  %19890 = vmatprep.mubr.msk.bf16.mxu0 %vm1491_vm2, %v5689_v61  ;;  %v13030_v2 = vld [vmem:[#allocation4 + $0x170] sm:$0xff]  ;;  %v22563_v7 = vld [vmem:[%s26391_s5 + $0x178] sm:$0xff]  }
 0x525   : > { %12939 = vst.msk [vmem:[#allocation4 + $0x1b0] sm:$0xff] %vm1162_vm1, %v12805_v24  ;;  %v13028_v19 = vld [vmem:[#allocation4 + $0x150] sm:$0xff]  ;;  %20719 = vmatpush3.bf16.msra.mxu1 %v22556_v21  ;;  %v13069_v52 = vpack.c.bf16 %v13030_v2, %v13029_v23 }
 0x526   : > { %12937 = vst.msk [vmem:[#allocation4 + $0x190] sm:$0xff] %vm1162_vm1, %v12803_v26  ;;  %v20654_v50 = vpop.f32.mrb[188].mxu1  ;;  %v13068_v37 = vpack.c.bf16 %v13028_v19, %v13027_v18  ;;  %20720 = vmatprep.subr.bf16.mxu1 %v22558_v39  ;;  %v5956_v26 = vld [vmem:[#allocation2 + $0x16a] sm:$0xff]  ;;  %v5957_v2 = vld [vmem:[#allocation2 + $0x172] sm:$0xff] }
 0x527   : > { %v12776_v57 = vadd.f32 %v20654_v50, %v24951_v32  ;;  %v12644_v55 = vpop.f32.mrb[189].mxu1  ;;  %v5959_v50 = vld [vmem:[#allocation2 + $0x192] sm:$0xff] }
 0x528   : > { %v12774_v22 = vadd.f32 %v24951_v32, %v12644_v55  ;;  %v20655_v46 = vpop.f32.mrb[190].mxu1  ;;  %20689 = vmatmul.mubr.msk.bf16.gmra.mrb[212].mxu1 %vm1162_vm1, %v13068_v37  ;;  %v5991_v55 = vpack.c.bf16 %v5957_v2, %v5956_v26 }
 0x529   : > { %v12808_v38 = vmax.f32 %v12776_v57, 0.0  ;;  %v12777_v34 = vadd.f32 %v20655_v46, %v24951_v32  ;;  %v12647_v9 = vpop.f32.mrb[191].mxu1  ;;  %20692 = vmatprep.mubr.msk.bf16.mxu1 %vm1162_vm1, %v13069_v52  ;;  %20721 = vmatpush3.bf16.msra.mxu1 %v22558_v39  ;;  %v25082_v52 = vld [vmem:[%s26391_s5 + $0x180] sm:$0xff]  }
 0x52a   : > { %v12806_v42 = vmax.f32 %v12774_v22, 0.0  ;;  %v12775_v59 = vadd.f32 %v24951_v32, %v12647_v9  ;;  %20722 = vmatprep.subr.bf16.mxu1 %v22559_v20  ;;  %v13033_v6 = vld [vmem:[#allocation4 + $0x1a8] sm:$0xff]  ;;  %v5992_v22 = vpack.c.bf16 %v5959_v50, %v5958_v41 }
 0x52b   : > { %12942 = vst.msk [vmem:[#allocation4 + $0x1e8] sm:$0xff] %vm1162_vm1, %v12808_v38  ;;  %v12809_v62 = vmax.f32 %v12777_v34, 0.0  ;;  %19891 = vmatmul.mubr.msk.bf16.gmra.mrb[44].mxu0 %vm1491_vm2, %v5690_v12  ;;  %v13031_v54 = vld [vmem:[#allocation4 + $0x188] sm:$0xff] }
 0x52c   : > { %12940 = vst.msk [vmem:[#allocation4 + $0x1c8] sm:$0xff] %vm1162_vm1, %v12806_v42  ;;  %v12807_v15 = vmax.f32 %v12775_v59, 0.0  ;;  %19900 = vmatprep.mubr.msk.bf16.mxu0 %vm1491_vm2, %v5988_v51  ;;  %v13034_v14 = vld [vmem:[#allocation4 + $0x1b0] sm:$0xff] }
 0x52d   : > { %12943 = vst.msk [vmem:[#allocation4 + $0x1f0] sm:$0xff] %vm1162_vm1, %v12809_v62  ;;  %v13032_v45 = vld [vmem:[#allocation4 + $0x190] sm:$0xff]  ;;  %20723 = vmatpush3.bf16.msra.mxu1 %v22559_v20  ;;  %v13071_v29 = vpack.c.bf16 %v13034_v14, %v13033_v6 }
 0x52e   : > { %12941 = vst.msk [vmem:[#allocation4 + $0x1d0] sm:$0xff] %vm1162_vm1, %v12807_v15  ;;  %v20658_v11 = vpop.f32.mrb[192].mxu1  ;;  %v13070_v17 = vpack.c.bf16 %v13032_v45, %v13031_v54  ;;  %20724 = vmatprep.subr.bf16.mxu1 %v22561_v60  ;;  %v5961_v62 = vld [vmem:[#allocation2 + $0x1b2] sm:$0xff]  ;;  %v5962_v45 = vld [vmem:[#allocation2 + $0x1ca] sm:$0xff] }
 0x52f   : > { %v12780_v27 = vadd.f32 %v20658_v11, %v24951_v32  ;;  %v12660_v36 = vpop.f32.mrb[193].mxu1  ;;  %v5994_v13 = vpack.c.bf16 %v5963_v3, %v5962_v45  ;;  %v12964_v45 = vld [vmem:[#allocation4 + $0x10f] sm:$0xff] }
 0x530   : > { %v12778_v16 = vadd.f32 %v24951_v32, %v12660_v36  ;;  %v20659_v30 = vpop.f32.mrb[194].mxu1  ;;  %20693 = vmatmul.mubr.msk.bf16.gmra.mrb[216].mxu1 %vm1162_vm1, %v13070_v17  ;;  %v12966_v3 = vld [vmem:[#allocation4 + $0x12f] sm:$0xff] }
 0x531   : > { %v12812_v44 = vmax.f32 %v12780_v27, 0.0  ;;  %v12781_v21 = vadd.f32 %v20659_v30, %v24951_v32  ;;  %v12663_v53 = vpop.f32.mrb[195].mxu1  ;;  %20696 = vmatprep.mubr.msk.bf16.mxu1 %vm1162_vm1, %v13071_v29  ;;  %20725 = vmatpush3.bf16.msra.mxu1 %v22561_v60  ;;  %v5960_v60 = vld [vmem:[#allocation2 + $0x1aa] sm:$0xff] }
 0x532   : > { %v12810_v31 = vmax.f32 %v12778_v16, 0.0  ;;  %v12779_v49 = vadd.f32 %v24951_v32, %v12663_v53  ;;  %20726 = vmatprep.subr.bf16.mxu1 %v22562_v4  ;;  %v13037_v24 = vld [vmem:[#allocation4 + $0x1e8] sm:$0xff]  ;;  %v5993_v27 = vpack.c.bf16 %v5961_v62, %v5960_v60  ;;  %v5973_v60 = vld [vmem:[#allocation2 + $0x272] sm:$0xff] }
 0x533   : > { %12946 = vst.msk [vmem:[#allocation4 + $0x228] sm:$0xff] %vm1162_vm1, %v12812_v44  ;;  %v12813_v8 = vmax.f32 %v12781_v21, 0.0  ;;  %19901 = vmatmul.mubr.msk.bf16.vlgmr.msra.gmra.mrb[16].mxu0 %vm1491_vm2, %v5989_v43  ;;  %v13035_v10 = vld [vmem:[#allocation4 + $0x1c8] sm:$0xff] }
 0x534   : > { %12944 = vst.msk [vmem:[#allocation4 + $0x208] sm:$0xff] %vm1162_vm1, %v12810_v31  ;;  %v12811_v25 = vmax.f32 %v12779_v49, 0.0  ;;  %19904 = vmatprep.mubr.msk.bf16.mxu0 %vm1491_vm2, %v5990_v56  ;;  %19933 = vmatpush3.bf16.msra.mxu0 %v24939_v40  ;;  %v13038_v33 = vld [vmem:[#allocation4 + $0x1f0] sm:$0xff] }
 0x535   : > { %12947 = vst.msk [vmem:[#allocation4 + $0x230] sm:$0xff] %vm1162_vm1, %v12813_v8  ;;  %v13036_v63 = vld [vmem:[#allocation4 + $0x1d0] sm:$0xff]  ;;  %19934 = vmatprep.subr.bf16.mxu0 %v22560_v48  ;;  %20727 = vmatpush3.bf16.msra.mxu1 %v22562_v4  ;;  %v13073_v19 = vpack.c.bf16 %v13038_v33, %v13037_v24 }
 0x536   : > { %12945 = vst.msk [vmem:[#allocation4 + $0x210] sm:$0xff] %vm1162_vm1, %v12811_v25  ;;  %v20662_v61 = vpop.f32.mrb[196].mxu1  ;;  %v13072_v39 = vpack.c.bf16 %v13036_v63, %v13035_v10  ;;  %20760 = vmatprep.subr.bf16.mxu1 %v25061_v35  ;;  %v5964_v31 = vld [vmem:[#allocation2 + $0x1ea] sm:$0xff]  ;;  %v5965_v49 = vld [vmem:[#allocation2 + $0x1f2] sm:$0xff] }
 0x537   : > { %v12784_v40 = vadd.f32 %v20662_v61, %v24951_v32  ;;  %v12676_v18 = vpop.f32.mrb[197].mxu1  ;;  %v5966_v33 = vld [vmem:[#allocation2 + $0x20a] sm:$0xff]  ;;  %v5967_v10 = vld [vmem:[#allocation2 + $0x212] sm:$0xff]  ;;  %v5995_v26 = vpack.c.bf16 %v5965_v49, %v5964_v31 }
 0x538   : > { %v12782_v37 = vadd.f32 %v24951_v32, %v12676_v18  ;;  %v20663_v23 = vpop.f32.mrb[198].mxu1  ;;  %20697 = vmatmul.mubr.msk.bf16.gmra.mrb[220].mxu1 %vm1162_vm1, %v13072_v39  ;;  %19935 = vmatpush3.bf16.msra.mxu0 %v22560_v48  ;;  %v5996_v18 = vpack.c.bf16 %v5967_v10, %v5966_v33  ;;  %v5974_v62 = vld [vmem:[#allocation2 + $0x28a] sm:$0xff]  ;;  %v22568_v49 = vld [vmem:[%s26397_s11 + $0x78] sm:$0xff]  }
 0x539   : > { %v12816_v0 = vmax.f32 %v12784_v40, 0.0  ;;  %v12785_v20 = vadd.f32 %v20663_v23, %v24951_v32  ;;  %v12679_v57 = vpop.f32.mrb[199].mxu1  ;;  %20700 = vmatprep.mubr.msk.bf16.mxu1 %vm1162_vm1, %v13073_v19  ;;  %19936 = vmatprep.subr.bf16.mxu0 %v22563_v7  ;;  %v12969_v31 = vld [vmem:[#allocation4 + $0x167] sm:$0xff] }
 0x53a   : > { %v12814_v47 = vmax.f32 %v12782_v37, 0.0  ;;  %v12783_v58 = vadd.f32 %v24951_v32, %v12679_v57  ;;  %v13041_v51 = vld [vmem:[#allocation4 + $0x228] sm:$0xff]  ;;  %v5969_v57 = vld [vmem:[#allocation2 + $0x232] sm:$0xff] }
 0x53b   : > { %12950 = vst.msk [vmem:[#allocation4 + $0x268] sm:$0xff] %vm1162_vm1, %v12816_v0  ;;  %v12817_v46 = vmax.f32 %v12785_v20, 0.0  ;;  %19905 = vmatmul.mubr.msk.bf16.gmra.mrb[20].mxu0 %vm1491_vm2, %v5991_v55  ;;  %v13039_v9 = vld [vmem:[#allocation4 + $0x208] sm:$0xff] }
 0x53c   : > { %12948 = vst.msk [vmem:[#allocation4 + $0x248] sm:$0xff] %vm1162_vm1, %v12814_v47  ;;  %v12815_v38 = vmax.f32 %v12783_v58, 0.0  ;;  %19908 = vmatprep.mubr.msk.bf16.mxu0 %vm1491_vm2, %v5992_v22  ;;  %v13042_v34 = vld [vmem:[#allocation4 + $0x230] sm:$0xff]  ;;  %19937 = vmatpush3.bf16.msra.mxu0 %v22563_v7  ;;  %v6264_v33 = vld [vmem:[#allocation2 + $0x126] sm:$0xff] }
 0x53d   : > { %12951 = vst.msk [vmem:[#allocation4 + $0x270] sm:$0xff] %vm1162_vm1, %v12817_v46  ;;  %v13040_v12 = vld [vmem:[#allocation4 + $0x210] sm:$0xff]  ;;  %19970 = vmatprep.subr.bf16.mxu0 %v25082_v52  ;;  %v13075_v54 = vpack.c.bf16 %v13042_v34, %v13041_v51 }
 0x53e   : > { %12949 = vst.msk [vmem:[#allocation4 + $0x250] sm:$0xff] %vm1162_vm1, %v12815_v38  ;;  %v20666_v42 = vpop.f32.mrb[200].mxu1  ;;  %v13074_v59 = vpack.c.bf16 %v13040_v12, %v13039_v9  ;;  %v5968_v20 = vld [vmem:[#allocation2 + $0x22a] sm:$0xff]  ;;  %v5971_v58 = vld [vmem:[#allocation2 + $0x252] sm:$0xff] }
 0x53f   : > { %v12788_v15 = vadd.f32 %v20666_v42, %v24951_v32  ;;  %v12692_v14 = vpop.f32.mrb[201].mxu1  ;;  %v5970_v47 = vld [vmem:[#allocation2 + $0x24a] sm:$0xff]  ;;  %v5997_v22 = vpack.c.bf16 %v5969_v57, %v5968_v20 }
 0x540   : > { %v12786_v11 = vadd.f32 %v24951_v32, %v12692_v14  ;;  %v20667_v17 = vpop.f32.mrb[202].mxu1  ;;  %20701 = vmatmul.mubr.msk.bf16.gmra.mrb[224].mxu1 %vm1162_vm1, %v13074_v59  ;;  %v5998_v46 = vpack.c.bf16 %v5971_v58, %v5970_v47  ;;  %v12961_v38 = vld [vmem:[#allocation4 + $0xe7] sm:$0xff]  ;;  %v12962_v34 = vld [vmem:[#allocation4 + $0xef] sm:$0xff] }
 0x541   : > { %v12820_v6 = vmax.f32 %v12788_v15, 0.0  ;;  %v12789_v5 = vadd.f32 %v20667_v17, %v24951_v32  ;;  %v12695_v4 = vpop.f32.mrb[203].mxu1  ;;  %20704 = vmatprep.mubr.msk.bf16.mxu1 %vm1162_vm1, %v13075_v54  ;;  %v13005_v42 = vpack.c.bf16 %v12962_v34, %v12961_v38  ;;  %v5972_v51 = vld [vmem:[#allocation2 + $0x26a] sm:$0xff]  ;;  %v5975_v15 = vld [vmem:[#allocation2 + $0x292] sm:$0xff] }
 0x542   : > { %v12818_v36 = vmax.f32 %v12786_v11, 0.0  ;;  %v12787_v29 = vadd.f32 %v24951_v32, %v12695_v4  ;;  %v13045_v48 = vld [vmem:[#allocation4 + $0x268] sm:$0xff]  ;;  %v5999_v14 = vpack.c.bf16 %v5973_v60, %v5972_v51  ;;  %v6000_v54 = vpack.c.bf16 %v5975_v15, %v5974_v62  ;;  %v5977_v4 = vld [vmem:[#allocation2 + $0x2b2] sm:$0xff] }
 0x543   : > { %12954 = vst.msk [vmem:[#allocation4 + $0x2a8] sm:$0xff] %vm1162_vm1, %v12820_v6  ;;  %v12821_v28 = vmax.f32 %v12789_v5, 0.0  ;;  %19909 = vmatmul.mubr.msk.bf16.gmra.mrb[24].mxu0 %vm1491_vm2, %v5993_v27  ;;  %v13043_v44 = vld [vmem:[#allocation4 + $0x248] sm:$0xff]  ;;  %v22572_v47 = vld [vmem:[%s26391_s5 + $0x190] sm:$0xff]  }
 0x544   : > { %12952 = vst.msk [vmem:[#allocation4 + $0x288] sm:$0xff] %vm1162_vm1, %v12818_v36  ;;  %v12819_v16 = vmax.f32 %v12787_v29, 0.0  ;;  %19912 = vmatprep.mubr.msk.bf16.mxu0 %vm1491_vm2, %v5994_v13  ;;  %v13046_v30 = vld [vmem:[#allocation4 + $0x270] sm:$0xff]  ;;  %v12963_v11 = vld [vmem:[#allocation4 + $0x107] sm:$0xff] }
 0x545   : > { %12955 = vst.msk [vmem:[#allocation4 + $0x2b0] sm:$0xff] %vm1162_vm1, %v12821_v28  ;;  %v13044_v21 = vld [vmem:[#allocation4 + $0x250] sm:$0xff]  ;;  %v13077_v25 = vpack.c.bf16 %v13046_v30, %v13045_v48  ;;  %v25124_v6 = vpack.c.bf16 %v12964_v45, %v12963_v11  ;;  %v12965_v5 = vld [vmem:[#allocation4 + $0x127] sm:$0xff] }
 0x546   : > { %12953 = vst.msk [vmem:[#allocation4 + $0x290] sm:$0xff] %vm1162_vm1, %v12819_v16  ;;  %v20670_v53 = vpop.f32.mrb[204].mxu1  ;;  %v13076_v43 = vpack.c.bf16 %v13044_v21, %v13043_v44  ;;  %v5976_v17 = vld [vmem:[#allocation2 + $0x2aa] sm:$0xff]  ;;  %v25129_v36 = vpack.c.bf16 %v12966_v3, %v12965_v5  ;;  %v5979_v13 = vld [vmem:[#allocation2 + $0x2d2] sm:$0xff] }
 0x547   : > { %v12792_v56 = vadd.f32 %v20670_v53, %v24951_v32  ;;  %v12708_v8 = vpop.f32.mrb[205].mxu1  ;;  %v22565_v27 = vld [vmem:[%s26397_s11 + $0x68] sm:$0xff]   ;;  %v6001_v28 = vpack.c.bf16 %v5977_v4, %v5976_v17  ;;  %v22567_v30 = vld [vmem:[%s26397_s11 + $0x70] sm:$0xff]  }
 0x548   : > { %v12790_v63 = vadd.f32 %v24951_v32, %v12708_v8  ;;  %v20671_v7 = vpop.f32.mrb[206].mxu1  ;;  %20705 = vmatmul.mubr.msk.bf16.gmra.mrb[228].mxu1 %vm1162_vm1, %v13076_v43  ;;  %v5978_v29 = vld [vmem:[#allocation2 + $0x2ca] sm:$0xff] }
 0x549   : > { %v12824_v61 = vmax.f32 %v12792_v56, 0.0  ;;  %v12793_v39 = vadd.f32 %v20671_v7, %v24951_v32  ;;  %v12711_v24 = vpop.f32.mrb[207].mxu1  ;;  %20708 = vmatprep.mubr.msk.bf16.mxu1 %vm1162_vm1, %v13077_v25  ;;  %v6002_v16 = vpack.c.bf16 %v5979_v13, %v5978_v29  ;;  %v12968_v44 = vld [vmem:[#allocation4 + $0x14f] sm:$0xff]  ;;  %v12967_v53 = vld [vmem:[#allocation4 + $0x147] sm:$0xff] }
 0x54a   : > { %v12822_v2 = vmax.f32 %v12790_v63, 0.0  ;;  %v12791_v40 = vadd.f32 %v24951_v32, %v12711_v24  ;;  %v13049_v32 = vld [vmem:[#allocation4 + $0x2a8] sm:$0xff]  ;;  %v25141_v48 = vpack.c.bf16 %v12968_v44, %v12967_v53  ;;  %v22570_v63 = vld [vmem:[%s26397_s11 + $0x80] sm:$0xff]  }
 0x54b   : > { %12958 = vst.msk [vmem:[#allocation4 + $0x2e8] sm:$0xff] %vm1162_vm1, %v12824_v61  ;;  %v12825_v19 = vmax.f32 %v12793_v39, 0.0  ;;  %19913 = vmatmul.mubr.msk.bf16.gmra.mrb[28].mxu0 %vm1491_vm2, %v5995_v26  ;;  %v13047_v37 = vld [vmem:[#allocation4 + $0x288] sm:$0xff] }
 0x54c   : > { %12956 = vst.msk [vmem:[#allocation4 + $0x2c8] sm:$0xff] %vm1162_vm1, %v12822_v2  ;;  %v12823_v41 = vmax.f32 %v12791_v40, 0.0  ;;  %19916 = vmatprep.mubr.msk.bf16.mxu0 %vm1491_vm2, %v5996_v18  ;;  %v13050_v50 = vld [vmem:[#allocation4 + $0x2b0] sm:$0xff]  ;;  %v12971_v39 = vld [vmem:[#allocation4 + $0x187] sm:$0xff] }
 0x54d   : > { %12959 = vst.msk [vmem:[#allocation4 + $0x2f0] sm:$0xff] %vm1162_vm1, %v12825_v19  ;;  %v13048_v23 = vld [vmem:[#allocation4 + $0x290] sm:$0xff]  ;;  %v13079_v55 = vpack.c.bf16 %v13050_v50, %v13049_v32  ;;  %v12973_v26 = vld [vmem:[#allocation4 + $0x1a7] sm:$0xff] }
 0x54e   : > { %12957 = vst.msk [vmem:[#allocation4 + $0x2d0] sm:$0xff] %vm1162_vm1, %v12823_v41  ;;  %v13078_v0 = vpack.c.bf16 %v13048_v23, %v13047_v37  ;;  %v12970_v21 = vld [vmem:[#allocation4 + $0x16f] sm:$0xff]  ;;  %v6266_v41 = vld [vmem:[#allocation2 + $0x146] sm:$0xff] }
 0x54f   : > { %v5980_v43 = vld [vmem:[#allocation2 + $0x2ea] sm:$0xff]  ;;  %v25146_v56 = vpack.c.bf16 %v12970_v21, %v12969_v31 }
 0x550   : > { %20709 = vmatmul.mubr.msk.bf16.gmra.mrb[232].mxu1 %vm1162_vm1, %v13078_v0  ;;  %v6265_v8 = vld [vmem:[#allocation2 + $0x12e] sm:$0xff]  ;;  %v6268_v37 = vld [vmem:[#allocation2 + $0x166] sm:$0xff] }
 0x551   : > { %20712 = vmatprep.mubr.msk.bf16.mxu1 %vm1162_vm1, %v13079_v55  ;;  %v6302_v10 = vpack.c.bf16 %v6265_v8, %v6264_v33  ;;  %v12972_v7 = vld [vmem:[#allocation4 + $0x18f] sm:$0xff]  ;;  %v12975_v55 = vld [vmem:[#allocation4 + $0x1c7] sm:$0xff] }
 0x552   : > { %v12974_v61 = vld [vmem:[#allocation4 + $0x1af] sm:$0xff]  ;;  %v25157_v24 = vpack.c.bf16 %v12972_v7, %v12971_v39  ;;  %v12979_v62 = vld [vmem:[#allocation4 + $0x207] sm:$0xff] }
 0x553   : > { %19917 = vmatmul.mubr.msk.bf16.gmra.mrb[32].mxu0 %vm1491_vm2, %v5997_v22  ;;  %v13051_v9 = vld [vmem:[#allocation4 + $0x2c8] sm:$0xff]  ;;  %v25162_v18 = vpack.c.bf16 %v12974_v61, %v12973_v26  ;;  %v25174_v32 = vld [vmem:[%s26397_s11 + $0x90] sm:$0xff]  }
 0x554   : > { %19920 = vmatprep.mubr.msk.bf16.mxu0 %vm1491_vm2, %v5998_v46  ;;  %v6267_v2 = vld [vmem:[#allocation2 + $0x14e] sm:$0xff]  ;;  %v6274_v11 = vld [vmem:[#allocation2 + $0x1c6] sm:$0xff] }
 0x555   : > { %v13052_v12 = vld [vmem:[#allocation4 + $0x2d0] sm:$0xff]  ;;  %v22571_v40 = vld [vmem:[%s26397_s11 + $0x88] sm:$0xff]   ;;  %v6303_v50 = vpack.c.bf16 %v6267_v2, %v6266_v41 }
 0x556   : > { %v13080_v59 = vpack.c.bf16 %v13052_v12, %v13051_v9  ;;  %v6269_v19 = vld [vmem:[#allocation2 + $0x16e] sm:$0xff]  ;;  %v6272_v12 = vld [vmem:[#allocation2 + $0x1a6] sm:$0xff] }
 0x557   : > { %v22569_v23 = vld [vmem:[%s26391_s5 + $0x188] sm:$0xff]   ;;  %v6304_v0 = vpack.c.bf16 %v6269_v19, %v6268_v37  ;;  %v13572_v41 = vld [vmem:[#allocation4 + $0xf1] sm:$0xff] }
 0x558   : > { %20713 = vmatmul.mubr.msk.bf16.gmra.mrb[236].mxu1 %vm1162_vm1, %v13080_v59  ;;  %v12976_v20 = vld [vmem:[#allocation4 + $0x1cf] sm:$0xff]  ;;  %v12977_v22 = vld [vmem:[#allocation4 + $0x1e7] sm:$0xff] }
 0x559   : > { %20728 = vmatprep.mubr.msk.bf16.mxu1 %vm1162_vm1, %v13005_v42  ;;  %v12978_v57 = vld [vmem:[#allocation4 + $0x1ef] sm:$0xff]  ;;  %v25182_v58 = vpack.c.bf16 %v12976_v20, %v12975_v55  ;;  %v25194_v42 = vld [vmem:[%s26391_s5 + $0x198] sm:$0xff]   ;;  %v6276_v5 = vld [vmem:[#allocation2 + $0x1e6] sm:$0xff] }
 0x55a   : > { %v6271_v46 = vld [vmem:[#allocation2 + $0x18e] sm:$0xff]  ;;  %v25185_v38 = vpack.c.bf16 %v12978_v57, %v12977_v22  ;;  %v6278_v53 = vld [vmem:[#allocation2 + $0x206] sm:$0xff] }
 0x55b   : > { %19921 = vmatmul.mubr.msk.bf16.gmra.mrb[36].mxu0 %vm1491_vm2, %v5999_v14  ;;  %v6273_v34 = vld [vmem:[#allocation2 + $0x1ae] sm:$0xff]  ;;  %v6280_v31 = vld [vmem:[#allocation2 + $0x226] sm:$0xff] }
 0x55c   : > { %19924 = vmatprep.mubr.msk.bf16.mxu0 %vm1491_vm2, %v6000_v54  ;;  %v6306_v59 = vpack.c.bf16 %v6273_v34, %v6272_v12  ;;  %v12980_v51 = vld [vmem:[#allocation4 + $0x20f] sm:$0xff]  ;;  %v12981_v14 = vld [vmem:[#allocation4 + $0x227] sm:$0xff] }
 0x55d   : > { %v12982_v60 = vld [vmem:[#allocation4 + $0x22f] sm:$0xff]  ;;  %v25199_v15 = vpack.c.bf16 %v12980_v51, %v12979_v62  ;;  %v12983_v13 = vld [vmem:[#allocation4 + $0x247] sm:$0xff] }
 0x55e   : > { %v6275_v54 = vld [vmem:[#allocation2 + $0x1ce] sm:$0xff]  ;;  %v25201_v45 = vpack.c.bf16 %v12982_v60, %v12981_v14  ;;  %v6282_v39 = vld [vmem:[#allocation2 + $0x246] sm:$0xff]  ;;  %v22574_v60 = vld [vmem:[%s26397_s11 + $0x98] sm:$0xff]  }
 0x55f   : > { %v6277_v3 = vld [vmem:[#allocation2 + $0x1ee] sm:$0xff]  ;;  %v6307_v17 = vpack.c.bf16 %v6275_v54, %v6274_v11  ;;  %v6284_v2 = vld [vmem:[#allocation2 + $0x266] sm:$0xff] }
 0x560   : > { %20729 = vmatmul.mubr.msk.bf16.vlgmr.msra.gmra.mrb[208].mxu1 %vm1162_vm1, %v25124_v6  ;;  %v6308_v4 = vpack.c.bf16 %v6277_v3, %v6276_v5  ;;  %v12986_v29 = vld [vmem:[#allocation4 + $0x26f] sm:$0xff]  ;;  %v12991_v37 = vld [vmem:[#allocation4 + $0x2c7] sm:$0xff] }
 0x561   : > { %20732 = vmatprep.mubr.msk.bf16.mxu1 %vm1162_vm1, %v25129_v36  ;;  %20761 = vmatpush3.bf16.msra.mxu1 %v25061_v35  ;;  %v5981_v35 = vld [vmem:[#allocation2 + $0x2f2] sm:$0xff]  ;;  %v13571_v19 = vld [vmem:[#allocation4 + $0xe9] sm:$0xff]  ;;  %v22576_v5 = vld [vmem:[%s26397_s11 + $0xa0] sm:$0xff]  }
 0x562   : > { %20762 = vmatprep.subr.bf16.mxu1 %v22565_v27  ;;  %v6003_v25 = vpack.c.bf16 %v5981_v35, %v5980_v43  ;;  %v6281_v21 = vld [vmem:[#allocation2 + $0x22e] sm:$0xff]  ;;  %v6286_v55 = vld [vmem:[#allocation2 + $0x286] sm:$0xff] }
 0x563   : > { %19925 = vmatmul.mubr.msk.bf16.gmra.mrb[40].mxu0 %vm1491_vm2, %v6001_v28  ;;  %v6310_v35 = vpack.c.bf16 %v6281_v21, %v6280_v31  ;;  %v12990_v8 = vld [vmem:[#allocation4 + $0x2af] sm:$0xff]  ;;  %v6288_v22 = vld [vmem:[#allocation2 + $0x2a6] sm:$0xff] }
 0x564   : > { %19928 = vmatprep.mubr.msk.bf16.mxu0 %vm1491_vm2, %v6002_v16  ;;  %v12985_v16 = vld [vmem:[#allocation4 + $0x267] sm:$0xff]  ;;  %v13576_v12 = vld [vmem:[#allocation4 + $0x131] sm:$0xff] }
 0x565   : > { %20763 = vmatpush3.bf16.msra.mxu1 %v22565_v27  ;;  %v12984_v27 = vld [vmem:[#allocation4 + $0x24f] sm:$0xff]  ;;  %v25211_v44 = vpack.c.bf16 %v12986_v29, %v12985_v16  ;;  %v6290_v54 = vld [vmem:[#allocation2 + $0x2c6] sm:$0xff] }
 0x566   : > { %20764 = vmatprep.subr.bf16.mxu1 %v22567_v30  ;;  %v25209_v28 = vpack.c.bf16 %v12984_v27, %v12983_v13  ;;  %v6285_v61 = vld [vmem:[#allocation2 + $0x26e] sm:$0xff]  ;;  %v6292_v11 = vld [vmem:[#allocation2 + $0x2e6] sm:$0xff] }
 0x567   : > { %v6287_v20 = vld [vmem:[#allocation2 + $0x28e] sm:$0xff]  ;;  %v6294_v16 = vld [vmem:[#allocation2 + $0x306] sm:$0xff] }
 0x568   : > { %20733 = vmatmul.mubr.msk.bf16.gmra.mrb[212].mxu1 %vm1162_vm1, %v25141_v48  ;;  %v6289_v57 = vld [vmem:[#allocation2 + $0x2ae] sm:$0xff] }
 0x569   : > { %20736 = vmatprep.mubr.msk.bf16.mxu1 %vm1162_vm1, %v25146_v56  ;;  %20765 = vmatpush3.bf16.msra.mxu1 %v22567_v30  ;;  %v6279_v30 = vld [vmem:[#allocation2 + $0x20e] sm:$0xff] }
 0x56a   : > { %20766 = vmatprep.subr.bf16.mxu1 %v22568_v49  ;;  %v6309_v43 = vpack.c.bf16 %v6279_v30, %v6278_v53  ;;  %v13573_v34 = vld [vmem:[#allocation4 + $0x109] sm:$0xff]  ;;  %v13578_v27 = vld [vmem:[#allocation4 + $0x151] sm:$0xff] }
 0x56b   : > { %19929 = vmatmul.mubr.msk.bf16.gmra.mrb[44].mxu0 %vm1491_vm2, %v6003_v25  ;;  %v12987_v25 = vld [vmem:[#allocation4 + $0x287] sm:$0xff]  ;;  %v13580_v13 = vld [vmem:[#allocation4 + $0x171] sm:$0xff] }
 0x56c   : > { %19938 = vmatprep.mubr.msk.bf16.mxu0 %vm1491_vm2, %v6302_v10  ;;  %v12989_v10 = vld [vmem:[#allocation4 + $0x2a7] sm:$0xff]  ;;  %v6578_v31 = vld [vmem:[#allocation2 + $0x12f] sm:$0xff] }
 0x56d   : > { %20767 = vmatpush3.bf16.msra.mxu1 %v22568_v49  ;;  %v12988_v49 = vld [vmem:[#allocation4 + $0x28f] sm:$0xff]  ;;  %v25221_v7 = vpack.c.bf16 %v12990_v8, %v12989_v10 }
 0x56e   : > { %20768 = vmatprep.subr.bf16.mxu1 %v22570_v63  ;;  %v25219_v33 = vpack.c.bf16 %v12988_v49, %v12987_v25  ;;  %v6291_v51 = vld [vmem:[#allocation2 + $0x2ce] sm:$0xff] }
 0x56f   : > { %v6293_v14 = vld [vmem:[#allocation2 + $0x2ee] sm:$0xff]  ;;  %v6315_v3 = vpack.c.bf16 %v6291_v51, %v6290_v54 }
 0x570   : > { %20737 = vmatmul.mubr.msk.bf16.gmra.mrb[216].mxu1 %vm1162_vm1, %v25157_v24  ;;  %v13579_v29 = vld [vmem:[#allocation4 + $0x169] sm:$0xff]  ;;  %v13582_v10 = vld [vmem:[#allocation4 + $0x191] sm:$0xff] }
 0x571   : > { %20740 = vmatprep.mubr.msk.bf16.mxu1 %vm1162_vm1, %v25162_v18  ;;  %20769 = vmatpush3.bf16.msra.mxu1 %v22570_v63  ;;  %v6283_v63 = vld [vmem:[#allocation2 + $0x24e] sm:$0xff]  ;;  %v13619_v53 = vpack.c.bf16 %v13580_v13, %v13579_v29 }
 0x572   : > { %20770 = vmatprep.subr.bf16.mxu1 %v22571_v40  ;;  %v6311_v26 = vpack.c.bf16 %v6283_v63, %v6282_v39  ;;  %v6295_v30 = vld [vmem:[#allocation2 + $0x30e] sm:$0xff] }
 0x573   : > { %19939 = vmatmul.mubr.msk.bf16.vlgmr.msra.gmra.mrb[16].mxu0 %vm1491_vm2, %v6303_v50  ;;  %v12992_v50 = vld [vmem:[#allocation4 + $0x2cf] sm:$0xff] }
 0x574   : > { %19942 = vmatprep.mubr.msk.bf16.mxu0 %vm1491_vm2, %v6304_v0  ;;  %19971 = vmatpush3.bf16.msra.mxu0 %v25082_v52  ;;  %v6270_v52 = vld [vmem:[#allocation2 + $0x186] sm:$0xff]  ;;  %v25229_v0 = vpack.c.bf16 %v12992_v50, %v12991_v37  ;;  %v22579_v8 = vld [vmem:[%s26397_s11 + $0xb0] sm:$0xff]  }
 0x575   : > { %19972 = vmatprep.subr.bf16.mxu0 %v22569_v23  ;;  %20771 = vmatpush3.bf16.msra.mxu1 %v22571_v40  ;;  %v6305_v9 = vpack.c.bf16 %v6271_v46, %v6270_v52  ;;  %v6312_v40 = vpack.c.bf16 %v6285_v61, %v6284_v2  ;;  %v6314_v46 = vpack.c.bf16 %v6289_v57, %v6288_v22  ;;  %v13574_v52 = vld [vmem:[#allocation4 + $0x111] sm:$0xff]  ;;  %v22577_v21 = vld [vmem:[%s26397_s11 + $0xa8] sm:$0xff]   ;;  %v25280_v57 = vld [vmem:[%s26397_s11 + $0xc0] sm:$0xff]  }
 0x576   : > { %20804 = vmatprep.subr.bf16.mxu1 %v25174_v32  ;;  %v13581_v25 = vld [vmem:[#allocation4 + $0x189] sm:$0xff]  ;;  %v13584_v61 = vld [vmem:[#allocation4 + $0x1b1] sm:$0xff] }
 0x577   : > { %v13583_v63 = vld [vmem:[#allocation4 + $0x1a9] sm:$0xff]  ;;  %v25266_v39 = vpack.c.bf16 %v13582_v10, %v13581_v25  ;;  %v22580_v2 = vld [vmem:[%s26397_s11 + $0xb8] sm:$0xff]  }
 0x578   : > { %20741 = vmatmul.mubr.msk.bf16.gmra.mrb[220].mxu1 %vm1162_vm1, %v25182_v58  ;;  %19973 = vmatpush3.bf16.msra.mxu0 %v22569_v23  ;;  %v13615_v23 = vpack.c.bf16 %v13572_v41, %v13571_v19  ;;  %v6582_v19 = vld [vmem:[#allocation2 + $0x16f] sm:$0xff]  ;;  %v6579_v41 = vld [vmem:[#allocation2 + $0x147] sm:$0xff] }
 0x579   : > { %20744 = vmatprep.mubr.msk.bf16.mxu1 %vm1162_vm1, %v25185_v38  ;;  %19974 = vmatprep.subr.bf16.mxu0 %v22572_v47  ;;  %v6581_v37 = vld [vmem:[#allocation2 + $0x167] sm:$0xff]  ;;  %v6586_v51 = vld [vmem:[#allocation2 + $0x1af] sm:$0xff] }
 0x57a   : > { %v13587_v22 = vld [vmem:[#allocation4 + $0x1e9] sm:$0xff] }
 0x57b   : > { %19943 = vmatmul.mubr.msk.bf16.gmra.mrb[20].mxu0 %vm1491_vm2, %v6305_v9  ;;  %v13575_v9 = vld [vmem:[#allocation4 + $0x129] sm:$0xff] }
 0x57c   : > { %19946 = vmatprep.mubr.msk.bf16.mxu0 %vm1491_vm2, %v6306_v59  ;;  %19975 = vmatpush3.bf16.msra.mxu0 %v22572_v47  ;;  %v6313_v47 = vpack.c.bf16 %v6287_v20, %v6286_v55  ;;  %v25236_v59 = vpack.c.bf16 %v13574_v52, %v13573_v34  ;;  %v25241_v62 = vpack.c.bf16 %v13576_v12, %v13575_v9  ;;  %v13585_v55 = vld [vmem:[#allocation4 + $0x1c9] sm:$0xff] }
 0x57d   : > { %20008 = vmatprep.subr.bf16.mxu0 %v25194_v42  ;;  %v6617_v20 = vpack.c.bf16 %v6582_v19, %v6581_v37  ;;  %v22581_v34 = vld [vmem:[%s26391_s5 + $0x1a8] sm:$0xff]   ;;  %v25297_v54 = vld [vmem:[%s26391_s5 + $0x1b0] sm:$0xff]  }
 0x57e   : > { %v6584_v9 = vld [vmem:[#allocation2 + $0x18f] sm:$0xff] }
 0x57f   : > { %v6588_v29 = vld [vmem:[#allocation2 + $0x1cf] sm:$0xff] }
 0x580   : > { %20745 = vmatmul.mubr.msk.bf16.gmra.mrb[224].mxu1 %vm1162_vm1, %v25199_v15  ;;  %v6592_v10 = vld [vmem:[#allocation2 + $0x20f] sm:$0xff] }
 0x581   : > { %20748 = vmatprep.mubr.msk.bf16.mxu1 %vm1162_vm1, %v25201_v45  ;;  %v13599_v37 = vld [vmem:[#allocation4 + $0x2a9] sm:$0xff] }
 0x583   : > { %19947 = vmatmul.mubr.msk.bf16.gmra.mrb[24].mxu0 %vm1491_vm2, %v6307_v17  ;;  %v6316_v17 = vpack.c.bf16 %v6293_v14, %v6292_v11  ;;  %v6585_v14 = vld [vmem:[#allocation2 + $0x1a7] sm:$0xff] }
 0x584   : > { %19950 = vmatprep.mubr.msk.bf16.mxu0 %vm1491_vm2, %v6308_v4  ;;  %v13577_v4 = vld [vmem:[#allocation4 + $0x149] sm:$0xff] }
 0x585   : > { %v13589_v11 = vld [vmem:[#allocation4 + $0x209] sm:$0xff] }
 0x588   : > { %20749 = vmatmul.mubr.msk.bf16.gmra.mrb[228].mxu1 %vm1162_vm1, %v25209_v28 }
 0x589   : > { %20752 = vmatprep.mubr.msk.bf16.mxu1 %vm1162_vm1, %v25211_v44 }
 0x58b   : > { %19951 = vmatmul.mubr.msk.bf16.gmra.mrb[28].mxu0 %vm1491_vm2, %v6309_v43  ;;  %v6317_v43 = vpack.c.bf16 %v6295_v30, %v6294_v16  ;;  %v6590_v16 = vld [vmem:[#allocation2 + $0x1ef] sm:$0xff]  ;;  %v6587_v30 = vld [vmem:[#allocation2 + $0x1c7] sm:$0xff] }
 0x58c   : > { %19954 = vmatprep.mubr.msk.bf16.mxu0 %vm1491_vm2, %v6310_v35  ;;  %v6577_v35 = vld [vmem:[#allocation2 + $0x127] sm:$0xff] }
 0x58d   : > { %v6615_v49 = vpack.c.bf16 %v6578_v31, %v6577_v35  ;;  %v13593_v31 = vld [vmem:[#allocation4 + $0x249] sm:$0xff]  ;;  %v13594_v35 = vld [vmem:[#allocation4 + $0x251] sm:$0xff] }
 0x58e   : > { %v25312_v25 = vpack.c.bf16 %v13594_v35, %v13593_v31  ;;  %v22585_v31 = vld [vmem:[%s26397_s11 + $0xd0] sm:$0xff]   ;;  %v6607_v35 = vld [vmem:[#allocation2 + $0x307] sm:$0xff] }
 0x590   : > { %20753 = vmatmul.mubr.msk.bf16.gmra.mrb[232].mxu1 %vm1162_vm1, %v25219_v33 }
 0x591   : > { %20756 = vmatprep.mubr.msk.bf16.mxu1 %vm1162_vm1, %v25221_v7 }
 0x593   : > { %19955 = vmatmul.mubr.msk.bf16.gmra.mrb[32].mxu0 %vm1491_vm2, %v6311_v26  ;;  %v6580_v26 = vld [vmem:[#allocation2 + $0x14f] sm:$0xff] }
 0x594   : > { %19958 = vmatprep.mubr.msk.bf16.mxu0 %vm1491_vm2, %v6312_v40  ;;  %v13621_v40 = vpack.c.bf16 %v13584_v61, %v13583_v63  ;;  %v6616_v50 = vpack.c.bf16 %v6580_v26, %v6579_v41  ;;  %v6594_v61 = vld [vmem:[#allocation2 + $0x22f] sm:$0xff]  ;;  %v6591_v26 = vld [vmem:[#allocation2 + $0x207] sm:$0xff] }
 0x595   : > { %v13597_v41 = vld [vmem:[#allocation4 + $0x289] sm:$0xff] }
 0x598   : > { %20757 = vmatmul.mubr.msk.bf16.gmra.mrb[236].mxu1 %vm1162_vm1, %v25229_v0 }
 0x599   : > { %20772 = vmatprep.mubr.msk.bf16.mxu1 %vm1162_vm1, %v13615_v23  ;;  %v22578_v23 = vld [vmem:[%s26391_s5 + $0x1a0] sm:$0xff]  }
 0x59b   : > { %19959 = vmatmul.mubr.msk.bf16.gmra.mrb[36].mxu0 %vm1491_vm2, %v6313_v47  ;;  %v13586_v47 = vld [vmem:[#allocation4 + $0x1d1] sm:$0xff] }
 0x59c   : > { %19962 = vmatprep.mubr.msk.bf16.mxu0 %vm1491_vm2, %v6314_v46  ;;  %v13588_v46 = vld [vmem:[#allocation4 + $0x1f1] sm:$0xff]  ;;  %v25288_v52 = vpack.c.bf16 %v13586_v47, %v13585_v55 }
 0x59d   : > { %v13623_v12 = vpack.c.bf16 %v13588_v46, %v13587_v22  ;;  %v6596_v55 = vld [vmem:[#allocation2 + $0x24f] sm:$0xff]  ;;  %v6595_v46 = vld [vmem:[#allocation2 + $0x247] sm:$0xff] }
 0x59e   : > { %v6598_v22 = vld [vmem:[#allocation2 + $0x26f] sm:$0xff] }
 0x5a0   : > { %20773 = vmatmul.mubr.msk.bf16.vlgmr.msra.gmra.mrb[208].mxu1 %vm1162_vm1, %v25236_v59 }
 0x5a1   : > { %20776 = vmatprep.mubr.msk.bf16.mxu1 %vm1162_vm1, %v25241_v62  ;;  %20805 = vmatpush3.bf16.msra.mxu1 %v25174_v32  ;;  %v25253_v32 = vpack.c.bf16 %v13578_v27, %v13577_v4  ;;  %v13592_v4 = vld [vmem:[#allocation4 + $0x231] sm:$0xff] }
 0x5a2   : > { %20806 = vmatprep.subr.bf16.mxu1 %v22574_v60 }
 0x5a3   : > { %19963 = vmatmul.mubr.msk.bf16.gmra.mrb[40].mxu0 %vm1491_vm2, %v6315_v3  ;;  %v6619_v3 = vpack.c.bf16 %v6586_v51, %v6585_v14  ;;  %v13601_v51 = vld [vmem:[#allocation4 + $0x2c9] sm:$0xff] }
 0x5a4   : > { %19966 = vmatprep.mubr.msk.bf16.mxu0 %vm1491_vm2, %v6316_v17  ;;  %v13590_v17 = vld [vmem:[#allocation4 + $0x211] sm:$0xff] }
 0x5a5   : > { %20807 = vmatpush3.bf16.msra.mxu1 %v22574_v60  ;;  %v6583_v60 = vld [vmem:[#allocation2 + $0x187] sm:$0xff]  ;;  %v25302_v27 = vpack.c.bf16 %v13590_v17, %v13589_v11  ;;  %v6600_v14 = vld [vmem:[#allocation2 + $0x28f] sm:$0xff] }
 0x5a6   : > { %20808 = vmatprep.subr.bf16.mxu1 %v22576_v5  ;;  %v6599_v11 = vld [vmem:[#allocation2 + $0x287] sm:$0xff] }
 0x5a7   : > { %v6626_v17 = vpack.c.bf16 %v6600_v14, %v6599_v11  ;;  %v6904_v14 = vld [vmem:[#allocation2 + $0x208] sm:$0xff] }
 0x5a8   : > { %20777 = vmatmul.mubr.msk.bf16.gmra.mrb[212].mxu1 %vm1162_vm1, %v25253_v32 }
 0x5a9   : > { %20780 = vmatprep.mubr.msk.bf16.mxu1 %vm1162_vm1, %v13619_v53  ;;  %20809 = vmatpush3.bf16.msra.mxu1 %v22576_v5  ;;  %v13591_v5 = vld [vmem:[#allocation4 + $0x229] sm:$0xff] }
 0x5aa   : > { %20810 = vmatprep.subr.bf16.mxu1 %v22577_v21  ;;  %v25304_v13 = vpack.c.bf16 %v13592_v4, %v13591_v5  ;;  %v6589_v53 = vld [vmem:[#allocation2 + $0x1e7] sm:$0xff] }
 0x5ab   : > { %19967 = vmatmul.mubr.msk.bf16.gmra.mrb[44].mxu0 %vm1491_vm2, %v6317_v43  ;;  %v6621_v43 = vpack.c.bf16 %v6590_v16, %v6589_v53  ;;  %v6601_v5 = vld [vmem:[#allocation2 + $0x2a7] sm:$0xff] }
 0x5ac   : > { %19976 = vmatprep.mubr.msk.bf16.mxu0 %vm1491_vm2, %v6615_v49  ;;  %v13595_v49 = vld [vmem:[#allocation4 + $0x269] sm:$0xff] }
 0x5ad   : > { %20811 = vmatpush3.bf16.msra.mxu1 %v22577_v21  ;;  %v6620_v21 = vpack.c.bf16 %v6588_v29, %v6587_v30  ;;  %v6604_v29 = vld [vmem:[#allocation2 + $0x2cf] sm:$0xff]  ;;  %v6605_v53 = vld [vmem:[#allocation2 + $0x2e7] sm:$0xff] }
 0x5ae   : > { %20812 = vmatprep.subr.bf16.mxu1 %v22579_v8  ;;  %v22583_v16 = vld [vmem:[%s26397_s11 + $0xc8] sm:$0xff]  }
 0x5af   : > { %v6606_v30 = vld [vmem:[#allocation2 + $0x2ef] sm:$0xff] }
 0x5b0   : > { %20781 = vmatmul.mubr.msk.bf16.gmra.mrb[216].mxu1 %vm1162_vm1, %v25266_v39 }
 0x5b1   : > { %20784 = vmatprep.mubr.msk.bf16.mxu1 %vm1162_vm1, %v13621_v40  ;;  %20813 = vmatpush3.bf16.msra.mxu1 %v22579_v8  ;;  %v13596_v8 = vld [vmem:[#allocation4 + $0x271] sm:$0xff]  ;;  %v6593_v40 = vld [vmem:[#allocation2 + $0x227] sm:$0xff] }
 0x5b2   : > { %20814 = vmatprep.subr.bf16.mxu1 %v22580_v2  ;;  %v13627_v63 = vpack.c.bf16 %v13596_v8, %v13595_v49  ;;  %v6623_v19 = vpack.c.bf16 %v6594_v61, %v6593_v40  ;;  %v6891_v49 = vld [vmem:[#allocation2 + $0x130] sm:$0xff]  ;;  %v6890_v8 = vld [vmem:[#allocation2 + $0x128] sm:$0xff] }
 0x5b3   : > { %19977 = vmatmul.mubr.msk.bf16.vlgmr.msra.gmra.mrb[16].mxu0 %vm1491_vm2, %v6616_v50  ;;  %v13598_v50 = vld [vmem:[#allocation4 + $0x291] sm:$0xff]  ;;  %v6894_v40 = vld [vmem:[#allocation2 + $0x168] sm:$0xff] }
 0x5b4   : > { %19980 = vmatprep.mubr.msk.bf16.mxu0 %vm1491_vm2, %v6617_v20  ;;  %20009 = vmatpush3.bf16.msra.mxu0 %v25194_v42  ;;  %v6618_v42 = vpack.c.bf16 %v6584_v9, %v6583_v60  ;;  %v25319_v20 = vpack.c.bf16 %v13598_v50, %v13597_v41  ;;  %v6597_v9 = vld [vmem:[#allocation2 + $0x267] sm:$0xff]  ;;  %v13602_v60 = vld [vmem:[#allocation4 + $0x2d1] sm:$0xff] }
 0x5b5   : > { %20010 = vmatprep.subr.bf16.mxu0 %v22578_v23  ;;  %20815 = vmatpush3.bf16.msra.mxu1 %v22580_v2  ;;  %v6622_v2 = vpack.c.bf16 %v6592_v10, %v6591_v26  ;;  %v6928_v10 = vpack.c.bf16 %v6891_v49, %v6890_v8  ;;  %v6893_v61 = vld [vmem:[#allocation2 + $0x150] sm:$0xff]  ;;  %v6892_v26 = vld [vmem:[#allocation2 + $0x148] sm:$0xff] }
 0x5b6   : > { %20848 = vmatprep.subr.bf16.mxu1 %v25280_v57  ;;  %v25372_v50 = vld [vmem:[%s26397_s11 + $0xf0] sm:$0xff]   ;;  %v14247_v49 = vld [vmem:[#allocation4 + $0x128] sm:$0xff] }
 0x5b8   : > { %20785 = vmatmul.mubr.msk.bf16.gmra.mrb[220].mxu1 %vm1162_vm1, %v25288_v52  ;;  %20011 = vmatpush3.bf16.msra.mxu0 %v22578_v23  ;;  %v13600_v23 = vld [vmem:[#allocation4 + $0x2b1] sm:$0xff] }
 0x5b9   : > { %20788 = vmatprep.mubr.msk.bf16.mxu1 %vm1162_vm1, %v13623_v12  ;;  %20012 = vmatprep.subr.bf16.mxu0 %v22581_v34  ;;  %v13629_v47 = vpack.c.bf16 %v13600_v23, %v13599_v37  ;;  %v6625_v12 = vpack.c.bf16 %v6598_v22, %v6597_v9  ;;  %v6899_v37 = vld [vmem:[#allocation2 + $0x1b0] sm:$0xff]  ;;  %v6896_v23 = vld [vmem:[#allocation2 + $0x188] sm:$0xff] }
 0x5ba   : > { %v6902_v9 = vld [vmem:[#allocation2 + $0x1e8] sm:$0xff] }
 0x5bb   : > { %19981 = vmatmul.mubr.msk.bf16.gmra.mrb[20].mxu0 %vm1491_vm2, %v6618_v42  ;;  %v25326_v42 = vpack.c.bf16 %v13602_v60, %v13601_v51  ;;  %v6905_v51 = vld [vmem:[#allocation2 + $0x210] sm:$0xff] }
 0x5bc   : > { %19984 = vmatprep.mubr.msk.bf16.mxu0 %vm1491_vm2, %v6619_v3  ;;  %20013 = vmatpush3.bf16.msra.mxu0 %v22581_v34  ;;  %v6624_v34 = vpack.c.bf16 %v6596_v55, %v6595_v46  ;;  %v6602_v3 = vld [vmem:[#allocation2 + $0x2af] sm:$0xff] }
 0x5bd   : > { %20046 = vmatprep.subr.bf16.mxu0 %v25297_v54  ;;  %v6627_v4 = vpack.c.bf16 %v6602_v3, %v6601_v5  ;;  %v6903_v46 = vld [vmem:[#allocation2 + $0x1f0] sm:$0xff]  ;;  %v6906_v3 = vld [vmem:[#allocation2 + $0x228] sm:$0xff] }
 0x5be   : > { %v6907_v60 = vld [vmem:[#allocation2 + $0x230] sm:$0xff]  ;;  %v6908_v5 = vld [vmem:[#allocation2 + $0x248] sm:$0xff] }
 0x5bf   : > { %v6936_v11 = vpack.c.bf16 %v6907_v60, %v6906_v3  ;;  %v14258_v60 = vld [vmem:[#allocation4 + $0x1d0] sm:$0xff] }
 0x5c0   : > { %20789 = vmatmul.mubr.msk.bf16.gmra.mrb[224].mxu1 %vm1162_vm1, %v25302_v27 }
 0x5c1   : > { %20792 = vmatprep.mubr.msk.bf16.mxu1 %vm1162_vm1, %v25304_v13 }
 0x5c3   : > { %19985 = vmatmul.mubr.msk.bf16.gmra.mrb[24].mxu0 %vm1491_vm2, %v6620_v21  ;;  %v6603_v21 = vld [vmem:[#allocation2 + $0x2c7] sm:$0xff] }
 0x5c4   : > { %19988 = vmatprep.mubr.msk.bf16.mxu0 %vm1491_vm2, %v6621_v43  ;;  %v6629_v43 = vpack.c.bf16 %v6606_v30, %v6605_v53  ;;  %v13938_v30 = vld [vmem:[#allocation4 + $0x2e7] sm:$0xff]  ;;  %v6913_v53 = vld [vmem:[#allocation2 + $0x290] sm:$0xff] }
 0x5c8   : > { %20793 = vmatmul.mubr.msk.bf16.gmra.mrb[228].mxu1 %vm1162_vm1, %v25312_v25 }
 0x5c9   : > { %20796 = vmatprep.mubr.msk.bf16.mxu1 %vm1162_vm1, %v13627_v63  ;;  %v22588_v63 = vld [vmem:[%s26397_s11 + $0xe0] sm:$0xff]  }
 0x5cb   : > { %19989 = vmatmul.mubr.msk.bf16.gmra.mrb[28].mxu0 %vm1491_vm2, %v6622_v2  ;;  %v6929_v2 = vpack.c.bf16 %v6893_v61, %v6892_v26  ;;  %v22592_v61 = vld [vmem:[%s26397_s11 + $0xf8] sm:$0xff]   ;;  %v6916_v26 = vld [vmem:[#allocation2 + $0x2c8] sm:$0xff] }
 0x5cc   : > { %19992 = vmatprep.mubr.msk.bf16.mxu0 %vm1491_vm2, %v6623_v19  ;;  %v22587_v19 = vld [vmem:[%s26391_s5 + $0x1b8] sm:$0xff]  }
 0x5d0   : > { %20797 = vmatmul.mubr.msk.bf16.gmra.mrb[232].mxu1 %vm1162_vm1, %v25319_v20 }
 0x5d1   : > { %20800 = vmatprep.mubr.msk.bf16.mxu1 %vm1162_vm1, %v13629_v47  ;;  %v25388_v47 = vld [vmem:[%s26391_s5 + $0x1c8] sm:$0xff]  }
 0x5d3   : > { %19993 = vmatmul.mubr.msk.bf16.gmra.mrb[32].mxu0 %vm1491_vm2, %v6624_v34 }
 0x5d4   : > { %19996 = vmatprep.mubr.msk.bf16.mxu0 %vm1491_vm2, %v6625_v12  ;;  %v6934_v12 = vpack.c.bf16 %v6903_v46, %v6902_v9 }
 0x5d8   : > { %20801 = vmatmul.mubr.msk.bf16.gmra.mrb[236].mxu1 %vm1162_vm1, %v25326_v42 }
 0x5d9   : > { %20816 = vmatprep.mubr.msk.bf16.mxu1 %vm1162_vm1, %v25124_v6  ;;  %v6628_v6 = vpack.c.bf16 %v6604_v29, %v6603_v21 }
 0x5db   : > { %19997 = vmatmul.mubr.msk.bf16.gmra.mrb[36].mxu0 %vm1491_vm2, %v6626_v17  ;;  %v6911_v17 = vld [vmem:[#allocation2 + $0x270] sm:$0xff] }
 0x5dc   : > { %20000 = vmatprep.mubr.msk.bf16.mxu0 %vm1491_vm2, %v6627_v4  ;;  %v6910_v4 = vld [vmem:[#allocation2 + $0x268] sm:$0xff] }
 0x5dd   : > { %v6938_v29 = vpack.c.bf16 %v6911_v17, %v6910_v4  ;;  %v22598_v17 = vld [vmem:[%s26397_s11 + $0x118] sm:$0xff]  }
 0x5de   : > { %v7208_v4 = vld [vmem:[#allocation2 + $0x171] sm:$0xff] }
 0x5e0   : > { %20817 = vmatmul.mubr.msk.bf16.vlgmr.msra.gmra.mrb[208].mxu1 %vm1162_vm1, %v25129_v36  ;;  %v6608_v36 = vld [vmem:[#allocation2 + $0x30f] sm:$0xff] }
 0x5e1   : > { %20820 = vmatprep.mubr.msk.bf16.mxu1 %vm1162_vm1, %v25141_v48  ;;  %20849 = vmatpush3.bf16.msra.mxu1 %v25280_v57  ;;  %v22586_v48 = vld [vmem:[%s26397_s11 + $0xd8] sm:$0xff]   ;;  %v6630_v57 = vpack.c.bf16 %v6608_v36, %v6607_v35  ;;  %v6914_v35 = vld [vmem:[#allocation2 + $0x2a8] sm:$0xff] }
 0x5e2   : > { %20850 = vmatprep.subr.bf16.mxu1 %v22583_v16 }
 0x5e3   : > { %20001 = vmatmul.mubr.msk.bf16.gmra.mrb[40].mxu0 %vm1491_vm2, %v6628_v6  ;;  %v14245_v6 = vld [vmem:[#allocation4 + $0x108] sm:$0xff] }
 0x5e4   : > { %20004 = vmatprep.mubr.msk.bf16.mxu0 %vm1491_vm2, %v6629_v43 }
 0x5e5   : > { %20851 = vmatpush3.bf16.msra.mxu1 %v22583_v16  ;;  %v14246_v16 = vld [vmem:[#allocation4 + $0x110] sm:$0xff] }
 0x5e6   : > { %20852 = vmatprep.subr.bf16.mxu1 %v22585_v31  ;;  %v14289_v43 = vpack.c.bf16 %v14246_v16, %v14245_v6  ;;  %v14260_v6 = vld [vmem:[#allocation4 + $0x1f0] sm:$0xff] }
 0x5e8   : > { %20821 = vmatmul.mubr.msk.bf16.gmra.mrb[212].mxu1 %vm1162_vm1, %v25146_v56  ;;  %v22589_v56 = vld [vmem:[%s26397_s11 + $0xe8] sm:$0xff]  }
 0x5e9   : > { %20824 = vmatprep.mubr.msk.bf16.mxu1 %vm1162_vm1, %v25157_v24  ;;  %20853 = vmatpush3.bf16.msra.mxu1 %v22585_v31  ;;  %v6895_v24 = vld [vmem:[#allocation2 + $0x170] sm:$0xff] }
 0x5ea   : > { %20854 = vmatprep.subr.bf16.mxu1 %v22586_v48  ;;  %v6930_v41 = vpack.c.bf16 %v6895_v24, %v6894_v40  ;;  %v6919_v24 = vld [vmem:[#allocation2 + $0x2f0] sm:$0xff]  ;;  %v6918_v40 = vld [vmem:[#allocation2 + $0x2e8] sm:$0xff] }
 0x5eb   : > { %20005 = vmatmul.mubr.msk.bf16.gmra.mrb[44].mxu0 %vm1491_vm2, %v6630_v57  ;;  %v14250_v57 = vld [vmem:[#allocation4 + $0x150] sm:$0xff] }
 0x5ec   : > { %20014 = vmatprep.mubr.msk.bf16.mxu0 %vm1491_vm2, %v6928_v10  ;;  %v14249_v10 = vld [vmem:[#allocation4 + $0x148] sm:$0xff] }
 0x5ed   : > { %20855 = vmatpush3.bf16.msra.mxu1 %v22586_v48  ;;  %v14248_v48 = vld [vmem:[#allocation4 + $0x130] sm:$0xff] }
 0x5ee   : > { %20856 = vmatprep.subr.bf16.mxu1 %v22588_v63  ;;  %v25418_v8 = vpack.c.bf16 %v14248_v48, %v14247_v49  ;;  %v7212_v49 = vld [vmem:[#allocation2 + $0x1b1] sm:$0xff] }
 0x5f0   : > { %20825 = vmatmul.mubr.msk.bf16.gmra.mrb[216].mxu1 %vm1162_vm1, %v25162_v18  ;;  %v22590_v18 = vld [vmem:[%s26391_s5 + $0x1c0] sm:$0xff]  }
 0x5f1   : > { %20828 = vmatprep.mubr.msk.bf16.mxu1 %vm1162_vm1, %v25182_v58  ;;  %20857 = vmatpush3.bf16.msra.mxu1 %v22588_v63  ;;  %v6897_v58 = vld [vmem:[#allocation2 + $0x190] sm:$0xff] }
 0x5f2   : > { %20858 = vmatprep.subr.bf16.mxu1 %v22589_v56  ;;  %v6931_v55 = vpack.c.bf16 %v6897_v58, %v6896_v23  ;;  %v6917_v63 = vld [vmem:[#allocation2 + $0x2d0] sm:$0xff] }
 0x5f3   : > { %20015 = vmatmul.mubr.msk.bf16.vlgmr.msra.gmra.mrb[16].mxu0 %vm1491_vm2, %v6929_v2  ;;  %v6941_v2 = vpack.c.bf16 %v6917_v63, %v6916_v26  ;;  %v14254_v58 = vld [vmem:[#allocation4 + $0x190] sm:$0xff]  ;;  %v14263_v26 = vld [vmem:[#allocation4 + $0x228] sm:$0xff] }
 0x5f4   : > { %20018 = vmatprep.mubr.msk.bf16.mxu0 %vm1491_vm2, %v6930_v41  ;;  %20047 = vmatpush3.bf16.msra.mxu0 %v25297_v54  ;;  %v6898_v54 = vld [vmem:[#allocation2 + $0x1a8] sm:$0xff]  ;;  %v22594_v41 = vld [vmem:[%s26397_s11 + $0x100] sm:$0xff]   ;;  %v6921_v23 = vld [vmem:[#allocation2 + $0x310] sm:$0xff] }
 0x5f5   : > { %20048 = vmatprep.subr.bf16.mxu0 %v22587_v19  ;;  %20859 = vmatpush3.bf16.msra.mxu1 %v22589_v56  ;;  %v6932_v22 = vpack.c.bf16 %v6899_v37, %v6898_v54  ;;  %v25423_v56 = vpack.c.bf16 %v14250_v57, %v14249_v10  ;;  %v6920_v37 = vld [vmem:[#allocation2 + $0x308] sm:$0xff]  ;;  %v25482_v10 = vld [vmem:[%s26391_s5 + $0x1e0] sm:$0xff]  }
 0x5f6   : > { %20892 = vmatprep.subr.bf16.mxu1 %v25372_v50  ;;  %v6943_v46 = vpack.c.bf16 %v6921_v23, %v6920_v37  ;;  %v7211_v57 = vld [vmem:[#allocation2 + $0x1a9] sm:$0xff]  ;;  %v7216_v37 = vld [vmem:[#allocation2 + $0x1f1] sm:$0xff] }
 0x5f7   : > { %v7245_v63 = vpack.c.bf16 %v7212_v49, %v7211_v57  ;;  %v7226_v57 = vld [vmem:[#allocation2 + $0x291] sm:$0xff]  ;;  %v7227_v49 = vld [vmem:[#allocation2 + $0x2a9] sm:$0xff] }
 0x5f8   : > { %20829 = vmatmul.mubr.msk.bf16.gmra.mrb[220].mxu1 %vm1162_vm1, %v25185_v38  ;;  %20049 = vmatpush3.bf16.msra.mxu0 %v22587_v19  ;;  %v6901_v38 = vld [vmem:[#allocation2 + $0x1d0] sm:$0xff]  ;;  %v6942_v19 = vpack.c.bf16 %v6919_v24, %v6918_v40  ;;  %v14265_v40 = vld [vmem:[#allocation4 + $0x248] sm:$0xff] }
 0x5f9   : > { %20832 = vmatprep.mubr.msk.bf16.mxu1 %vm1162_vm1, %v25199_v15  ;;  %20050 = vmatprep.subr.bf16.mxu0 %v22590_v18  ;;  %v6900_v15 = vld [vmem:[#allocation2 + $0x1c8] sm:$0xff]  ;;  %v14266_v24 = vld [vmem:[#allocation4 + $0x250] sm:$0xff] }
 0x5fa   : > { %v6933_v34 = vpack.c.bf16 %v6901_v38, %v6900_v15  ;;  %v7203_v15 = vld [vmem:[#allocation2 + $0x129] sm:$0xff] }
 0x5fb   : > { %20019 = vmatmul.mubr.msk.bf16.gmra.mrb[20].mxu0 %vm1491_vm2, %v6931_v55  ;;  %v14251_v55 = vld [vmem:[#allocation4 + $0x168] sm:$0xff] }
 0x5fc   : > { %20022 = vmatprep.mubr.msk.bf16.mxu0 %vm1491_vm2, %v6932_v22  ;;  %20051 = vmatpush3.bf16.msra.mxu0 %v22590_v18  ;;  %v14252_v18 = vld [vmem:[#allocation4 + $0x170] sm:$0xff]  ;;  %v22595_v22 = vld [vmem:[%s26397_s11 + $0x108] sm:$0xff]  }
 0x5fd   : > { %20084 = vmatprep.subr.bf16.mxu0 %v25388_v47  ;;  %v25435_v54 = vpack.c.bf16 %v14252_v18, %v14251_v55  ;;  %v25489_v18 = vpack.c.bf16 %v14266_v24, %v14265_v40  ;;  %v7229_v24 = vld [vmem:[#allocation2 + $0x2c9] sm:$0xff] }
 0x5fe   : > { %v22601_v40 = vld [vmem:[%s26397_s11 + $0x128] sm:$0xff]  }
 0x600   : > { %20833 = vmatmul.mubr.msk.bf16.gmra.mrb[224].mxu1 %vm1162_vm1, %v25201_v45  ;;  %v6935_v45 = vpack.c.bf16 %v6905_v51, %v6904_v14  ;;  %v14256_v51 = vld [vmem:[#allocation4 + $0x1b0] sm:$0xff]  ;;  %v14255_v14 = vld [vmem:[#allocation4 + $0x1a8] sm:$0xff] }
 0x601   : > { %20836 = vmatprep.mubr.msk.bf16.mxu1 %vm1162_vm1, %v25209_v28  ;;  %v6909_v28 = vld [vmem:[#allocation2 + $0x250] sm:$0xff]  ;;  %v25451_v3 = vpack.c.bf16 %v14256_v51, %v14255_v14 }
 0x602   : > { %v7220_v14 = vld [vmem:[#allocation2 + $0x231] sm:$0xff] }
 0x603   : > { %20023 = vmatmul.mubr.msk.bf16.gmra.mrb[24].mxu0 %vm1491_vm2, %v6933_v34  ;;  %v7204_v34 = vld [vmem:[#allocation2 + $0x131] sm:$0xff] }
 0x604   : > { %20026 = vmatprep.mubr.msk.bf16.mxu0 %vm1491_vm2, %v6934_v12  ;;  %v7241_v9 = vpack.c.bf16 %v7204_v34, %v7203_v15  ;;  %v22597_v12 = vld [vmem:[%s26397_s11 + $0x110] sm:$0xff]   ;;  %v14269_v34 = vld [vmem:[#allocation4 + $0x288] sm:$0xff] }
 0x608   : > { %20837 = vmatmul.mubr.msk.bf16.gmra.mrb[228].mxu1 %vm1162_vm1, %v25211_v44  ;;  %v6937_v44 = vpack.c.bf16 %v6909_v28, %v6908_v5  ;;  %v7206_v28 = vld [vmem:[#allocation2 + $0x151] sm:$0xff] }
 0x609   : > { %20840 = vmatprep.mubr.msk.bf16.mxu1 %vm1162_vm1, %v25219_v33  ;;  %v13939_v33 = vld [vmem:[#allocation4 + $0x2ef] sm:$0xff] }
 0x60a   : > { %v25411_v21 = vpack.c.bf16 %v13939_v33, %v13938_v30  ;;  %v22596_v33 = vld [vmem:[%s26391_s5 + $0x1d0] sm:$0xff]   ;;  %v25465_v30 = vld [vmem:[%s26397_s11 + $0x120] sm:$0xff]  }
 0x60b   : > { %20027 = vmatmul.mubr.msk.bf16.gmra.mrb[28].mxu0 %vm1491_vm2, %v6935_v45  ;;  %v7205_v45 = vld [vmem:[#allocation2 + $0x149] sm:$0xff] }
 0x60c   : > { %20030 = vmatprep.mubr.msk.bf16.mxu0 %vm1491_vm2, %v6936_v11  ;;  %v14257_v11 = vld [vmem:[#allocation4 + $0x1c8] sm:$0xff] }
 0x60d   : > { %v14295_v5 = vpack.c.bf16 %v14258_v60, %v14257_v11  ;;  %v7219_v60 = vld [vmem:[#allocation2 + $0x229] sm:$0xff] }
 0x60e   : > { %v7249_v11 = vpack.c.bf16 %v7220_v14, %v7219_v60  ;;  %v14593_v60 = vld [vmem:[#allocation4 + $0x1b1] sm:$0xff] }
 0x610   : > { %20841 = vmatmul.mubr.msk.bf16.gmra.mrb[232].mxu1 %vm1162_vm1, %v25221_v7  ;;  %v6915_v7 = vld [vmem:[#allocation2 + $0x2b0] sm:$0xff] }
 0x611   : > { %20844 = vmatprep.mubr.msk.bf16.mxu1 %vm1162_vm1, %v25229_v0  ;;  %v6912_v0 = vld [vmem:[#allocation2 + $0x288] sm:$0xff]  ;;  %v6940_v36 = vpack.c.bf16 %v6915_v7, %v6914_v35  ;;  %v22599_v7 = vld [vmem:[%s26391_s5 + $0x1d8] sm:$0xff]  }
 0x612   : > { %v6939_v31 = vpack.c.bf16 %v6913_v53, %v6912_v0  ;;  %v14262_v53 = vld [vmem:[#allocation4 + $0x210] sm:$0xff] }
 0x613   : > { %20031 = vmatmul.mubr.msk.bf16.gmra.mrb[32].mxu0 %vm1491_vm2, %v6937_v44  ;;  %v7207_v44 = vld [vmem:[#allocation2 + $0x169] sm:$0xff] }
 0x614   : > { %20034 = vmatprep.mubr.msk.bf16.mxu0 %vm1491_vm2, %v6938_v29  ;;  %v7242_v29 = vpack.c.bf16 %v7206_v28, %v7205_v45  ;;  %v7243_v16 = vpack.c.bf16 %v7208_v4, %v7207_v44  ;;  %v7209_v35 = vld [vmem:[#allocation2 + $0x189] sm:$0xff] }
 0x615   : > { %v14272_v28 = vld [vmem:[#allocation4 + $0x2b0] sm:$0xff]  ;;  %v14273_v4 = vld [vmem:[#allocation4 + $0x2c8] sm:$0xff] }
 0x618   : > { %20845 = vmatmul.mubr.msk.bf16.gmra.mrb[236].mxu1 %vm1162_vm1, %v25411_v21 }
 0x619   : > { %20860 = vmatprep.mubr.msk.bf16.mxu1 %vm1162_vm1, %v14289_v43  ;;  %v14259_v43 = vld [vmem:[#allocation4 + $0x1e8] sm:$0xff] }
 0x61a   : > { %v25473_v0 = vpack.c.bf16 %v14260_v6, %v14259_v43  ;;  %v7223_v6 = vld [vmem:[#allocation2 + $0x269] sm:$0xff] }
 0x61b   : > { %20035 = vmatmul.mubr.msk.bf16.gmra.mrb[36].mxu0 %vm1491_vm2, %v6939_v31  ;;  %v14261_v31 = vld [vmem:[#allocation4 + $0x208] sm:$0xff] }
 0x61c   : > { %20038 = vmatprep.mubr.msk.bf16.mxu0 %vm1491_vm2, %v6940_v36  ;;  %v7210_v36 = vld [vmem:[#allocation2 + $0x191] sm:$0xff]  ;;  %v14297_v48 = vpack.c.bf16 %v14262_v53, %v14261_v31 }
 0x61d   : > { %v7224_v53 = vld [vmem:[#allocation2 + $0x271] sm:$0xff] }
 0x61e   : > { %v14276_v31 = vld [vmem:[#allocation4 + $0x2f0] sm:$0xff] }
 0x620   : > { %20861 = vmatmul.mubr.msk.bf16.vlgmr.msra.gmra.mrb[208].mxu1 %vm1162_vm1, %v25418_v8 }
 0x621   : > { %20864 = vmatprep.mubr.msk.bf16.mxu1 %vm1162_vm1, %v25423_v56  ;;  %20893 = vmatpush3.bf16.msra.mxu1 %v25372_v50  ;;  %v14253_v50 = vld [vmem:[#allocation4 + $0x188] sm:$0xff] }
 0x622   : > { %20894 = vmatprep.subr.bf16.mxu1 %v22592_v61  ;;  %v25440_v38 = vpack.c.bf16 %v14254_v58, %v14253_v50  ;;  %v7215_v58 = vld [vmem:[#allocation2 + $0x1e9] sm:$0xff] }
 0x623   : > { %20039 = vmatmul.mubr.msk.bf16.gmra.mrb[40].mxu0 %vm1491_vm2, %v6941_v2  ;;  %v7247_v55 = vpack.c.bf16 %v7216_v37, %v7215_v58  ;;  %v14268_v50 = vld [vmem:[#allocation4 + $0x270] sm:$0xff] }
 0x624   : > { %20042 = vmatprep.mubr.msk.bf16.mxu0 %vm1491_vm2, %v6942_v19  ;;  %v7213_v19 = vld [vmem:[#allocation2 + $0x1c9] sm:$0xff] }
 0x625   : > { %20895 = vmatpush3.bf16.msra.mxu1 %v22592_v61  ;;  %v14264_v61 = vld [vmem:[#allocation4 + $0x230] sm:$0xff] }
 0x626   : > { %20896 = vmatprep.subr.bf16.mxu1 %v22594_v41  ;;  %v25487_v2 = vpack.c.bf16 %v14264_v61, %v14263_v26  ;;  %v7230_v26 = vld [vmem:[#allocation2 + $0x2d1] sm:$0xff] }
 0x627   : > { %v22603_v37 = vld [vmem:[%s26397_s11 + $0x130] sm:$0xff]  }
 0x628   : > { %20865 = vmatmul.mubr.msk.bf16.gmra.mrb[212].mxu1 %vm1162_vm1, %v25435_v54 }
 0x629   : > { %20868 = vmatprep.mubr.msk.bf16.mxu1 %vm1162_vm1, %v25440_v38  ;;  %20897 = vmatpush3.bf16.msra.mxu1 %v22594_v41  ;;  %v7214_v41 = vld [vmem:[#allocation2 + $0x1d1] sm:$0xff] }
 0x62a   : > { %20898 = vmatprep.subr.bf16.mxu1 %v22595_v22  ;;  %v7246_v23 = vpack.c.bf16 %v7214_v41, %v7213_v19  ;;  %v7231_v19 = vld [vmem:[#allocation2 + $0x2e9] sm:$0xff]  ;;  %v7232_v41 = vld [vmem:[#allocation2 + $0x2f1] sm:$0xff] }
 0x62b   : > { %20043 = vmatmul.mubr.msk.bf16.gmra.mrb[44].mxu0 %vm1491_vm2, %v6943_v46  ;;  %v14267_v46 = vld [vmem:[#allocation4 + $0x268] sm:$0xff]  ;;  %v7255_v58 = vpack.c.bf16 %v7232_v41, %v7231_v19 }
 0x62c   : > { %20052 = vmatprep.mubr.msk.bf16.mxu0 %vm1491_vm2, %v7241_v9  ;;  %v25497_v15 = vpack.c.bf16 %v14268_v50, %v14267_v46  ;;  %v7217_v9 = vld [vmem:[#allocation2 + $0x209] sm:$0xff] }
 0x62d   : > { %20899 = vmatpush3.bf16.msra.mxu1 %v22595_v22  ;;  %v14270_v22 = vld [vmem:[#allocation4 + $0x290] sm:$0xff] }
 0x62e   : > { %20900 = vmatprep.subr.bf16.mxu1 %v22597_v12  ;;  %v14301_v51 = vpack.c.bf16 %v14270_v22, %v14269_v34  ;;  %v7233_v50 = vld [vmem:[#allocation2 + $0x309] sm:$0xff]  ;;  %v7517_v34 = vld [vmem:[#allocation2 + $0x132] sm:$0xff] }
 0x62f   : > { %v7516_v46 = vld [vmem:[#allocation2 + $0x12a] sm:$0xff] }
 0x630   : > { %20869 = vmatmul.mubr.msk.bf16.gmra.mrb[216].mxu1 %vm1162_vm1, %v25451_v3  ;;  %v7530_v41 = vld [vmem:[#allocation2 + $0x20a] sm:$0xff] }
 0x631   : > { %20872 = vmatprep.mubr.msk.bf16.mxu1 %vm1162_vm1, %v14295_v5  ;;  %20901 = vmatpush3.bf16.msra.mxu1 %v22597_v12  ;;  %v7218_v12 = vld [vmem:[#allocation2 + $0x211] sm:$0xff]  ;;  %v14271_v5 = vld [vmem:[#allocation4 + $0x2a8] sm:$0xff] }
 0x632   : > { %20902 = vmatprep.subr.bf16.mxu1 %v22598_v17  ;;  %v7248_v45 = vpack.c.bf16 %v7218_v12, %v7217_v9  ;;  %v25504_v44 = vpack.c.bf16 %v14272_v28, %v14271_v5  ;;  %v7554_v9 = vpack.c.bf16 %v7517_v34, %v7516_v46  ;;  %v22606_v12 = vld [vmem:[%s26397_s11 + $0x140] sm:$0xff]   ;;  %v7520_v28 = vld [vmem:[#allocation2 + $0x16a] sm:$0xff]  ;;  %v7537_v46 = vld [vmem:[#allocation2 + $0x272] sm:$0xff] }
 0x633   : > { %20053 = vmatmul.mubr.msk.bf16.vlgmr.msra.gmra.mrb[16].mxu0 %vm1491_vm2, %v7242_v29  ;;  %v7221_v29 = vld [vmem:[#allocation2 + $0x249] sm:$0xff] }
 0x634   : > { %20056 = vmatprep.mubr.msk.bf16.mxu0 %vm1491_vm2, %v7243_v16  ;;  %20085 = vmatpush3.bf16.msra.mxu0 %v25388_v47  ;;  %v7244_v47 = vpack.c.bf16 %v7210_v36, %v7209_v35  ;;  %v14275_v35 = vld [vmem:[#allocation4 + $0x2e8] sm:$0xff] }
 0x635   : > { %20086 = vmatprep.subr.bf16.mxu0 %v22596_v33  ;;  %20903 = vmatpush3.bf16.msra.mxu1 %v22598_v17  ;;  %v14274_v17 = vld [vmem:[#allocation4 + $0x2d0] sm:$0xff]  ;;  %v25511_v36 = vpack.c.bf16 %v14276_v31, %v14275_v35 }
 0x636   : > { %20936 = vmatprep.subr.bf16.mxu1 %v25465_v30  ;;  %v14303_v16 = vpack.c.bf16 %v14274_v17, %v14273_v4  ;;  %v7521_v17 = vld [vmem:[#allocation2 + $0x172] sm:$0xff]  ;;  %v22605_v4 = vld [vmem:[%s26391_s5 + $0x1e8] sm:$0xff]  }
 0x637   : > { %v7524_v31 = vld [vmem:[#allocation2 + $0x1aa] sm:$0xff]  ;;  %v7525_v35 = vld [vmem:[#allocation2 + $0x1b2] sm:$0xff] }
 0x638   : > { %20873 = vmatmul.mubr.msk.bf16.gmra.mrb[220].mxu1 %vm1162_vm1, %v25473_v0  ;;  %20087 = vmatpush3.bf16.msra.mxu0 %v22596_v33  ;;  %v7222_v33 = vld [vmem:[#allocation2 + $0x251] sm:$0xff] }
 0x639   : > { %20876 = vmatprep.mubr.msk.bf16.mxu1 %vm1162_vm1, %v14297_v48  ;;  %20088 = vmatprep.subr.bf16.mxu0 %v22599_v7  ;;  %v7250_v43 = vpack.c.bf16 %v7222_v33, %v7221_v29  ;;  %v7225_v48 = vld [vmem:[#allocation2 + $0x289] sm:$0xff]  ;;  %v7556_v29 = vpack.c.bf16 %v7521_v17, %v7520_v28 }
 0x63a   : > { %v25561_v33 = vld [vmem:[%s26397_s11 + $0x150] sm:$0xff]  }
 0x63b   : > { %20057 = vmatmul.mubr.msk.bf16.gmra.mrb[20].mxu0 %vm1491_vm2, %v7244_v47  ;;  %v7228_v47 = vld [vmem:[#allocation2 + $0x2b1] sm:$0xff] }
 0x63c   : > { %20060 = vmatprep.mubr.msk.bf16.mxu0 %vm1491_vm2, %v7245_v63  ;;  %20089 = vmatpush3.bf16.msra.mxu0 %v22599_v7  ;;  %v7251_v7 = vpack.c.bf16 %v7224_v53, %v7223_v6  ;;  %v7252_v63 = vpack.c.bf16 %v7226_v57, %v7225_v48  ;;  %v7253_v61 = vpack.c.bf16 %v7228_v47, %v7227_v49  ;;  %v14597_v6 = vld [vmem:[#allocation4 + $0x1f1] sm:$0xff] }
 0x63d   : > { %20122 = vmatprep.subr.bf16.mxu0 %v25482_v10  ;;  %v25579_v48 = vld [vmem:[%s26391_s5 + $0x1f8] sm:$0xff]   ;;  %v7558_v57 = vpack.c.bf16 %v7525_v35, %v7524_v31  ;;  %v7526_v49 = vld [vmem:[#allocation2 + $0x1ca] sm:$0xff] }
 0x63e   : > { %v7527_v47 = vld [vmem:[#allocation2 + $0x1d2] sm:$0xff]  ;;  %v7540_v17 = vld [vmem:[#allocation2 + $0x2aa] sm:$0xff] }
 0x63f   : > { %v7543_v31 = vld [vmem:[#allocation2 + $0x2d2] sm:$0xff] }
 0x640   : > { %20877 = vmatmul.mubr.msk.bf16.gmra.mrb[224].mxu1 %vm1162_vm1, %v25487_v2  ;;  %v22610_v35 = vld [vmem:[%s26397_s11 + $0x158] sm:$0xff]  }
 0x641   : > { %20880 = vmatprep.mubr.msk.bf16.mxu1 %vm1162_vm1, %v25489_v18 }
 0x643   : > { %20061 = vmatmul.mubr.msk.bf16.gmra.mrb[24].mxu0 %vm1491_vm2, %v7246_v23  ;;  %v14588_v23 = vld [vmem:[#allocation4 + $0x169] sm:$0xff] }
 0x644   : > { %20064 = vmatprep.mubr.msk.bf16.mxu0 %vm1491_vm2, %v7247_v55  ;;  %v14589_v55 = vld [vmem:[#allocation4 + $0x171] sm:$0xff] }
 0x645   : > { %v25532_v22 = vpack.c.bf16 %v14589_v55, %v14588_v23  ;;  %v14608_v23 = vld [vmem:[#allocation4 + $0x2a9] sm:$0xff]  ;;  %v14609_v55 = vld [vmem:[#allocation4 + $0x2b1] sm:$0xff] }
 0x648   : > { %20881 = vmatmul.mubr.msk.bf16.gmra.mrb[228].mxu1 %vm1162_vm1, %v25497_v15 }
 0x649   : > { %20884 = vmatprep.mubr.msk.bf16.mxu1 %vm1162_vm1, %v14301_v51  ;;  %v14592_v51 = vld [vmem:[#allocation4 + $0x1a9] sm:$0xff] }
 0x64a   : > { %v25546_v14 = vpack.c.bf16 %v14593_v60, %v14592_v51  ;;  %v14921_v51 = vld [vmem:[#allocation4 + $0x12f] sm:$0xff] }
 0x64b   : > { %20065 = vmatmul.mubr.msk.bf16.gmra.mrb[28].mxu0 %vm1491_vm2, %v7248_v45  ;;  %v7518_v45 = vld [vmem:[#allocation2 + $0x14a] sm:$0xff] }
 0x64c   : > { %20068 = vmatprep.mubr.msk.bf16.mxu0 %vm1491_vm2, %v7249_v11  ;;  %v7519_v11 = vld [vmem:[#allocation2 + $0x152] sm:$0xff] }
 0x64d   : > { %v7555_v5 = vpack.c.bf16 %v7519_v11, %v7518_v45  ;;  %v14920_v45 = vld [vmem:[#allocation4 + $0x127] sm:$0xff] }
 0x64e   : > { %v7538_v11 = vld [vmem:[#allocation2 + $0x28a] sm:$0xff]  ;;  %v14964_v28 = vpack.c.bf16 %v14921_v51, %v14920_v45 }
 0x64f   : > { %v7832_v51 = vld [vmem:[#allocation2 + $0x166] sm:$0xff] }
 0x650   : > { %20885 = vmatmul.mubr.msk.bf16.gmra.mrb[232].mxu1 %vm1162_vm1, %v25504_v44  ;;  %v7834_v45 = vld [vmem:[#allocation2 + $0x186] sm:$0xff] }
 0x651   : > { %20888 = vmatprep.mubr.msk.bf16.mxu1 %vm1162_vm1, %v14303_v16  ;;  %v14596_v16 = vld [vmem:[#allocation4 + $0x1e9] sm:$0xff] }
 0x652   : > { %v25569_v53 = vpack.c.bf16 %v14597_v6, %v14596_v16  ;;  %v14925_v16 = vld [vmem:[#allocation4 + $0x16f] sm:$0xff]  ;;  %v14922_v6 = vld [vmem:[#allocation4 + $0x147] sm:$0xff] }
 0x653   : > { %20069 = vmatmul.mubr.msk.bf16.gmra.mrb[32].mxu0 %vm1491_vm2, %v7250_v43  ;;  %v7522_v43 = vld [vmem:[#allocation2 + $0x18a] sm:$0xff] }
 0x654   : > { %20072 = vmatprep.mubr.msk.bf16.mxu0 %vm1491_vm2, %v7251_v7  ;;  %v7523_v7 = vld [vmem:[#allocation2 + $0x192] sm:$0xff] }
 0x658   : > { %20889 = vmatmul.mubr.msk.bf16.gmra.mrb[236].mxu1 %vm1162_vm1, %v25511_v36 }
 0x659   : > { %20904 = vmatprep.mubr.msk.bf16.mxu1 %vm1162_vm1, %v25236_v59  ;;  %v7254_v59 = vpack.c.bf16 %v7230_v26, %v7229_v24  ;;  %v14604_v26 = vld [vmem:[#allocation4 + $0x269] sm:$0xff] }
 0x65b   : > { %20073 = vmatmul.mubr.msk.bf16.gmra.mrb[36].mxu0 %vm1491_vm2, %v7252_v63  ;;  %v7528_v63 = vld [vmem:[#allocation2 + $0x1ea] sm:$0xff] }
 0x65c   : > { %20076 = vmatprep.mubr.msk.bf16.mxu0 %vm1491_vm2, %v7253_v61  ;;  %v7529_v61 = vld [vmem:[#allocation2 + $0x1f2] sm:$0xff] }
 0x65d   : > { %v7560_v24 = vpack.c.bf16 %v7529_v61, %v7528_v63  ;;  %v22612_v61 = vld [vmem:[%s26397_s11 + $0x160] sm:$0xff]  }
 0x660   : > { %20905 = vmatmul.mubr.msk.bf16.vlgmr.msra.gmra.mrb[208].mxu1 %vm1162_vm1, %v25241_v62  ;;  %v7234_v62 = vld [vmem:[#allocation2 + $0x311] sm:$0xff] }
 0x661   : > { %20908 = vmatprep.mubr.msk.bf16.mxu1 %vm1162_vm1, %v25253_v32  ;;  %20937 = vmatpush3.bf16.msra.mxu1 %v25465_v30  ;;  %v22604_v32 = vld [vmem:[%s26397_s11 + $0x138] sm:$0xff]   ;;  %v7256_v30 = vpack.c.bf16 %v7234_v62, %v7233_v50  ;;  %v14639_v50 = vpack.c.bf16 %v14609_v55, %v14608_v23  ;;  %v7534_v62 = vld [vmem:[#allocation2 + $0x24a] sm:$0xff] }
 0x662   : > { %20938 = vmatprep.subr.bf16.mxu1 %v22601_v40  ;;  %v22615_v55 = vld [vmem:[%s26397_s11 + $0x170] sm:$0xff]  }
 0x663   : > { %20077 = vmatmul.mubr.msk.bf16.gmra.mrb[40].mxu0 %vm1491_vm2, %v7254_v59  ;;  %v7531_v59 = vld [vmem:[#allocation2 + $0x212] sm:$0xff] }
 0x664   : > { %20080 = vmatprep.mubr.msk.bf16.mxu0 %vm1491_vm2, %v7255_v58  ;;  %v7532_v58 = vld [vmem:[#allocation2 + $0x22a] sm:$0xff] }
 0x665   : > { %20939 = vmatpush3.bf16.msra.mxu1 %v22601_v40  ;;  %v14605_v40 = vld [vmem:[#allocation4 + $0x271] sm:$0xff] }
 0x666   : > { %20940 = vmatprep.subr.bf16.mxu1 %v22603_v37  ;;  %v14637_v19 = vpack.c.bf16 %v14605_v40, %v14604_v26  ;;  %v7546_v26 = vld [vmem:[#allocation2 + $0x30a] sm:$0xff]  ;;  %v7547_v40 = vld [vmem:[#allocation2 + $0x312] sm:$0xff] }
 0x668   : > { %20909 = vmatmul.mubr.msk.bf16.gmra.mrb[212].mxu1 %vm1162_vm1, %v25532_v22 }
 0x669   : > { %20912 = vmatprep.mubr.msk.bf16.mxu1 %vm1162_vm1, %v25266_v39  ;;  %20941 = vmatpush3.bf16.msra.mxu1 %v22603_v37  ;;  %v22607_v39 = vld [vmem:[%s26397_s11 + $0x148] sm:$0xff]   ;;  %v7533_v37 = vld [vmem:[#allocation2 + $0x232] sm:$0xff] }
 0x66a   : > { %20942 = vmatprep.subr.bf16.mxu1 %v22604_v32 }
 0x66b   : > { %20081 = vmatmul.mubr.msk.bf16.gmra.mrb[44].mxu0 %vm1491_vm2, %v7256_v30  ;;  %v7536_v30 = vld [vmem:[#allocation2 + $0x26a] sm:$0xff] }
 0x66c   : > { %20090 = vmatprep.mubr.msk.bf16.mxu0 %vm1491_vm2, %v7554_v9  ;;  %v14612_v9 = vld [vmem:[#allocation4 + $0x2e9] sm:$0xff] }
 0x66d   : > { %20943 = vmatpush3.bf16.msra.mxu1 %v22604_v32  ;;  %v7535_v32 = vld [vmem:[#allocation2 + $0x252] sm:$0xff] }
 0x66e   : > { %20944 = vmatprep.subr.bf16.mxu1 %v22606_v12  ;;  %v7563_v34 = vpack.c.bf16 %v7535_v32, %v7534_v62  ;;  %v14933_v62 = vld [vmem:[#allocation4 + $0x1ef] sm:$0xff]  ;;  %v14930_v32 = vld [vmem:[#allocation4 + $0x1c7] sm:$0xff] }
 0x670   : > { %20913 = vmatmul.mubr.msk.bf16.gmra.mrb[216].mxu1 %vm1162_vm1, %v25546_v14 }
 0x671   : > { %20916 = vmatprep.mubr.msk.bf16.mxu1 %vm1162_vm1, %v25288_v52  ;;  %20945 = vmatpush3.bf16.msra.mxu1 %v22606_v12  ;;  %v22608_v52 = vld [vmem:[%s26391_s5 + $0x1f0] sm:$0xff]  }
 0x672   : > { %20946 = vmatprep.subr.bf16.mxu1 %v22607_v39  ;;  %v14613_v12 = vld [vmem:[#allocation4 + $0x2f1] sm:$0xff] }
 0x673   : > { %20091 = vmatmul.mubr.msk.bf16.vlgmr.msra.gmra.mrb[16].mxu0 %vm1491_vm2, %v7555_v5  ;;  %v14641_v60 = vpack.c.bf16 %v14613_v12, %v14612_v9  ;;  %v7541_v5 = vld [vmem:[#allocation2 + $0x2b2] sm:$0xff] }
 0x674   : > { %20094 = vmatprep.mubr.msk.bf16.mxu0 %vm1491_vm2, %v7556_v29  ;;  %20123 = vmatpush3.bf16.msra.mxu0 %v25482_v10  ;;  %v7557_v10 = vpack.c.bf16 %v7523_v7, %v7522_v43  ;;  %v14923_v29 = vld [vmem:[#allocation4 + $0x14f] sm:$0xff]  ;;  %v14924_v7 = vld [vmem:[#allocation4 + $0x167] sm:$0xff] }
 0x675   : > { %20124 = vmatprep.subr.bf16.mxu0 %v22605_v4  ;;  %20947 = vmatpush3.bf16.msra.mxu1 %v22607_v39  ;;  %v7539_v39 = vld [vmem:[#allocation2 + $0x292] sm:$0xff]  ;;  %v14965_v43 = vpack.c.bf16 %v14923_v29, %v14922_v6 }
 0x676   : > { %20980 = vmatprep.subr.bf16.mxu1 %v25561_v33  ;;  %v7835_v12 = vld [vmem:[#allocation2 + $0x18e] sm:$0xff] }
 0x677   : > { %v7837_v6 = vld [vmem:[#allocation2 + $0x1ae] sm:$0xff] }
 0x678   : > { %20917 = vmatmul.mubr.msk.bf16.gmra.mrb[220].mxu1 %vm1162_vm1, %v25569_v53  ;;  %20125 = vmatpush3.bf16.msra.mxu0 %v22605_v4  ;;  %v7566_v4 = vpack.c.bf16 %v7541_v5, %v7540_v17  ;;  %v14935_v17 = vld [vmem:[#allocation4 + $0x20f] sm:$0xff] }
 0x679   : > { %20920 = vmatprep.mubr.msk.bf16.mxu1 %vm1162_vm1, %v25302_v27  ;;  %20126 = vmatprep.subr.bf16.mxu0 %v22608_v52  ;;  %v7559_v27 = vpack.c.bf16 %v7527_v47, %v7526_v49  ;;  %v7545_v49 = vld [vmem:[#allocation2 + $0x2f2] sm:$0xff] }
 0x67a   : > { %v14937_v5 = vld [vmem:[#allocation4 + $0x22f] sm:$0xff] }
 0x67b   : > { %20095 = vmatmul.mubr.msk.bf16.gmra.mrb[20].mxu0 %vm1491_vm2, %v7557_v10  ;;  %v14966_v10 = vpack.c.bf16 %v14925_v16, %v14924_v7  ;;  %v14936_v16 = vld [vmem:[#allocation4 + $0x227] sm:$0xff] }
 0x67c   : > { %20098 = vmatprep.mubr.msk.bf16.mxu0 %vm1491_vm2, %v7558_v57  ;;  %20127 = vmatpush3.bf16.msra.mxu0 %v22608_v52  ;;  %v7542_v52 = vld [vmem:[#allocation2 + $0x2ca] sm:$0xff] }
 0x67d   : > { %20160 = vmatprep.subr.bf16.mxu0 %v25579_v48  ;;  %v7544_v57 = vld [vmem:[#allocation2 + $0x2ea] sm:$0xff]  ;;  %v7567_v47 = vpack.c.bf16 %v7543_v31, %v7542_v52  ;;  %v14972_v52 = vpack.c.bf16 %v14937_v5, %v14936_v16 }
 0x67e   : > { %v7568_v63 = vpack.c.bf16 %v7545_v49, %v7544_v57  ;;  %v7836_v7 = vld [vmem:[#allocation2 + $0x1a6] sm:$0xff]  ;;  %v14939_v57 = vld [vmem:[#allocation4 + $0x24f] sm:$0xff] }
 0x67f   : > { %v7838_v31 = vld [vmem:[#allocation2 + $0x1c6] sm:$0xff]  ;;  %v14941_v49 = vld [vmem:[#allocation4 + $0x26f] sm:$0xff] }
 0x680   : > { %20921 = vmatmul.mubr.msk.bf16.gmra.mrb[224].mxu1 %vm1162_vm1, %v25304_v13  ;;  %v7561_v13 = vpack.c.bf16 %v7531_v59, %v7530_v41  ;;  %v14928_v59 = vld [vmem:[#allocation4 + $0x1a7] sm:$0xff] }
 0x681   : > { %20924 = vmatprep.mubr.msk.bf16.mxu1 %vm1162_vm1, %v25312_v25  ;;  %v7562_v25 = vpack.c.bf16 %v7533_v37, %v7532_v58  ;;  %v7569_v37 = vpack.c.bf16 %v7547_v40, %v7546_v26  ;;  %v7843_v26 = vld [vmem:[#allocation2 + $0x20e] sm:$0xff]  ;;  %v7840_v40 = vld [vmem:[#allocation2 + $0x1e6] sm:$0xff] }
 0x682   : > { %v7852_v16 = vld [vmem:[#allocation2 + $0x2a6] sm:$0xff] }
 0x683   : > { %20099 = vmatmul.mubr.msk.bf16.gmra.mrb[24].mxu0 %vm1491_vm2, %v7559_v27  ;;  %v14927_v27 = vld [vmem:[#allocation4 + $0x18f] sm:$0xff] }
 0x684   : > { %20102 = vmatprep.mubr.msk.bf16.mxu0 %vm1491_vm2, %v7560_v24  ;;  %v14929_v24 = vld [vmem:[#allocation4 + $0x1af] sm:$0xff] }
 0x685   : > { %v14968_v58 = vpack.c.bf16 %v14929_v24, %v14928_v59 }
 0x688   : > { %20925 = vmatmul.mubr.msk.bf16.gmra.mrb[228].mxu1 %vm1162_vm1, %v14637_v19  ;;  %v14926_v19 = vld [vmem:[#allocation4 + $0x187] sm:$0xff] }
 0x689   : > { %20928 = vmatprep.mubr.msk.bf16.mxu1 %vm1162_vm1, %v25319_v20  ;;  %v7564_v20 = vpack.c.bf16 %v7537_v46, %v7536_v30  ;;  %v14967_v41 = vpack.c.bf16 %v14927_v27, %v14926_v19  ;;  %v14932_v46 = vld [vmem:[#allocation4 + $0x1e7] sm:$0xff] }
 0x68a   : > { %v14970_v9 = vpack.c.bf16 %v14933_v62, %v14932_v46  ;;  %v7841_v27 = vld [vmem:[#allocation2 + $0x1ee] sm:$0xff]  ;;  %v7844_v62 = vld [vmem:[#allocation2 + $0x226] sm:$0xff] }
 0x68b   : > { %20103 = vmatmul.mubr.msk.bf16.gmra.mrb[28].mxu0 %vm1491_vm2, %v7561_v13  ;;  %v7831_v13 = vld [vmem:[#allocation2 + $0x14e] sm:$0xff]  ;;  %v7873_v19 = vpack.c.bf16 %v7841_v27, %v7840_v40 }
 0x68c   : > { %20106 = vmatprep.mubr.msk.bf16.mxu0 %vm1491_vm2, %v7562_v25  ;;  %v7830_v25 = vld [vmem:[#allocation2 + $0x146] sm:$0xff] }
 0x68d   : > { %v7868_v23 = vpack.c.bf16 %v7831_v13, %v7830_v25  ;;  %v14944_v25 = vld [vmem:[#allocation4 + $0x2a7] sm:$0xff] }
 0x68e   : > { %v15267_v40 = vld [vmem:[#allocation4 + $0x1c8] sm:$0xff] }
 0x690   : > { %20929 = vmatmul.mubr.msk.bf16.gmra.mrb[232].mxu1 %vm1162_vm1, %v14639_v50  ;;  %v14931_v50 = vld [vmem:[#allocation4 + $0x1cf] sm:$0xff] }
 0x691   : > { %20932 = vmatprep.mubr.msk.bf16.mxu1 %vm1162_vm1, %v25326_v42  ;;  %v7565_v42 = vpack.c.bf16 %v7539_v39, %v7538_v11  ;;  %v14969_v30 = vpack.c.bf16 %v14931_v50, %v14930_v32  ;;  %v22614_v11 = vld [vmem:[%s26391_s5 + $0x200] sm:$0xff]   ;;  %v7870_v39 = vpack.c.bf16 %v7835_v12, %v7834_v45  ;;  %v7847_v50 = vld [vmem:[#allocation2 + $0x24e] sm:$0xff] }
 0x692   : > { %v7849_v12 = vld [vmem:[#allocation2 + $0x26e] sm:$0xff] }
 0x693   : > { %20107 = vmatmul.mubr.msk.bf16.gmra.mrb[32].mxu0 %vm1491_vm2, %v7563_v34  ;;  %v7833_v34 = vld [vmem:[#allocation2 + $0x16e] sm:$0xff] }
 0x694   : > { %20110 = vmatprep.mubr.msk.bf16.mxu0 %vm1491_vm2, %v7564_v20  ;;  %v22616_v20 = vld [vmem:[%s26397_s11 + $0x178] sm:$0xff]  }
 0x698   : > { %20933 = vmatmul.mubr.msk.bf16.gmra.mrb[236].mxu1 %vm1162_vm1, %v14641_v60  ;;  %v7869_v60 = vpack.c.bf16 %v7833_v34, %v7832_v51  ;;  %v14947_v34 = vld [vmem:[#allocation4 + $0x2cf] sm:$0xff] }
 0x699   : > { %20948 = vmatprep.mubr.msk.bf16.mxu1 %vm1162_vm1, %v14964_v28  ;;  %v25636_v28 = vld [vmem:[%s26397_s11 + $0x180] sm:$0xff]   ;;  %v7851_v51 = vld [vmem:[#allocation2 + $0x28e] sm:$0xff] }
 0x69b   : > { %20111 = vmatmul.mubr.msk.bf16.gmra.mrb[36].mxu0 %vm1491_vm2, %v7565_v42  ;;  %v14934_v42 = vld [vmem:[#allocation4 + $0x207] sm:$0xff] }
 0x69c   : > { %20114 = vmatprep.mubr.msk.bf16.mxu0 %vm1491_vm2, %v7566_v4  ;;  %v22617_v4 = vld [vmem:[%s26391_s5 + $0x208] sm:$0xff]   ;;  %v14971_v29 = vpack.c.bf16 %v14935_v17, %v14934_v42 }
 0x69d   : > { %v14951_v17 = vld [vmem:[#allocation4 + $0x30f] sm:$0xff] }
 0x6a0   : > { %20949 = vmatmul.mubr.msk.bf16.vlgmr.msra.gmra.mrb[208].mxu1 %vm1162_vm1, %v14965_v43  ;;  %v7839_v43 = vld [vmem:[#allocation2 + $0x1ce] sm:$0xff] }
 0x6a1   : > { %20952 = vmatprep.mubr.msk.bf16.mxu1 %vm1162_vm1, %v14966_v10  ;;  %20981 = vmatpush3.bf16.msra.mxu1 %v25561_v33  ;;  %v22613_v33 = vld [vmem:[%s26397_s11 + $0x168] sm:$0xff]   ;;  %v7872_v10 = vpack.c.bf16 %v7839_v43, %v7838_v31 }
 0x6a2   : > { %20982 = vmatprep.subr.bf16.mxu1 %v22610_v35  ;;  %v7858_v43 = vld [vmem:[#allocation2 + $0x306] sm:$0xff] }
 0x6a3   : > { %20115 = vmatmul.mubr.msk.bf16.gmra.mrb[40].mxu0 %vm1491_vm2, %v7567_v47  ;;  %v14938_v47 = vld [vmem:[#allocation4 + $0x247] sm:$0xff] }
 0x6a4   : > { %20118 = vmatprep.mubr.msk.bf16.mxu0 %vm1491_vm2, %v7568_v63  ;;  %v14973_v63 = vpack.c.bf16 %v14939_v57, %v14938_v47  ;;  %v22619_v31 = vld [vmem:[%s26397_s11 + $0x188] sm:$0xff]  }
 0x6a5   : > { %20983 = vmatpush3.bf16.msra.mxu1 %v22610_v35  ;;  %v25650_v35 = vld [vmem:[%s26391_s5 + $0x210] sm:$0xff]   ;;  %v7860_v47 = vld [vmem:[#allocation2 + $0x326] sm:$0xff] }
 0x6a6   : > { %20984 = vmatprep.subr.bf16.mxu1 %v22612_v61 }
 0x6a8   : > { %20953 = vmatmul.mubr.msk.bf16.gmra.mrb[212].mxu1 %vm1162_vm1, %v14967_v41  ;;  %v7842_v41 = vld [vmem:[#allocation2 + $0x206] sm:$0xff] }
 0x6a9   : > { %20956 = vmatprep.mubr.msk.bf16.mxu1 %vm1162_vm1, %v14968_v58  ;;  %20985 = vmatpush3.bf16.msra.mxu1 %v22612_v61  ;;  %v14940_v61 = vld [vmem:[#allocation4 + $0x267] sm:$0xff]  ;;  %v7874_v59 = vpack.c.bf16 %v7843_v26, %v7842_v41  ;;  %v14945_v58 = vld [vmem:[#allocation4 + $0x2af] sm:$0xff] }
 0x6aa   : > { %20986 = vmatprep.subr.bf16.mxu1 %v22613_v33  ;;  %v14974_v24 = vpack.c.bf16 %v14941_v49, %v14940_v61  ;;  %v22621_v49 = vld [vmem:[%s26397_s11 + $0x190] sm:$0xff]   ;;  %v8143_v61 = vld [vmem:[#allocation2 + $0x147] sm:$0xff] }
 0x6ab   : > { %20119 = vmatmul.mubr.msk.bf16.gmra.mrb[44].mxu0 %vm1491_vm2, %v7569_v37  ;;  %v14942_v37 = vld [vmem:[#allocation4 + $0x287] sm:$0xff]  ;;  %v15268_v26 = vld [vmem:[#allocation4 + $0x1d0] sm:$0xff] }
 0x6ac   : > { %20128 = vmatprep.mubr.msk.bf16.mxu0 %vm1491_vm2, %v7868_v23  ;;  %v7845_v23 = vld [vmem:[#allocation2 + $0x22e] sm:$0xff] }
 0x6ad   : > { %20987 = vmatpush3.bf16.msra.mxu1 %v22613_v33  ;;  %v14943_v33 = vld [vmem:[#allocation4 + $0x28f] sm:$0xff]  ;;  %v7875_v32 = vpack.c.bf16 %v7845_v23, %v7844_v62 }
 0x6ae   : > { %20988 = vmatprep.subr.bf16.mxu1 %v22615_v55  ;;  %v14975_v13 = vpack.c.bf16 %v14943_v33, %v14942_v37  ;;  %v8148_v41 = vld [vmem:[#allocation2 + $0x18f] sm:$0xff]  ;;  %v22623_v37 = vld [vmem:[%s26391_s5 + $0x218] sm:$0xff]  }
 0x6af   : > { %v15271_v23 = vld [vmem:[#allocation4 + $0x208] sm:$0xff] }
 0x6b0   : > { %20957 = vmatmul.mubr.msk.bf16.gmra.mrb[216].mxu1 %vm1162_vm1, %v14969_v30  ;;  %v7846_v30 = vld [vmem:[#allocation2 + $0x246] sm:$0xff]  ;;  %v8152_v62 = vld [vmem:[#allocation2 + $0x1cf] sm:$0xff] }
 0x6b1   : > { %20960 = vmatprep.mubr.msk.bf16.mxu1 %vm1162_vm1, %v14970_v9  ;;  %20989 = vmatpush3.bf16.msra.mxu1 %v22615_v55  ;;  %v14976_v55 = vpack.c.bf16 %v14945_v58, %v14944_v25  ;;  %v7876_v46 = vpack.c.bf16 %v7847_v50, %v7846_v30  ;;  %v8147_v58 = vld [vmem:[#allocation2 + $0x187] sm:$0xff]  ;;  %v15272_v25 = vld [vmem:[#allocation4 + $0x210] sm:$0xff] }
 0x6b2   : > { %20990 = vmatprep.subr.bf16.mxu1 %v22616_v20  ;;  %v8150_v50 = vld [vmem:[#allocation2 + $0x1af] sm:$0xff]  ;;  %v8151_v30 = vld [vmem:[#allocation2 + $0x1c7] sm:$0xff] }
 0x6b3   : > { %20129 = vmatmul.mubr.msk.bf16.vlgmr.msra.gmra.mrb[16].mxu0 %vm1491_vm2, %v7869_v60  ;;  %v7848_v60 = vld [vmem:[#allocation2 + $0x266] sm:$0xff] }
 0x6b4   : > { %20132 = vmatprep.mubr.msk.bf16.mxu0 %vm1491_vm2, %v7870_v39  ;;  %20161 = vmatpush3.bf16.msra.mxu0 %v25579_v48  ;;  %v7871_v48 = vpack.c.bf16 %v7837_v6, %v7836_v7  ;;  %v7877_v45 = vpack.c.bf16 %v7849_v12, %v7848_v60  ;;  %v14950_v39 = vld [vmem:[#allocation4 + $0x307] sm:$0xff] }
 0x6b5   : > { %20162 = vmatprep.subr.bf16.mxu0 %v22614_v11  ;;  %20991 = vmatpush3.bf16.msra.mxu1 %v22616_v20  ;;  %v14946_v20 = vld [vmem:[#allocation4 + $0x2c7] sm:$0xff]  ;;  %v14979_v42 = vpack.c.bf16 %v14951_v17, %v14950_v39  ;;  %v8158_v17 = vld [vmem:[#allocation2 + $0x22f] sm:$0xff] }
 0x6b6   : > { %21024 = vmatprep.subr.bf16.mxu1 %v25636_v28  ;;  %v14977_v9 = vpack.c.bf16 %v14947_v34, %v14946_v20  ;;  %v7859_v7 = vld [vmem:[#allocation2 + $0x30e] sm:$0xff]  ;;  %v8185_v34 = vpack.c.bf16 %v8152_v62, %v8151_v30 }
 0x6b7   : > { %v7882_v57 = vpack.c.bf16 %v7859_v7, %v7858_v43  ;;  %v8154_v20 = vld [vmem:[#allocation2 + $0x1ef] sm:$0xff]  ;;  %v8161_v43 = vld [vmem:[#allocation2 + $0x267] sm:$0xff] }
 0x6b8   : > { %20961 = vmatmul.mubr.msk.bf16.gmra.mrb[220].mxu1 %vm1162_vm1, %v14971_v29  ;;  %20163 = vmatpush3.bf16.msra.mxu0 %v22614_v11  ;;  %v7850_v11 = vld [vmem:[#allocation2 + $0x286] sm:$0xff]  ;;  %v7855_v29 = vld [vmem:[#allocation2 + $0x2ce] sm:$0xff] }
 0x6b9   : > { %20964 = vmatprep.mubr.msk.bf16.mxu1 %vm1162_vm1, %v14972_v52  ;;  %20164 = vmatprep.subr.bf16.mxu0 %v22617_v4  ;;  %v7878_v5 = vpack.c.bf16 %v7851_v51, %v7850_v11  ;;  %v8155_v51 = vld [vmem:[#allocation2 + $0x207] sm:$0xff] }
 0x6ba   : > { %v15279_v11 = vld [vmem:[#allocation4 + $0x288] sm:$0xff] }
 0x6bb   : > { %20133 = vmatmul.mubr.msk.bf16.gmra.mrb[20].mxu0 %vm1491_vm2, %v7871_v48  ;;  %v7857_v48 = vld [vmem:[#allocation2 + $0x2ee] sm:$0xff] }
 0x6bc   : > { %20136 = vmatprep.mubr.msk.bf16.mxu0 %vm1491_vm2, %v7872_v10  ;;  %20165 = vmatpush3.bf16.msra.mxu0 %v22617_v4  ;;  %v7853_v4 = vld [vmem:[#allocation2 + $0x2ae] sm:$0xff]  ;;  %v7856_v10 = vld [vmem:[#allocation2 + $0x2e6] sm:$0xff] }
 0x6bd   : > { %20198 = vmatprep.subr.bf16.mxu0 %v25650_v35  ;;  %v7879_v6 = vpack.c.bf16 %v7853_v4, %v7852_v16  ;;  %v15283_v16 = vld [vmem:[#allocation4 + $0x2c8] sm:$0xff] }
 0x6be   : > { %v8456_v62 = vld [vmem:[#allocation2 + $0x148] sm:$0xff] }
 0x6bf   : > { %v15604_v30 = vld [vmem:[#allocation4 + $0x1c9] sm:$0xff] }
 0x6c0   : > { %20965 = vmatmul.mubr.msk.bf16.gmra.mrb[224].mxu1 %vm1162_vm1, %v14973_v63  ;;  %v7861_v63 = vld [vmem:[#allocation2 + $0x32e] sm:$0xff] }
 0x6c1   : > { %20968 = vmatprep.mubr.msk.bf16.mxu1 %vm1162_vm1, %v14974_v24  ;;  %v22624_v24 = vld [vmem:[%s26397_s11 + $0x1a0] sm:$0xff]  }
 0x6c3   : > { %20137 = vmatmul.mubr.msk.bf16.gmra.mrb[24].mxu0 %vm1491_vm2, %v7873_v19  ;;  %v15306_v19 = vpack.c.bf16 %v15268_v26, %v15267_v40  ;;  %v22627_v26 = vld [vmem:[%s26399_s13] sm:$0xff]  }
 0x6c4   : > { %20140 = vmatprep.mubr.msk.bf16.mxu0 %vm1491_vm2, %v7874_v59  ;;  %v8145_v59 = vld [vmem:[#allocation2 + $0x167] sm:$0xff] }
 0x6c5   : > { %v8171_v40 = vld [vmem:[#allocation2 + $0x307] sm:$0xff] }
 0x6c8   : > { %20969 = vmatmul.mubr.msk.bf16.gmra.mrb[228].mxu1 %vm1162_vm1, %v14975_v13  ;;  %v8183_v13 = vpack.c.bf16 %v8148_v41, %v8147_v58  ;;  %v8169_v41 = vld [vmem:[#allocation2 + $0x2e7] sm:$0xff] }
 0x6c9   : > { %20972 = vmatprep.mubr.msk.bf16.mxu1 %vm1162_vm1, %v14976_v55  ;;  %v15308_v55 = vpack.c.bf16 %v15272_v25, %v15271_v23  ;;  %v22628_v58 = vld [vmem:[%s26399_s13 + $0x8] sm:$0xff]  }
 0x6ca   : > { %v8173_v25 = vld [vmem:[#allocation2 + $0x327] sm:$0xff]  ;;  %v8174_v23 = vld [vmem:[#allocation2 + $0x32f] sm:$0xff] }
 0x6cb   : > { %20141 = vmatmul.mubr.msk.bf16.gmra.mrb[28].mxu0 %vm1491_vm2, %v7875_v32  ;;  %v8149_v32 = vld [vmem:[#allocation2 + $0x1a7] sm:$0xff] }
 0x6cc   : > { %20144 = vmatprep.mubr.msk.bf16.mxu0 %vm1491_vm2, %v7876_v46  ;;  %v25720_v46 = vld [vmem:[%s26391_s5 + $0x228] sm:$0xff]  }
 0x6d0   : > { %20973 = vmatmul.mubr.msk.bf16.gmra.mrb[232].mxu1 %vm1162_vm1, %v14977_v9  ;;  %v8156_v9 = vld [vmem:[#allocation2 + $0x20f] sm:$0xff] }
 0x6d1   : > { %20976 = vmatprep.mubr.msk.bf16.mxu1 %vm1162_vm1, %v25411_v21  ;;  %v7854_v21 = vld [vmem:[#allocation2 + $0x2c6] sm:$0xff]  ;;  %v8187_v60 = vpack.c.bf16 %v8156_v9, %v8155_v51  ;;  %v8459_v9 = vld [vmem:[#allocation2 + $0x170] sm:$0xff] }
 0x6d2   : > { %v7880_v52 = vpack.c.bf16 %v7855_v29, %v7854_v21  ;;  %v15284_v29 = vld [vmem:[#allocation4 + $0x2d0] sm:$0xff] }
 0x6d3   : > { %20145 = vmatmul.mubr.msk.bf16.gmra.mrb[32].mxu0 %vm1491_vm2, %v7877_v45  ;;  %v15280_v45 = vld [vmem:[#allocation4 + $0x290] sm:$0xff] }
 0x6d4   : > { %20148 = vmatprep.mubr.msk.bf16.mxu0 %vm1491_vm2, %v7878_v5  ;;  %v15312_v39 = vpack.c.bf16 %v15280_v45, %v15279_v11  ;;  %v8160_v5 = vld [vmem:[#allocation2 + $0x24f] sm:$0xff] }
 0x6d5   : > { %v8162_v21 = vld [vmem:[#allocation2 + $0x26f] sm:$0xff] }
 0x6d6   : > { %v8190_v7 = vpack.c.bf16 %v8162_v21, %v8161_v43  ;;  %v22633_v45 = vld [vmem:[%s26399_s13 + $0x28] sm:$0xff]   ;;  %v22636_v11 = vld [vmem:[%s26391_s5 + $0x230] sm:$0xff]   ;;  %v22635_v43 = vld [vmem:[%s26399_s13 + $0x38] sm:$0xff]  }
 0x6d8   : > { %20977 = vmatmul.mubr.msk.bf16.gmra.mrb[236].mxu1 %vm1162_vm1, %v14979_v42  ;;  %v8157_v42 = vld [vmem:[#allocation2 + $0x227] sm:$0xff] }
 0x6d9   : > { %20992 = vmatprep.mubr.msk.bf16.mxu1 %vm1162_vm1, %v25418_v8  ;;  %v7881_v8 = vpack.c.bf16 %v7857_v48, %v7856_v10  ;;  %v15287_v48 = vld [vmem:[#allocation4 + $0x308] sm:$0xff] }
 0x6db   : > { %20149 = vmatmul.mubr.msk.bf16.gmra.mrb[36].mxu0 %vm1491_vm2, %v7879_v6  ;;  %v15314_v6 = vpack.c.bf16 %v15284_v29, %v15283_v16  ;;  %v22641_v29 = vld [vmem:[%s26391_s5 + $0x238] sm:$0xff]  }
 0x6dc   : > { %20152 = vmatprep.mubr.msk.bf16.mxu0 %vm1491_vm2, %v7880_v52  ;;  %v8164_v52 = vld [vmem:[#allocation2 + $0x28f] sm:$0xff] }
 0x6e0   : > { %20993 = vmatmul.mubr.msk.bf16.vlgmr.msra.gmra.mrb[208].mxu1 %vm1162_vm1, %v25423_v56  ;;  %v22622_v56 = vld [vmem:[%s26397_s11 + $0x198] sm:$0xff]  }
 0x6e1   : > { %20996 = vmatprep.mubr.msk.bf16.mxu1 %vm1162_vm1, %v25435_v54  ;;  %21025 = vmatpush3.bf16.msra.mxu1 %v25636_v28  ;;  %v7883_v54 = vpack.c.bf16 %v7861_v63, %v7860_v47  ;;  %v8144_v28 = vld [vmem:[#allocation2 + $0x14f] sm:$0xff] }
 0x6e2   : > { %21026 = vmatprep.subr.bf16.mxu1 %v22619_v31  ;;  %v8181_v27 = vpack.c.bf16 %v8144_v28, %v8143_v61  ;;  %v8166_v47 = vld [vmem:[#allocation2 + $0x2af] sm:$0xff]  ;;  %v8167_v28 = vld [vmem:[#allocation2 + $0x2c7] sm:$0xff] }
 0x6e3   : > { %20153 = vmatmul.mubr.msk.bf16.gmra.mrb[40].mxu0 %vm1491_vm2, %v7881_v8  ;;  %v15594_v8 = vld [vmem:[#allocation4 + $0x129] sm:$0xff] }
 0x6e4   : > { %20156 = vmatprep.mubr.msk.bf16.mxu0 %vm1491_vm2, %v7882_v57 }
 0x6e5   : > { %21027 = vmatpush3.bf16.msra.mxu1 %v22619_v31  ;;  %v15288_v31 = vld [vmem:[#allocation4 + $0x310] sm:$0xff] }
 0x6e6   : > { %21028 = vmatprep.subr.bf16.mxu1 %v22621_v49  ;;  %v15316_v57 = vpack.c.bf16 %v15288_v31, %v15287_v48  ;;  %v15612_v48 = vld [vmem:[#allocation4 + $0x249] sm:$0xff]  ;;  %v15613_v31 = vld [vmem:[#allocation4 + $0x251] sm:$0xff] }
 0x6e8   : > { %20997 = vmatmul.mubr.msk.bf16.gmra.mrb[212].mxu1 %vm1162_vm1, %v25440_v38  ;;  %v8146_v38 = vld [vmem:[#allocation2 + $0x16f] sm:$0xff] }
 0x6e9   : > { %21000 = vmatprep.mubr.msk.bf16.mxu1 %vm1162_vm1, %v25451_v3  ;;  %21029 = vmatpush3.bf16.msra.mxu1 %v22621_v49  ;;  %v22625_v3 = vld [vmem:[%s26397_s11 + $0x1a8] sm:$0xff]   ;;  %v8182_v33 = vpack.c.bf16 %v8146_v38, %v8145_v59  ;;  %v15595_v49 = vld [vmem:[#allocation4 + $0x131] sm:$0xff] }
 0x6ea   : > { %21030 = vmatprep.subr.bf16.mxu1 %v22622_v56  ;;  %v15638_v63 = vpack.c.bf16 %v15595_v49, %v15594_v8  ;;  %v22637_v8 = vld [vmem:[%s26399_s13 + $0x40] sm:$0xff]   ;;  %v15647_v49 = vpack.c.bf16 %v15613_v31, %v15612_v48  ;;  %v8485_v48 = vld [vmem:[#allocation2 + $0x310] sm:$0xff] }
 0x6eb   : > { %20157 = vmatmul.mubr.msk.bf16.gmra.mrb[44].mxu0 %vm1491_vm2, %v7883_v54  ;;  %v8165_v54 = vld [vmem:[#allocation2 + $0x2a7] sm:$0xff]  ;;  %v8483_v31 = vld [vmem:[#allocation2 + $0x2f0] sm:$0xff] }
 0x6ec   : > { %20166 = vmatprep.mubr.msk.bf16.mxu0 %vm1491_vm2, %v8181_v27  ;;  %v15596_v27 = vld [vmem:[#allocation4 + $0x149] sm:$0xff] }
 0x6ed   : > { %21031 = vmatpush3.bf16.msra.mxu1 %v22622_v56  ;;  %v8168_v56 = vld [vmem:[#allocation2 + $0x2cf] sm:$0xff] }
 0x6ee   : > { %21032 = vmatprep.subr.bf16.mxu1 %v22624_v24  ;;  %v8193_v61 = vpack.c.bf16 %v8168_v56, %v8167_v28  ;;  %v8469_v56 = vld [vmem:[#allocation2 + $0x210] sm:$0xff]  ;;  %v8468_v28 = vld [vmem:[#allocation2 + $0x208] sm:$0xff] }
 0x6f0   : > { %21001 = vmatmul.mubr.msk.bf16.gmra.mrb[216].mxu1 %vm1162_vm1, %v15306_v19  ;;  %v8172_v19 = vld [vmem:[#allocation2 + $0x30f] sm:$0xff] }
 0x6f1   : > { %21004 = vmatprep.mubr.msk.bf16.mxu1 %vm1162_vm1, %v25473_v0  ;;  %21033 = vmatpush3.bf16.msra.mxu1 %v22624_v24  ;;  %v22626_v0 = vld [vmem:[%s26391_s5 + $0x220] sm:$0xff]   ;;  %v15597_v24 = vld [vmem:[#allocation4 + $0x151] sm:$0xff]  ;;  %v8195_v59 = vpack.c.bf16 %v8172_v19, %v8171_v40  ;;  %v15618_v40 = vld [vmem:[#allocation4 + $0x2a9] sm:$0xff] }
 0x6f2   : > { %21034 = vmatprep.subr.bf16.mxu1 %v22625_v3  ;;  %v15639_v38 = vpack.c.bf16 %v15597_v24, %v15596_v27  ;;  %v8500_v27 = vpack.c.bf16 %v8469_v56, %v8468_v28  ;;  %v15616_v24 = vld [vmem:[#allocation4 + $0x289] sm:$0xff]  ;;  %v15619_v19 = vld [vmem:[#allocation4 + $0x2b1] sm:$0xff] }
 0x6f3   : > { %20167 = vmatmul.mubr.msk.bf16.vlgmr.msra.gmra.mrb[16].mxu0 %vm1491_vm2, %v8182_v33  ;;  %v22680_v56 = vld [vmem:[%s22852_s28 + $0x14] ss:$8 sps:$4 sm:$0xff]   ;;  %v8486_v28 = vld [vmem:[#allocation2 + $0x328] sm:$0xff] }
 0x6f4   : > { %20170 = vmatprep.mubr.msk.bf16.mxu0 %vm1491_vm2, %v8183_v13  ;;  %20199 = vmatpush3.bf16.msra.mxu0 %v25650_v35  ;;  %v8184_v35 = vpack.c.bf16 %v8150_v50, %v8149_v32  ;;  %v15601_v13 = vld [vmem:[#allocation4 + $0x191] sm:$0xff] }
 0x6f5   : > { %20200 = vmatprep.subr.bf16.mxu0 %v22623_v37  ;;  %21035 = vmatpush3.bf16.msra.mxu1 %v22625_v3  ;;  %v8170_v3 = vld [vmem:[#allocation2 + $0x2ef] sm:$0xff]  ;;  %v22630_v32 = vld [vmem:[%s26399_s13 + $0x18] sm:$0xff]  }
 0x6f6   : > { %16130 = vmatprep.subr.bf16.mxu1 %v22719_v1  ;;  %v8194_v33 = vpack.c.bf16 %v8170_v3, %v8169_v41  ;;  %v8457_v50 = vld [vmem:[#allocation2 + $0x150] sm:$0xff] }
 0x6f7   : > { %v22639_v3 = vld [vmem:[%s26399_s13 + $0x50] sm:$0xff]  }
 0x6f8   : > { %21005 = vmatmul.mubr.msk.bf16.gmra.mrb[220].mxu1 %vm1162_vm1, %v15308_v55  ;;  %20201 = vmatpush3.bf16.msra.mxu0 %v22623_v37  ;;  %v15600_v37 = vld [vmem:[#allocation4 + $0x189] sm:$0xff]  ;;  %v8196_v55 = vpack.c.bf16 %v8174_v23, %v8173_v25 }
 0x6f9   : > { %21008 = vmatprep.mubr.msk.bf16.mxu1 %vm1162_vm1, %v25487_v2  ;;  %20202 = vmatprep.subr.bf16.mxu0 %v22626_v0  ;;  %v8153_v2 = vld [vmem:[#allocation2 + $0x1e7] sm:$0xff] }
 0x6fa   : > { %v8186_v12 = vpack.c.bf16 %v8154_v20, %v8153_v2  ;;  %v8461_v2 = vld [vmem:[#allocation2 + $0x190] sm:$0xff]  ;;  %v8472_v23 = vld [vmem:[#allocation2 + $0x248] sm:$0xff] }
 0x6fb   : > { %20171 = vmatmul.mubr.msk.bf16.gmra.mrb[20].mxu0 %vm1491_vm2, %v8184_v35  ;;  %v8494_v35 = vpack.c.bf16 %v8457_v50, %v8456_v62  ;;  %v15621_v50 = vld [vmem:[#allocation4 + $0x2d1] sm:$0xff]  ;;  %v17003_v62 = vld [vmem:[%s26401_s15 + $0x8] sm:$0xff] }
 0x6fc   : > { %20174 = vmatprep.mubr.msk.bf16.mxu0 %vm1491_vm2, %v8185_v34  ;;  %20203 = vmatpush3.bf16.msra.mxu0 %v22626_v0  ;;  %v15641_v0 = vpack.c.bf16 %v15601_v13, %v15600_v37  ;;  %v15605_v34 = vld [vmem:[#allocation4 + $0x1d1] sm:$0xff]  ;;  %v8470_v37 = vld [vmem:[#allocation2 + $0x228] sm:$0xff] }
 0x6fd   : > { %20236 = vmatprep.subr.bf16.mxu0 %v25720_v46  ;;  %v15643_v20 = vpack.c.bf16 %v15605_v34, %v15604_v30  ;;  %v17004_v13 = vld [vmem:[%s26401_s15 + $0x10] sm:$0xff]  ;;  %v17005_v30 = vld [vmem:[%s26401_s15 + $0x18] sm:$0xff] }
 0x6fe   : > { %17046 = vperm.xlu1 %22383, %v17004_v13   ;;  %v8475_v34 = vld [vmem:[#allocation2 + $0x270] sm:$0xff]  ;;  %v17022_v13 = vld [vmem:[%s26401_s15 + $0xa0] sm:$0xff] }
 0x700   : > { %21009 = vmatmul.mubr.msk.bf16.gmra.mrb[224].mxu1 %vm1162_vm1, %v25489_v18  ;;  %v8188_v18 = vpack.c.bf16 %v8158_v17, %v8157_v42  ;;  %v15608_v17 = vld [vmem:[#allocation4 + $0x209] sm:$0xff]  ;;  %v15611_v42 = vld [vmem:[#allocation4 + $0x231] sm:$0xff] }
 0x701   : > { %21012 = vmatprep.mubr.msk.bf16.mxu1 %vm1162_vm1, %v25497_v15  ;;  %v8159_v15 = vld [vmem:[#allocation2 + $0x247] sm:$0xff] }
 0x702   : > { %v8189_v4 = vpack.c.bf16 %v8160_v5, %v8159_v15  ;;  %v15609_v5 = vld [vmem:[#allocation4 + $0x211] sm:$0xff]  ;;  %17051 = vperm.xlu1 %22383, %v17005_v30   ;;  %v8775_v30 = vld [vmem:[#allocation2 + $0x1a9] sm:$0xff] }
 0x703   : > { %20175 = vmatmul.mubr.msk.bf16.gmra.mrb[24].mxu0 %vm1491_vm2, %v8186_v12  ;;  %v8458_v12 = vld [vmem:[#allocation2 + $0x168] sm:$0xff]  ;;  %v15645_v15 = vpack.c.bf16 %v15609_v5, %v15608_v17  ;;  %v17009_v5 = vld [vmem:[%s26401_s15 + $0x38] sm:$0xff] }
 0x704   : > { %20178 = vmatprep.mubr.msk.bf16.mxu0 %vm1491_vm2, %v8187_v60  ;;  %v8495_v51 = vpack.c.bf16 %v8459_v9, %v8458_v12  ;;  %v8460_v60 = vld [vmem:[#allocation2 + $0x188] sm:$0xff]  ;;  %v17006_v12 = vld [vmem:[%s26401_s15 + $0x20] sm:$0xff] }
 0x705   : > { %v8474_v9 = vld [vmem:[#allocation2 + $0x268] sm:$0xff] }
 0x708   : > { %21013 = vmatmul.mubr.msk.bf16.gmra.mrb[228].mxu1 %vm1162_vm1, %v15312_v39  ;;  %v8496_v39 = vpack.c.bf16 %v8461_v2, %v8460_v60  ;;  %v17007_v2 = vld [vmem:[%s26401_s15 + $0x28] sm:$0xff] }
 0x709   : > { %21016 = vmatprep.mubr.msk.bf16.mxu1 %vm1162_vm1, %v25504_v44  ;;  %v8163_v44 = vld [vmem:[#allocation2 + $0x287] sm:$0xff]  ;;  %17061 = vperm.xlu1 %22383, %v17007_v2  }
 0x70a   : > { %v8191_v10 = vpack.c.bf16 %v8164_v52, %v8163_v44  ;;  %v8464_v52 = vld [vmem:[#allocation2 + $0x1c8] sm:$0xff] }
 0x70b   : > { %20179 = vmatmul.mubr.msk.bf16.gmra.mrb[28].mxu0 %vm1491_vm2, %v8188_v18  ;;  %v22634_v18 = vld [vmem:[%s26399_s13 + $0x30] sm:$0xff]   ;;  %v8476_v60 = vld [vmem:[#allocation2 + $0x288] sm:$0xff] }
 0x70c   : > { %20182 = vmatprep.mubr.msk.bf16.mxu0 %vm1491_vm2, %v8189_v4  ;;  %v8463_v4 = vld [vmem:[#allocation2 + $0x1b0] sm:$0xff]  ;;  %v22686_v2 = vld [vmem:[%s22852_s28 + $0x44] ss:$8 sps:$4 sm:$0xff]  }
 0x70d   : > { %17071 = vperm.xlu1 %22383, %v17009_v5   ;;  %v17026_v5 = vld [vmem:[%s26401_s15 + $0xc0] sm:$0xff] }
 0x710   : > { %21017 = vmatmul.mubr.msk.bf16.gmra.mrb[232].mxu1 %vm1162_vm1, %v15314_v6  ;;  %v8465_v6 = vld [vmem:[#allocation2 + $0x1d0] sm:$0xff] }
 0x711   : > { %21020 = vmatprep.mubr.msk.bf16.mxu1 %vm1162_vm1, %v25511_v36  ;;  %v8192_v36 = vpack.c.bf16 %v8166_v47, %v8165_v54  ;;  %v8498_v44 = vpack.c.bf16 %v8465_v6, %v8464_v52  ;;  %v8467_v47 = vld [vmem:[#allocation2 + $0x1f0] sm:$0xff]  ;;  %v8466_v54 = vld [vmem:[#allocation2 + $0x1e8] sm:$0xff]  ;;  %v17013_v52 = vld [vmem:[%s26401_s15 + $0x58] sm:$0xff] }
 0x712   : > { %v8480_v6 = vld [vmem:[#allocation2 + $0x2c8] sm:$0xff] }
 0x713   : > { %20183 = vmatmul.mubr.msk.bf16.gmra.mrb[32].mxu0 %vm1491_vm2, %v8190_v7  ;;  %v25802_v7 = vld [vmem:[%s26391_s5 + $0x240] sm:$0xff]  }
 0x714   : > { %20186 = vmatprep.mubr.msk.bf16.mxu0 %vm1491_vm2, %v8191_v10  ;;  %v15614_v10 = vld [vmem:[#allocation4 + $0x269] sm:$0xff] }
 0x718   : > { %21021 = vmatmul.mubr.msk.bf16.gmra.mrb[236].mxu1 %vm1162_vm1, %v15316_v57  ;;  %v15615_v57 = vld [vmem:[#allocation4 + $0x271] sm:$0xff] }
 0x719   : > { %21036 = vmatprep.mubr.msk.bf16.mxu1 %vm1162_vm1, %v15638_v63  ;;  %v15648_v63 = vpack.c.bf16 %v15615_v57, %v15614_v10  ;;  %v17014_v10 = vld [vmem:[%s26401_s15 + $0x60] sm:$0xff]  ;;  %v17015_v57 = vld [vmem:[%s26401_s15 + $0x68] sm:$0xff] }
 0x71b   : > { %20187 = vmatmul.mubr.msk.bf16.gmra.mrb[36].mxu0 %vm1491_vm2, %v8192_v36  ;;  %v8499_v36 = vpack.c.bf16 %v8467_v47, %v8466_v54  ;;  %v17017_v54 = vld [vmem:[%s26401_s15 + $0x78] sm:$0xff] }
 0x71c   : > { %20190 = vmatprep.mubr.msk.bf16.mxu0 %vm1491_vm2, %v8193_v61  ;;  %v22638_v61 = vld [vmem:[%s26399_s13 + $0x48] sm:$0xff]  }
 0x720   : > { %21037 = vmatmul.mubr.msk.bf16.vlgmr.msra.gmra.mrb[208].mxu1 %vm1162_vm1, %v15639_v38  ;;  %v17002_v38 = vld [vmem:[%s26401_s15] sm:$0xff] }
 0x721   : > { %21040 = vmatprep.mubr.msk.bf16.mxu1 %vm1162_vm1, %v25532_v22  ;;  %16131 = vmatpush1.bf16.msra.mxu1 %v22627_v26  ;;  %v22629_v22 = vld [vmem:[%s26399_s13 + $0x10] sm:$0xff]  }
 0x722   : > { %16132 = vmatprep.subr.bf16.mxu1 %v22719_v1  ;;  %v15617_v26 = vld [vmem:[#allocation4 + $0x291] sm:$0xff]  ;;  %17036 = vperm.xlu0 %22382, %v17002_v38  }
 0x723   : > { %20191 = vmatmul.mubr.msk.bf16.gmra.mrb[40].mxu0 %vm1491_vm2, %v8194_v33  ;;  %v15649_v41 = vpack.c.bf16 %v15617_v26, %v15616_v24  ;;  %v15650_v33 = vpack.c.bf16 %v15619_v19, %v15618_v40  ;;  %v8769_v26 = vld [vmem:[#allocation2 + $0x149] sm:$0xff]  ;;  %v8770_v40 = vld [vmem:[#allocation2 + $0x151] sm:$0xff] }
 0x724   : > { %20194 = vmatprep.mubr.msk.bf16.mxu0 %vm1491_vm2, %v8195_v59  ;;  %v8471_v59 = vld [vmem:[#allocation2 + $0x230] sm:$0xff]  ;;  %v17019_v19 = vld [vmem:[%s26401_s15 + $0x88] sm:$0xff] }
 0x725   : > { %16133 = vmatpush1.bf16.msra.mxu1 %v22628_v58  ;;  %v8473_v58 = vld [vmem:[#allocation2 + $0x250] sm:$0xff]  ;;  %v8501_v25 = vpack.c.bf16 %v8471_v59, %v8470_v37  ;;  %v17021_v59 = vld [vmem:[%s26401_s15 + $0x98] sm:$0xff] }
 0x726   : > { %16134 = vmatprep.subr.bf16.mxu1 %v22719_v1  ;;  %17041 = vperm.xlu0 %22382, %v17003_v62   ;;  %v22681_v38 = vld [vmem:[%s22852_s28 + $0x10] ss:$8 sps:$4 sm:$0xff]   ;;  %v22643_v62 = vld [vmem:[%s26391_s5 + $0x248] sm:$0xff]  }
 0x727   : > { %v8772_v37 = vld [vmem:[#allocation2 + $0x171] sm:$0xff] }
 0x728   : > { %21041 = vmatmul.mubr.msk.bf16.gmra.mrb[212].mxu1 %vm1162_vm1, %v15641_v0  ;;  %v8502_v0 = vpack.c.bf16 %v8473_v58, %v8472_v23  ;;  %v8771_v58 = vld [vmem:[#allocation2 + $0x169] sm:$0xff]  ;;  %v8774_v23 = vld [vmem:[#allocation2 + $0x191] sm:$0xff] }
 0x729   : > { %21044 = vmatprep.mubr.msk.bf16.mxu1 %vm1162_vm1, %v25546_v14  ;;  %16135 = vmatpush1.bf16.msra.mxu1 %v22629_v22  ;;  %v22632_v14 = vld [vmem:[%s26399_s13 + $0x20] sm:$0xff]   ;;  %v22640_v22 = vld [vmem:[%s26399_s13 + $0x58] sm:$0xff]  }
 0x72a   : > { %16136 = vmatprep.subr.bf16.mxu1 %v22719_v1  ;;  %17056 = vperm.xlu0 %22382, %v17006_v12  }
 0x72b   : > { %20195 = vmatmul.mubr.msk.bf16.gmra.mrb[44].mxu0 %vm1491_vm2, %v8196_v55  ;;  %v15620_v55 = vld [vmem:[#allocation4 + $0x2c9] sm:$0xff] }
 0x72c   : > { %20204 = vmatprep.mubr.msk.bf16.mxu0 %vm1491_vm2, %v8494_v35  ;;  %v15623_v35 = vld [vmem:[#allocation4 + $0x2f1] sm:$0xff] }
 0x72d   : > { %16137 = vmatpush1.bf16.msra.mxu1 %v22630_v32  ;;  %v15622_v32 = vld [vmem:[#allocation4 + $0x2e9] sm:$0xff] }
 0x72e   : > { %16138 = vmatprep.subr.bf16.mxu1 %v22719_v1 }
 0x730   : > { %21045 = vmatmul.mubr.msk.bf16.gmra.mrb[216].mxu1 %vm1162_vm1, %v15643_v20  ;;  %v8477_v20 = vld [vmem:[#allocation2 + $0x290] sm:$0xff] }
 0x731   : > { %21048 = vmatprep.mubr.msk.bf16.mxu1 %vm1162_vm1, %v25569_v53  ;;  %16139 = vmatpush1.bf16.msra.mxu1 %v22632_v14  ;;  %v15610_v53 = vld [vmem:[#allocation4 + $0x229] sm:$0xff]  ;;  %v15652_v14 = vpack.c.bf16 %v15623_v35, %v15622_v32 }
 0x732   : > { %16140 = vmatprep.subr.bf16.mxu1 %v22719_v1  ;;  %v15646_v16 = vpack.c.bf16 %v15611_v42, %v15610_v53  ;;  %v17008_v53 = vld [vmem:[%s26401_s15 + $0x30] sm:$0xff] }
 0x733   : > { %20205 = vmatmul.mubr.msk.bf16.vlgmr.msra.gmra.mrb[16].mxu0 %vm1491_vm2, %v8495_v51  ;;  %v8503_v51 = vpack.c.bf16 %v8475_v34, %v8474_v9  ;;  %17066 = vperm.xlu0 %22382, %v17008_v53   ;;  %v8479_v42 = vld [vmem:[#allocation2 + $0x2b0] sm:$0xff]  ;;  %v22687_v53 = vld [vmem:[%s22852_s28 + $0x40] ss:$8 sps:$4 sm:$0xff]  }
 0x734   : > { %20208 = vmatprep.mubr.msk.bf16.mxu0 %vm1491_vm2, %v8496_v39  ;;  %20237 = vmatpush3.bf16.msra.mxu0 %v25720_v46  ;;  %v8462_v46 = vld [vmem:[#allocation2 + $0x1a8] sm:$0xff]  ;;  %v8504_v39 = vpack.c.bf16 %v8477_v20, %v8476_v60  ;;  %v22644_v35 = vld [vmem:[%s26391_s5 + $0x250] sm:$0xff]  }
 0x735   : > { %16141 = vmatpush1.bf16.msra.mxu1 %v22633_v45  ;;  %20238 = vmatprep.subr.bf16.mxu0 %v22636_v11  ;;  %v8497_v21 = vpack.c.bf16 %v8463_v4, %v8462_v46  ;;  %v15624_v45 = vld [vmem:[#allocation4 + $0x309] sm:$0xff] }
 0x736   : > { %16142 = vmatprep.subr.bf16.mxu1 %v22719_v1  ;;  %v17011_v4 = vld [vmem:[%s26401_s15 + $0x48] sm:$0xff]  ;;  %v22685_v20 = vld [vmem:[%s22852_s28 + $0x30] ss:$8 sps:$4 sm:$0xff]  }
 0x737   : > { %v22678_v46 = vld [vmem:[%s22852_s28 + $0x4] ss:$8 sps:$4 sm:$0xff]   ;;  %17081 = vperm.xlu1 %22383, %v17011_v4   ;;  %v17029_v4 = vld [vmem:[%s26401_s15 + $0xd8] sm:$0xff] }
 0x738   : > { %21049 = vmatmul.mubr.msk.bf16.gmra.mrb[220].mxu1 %vm1162_vm1, %v15645_v15  ;;  %20239 = vmatpush3.bf16.msra.mxu0 %v22636_v11  ;;  %v15625_v11 = vld [vmem:[#allocation4 + $0x311] sm:$0xff]  ;;  %v8478_v15 = vld [vmem:[#allocation2 + $0x2a8] sm:$0xff] }
 0x739   : > { %21052 = vmatprep.mubr.msk.bf16.mxu1 %vm1162_vm1, %v15646_v16  ;;  %16143 = vmatpush1.bf16.msra.mxu1 %v22634_v18  ;;  %v15653_v17 = vpack.c.bf16 %v15625_v11, %v15624_v45  ;;  %v8481_v18 = vld [vmem:[#allocation2 + $0x2d0] sm:$0xff]  ;;  %v8505_v16 = vpack.c.bf16 %v8479_v42, %v8478_v15  ;;  %v17027_v11 = vld [vmem:[%s26401_s15 + $0xc8] sm:$0xff] }
 0x73a   : > { %16144 = vmatprep.subr.bf16.mxu1 %v22719_v1  ;;  %20240 = vmatprep.subr.bf16.mxu0 %v22641_v29  ;;  %v8777_v34 = vld [vmem:[#allocation2 + $0x1c9] sm:$0xff]  ;;  %v8780_v45 = vld [vmem:[#allocation2 + $0x1f1] sm:$0xff] }
 0x73b   : > { %20209 = vmatmul.mubr.msk.bf16.gmra.mrb[20].mxu0 %vm1491_vm2, %v8497_v21  ;;  %v8506_v21 = vpack.c.bf16 %v8481_v18, %v8480_v6  ;;  %17091 = vperm.xlu1 %22383, %v17013_v52   ;;  %v8779_v60 = vld [vmem:[#allocation2 + $0x1e9] sm:$0xff]  ;;  %v22688_v18 = vld [vmem:[%s22852_s28 + $0x54] ss:$8 sps:$4 sm:$0xff]  }
 0x73c   : > { %20212 = vmatprep.mubr.msk.bf16.mxu0 %vm1491_vm2, %v8498_v44  ;;  %20241 = vmatpush3.bf16.msra.mxu0 %v22641_v29  ;;  %v17010_v29 = vld [vmem:[%s26401_s15 + $0x40] sm:$0xff]  ;;  %v8484_v44 = vld [vmem:[#allocation2 + $0x308] sm:$0xff]  ;;  %v8812_v42 = vpack.c.bf16 %v8780_v45, %v8779_v60  ;;  %v8784_v6 = vld [vmem:[#allocation2 + $0x231] sm:$0xff] }
 0x73d   : > { %16145 = vmatpush1.bf16.msra.mxu1 %v22635_v43  ;;  %20274 = vmatprep.subr.bf16.mxu0 %v25802_v7  ;;  %v17012_v43 = vld [vmem:[%s26401_s15 + $0x50] sm:$0xff]  ;;  %v8508_v47 = vpack.c.bf16 %v8485_v48, %v8484_v44 }
 0x73e   : > { %16146 = vmatprep.subr.bf16.mxu1 %v22719_v1  ;;  %17076 = vperm.xlu0 %22382, %v17010_v29   ;;  %v17028_v29 = vld [vmem:[%s26401_s15 + $0xd0] sm:$0xff] }
 0x73f   : > { %17101 = vperm.xlu1 %22383, %v17015_v57   ;;  %v8786_v52 = vld [vmem:[#allocation2 + $0x251] sm:$0xff] }
 0x740   : > { %21053 = vmatmul.mubr.msk.bf16.gmra.mrb[224].mxu1 %vm1162_vm1, %v15647_v49  ;;  %v8482_v49 = vld [vmem:[#allocation2 + $0x2e8] sm:$0xff]  ;;  %v22689_v44 = vld [vmem:[%s22852_s28 + $0x50] ss:$8 sps:$4 sm:$0xff]  }
 0x741   : > { %21056 = vmatprep.mubr.msk.bf16.mxu1 %vm1162_vm1, %v15648_v63  ;;  %16147 = vmatpush1.bf16.msra.mxu1 %v22637_v8  ;;  %v22679_v8 = vld [vmem:[%s22852_s28] ss:$8 sps:$4 sm:$0xff]   ;;  %v8507_v63 = vpack.c.bf16 %v8483_v31, %v8482_v49  ;;  %v22690_v31 = vld [vmem:[%s22852_s28 + $0x64] ss:$8 sps:$4 sm:$0xff]   ;;  %v17033_v57 = vld [vmem:[%s26401_s15 + $0xf8] sm:$0xff] }
 0x742   : > { %16148 = vmatprep.subr.bf16.mxu1 %v22719_v1  ;;  %17086 = vperm.xlu0 %22382, %v17012_v43   ;;  %v17030_v43 = vld [vmem:[%s26401_s15 + $0xe0] sm:$0xff]  ;;  %v8787_v49 = vld [vmem:[#allocation2 + $0x269] sm:$0xff]  ;;  %v9089_v45 = vld [vmem:[#allocation2 + $0x1b2] sm:$0xff] }
 0x743   : > { %20213 = vmatmul.mubr.msk.bf16.gmra.mrb[24].mxu0 %vm1491_vm2, %v8499_v36  ;;  %v17016_v36 = vld [vmem:[%s26401_s15 + $0x70] sm:$0xff]  ;;  %17111 = vperm.xlu1 %22383, %v17017_v54   ;;  %v22691_v54 = vld [vmem:[%s22852_s28 + $0x60] ss:$8 sps:$4 sm:$0xff]  }
 0x744   : > { %20216 = vmatprep.mubr.msk.bf16.mxu0 %vm1491_vm2, %v8500_v27  ;;  %v17018_v27 = vld [vmem:[%s26401_s15 + $0x80] sm:$0xff]  ;;  %v9088_v60 = vld [vmem:[#allocation2 + $0x1aa] sm:$0xff] }
 0x745   : > { %16149 = vmatpush1.bf16.msra.mxu1 %v22638_v61  ;;  %v8487_v61 = vld [vmem:[#allocation2 + $0x330] sm:$0xff] }
 0x746   : > { %16150 = vmatprep.subr.bf16.mxu1 %v22719_v1  ;;  %17096 = vperm.xlu0 %22382, %v17014_v10   ;;  %v8509_v24 = vpack.c.bf16 %v8487_v61, %v8486_v28  ;;  %v22692_v28 = vld [vmem:[%s22852_s28 + $0x74] ss:$8 sps:$4 sm:$0xff]  }
 0x747   : > { %17121 = vperm.xlu1 %22383, %v17019_v19   ;;  %v22693_v19 = vld [vmem:[%s22852_s28 + $0x70] ss:$8 sps:$4 sm:$0xff]  }
 0x748   : > { %21057 = vmatmul.mubr.msk.bf16.gmra.mrb[228].mxu1 %vm1162_vm1, %v15649_v41  ;;  %v8807_v41 = vpack.c.bf16 %v8770_v40, %v8769_v26  ;;  %v8793_v26 = vld [vmem:[#allocation2 + $0x2c9] sm:$0xff]  ;;  %v8794_v40 = vld [vmem:[#allocation2 + $0x2d1] sm:$0xff] }
 0x749   : > { %21060 = vmatprep.mubr.msk.bf16.mxu1 %vm1162_vm1, %v15650_v33  ;;  %16151 = vmatpush1.bf16.msra.mxu1 %v22639_v3  ;;  %v22682_v3 = vld [vmem:[%s22852_s28 + $0x24] ss:$8 sps:$4 sm:$0xff]   ;;  %v17020_v33 = vld [vmem:[%s26401_s15 + $0x90] sm:$0xff] }
 0x74a   : > { %16152 = vmatprep.subr.bf16.mxu1 %v22719_v1  ;;  %v15651_v1 = vpack.c.bf16 %v15621_v50, %v15620_v55  ;;  %17106 = vperm.xlu0 %22382, %v17016_v36   ;;  %v8808_v55 = vpack.c.bf16 %v8772_v37, %v8771_v58  ;;  %v22684_v50 = vld [vmem:[%s22852_s28 + $0x34] ss:$8 sps:$4 sm:$0xff]   ;;  %v8795_v58 = vld [vmem:[#allocation2 + $0x2e9] sm:$0xff] }
 0x74b   : > { %20217 = vmatmul.mubr.msk.bf16.gmra.mrb[28].mxu0 %vm1491_vm2, %v8501_v25  ;;  %17131 = vperm.xlu1 %22383, %v17021_v59   ;;  %v8773_v25 = vld [vmem:[#allocation2 + $0x189] sm:$0xff]  ;;  %v8796_v37 = vld [vmem:[#allocation2 + $0x2f1] sm:$0xff] }
 0x74c   : > { %20220 = vmatprep.mubr.msk.bf16.mxu0 %vm1491_vm2, %v8502_v0  ;;  %v22683_v0 = vld [vmem:[%s22852_s28 + $0x20] ss:$8 sps:$4 sm:$0xff]   ;;  %v8809_v32 = vpack.c.bf16 %v8774_v23, %v8773_v25  ;;  %v8820_v23 = vpack.c.bf16 %v8796_v37, %v8795_v58  ;;  %v9109_v58 = vld [vmem:[#allocation2 + $0x2f2] sm:$0xff] }
 0x74d   : > { %16153 = vmatpush1.bf16.msra.mxu1 %v22640_v22  ;;  %v17023_v22 = vld [vmem:[%s26401_s15 + $0xa8] sm:$0xff] }
 0x74e   : > { %17116 = vperm.xlu0 %22382, %v17018_v27   ;;  %v8791_v27 = vld [vmem:[#allocation2 + $0x2a9] sm:$0xff] }
 0x74f   : > { %17141 = vperm.xlu1 %22383, %v17023_v22   ;;  %v8797_v59 = vld [vmem:[#allocation2 + $0x309] sm:$0xff]  ;;  %v22696_v22 = vld [vmem:[%s22852_s28 + $0x94] ss:$8 sps:$4 sm:$0xff]  }
 0x750   : > { %21061 = vmatmul.mubr.msk.bf16.gmra.mrb[232].mxu1 %vm1162_vm1, %v15651_v1  ;;  %v8776_v1 = vld [vmem:[#allocation2 + $0x1b1] sm:$0xff] }
 0x751   : > { %21064 = vmatprep.mubr.msk.bf16.mxu1 %vm1162_vm1, %v15652_v14  ;;  %v8778_v14 = vld [vmem:[#allocation2 + $0x1d1] sm:$0xff]  ;;  %v8810_v9 = vpack.c.bf16 %v8776_v1, %v8775_v30  ;;  %v22698_v30 = vld [vmem:[%s22852_s28 + $0xa4] ss:$8 sps:$4 sm:$0xff]  }
 0x752   : > { %17126 = vperm.xlu0 %22382, %v17020_v33   ;;  %v8811_v12 = vpack.c.bf16 %v8778_v14, %v8777_v34  ;;  %v8798_v33 = vld [vmem:[#allocation2 + $0x311] sm:$0xff] }
 0x753   : > { %20221 = vmatmul.mubr.msk.bf16.gmra.mrb[32].mxu0 %vm1491_vm2, %v8503_v51  ;;  %v17024_v51 = vld [vmem:[%s26401_s15 + $0xb0] sm:$0xff]  ;;  %v8821_v25 = vpack.c.bf16 %v8798_v33, %v8797_v59 }
 0x754   : > { %20224 = vmatprep.mubr.msk.bf16.mxu0 %vm1491_vm2, %v8504_v39  ;;  %v8781_v39 = vld [vmem:[#allocation2 + $0x209] sm:$0xff]  ;;  %v9085_v14 = vld [vmem:[#allocation2 + $0x172] sm:$0xff] }
 0x755   : > { %v9084_v34 = vld [vmem:[#allocation2 + $0x16a] sm:$0xff]  ;;  %v9111_v59 = vld [vmem:[#allocation2 + $0x312] sm:$0xff] }
 0x756   : > { %17136 = vperm.xlu0 %22382, %v17022_v13   ;;  %v22695_v13 = vld [vmem:[%s22852_s28 + $0x80] ss:$8 sps:$4 sm:$0xff]  }
 0x757   : > { %v9108_v33 = vld [vmem:[#allocation2 + $0x2ea] sm:$0xff] }
 0x758   : > { %21065 = vmatmul.mubr.msk.bf16.gmra.mrb[236].mxu1 %vm1162_vm1, %v15653_v17  ;;  %v8782_v17 = vld [vmem:[#allocation2 + $0x211] sm:$0xff] }
 0x759   : > { %18485 = vmatprep.mubr.msk.bf16.mxu1 %vm920_vm0, %v22678_v46  ;;  %v8813_v15 = vpack.c.bf16 %v8782_v17, %v8781_v39  ;;  %v17031_v46 = vld [vmem:[%s26401_s15 + $0xe8] sm:$0xff]  ;;  %v9091_v39 = vld [vmem:[#allocation2 + $0x1d2] sm:$0xff] }
 0x75a   : > { %17146 = vperm.xlu0 %22382, %v17024_v51   ;;  %v22701_v17 = vld [vmem:[%s22852_s28 + $0xb0] ss:$8 sps:$4 sm:$0xff]  }
 0x75b   : > { %20225 = vmatmul.mubr.msk.bf16.gmra.mrb[36].mxu0 %vm1491_vm2, %v8505_v16  ;;  %v8783_v16 = vld [vmem:[#allocation2 + $0x229] sm:$0xff] }
 0x75c   : > { %20228 = vmatprep.mubr.msk.bf16.mxu0 %vm1491_vm2, %v8506_v21  ;;  %v8785_v21 = vld [vmem:[#allocation2 + $0x249] sm:$0xff]  ;;  %v8814_v48 = vpack.c.bf16 %v8784_v6, %v8783_v16 }
 0x75d   : > { %v8815_v10 = vpack.c.bf16 %v8786_v52, %v8785_v21  ;;  %v22703_v16 = vld [vmem:[%s22852_s28 + $0xc0] ss:$8 sps:$4 sm:$0xff]  }
 0x75e   : > { %17156 = vperm.xlu0 %22382, %v17026_v5   ;;  %v9123_v5 = vpack.c.bf16 %v9089_v45, %v9088_v60  ;;  %v9096_v52 = vld [vmem:[#allocation2 + $0x22a] sm:$0xff] }
 0x760   : > { %16163 = vmatmul.mubr.bf16.vlgmr.msra.gmra.mrb[240].mxu1 %v22679_v8  ;;  %v17032_v8 = vld [vmem:[%s26401_s15 + $0xf0] sm:$0xff] }
 0x761   : > { %18486 = vmatprep.mubr.msk.bf16.mxu1 %vm920_vm0, %v22680_v56  ;;  %v8790_v56 = vld [vmem:[#allocation2 + $0x291] sm:$0xff] }
 0x762   : > { %17166 = vperm.xlu0 %22382, %v17028_v29   ;;  %v9095_v29 = vld [vmem:[#allocation2 + $0x212] sm:$0xff] }
 0x763   : > { %20229 = vmatmul.mubr.msk.bf16.gmra.mrb[40].mxu0 %vm1491_vm2, %v8507_v63  ;;  %v8789_v63 = vld [vmem:[#allocation2 + $0x289] sm:$0xff] }
 0x764   : > { %20232 = vmatprep.mubr.msk.bf16.mxu0 %vm1491_vm2, %v8508_v47  ;;  %v8788_v47 = vld [vmem:[#allocation2 + $0x271] sm:$0xff]  ;;  %v8817_v61 = vpack.c.bf16 %v8790_v56, %v8789_v63 }
 0x765   : > { %v8816_v36 = vpack.c.bf16 %v8788_v47, %v8787_v49  ;;  %v9100_v49 = vld [vmem:[#allocation2 + $0x26a] sm:$0xff]  ;;  %v9101_v47 = vld [vmem:[#allocation2 + $0x272] sm:$0xff] }
 0x766   : > { %17176 = vperm.xlu0 %22382, %v17030_v43   ;;  %v9097_v43 = vld [vmem:[#allocation2 + $0x232] sm:$0xff]  ;;  %v9102_v63 = vld [vmem:[#allocation2 + $0x28a] sm:$0xff] }
 0x767   : > { %v9103_v56 = vld [vmem:[#allocation2 + $0x292] sm:$0xff] }
 0x768   : > { %16171 = vmatmul.mubr.bf16.gmra.mrb[244].mxu1 %v22681_v38 }
 0x769   : > { %18487 = vmatprep.mubr.msk.bf16.mxu1 %vm920_vm0, %v22682_v3  ;;  %v22694_v3 = vld [vmem:[%s22852_s28 + $0x84] ss:$8 sps:$4 sm:$0xff]  }
 0x76a   : > { %17186 = vperm.xlu0 %22382, %v17032_v8  }
 0x76b   : > { %20233 = vmatmul.mubr.msk.bf16.gmra.mrb[44].mxu0 %vm1491_vm2, %v8509_v24  ;;  %v8792_v24 = vld [vmem:[#allocation2 + $0x2b1] sm:$0xff] }
 0x76c   : > { %20242 = vmatprep.mubr.msk.bf16.mxu0 %vm1491_vm2, %v8807_v41  ;;  %v8818_v38 = vpack.c.bf16 %v8792_v24, %v8791_v27  ;;  %v8819_v41 = vpack.c.bf16 %v8794_v40, %v8793_v26  ;;  %v9104_v27 = vld [vmem:[#allocation2 + $0x2aa] sm:$0xff]  ;;  %v9105_v24 = vld [vmem:[#allocation2 + $0x2b2] sm:$0xff] }
 0x76d   : > { %v9106_v26 = vld [vmem:[#allocation2 + $0x2ca] sm:$0xff]  ;;  %v9107_v40 = vld [vmem:[#allocation2 + $0x2d2] sm:$0xff] }
 0x770   : > { %16179 = vmatmul.mubr.bf16.gmra.mrb[248].mxu1 %v22683_v0  ;;  %v8799_v0 = vld [vmem:[#allocation2 + $0x329] sm:$0xff] }
 0x771   : > { %18488 = vmatprep.mubr.msk.bf16.mxu1 %vm920_vm0, %v22684_v50 }
 0x773   : > { %20243 = vmatmul.mubr.msk.bf16.vlgmr.msra.gmra.mrb[16].mxu0 %vm1491_vm2, %v8808_v55  ;;  %v8800_v55 = vld [vmem:[#allocation2 + $0x331] sm:$0xff] }
 0x774   : > { %20246 = vmatprep.mubr.msk.bf16.mxu0 %vm1491_vm2, %v8809_v32  ;;  %20275 = vmatpush3.bf16.msra.mxu0 %v25802_v7  ;;  %v17025_v7 = vld [vmem:[%s26401_s15 + $0xb8] sm:$0xff]  ;;  %v8822_v50 = vpack.c.bf16 %v8800_v55, %v8799_v0  ;;  %v26028_v0 = vld [vmem:[%s26398_s12] ss:$0 sm:$0xff] }
 0x775   : > { %20276 = vmatprep.subr.bf16.mxu0 %v22643_v62  ;;  %17151 = vperm.xlu1 %22383, %v17025_v7   ;;  %v9083_v32 = vld [vmem:[#allocation2 + $0x152] sm:$0xff] }
 0x776   : > { %v22700_v7 = vld [vmem:[%s22852_s28 + $0xb4] ss:$8 sps:$4 sm:$0xff]  }
 0x778   : > { %16187 = vmatmul.mubr.bf16.gmra.mrb[252].mxu1 %v22685_v20  ;;  %20277 = vmatpush3.bf16.msra.mxu0 %v22643_v62  ;;  %v9082_v62 = vld [vmem:[#allocation2 + $0x14a] sm:$0xff] }
 0x779   : > { %18489 = vmatprep.mubr.msk.bf16.mxu1 %vm920_vm0, %v22686_v2  ;;  %20278 = vmatprep.subr.bf16.mxu0 %v22644_v35  ;;  %v9120_v1 = vpack.c.bf16 %v9083_v32, %v9082_v62  ;;  %v9086_v20 = vld [vmem:[#allocation2 + $0x18a] sm:$0xff] }
 0x77a   : > { %17161 = vperm.xlu1 %22383, %v17027_v11   ;;  %v22699_v2 = vld [vmem:[%s22852_s28 + $0xa0] ss:$8 sps:$4 sm:$0xff]  }
 0x77b   : > { %20247 = vmatmul.mubr.msk.bf16.gmra.mrb[20].mxu0 %vm1491_vm2, %v8810_v9  ;;  %v9087_v9 = vld [vmem:[#allocation2 + $0x192] sm:$0xff]  ;;  %v9090_v11 = vld [vmem:[#allocation2 + $0x1ca] sm:$0xff] }
 0x77c   : > { %20250 = vmatprep.mubr.msk.bf16.mxu0 %vm1491_vm2, %v8811_v12  ;;  %20279 = vmatpush3.bf16.msra.mxu0 %v22644_v35  ;;  %v22697_v35 = vld [vmem:[%s22852_s28 + $0x90] ss:$8 sps:$4 sm:$0xff]   ;;  %v9121_v12 = vpack.c.bf16 %v9085_v14, %v9084_v34  ;;  %v9122_v51 = vpack.c.bf16 %v9087_v9, %v9086_v20 }
 0x77e   : > { %17171 = vperm.xlu1 %22383, %v17029_v4   ;;  %v9094_v4 = vld [vmem:[#allocation2 + $0x20a] sm:$0xff] }
 0x77f   : > { %v9126_v21 = vpack.c.bf16 %v9095_v29, %v9094_v4 }
 0x780   : > { %16195 = vmatmul.mubr.bf16.gmra.mrb[0].mxu1 %v22687_v53  ;;  %v22702_v53 = vld [vmem:[%s22852_s28 + $0xc4] ss:$8 sps:$4 sm:$0xff]  }
 0x781   : > { %18490 = vmatprep.mubr.msk.bf16.mxu1 %vm920_vm0, %v22688_v18  ;;  %v9092_v18 = vld [vmem:[#allocation2 + $0x1ea] sm:$0xff] }
 0x782   : > { %17181 = vperm.xlu1 %22383, %v17031_v46   ;;  %v22704_v46 = vld [vmem:[%s22852_s28 + $0xd4] ss:$8 sps:$4 sm:$0xff]  }
 0x783   : > { %20251 = vmatmul.mubr.msk.bf16.gmra.mrb[24].mxu0 %vm1491_vm2, %v8812_v42  ;;  %v9124_v42 = vpack.c.bf16 %v9091_v39, %v9090_v11 }
 0x784   : > { %20254 = vmatprep.mubr.msk.bf16.mxu0 %vm1491_vm2, %v8813_v15  ;;  %v9093_v15 = vld [vmem:[#allocation2 + $0x1f2] sm:$0xff] }
 0x785   : > { %v9125_v6 = vpack.c.bf16 %v9093_v15, %v9092_v18 }
 0x786   : > { %17191 = vperm.xlu1 %22383, %v17033_v57   ;;  %v22706_v57 = vld [vmem:[%s22852_s28 + $0xe4] ss:$8 sps:$4 sm:$0xff]  }
 0x788   : > { %16203 = vmatmul.mubr.bf16.gmra.mrb[4].mxu1 %v22689_v44  ;;  %v9098_v44 = vld [vmem:[#allocation2 + $0x24a] sm:$0xff] }
 0x789   : > { %18491 = vmatprep.mubr.msk.bf16.mxu1 %vm920_vm0, %v22690_v31  ;;  %v22705_v31 = vld [vmem:[%s22852_s28 + $0xd0] ss:$8 sps:$4 sm:$0xff]  }
 0x78b   : > { %20255 = vmatmul.mubr.msk.bf16.gmra.mrb[28].mxu0 %vm1491_vm2, %v8814_v48  ;;  %v9099_v48 = vld [vmem:[#allocation2 + $0x252] sm:$0xff] }
 0x78c   : > { %20258 = vmatprep.mubr.msk.bf16.mxu0 %vm1491_vm2, %v8815_v10  ;;  %v9127_v10 = vpack.c.bf16 %v9097_v43, %v9096_v52  ;;  %v9128_v8 = vpack.c.bf16 %v9099_v48, %v9098_v44 }
 0x790   : > { %16211 = vmatmul.mubr.bf16.gmra.mrb[8].mxu1 %v22691_v54  ;;  %v22707_v54 = vld [vmem:[%s22852_s28 + $0xe0] ss:$8 sps:$4 sm:$0xff]  }
 0x791   : > { %18492 = vmatprep.mubr.msk.bf16.mxu1 %vm920_vm0, %v22692_v28  ;;  %v22708_v28 = vld [vmem:[%s22852_s28 + $0xf4] ss:$8 sps:$4 sm:$0xff]  }
 0x793   : > { %20259 = vmatmul.mubr.msk.bf16.gmra.mrb[32].mxu0 %vm1491_vm2, %v8816_v36  ;;  %v9129_v36 = vpack.c.bf16 %v9101_v47, %v9100_v49 }
 0x794   : > { %20262 = vmatprep.mubr.msk.bf16.mxu0 %vm1491_vm2, %v8817_v61  ;;  %v9130_v61 = vpack.c.bf16 %v9103_v56, %v9102_v63 }
 0x798   : > { %16219 = vmatmul.mubr.bf16.gmra.mrb[12].mxu1 %v22693_v19  ;;  %v22709_v19 = vld [vmem:[%s22852_s28 + $0xf0] ss:$8 sps:$4 sm:$0xff]  }
 0x799   : > { %18493 = vmatprep.mubr.msk.bf16.mxu1 %vm920_vm0, %v22694_v3  ;;  %v9132_v3 = vpack.c.bf16 %v9107_v40, %v9106_v26 }
 0x79b   : > { %20263 = vmatmul.mubr.msk.bf16.gmra.mrb[36].mxu0 %vm1491_vm2, %v8818_v38  ;;  %v9131_v38 = vpack.c.bf16 %v9105_v24, %v9104_v27 }
 0x79c   : > { %20266 = vmatprep.mubr.msk.bf16.mxu0 %vm1491_vm2, %v8819_v41  ;;  %v9110_v41 = vld [vmem:[#allocation2 + $0x30a] sm:$0xff] }
 0x79d   : > { %v9134_v37 = vpack.c.bf16 %v9111_v59, %v9110_v41 }
 0x7a0   : > { %16227 = vmatmul.mubr.bf16.gmra.mrb[16].mxu1 %v22695_v13  ;;  %v9133_v13 = vpack.c.bf16 %v9109_v58, %v9108_v33 }
 0x7a1   : > { %18494 = vmatprep.mubr.msk.bf16.mxu1 %vm920_vm0, %v22696_v22 }
 0x7a3   : > { %20267 = vmatmul.mubr.msk.bf16.gmra.mrb[40].mxu0 %vm1491_vm2, %v8820_v23  ;;  %v9113_v23 = vld [vmem:[#allocation2 + $0x332] sm:$0xff] }
 0x7a4   : > { %20270 = vmatprep.mubr.msk.bf16.mxu0 %vm1491_vm2, %v8821_v25  ;;  %v9112_v25 = vld [vmem:[#allocation2 + $0x32a] sm:$0xff] }
 0x7a5   : > { %v9135_v22 = vpack.c.bf16 %v9113_v23, %v9112_v25 }
 0x7a8   : > { %16235 = vmatmul.mubr.bf16.gmra.mrb[20].mxu1 %v22697_v35 }
 0x7a9   : > { %18495 = vmatprep.mubr.msk.bf16.mxu1 %vm920_vm0, %v22698_v30 }
 0x7ab   : > { %20271 = vmatmul.mubr.msk.bf16.gmra.mrb[44].mxu0 %vm1491_vm2, %v8822_v50 }
 0x7ac   : > { %20280 = vmatprep.mubr.msk.bf16.mxu0 %vm1491_vm2, %v9120_v1 }
 0x7b0   : > { %16243 = vmatmul.mubr.bf16.gmra.mrb[24].mxu1 %v22699_v2 }
 0x7b1   : > { %18496 = vmatprep.mubr.msk.bf16.mxu1 %vm920_vm0, %v22700_v7 }
 0x7b3   : > { %20281 = vmatmul.mubr.msk.bf16.vlgmr.msra.gmra.mrb[16].mxu0 %vm1491_vm2, %v9121_v12 }
 0x7b4   : > { %20284 = vmatprep.mubr.msk.bf16.mxu0 %vm1491_vm2, %v9122_v51 }
 0x7b8   : > { %16251 = vmatmul.mubr.bf16.gmra.mrb[28].mxu1 %v22701_v17 }
 0x7b9   : > { %18497 = vmatprep.mubr.msk.bf16.mxu1 %vm920_vm0, %v22702_v53 }
 0x7bb   : > { %20285 = vmatmul.mubr.msk.bf16.gmra.mrb[20].mxu0 %vm1491_vm2, %v9123_v5 }
 0x7bc   : > { %20288 = vmatprep.mubr.msk.bf16.mxu0 %vm1491_vm2, %v9124_v42 }
 0x7c0   : > { %16259 = vmatmul.mubr.bf16.gmra.mrb[32].mxu1 %v22703_v16 }
 0x7c1   : > { %18498 = vmatprep.mubr.msk.bf16.mxu1 %vm920_vm0, %v22704_v46 }
 0x7c3   : > { %20289 = vmatmul.mubr.msk.bf16.gmra.mrb[24].mxu0 %vm1491_vm2, %v9125_v6 }
 0x7c4   : > { %20292 = vmatprep.mubr.msk.bf16.mxu0 %vm1491_vm2, %v9126_v21 }
 0x7c8   : > { %16267 = vmatmul.mubr.bf16.gmra.mrb[36].mxu1 %v22705_v31 }
 0x7c9   : > { %18499 = vmatprep.mubr.msk.bf16.mxu1 %vm920_vm0, %v22706_v57 }
 0x7cb   : > { %20293 = vmatmul.mubr.msk.bf16.gmra.mrb[28].mxu0 %vm1491_vm2, %v9127_v10 }
 0x7cc   : > { %20296 = vmatprep.mubr.msk.bf16.mxu0 %vm1491_vm2, %v9128_v8 }
 0x7d0   : > { %16275 = vmatmul.mubr.bf16.gmra.mrb[40].mxu1 %v22707_v54 }
 0x7d1   : > { %18500 = vmatprep.mubr.msk.bf16.mxu1 %vm920_vm0, %v22708_v28 }
 0x7d3   : > { %20297 = vmatmul.mubr.msk.bf16.gmra.mrb[32].mxu0 %vm1491_vm2, %v9129_v36 }
 0x7d4   : > { %20300 = vmatprep.mubr.msk.bf16.mxu0 %vm1491_vm2, %v9130_v61 }
 0x7d8   : > { %16283 = vmatmul.mubr.bf16.gmra.mrb[44].mxu1 %v22709_v19 }
 0x7db   : > { %20301 = vmatmul.mubr.msk.bf16.gmra.mrb[36].mxu0 %vm1491_vm2, %v9131_v38 }
 0x7dc   : > { %20304 = vmatprep.mubr.msk.bf16.mxu0 %vm1491_vm2, %v9132_v3 }
 0x7e3   : > { %20305 = vmatmul.mubr.msk.bf16.gmra.mrb[40].mxu0 %vm1491_vm2, %v9133_v13 }
 0x7e4   : > { %20308 = vmatprep.mubr.msk.bf16.mxu0 %vm1491_vm2, %v9134_v37 }
 0x7eb   : > { %20309 = vmatmul.mubr.msk.bf16.gmra.mrb[44].mxu0 %vm1491_vm2, %v9135_v22 }
 0x7f3   : > { %v21038_v55 = vpop.f32.mrb[208].mxu1 }
 0x7f4   : > { %v15940_v50 = vadd.f32 %v21038_v55, %v26028_v0  ;;  %v15772_v62 = vpop.f32.mrb[209].mxu1 }
 0x7f5   : > { %v15938_v32 = vadd.f32 %v26028_v0, %v15772_v62  ;;  %v21039_v35 = vpop.f32.mrb[210].mxu1 }
 0x7f6   : > { %v15972_v30 = vmax.f32 %v15940_v50, 0.0  ;;  %v15941_v1 = vadd.f32 %v21039_v35, %v26028_v0  ;;  %v15775_v34 = vpop.f32.mrb[211].mxu1 }
 0x7f7   : > { %v15970_v14 = vmax.f32 %v15938_v32, 0.0  ;;  %v15939_v20 = vadd.f32 %v26028_v0, %v15775_v34 }
 0x7f8   : > { %16004 = vst.msk [vmem:[%s26035_s29 + $0x10] sm:$0xff] %vm1162_vm1, %v15972_v30  ;;  %v15973_v9 = vmax.f32 %v15941_v1, 0.0 }
 0x7f9   : > { %16002 = vst.msk [vmem:[%s26035_s29] sm:$0xff] %vm1162_vm1, %v15970_v14  ;;  %v15971_v2 = vmax.f32 %v15939_v20, 0.0 }
 0x7fa   : > { %16005 = vst.msk [vmem:[%s26035_s29 + $0x18] sm:$0xff] %vm1162_vm1, %v15973_v9 }
 0x7fb   : > { %16003 = vst.msk [vmem:[%s26035_s29 + $0x8] sm:$0xff] %vm1162_vm1, %v15971_v2  ;;  %v21042_v12 = vpop.f32.mrb[212].mxu1 }
 0x7fc   : > { %v15944_v7 = vadd.f32 %v21042_v12, %v26028_v0  ;;  %v15788_v51 = vpop.f32.mrb[213].mxu1 }
 0x7fd   : > { %v15942_v60 = vadd.f32 %v26028_v0, %v15788_v51  ;;  %v21043_v45 = vpop.f32.mrb[214].mxu1 }
 0x7fe   : > { %v15976_v11 = vmax.f32 %v15944_v7, 0.0  ;;  %v15945_v39 = vadd.f32 %v21043_v45, %v26028_v0  ;;  %v15791_v17 = vpop.f32.mrb[215].mxu1 }
 0x7ff   : > { %v15974_v5 = vmax.f32 %v15942_v60, 0.0  ;;  %v15943_v53 = vadd.f32 %v26028_v0, %v15791_v17 }
 0x800   : > { %16008 = vst.msk [vmem:[%s26035_s29 + $0x30] sm:$0xff] %vm1162_vm1, %v15976_v11  ;;  %v15977_v42 = vmax.f32 %v15945_v39, 0.0 }
 0x801   : > { %16006 = vst.msk [vmem:[%s26035_s29 + $0x20] sm:$0xff] %vm1162_vm1, %v15974_v5  ;;  %v15975_v18 = vmax.f32 %v15943_v53, 0.0 }
 0x802   : > { %16009 = vst.msk [vmem:[%s26035_s29 + $0x38] sm:$0xff] %vm1162_vm1, %v15977_v42 }
 0x803   : > { %16007 = vst.msk [vmem:[%s26035_s29 + $0x28] sm:$0xff] %vm1162_vm1, %v15975_v18  ;;  %v21046_v15 = vpop.f32.mrb[216].mxu1 }
 0x804   : > { %v15948_v4 = vadd.f32 %v21046_v15, %v26028_v0  ;;  %v15804_v29 = vpop.f32.mrb[217].mxu1 }
 0x805   : > { %v15946_v16 = vadd.f32 %v26028_v0, %v15804_v29  ;;  %v21047_v6 = vpop.f32.mrb[218].mxu1 }
 0x806   : > { %v15980_v46 = vmax.f32 %v15948_v4, 0.0  ;;  %v15949_v21 = vadd.f32 %v21047_v6, %v26028_v0  ;;  %v15807_v52 = vpop.f32.mrb[219].mxu1 }
 0x807   : > { %v15978_v43 = vmax.f32 %v15946_v16, 0.0  ;;  %v15947_v44 = vadd.f32 %v26028_v0, %v15807_v52 }
 0x808   : > { %16012 = vst.msk [vmem:[%s26035_s29 + $0x50] sm:$0xff] %vm1162_vm1, %v15980_v46  ;;  %v15981_v48 = vmax.f32 %v15949_v21, 0.0 }
 0x809   : > { %16010 = vst.msk [vmem:[%s26035_s29 + $0x40] sm:$0xff] %vm1162_vm1, %v15978_v43  ;;  %v15979_v31 = vmax.f32 %v15947_v44, 0.0  ;;  %v16425_v44 = vld [vmem:[#allocation5 + $0xe7] sm:$0xff] }
 0x80a   : > { %16013 = vst.msk [vmem:[%s26035_s29 + $0x58] sm:$0xff] %vm1162_vm1, %v15981_v48  ;;  %v16489_v48 = vld [vmem:[#allocation5 + $0xe8] sm:$0xff] }
 0x80b   : > { %16011 = vst.msk [vmem:[%s26035_s29 + $0x48] sm:$0xff] %vm1162_vm1, %v15979_v31  ;;  %v21050_v10 = vpop.f32.mrb[220].mxu1 }
 0x80c   : > { %v15952_v57 = vadd.f32 %v21050_v10, %v26028_v0  ;;  %v15820_v8 = vpop.f32.mrb[221].mxu1  ;;  %v16426_v10 = vld [vmem:[#allocation5 + $0xef] sm:$0xff] }
 0x80d   : > { %v15950_v49 = vadd.f32 %v26028_v0, %v15820_v8  ;;  %v21051_v47 = vpop.f32.mrb[222].mxu1 }
 0x80e   : > { %v15984_v63 = vmax.f32 %v15952_v57, 0.0  ;;  %v15953_v56 = vadd.f32 %v21051_v47, %v26028_v0  ;;  %v15823_v54 = vpop.f32.mrb[223].mxu1  ;;  %v16490_v57 = vld [vmem:[#allocation5 + $0xf0] sm:$0xff] }
 0x80f   : > { %v15982_v36 = vmax.f32 %v15950_v49, 0.0  ;;  %v15951_v28 = vadd.f32 %v26028_v0, %v15823_v54  ;;  %v16521_v49 = vadd.f32 %v16489_v48, %v16425_v44  ;;  %v16553_v47 = vld [vmem:[#allocation5 + $0xe9] sm:$0xff]  ;;  %v16554_v54 = vld [vmem:[#allocation5 + $0xf1] sm:$0xff] }
 0x810   : > { %16016 = vst.msk [vmem:[%s26035_s29 + $0x70] sm:$0xff] %vm1162_vm1, %v15984_v63  ;;  %v15985_v61 = vmax.f32 %v15953_v56, 0.0  ;;  %v16522_v56 = vadd.f32 %v16490_v57, %v16426_v10 }
 0x811   : > { %16014 = vst.msk [vmem:[%s26035_s29 + $0x60] sm:$0xff] %vm1162_vm1, %v15982_v36  ;;  %v15983_v27 = vmax.f32 %v15951_v28, 0.0  ;;  %v16585_v36 = vadd.f32 %v16553_v47, %v16521_v49 }
 0x812   : > { %16017 = vst.msk [vmem:[%s26035_s29 + $0x78] sm:$0xff] %vm1162_vm1, %v15985_v61  ;;  %v16586_v28 = vadd.f32 %v16554_v54, %v16522_v56 }
 0x813   : > { %16015 = vst.msk [vmem:[%s26035_s29 + $0x68] sm:$0xff] %vm1162_vm1, %v15983_v27  ;;  %v21054_v24 = vpop.f32.mrb[224].mxu1 }
 0x814   : > { %v15956_v26 = vadd.f32 %v21054_v24, %v26028_v0  ;;  %v15836_v40 = vpop.f32.mrb[225].mxu1 }
 0x815   : > { %v15954_v19 = vadd.f32 %v26028_v0, %v15836_v40  ;;  %v21055_v38 = vpop.f32.mrb[226].mxu1 }
 0x816   : > { %v15988_v3 = vmax.f32 %v15956_v26, 0.0  ;;  %v15957_v41 = vadd.f32 %v21055_v38, %v26028_v0  ;;  %v15839_v59 = vpop.f32.mrb[227].mxu1 }
 0x817   : > { %v15986_v33 = vmax.f32 %v15954_v19, 0.0  ;;  %v15955_v58 = vadd.f32 %v26028_v0, %v15839_v59 }
 0x818   : > { %16020 = vst.msk [vmem:[%s26035_s29 + $0x90] sm:$0xff] %vm1162_vm1, %v15988_v3  ;;  %v15989_v37 = vmax.f32 %v15957_v41, 0.0 }
 0x819   : > { %16018 = vst.msk [vmem:[%s26035_s29 + $0x80] sm:$0xff] %vm1162_vm1, %v15986_v33  ;;  %v15987_v13 = vmax.f32 %v15955_v58, 0.0 }
 0x81a   : > { %16021 = vst.msk [vmem:[%s26035_s29 + $0x98] sm:$0xff] %vm1162_vm1, %v15989_v37 }
 0x81b   : > { %16019 = vst.msk [vmem:[%s26035_s29 + $0x88] sm:$0xff] %vm1162_vm1, %v15987_v13  ;;  %v21058_v25 = vpop.f32.mrb[228].mxu1 }
 0x81c   : > { %v15960_v23 = vadd.f32 %v21058_v25, %v26028_v0  ;;  %v15852_v22 = vpop.f32.mrb[229].mxu1 }
 0x81d   : > { %v15958_v55 = vadd.f32 %v26028_v0, %v15852_v22  ;;  %v21059_v50 = vpop.f32.mrb[230].mxu1 }
 0x81e   : > { %v15992_v62 = vmax.f32 %v15960_v23, 0.0  ;;  %v15961_v32 = vadd.f32 %v21059_v50, %v26028_v0  ;;  %v15855_v35 = vpop.f32.mrb[231].mxu1  ;;  %v17037_v50 = vpop.permute.xlu0 %17036 }
 0x81f   : > { %v15990_v30 = vmax.f32 %v15958_v55, 0.0  ;;  %v15959_v1 = vadd.f32 %v26028_v0, %v15855_v35 }
 0x820   : > { %16024 = vst.msk [vmem:[%s26035_s29 + $0xb0] sm:$0xff] %vm1162_vm1, %v15992_v62  ;;  %v15993_v34 = vmax.f32 %v15961_v32, 0.0 }
 0x821   : > { %16022 = vst.msk [vmem:[%s26035_s29 + $0xa0] sm:$0xff] %vm1162_vm1, %v15990_v30  ;;  %v15991_v14 = vmax.f32 %v15959_v1, 0.0 }
 0x822   : > { %16025 = vst.msk [vmem:[%s26035_s29 + $0xb8] sm:$0xff] %vm1162_vm1, %v15993_v34 }
 0x823   : > { %16023 = vst.msk [vmem:[%s26035_s29 + $0xa8] sm:$0xff] %vm1162_vm1, %v15991_v14  ;;  %v21062_v20 = vpop.f32.mrb[232].mxu1 }
 0x824   : > { %v15964_v9 = vadd.f32 %v21062_v20, %v26028_v0  ;;  %v15868_v2 = vpop.f32.mrb[233].mxu1 }
 0x825   : > { %v15962_v12 = vadd.f32 %v26028_v0, %v15868_v2  ;;  %v21063_v7 = vpop.f32.mrb[234].mxu1 }
 0x826   : > { %v15996_v51 = vmax.f32 %v15964_v9, 0.0  ;;  %v15965_v60 = vadd.f32 %v21063_v7, %v26028_v0  ;;  %v15871_v45 = vpop.f32.mrb[235].mxu1 }
 0x827   : > { %v15994_v11 = vmax.f32 %v15962_v12, 0.0  ;;  %v15963_v39 = vadd.f32 %v26028_v0, %v15871_v45 }
 0x828   : > { %16028 = vst.msk [vmem:[%s26035_s29 + $0xd0] sm:$0xff] %vm1162_vm1, %v15996_v51  ;;  %v15997_v17 = vmax.f32 %v15965_v60, 0.0 }
 0x829   : > { %16026 = vst.msk [vmem:[%s26035_s29 + $0xc0] sm:$0xff] %vm1162_vm1, %v15994_v11  ;;  %v15995_v5 = vmax.f32 %v15963_v39, 0.0 }
 0x82a   : > { %16029 = vst.msk [vmem:[%s26035_s29 + $0xd8] sm:$0xff] %vm1162_vm1, %v15997_v17 }
 0x82b   : > { %16027 = vst.msk [vmem:[%s26035_s29 + $0xc8] sm:$0xff] %vm1162_vm1, %v15995_v5  ;;  %v21066_v53 = vpop.f32.mrb[236].mxu1 }
 0x82c   : > { %v15968_v42 = vadd.f32 %v21066_v53, %v26028_v0  ;;  %v15884_v18 = vpop.f32.mrb[237].mxu1 }
 0x82d   : > { %v15966_v15 = vadd.f32 %v26028_v0, %v15884_v18  ;;  %v21067_v4 = vpop.f32.mrb[238].mxu1  ;;  %v26141_v18 = vld [vmem:[%s26400_s14] ss:$0 sm:$0xff] }
 0x82e   : > { %v16000_v29 = vmax.f32 %v15968_v42, 0.0  ;;  %v15969_v16 = vadd.f32 %v21067_v4, %v26028_v0  ;;  %v15887_v6 = vpop.f32.mrb[239].mxu1 }
 0x82f   : > { %v15998_v46 = vmax.f32 %v15966_v15, 0.0  ;;  %v15967_v21 = vadd.f32 %v26028_v0, %v15887_v6  ;;  %v17042_v15 = vpop.permute.xlu0 %17041 }
 0x830   : > { %16032 = vst.msk [vmem:[%s26035_s29 + $0xf0] sm:$0xff] %vm1162_vm1, %v16000_v29  ;;  %v16001_v52 = vmax.f32 %v15969_v16, 0.0 }
 0x831   : > { %16030 = vst.msk [vmem:[%s26035_s29 + $0xe0] sm:$0xff] %vm1162_vm1, %v15998_v46  ;;  %v15999_v43 = vmax.f32 %v15967_v21, 0.0 }
 0x832   : > { %16033 = vst.msk [vmem:[%s26035_s29 + $0xf8] sm:$0xff] %vm1162_vm1, %v16001_v52 }
 0x833   : > { %16031 = vst.msk [vmem:[%s26035_s29 + $0xe8] sm:$0xff] %vm1162_vm1, %v15999_v43  ;;  %v16164_v31 = vpop.f32.mrb[240].mxu1  ;;  %s26221_s29 = scalar_lea.vmem %s26403_s17, %s22844_s25 }
 0x834   : > { %16392 = vst.msk [vmem:[#allocation5 + $0x108] sm:$0xff] %vm920_vm0, %v16164_v31  ;;  %v16166_v8 = vpop.f32.mrb[241].mxu1 }
 0x835   : > { %v16167_v0 = vpop.f32.mrb[242].mxu1 }
 0x836   : > { %16393 = vst.msk [vmem:[#allocation5 + $0x110] sm:$0xff] %vm920_vm0, %v16167_v0  ;;  %v16169_v63 = vpop.f32.mrb[243].mxu1  ;;  %v17047_v0 = vpop.permute.xlu1 %17046 }
 0x83b   : > { %v16172_v61 = vpop.f32.mrb[244].mxu1  ;;  %v16617_v27 = vld [vmem:[#allocation5 + $0x107] sm:$0xff] }
 0x83c   : > { %v16681_v24 = vld [vmem:[#allocation5 + $0x108] sm:$0xff]  ;;  %16394 = vst.msk [vmem:[#allocation5 + $0x128] sm:$0xff] %vm920_vm0, %v16172_v61  ;;  %v16174_v26 = vpop.f32.mrb[245].mxu1  ;;  %v16649_v40 = vadd.f32 %v16617_v27, %v16585_v36 }
 0x83d   : > { %v16175_v19 = vpop.f32.mrb[246].mxu1  ;;  %v16618_v38 = vld [vmem:[#allocation5 + $0x10f] sm:$0xff]  ;;  %v16523_v33 = vadd.f32 %v16681_v24, %v16617_v27 }
 0x83e   : > { %v16682_v3 = vld [vmem:[#allocation5 + $0x110] sm:$0xff]  ;;  %16395 = vst.msk [vmem:[#allocation5 + $0x130] sm:$0xff] %vm920_vm0, %v16175_v19  ;;  %v16177_v41 = vpop.f32.mrb[247].mxu1  ;;  %v16713_v59 = vadd.f32 %v16681_v24, %v16649_v40  ;;  %v16650_v58 = vadd.f32 %v16618_v38, %v16586_v28 }
 0x83f   : > { %v16745_v37 = vld [vmem:[#allocation5 + $0x109] sm:$0xff]  ;;  %v16524_v25 = vadd.f32 %v16682_v3, %v16618_v38  ;;  %v16746_v35 = vld [vmem:[#allocation5 + $0x111] sm:$0xff] }
 0x840   : > { %v16714_v13 = vadd.f32 %v16682_v3, %v16650_v58  ;;  %v16777_v23 = vadd.f32 %v16745_v37, %v16713_v59  ;;  %v16587_v22 = vadd.f32 %v16745_v37, %v16523_v33 }
 0x841   : > { %v16588_v20 = vadd.f32 %v16746_v35, %v16524_v25 }
 0x842   : > { %v16778_v14 = vadd.f32 %v16746_v35, %v16714_v13 }
 0x843   : > { %v16180_v55 = vpop.f32.mrb[248].mxu1  ;;  %v16810_v62 = vld [vmem:[#allocation5 + $0x127] sm:$0xff] }
 0x844   : > { %v16874_v32 = vld [vmem:[#allocation5 + $0x128] sm:$0xff]  ;;  %16396 = vst.msk [vmem:[#allocation5 + $0x148] sm:$0xff] %vm920_vm0, %v16180_v55  ;;  %v16182_v30 = vpop.f32.mrb[249].mxu1  ;;  %v16842_v1 = vadd.f32 %v16810_v62, %v16777_v23  ;;  %v16651_v34 = vadd.f32 %v16810_v62, %v16587_v22 }
 0x845   : > { %v16183_v9 = vpop.f32.mrb[250].mxu1  ;;  %v16811_v2 = vld [vmem:[#allocation5 + $0x12f] sm:$0xff]  ;;  %v16525_v12 = vadd.f32 %v16874_v32, %v16810_v62 }
 0x846   : > { %16397 = vst.msk [vmem:[#allocation5 + $0x150] sm:$0xff] %vm920_vm0, %v16183_v9  ;;  %v16185_v7 = vpop.f32.mrb[251].mxu1  ;;  %v16906_v51 = vadd.f32 %v16874_v32, %v16842_v1  ;;  %v16715_v60 = vadd.f32 %v16874_v32, %v16651_v34  ;;  %v16843_v45 = vadd.f32 %v16811_v2, %v16778_v14  ;;  %v16875_v11 = vld [vmem:[#allocation5 + $0x130] sm:$0xff]  ;;  %v16652_v39 = vadd.f32 %v16811_v2, %v16588_v20 }
 0x847   : > { %v16938_v17 = vld [vmem:[#allocation5 + $0x129] sm:$0xff]  ;;  %v16939_v4 = vld [vmem:[#allocation5 + $0x131] sm:$0xff]  ;;  %v16526_v29 = vadd.f32 %v16875_v11, %v16811_v2 }
 0x848   : > { %v16970_v5 = vadd.f32 %v16938_v17, %v16906_v51  ;;  %v16907_v53 = vadd.f32 %v16875_v11, %v16843_v45  ;;  %v16716_v42 = vadd.f32 %v16875_v11, %v16652_v39  ;;  %v16779_v6 = vadd.f32 %v16938_v17, %v16715_v60 }
 0x849   : > { %v16589_v21 = vadd.f32 %v16938_v17, %v16525_v12  ;;  %v16590_v56 = vadd.f32 %v16939_v4, %v16526_v29 }
 0x84a   : > { %v17194_v16 = vmul.f32 %v17037_v50, %v16970_v5  ;;  %v16971_v46 = vadd.f32 %v16939_v4, %v16907_v53  ;;  %v16780_v44 = vadd.f32 %v16939_v4, %v16716_v42  ;;  %v17052_v50 = vpop.permute.xlu1 %17051 }
 0x84b   : > { %v16812_v52 = vld [vmem:[#allocation5 + $0x147] sm:$0xff]  ;;  %v16188_v43 = vpop.f32.mrb[252].mxu1 }
 0x84c   : > { %v17233_v48 = vadd.f32 %v26141_v18, %v17194_v16  ;;  %v16844_v31 = vadd.f32 %v16812_v52, %v16779_v6  ;;  %v16876_v10 = vld [vmem:[#allocation5 + $0x148] sm:$0xff]  ;;  %v17195_v57 = vmul.f32 %v17042_v15, %v16971_v46  ;;  %16398 = vst.msk [vmem:[#allocation5 + $0x168] sm:$0xff] %vm920_vm0, %v16188_v43  ;;  %v16190_v8 = vpop.f32.mrb[253].mxu1  ;;  %v16653_v49 = vadd.f32 %v16812_v52, %v16589_v21 }
 0x84d   : > { %v16191_v47 = vpop.f32.mrb[254].mxu1  ;;  %v16813_v63 = vld [vmem:[#allocation5 + $0x14f] sm:$0xff]  ;;  %v16527_v38 = vadd.f32 %v16876_v10, %v16812_v52  ;;  %v17057_v52 = vpop.permute.xlu0 %17056 }
 0x84e   : > { %v17265_v54 = vmax.f32 %v17233_v48, 0.0  ;;  %v16908_v36 = vadd.f32 %v16876_v10, %v16844_v31  ;;  %v17234_v28 = vadd.f32 %v26141_v18, %v17195_v57  ;;  %16399 = vst.msk [vmem:[#allocation5 + $0x170] sm:$0xff] %vm920_vm0, %v16191_v47  ;;  %v16845_v61 = vadd.f32 %v16813_v63, %v16780_v44  ;;  %v16877_v27 = vld [vmem:[#allocation5 + $0x150] sm:$0xff]  ;;  %v16193_v24 = vpop.f32.mrb[255].mxu1 }
 0x84f   : > { %v16940_v26 = vld [vmem:[#allocation5 + $0x149] sm:$0xff]  ;;  %v16654_v40 = vadd.f32 %v16813_v63, %v16590_v56  ;;  %v16717_v19 = vadd.f32 %v16876_v10, %v16653_v49  ;;  %v16941_v33 = vld [vmem:[#allocation5 + $0x151] sm:$0xff]  ;;  %v16528_v37 = vadd.f32 %v16877_v27, %v16813_v63  ;;  %v17062_v49 = vpop.permute.xlu1 %17061 }
 0x850   : > { %17297 = vst.msk [vmem:[%s26149_s24] sm:$0xff] %vm920_vm0, %v17265_v54  ;;  %v16972_v3 = vadd.f32 %v16940_v26, %v16908_v36  ;;  %v17266_v41 = vmax.f32 %v17234_v28, 0.0  ;;  %v16909_v59 = vadd.f32 %v16877_v27, %v16845_v61  ;;  %v16591_v32 = vadd.f32 %v16940_v26, %v16527_v38 }
 0x851   : > { %v16718_v58 = vadd.f32 %v16877_v27, %v16654_v40  ;;  %v16781_v23 = vadd.f32 %v16940_v26, %v16717_v19  ;;  %v16592_v12 = vadd.f32 %v16941_v33, %v16528_v37 }
 0x852   : > { %v17196_v13 = vmul.f32 %v17047_v0, %v16972_v3  ;;  %17298 = vst.msk [vmem:[%s26149_s24 + $0x8] sm:$0xff] %vm920_vm0, %v17266_v41  ;;  %v16973_v25 = vadd.f32 %v16941_v33, %v16909_v59 }
 0x853   : > { %v16433_v22 = vld [vmem:[#allocation5 + $0x167] sm:$0xff]  ;;  %v16196_v62 = vpop.f32.mrb[0].mxu1  ;;  %v16782_v9 = vadd.f32 %v16941_v33, %v16718_v58 }
 0x854   : > { %v16497_v55 = vld [vmem:[#allocation5 + $0x168] sm:$0xff]  ;;  %v17235_v35 = vadd.f32 %v26141_v18, %v17196_v13  ;;  %v17197_v30 = vmul.f32 %v17052_v50, %v16973_v25  ;;  %v16846_v1 = vadd.f32 %v16781_v23, %v16433_v22  ;;  %16400 = vst.msk [vmem:[#allocation5 + $0x188] sm:$0xff] %vm920_vm0, %v16196_v62  ;;  %v16198_v34 = vpop.f32.mrb[1].mxu1  ;;  %v16655_v7 = vadd.f32 %v16591_v32, %v16433_v22  ;;  %v17067_v62 = vpop.permute.xlu0 %17066 }
 0x855   : > { %v16434_v14 = vld [vmem:[#allocation5 + $0x16f] sm:$0xff]  ;;  %v16199_v2 = vpop.f32.mrb[2].mxu1  ;;  %v16529_v60 = vadd.f32 %v16497_v55, %v16433_v22 }
 0x856   : > { %v16498_v20 = vld [vmem:[#allocation5 + $0x170] sm:$0xff]  ;;  %v17267_v51 = vmax.f32 %v17235_v35, 0.0  ;;  %v17236_v45 = vadd.f32 %v26141_v18, %v17197_v30  ;;  %16401 = vst.msk [vmem:[#allocation5 + $0x190] sm:$0xff] %vm920_vm0, %v16199_v2  ;;  %v16201_v11 = vpop.f32.mrb[3].mxu1  ;;  %v16847_v17 = vadd.f32 %v16782_v9, %v16434_v14  ;;  %v16910_v5 = vadd.f32 %v16846_v1, %v16497_v55 }
 0x857   : > { %v16561_v39 = vld [vmem:[#allocation5 + $0x169] sm:$0xff]  ;;  %v16656_v53 = vadd.f32 %v16592_v12, %v16434_v14  ;;  %v16719_v42 = vadd.f32 %v16655_v7, %v16497_v55  ;;  %v16530_v15 = vadd.f32 %v16498_v20, %v16434_v14  ;;  %v16562_v46 = vld [vmem:[#allocation5 + $0x171] sm:$0xff]  ;;  %v17072_v14 = vpop.permute.xlu1 %17071 }
 0x858   : > { %17299 = vst.msk [vmem:[%s26149_s24 + $0x10] sm:$0xff] %vm920_vm0, %v17267_v51  ;;  %v17268_v4 = vmax.f32 %v17236_v45, 0.0  ;;  %v16911_v29 = vadd.f32 %v16847_v17, %v16498_v20  ;;  %v16974_v16 = vadd.f32 %v16910_v5, %v16561_v39  ;;  %v16593_v21 = vadd.f32 %v16561_v39, %v16529_v60 }
 0x859   : > { %v16720_v6 = vadd.f32 %v16656_v53, %v16498_v20  ;;  %v16783_v43 = vadd.f32 %v16719_v42, %v16561_v39  ;;  %v16594_v8 = vadd.f32 %v16562_v46, %v16530_v15 }
 0x85a   : > { %17300 = vst.msk [vmem:[%s26149_s24 + $0x18] sm:$0xff] %vm920_vm0, %v17268_v4  ;;  %v16975_v44 = vadd.f32 %v16911_v29, %v16562_v46  ;;  %v17198_v48 = vmul.f32 %v17057_v52, %v16974_v16  ;;  %v17077_v52 = vpop.permute.xlu0 %17076 }
 0x85b   : > { %v16435_v31 = vld [vmem:[#allocation5 + $0x187] sm:$0xff]  ;;  %v16204_v57 = vpop.f32.mrb[4].mxu1  ;;  %v16784_v61 = vadd.f32 %v16720_v6, %v16562_v46 }
 0x85c   : > { %v16499_v10 = vld [vmem:[#allocation5 + $0x188] sm:$0xff]  ;;  %v16657_v0 = vadd.f32 %v16593_v21, %v16435_v31  ;;  %v16848_v47 = vadd.f32 %v16783_v43, %v16435_v31  ;;  %16402 = vst.msk [vmem:[#allocation5 + $0x1a8] sm:$0xff] %vm920_vm0, %v16204_v57  ;;  %v16206_v63 = vpop.f32.mrb[5].mxu1  ;;  %v17199_v56 = vmul.f32 %v17062_v49, %v16975_v44  ;;  %v17237_v54 = vadd.f32 %v26141_v18, %v17198_v48 }
 0x85d   : > { %v16436_v36 = vld [vmem:[#allocation5 + $0x18f] sm:$0xff]  ;;  %v16207_v27 = vpop.f32.mrb[6].mxu1  ;;  %v16531_v24 = vadd.f32 %v16499_v10, %v16435_v31 }
 0x85e   : > { %v16500_v28 = vld [vmem:[#allocation5 + $0x190] sm:$0xff]  ;;  %v16721_v26 = vadd.f32 %v16657_v0, %v16499_v10  ;;  %v16658_v40 = vadd.f32 %v16594_v8, %v16436_v36  ;;  %16403 = vst.msk [vmem:[#allocation5 + $0x1b0] sm:$0xff] %vm920_vm0, %v16207_v27  ;;  %v16209_v19 = vpop.f32.mrb[7].mxu1  ;;  %v17238_v38 = vadd.f32 %v26141_v18, %v17199_v56  ;;  %v17269_v3 = vmax.f32 %v17237_v54, 0.0  ;;  %v17082_v56 = vpop.permute.xlu1 %17081 }
 0x85f   : > { %v16563_v41 = vld [vmem:[#allocation5 + $0x189] sm:$0xff]  ;;  %v16849_v59 = vadd.f32 %v16784_v61, %v16436_v36  ;;  %v16912_v33 = vadd.f32 %v16848_v47, %v16499_v10  ;;  %v16532_v58 = vadd.f32 %v16500_v28, %v16436_v36  ;;  %v16564_v22 = vld [vmem:[#allocation5 + $0x191] sm:$0xff] }
 0x860   : > { %v17270_v37 = vmax.f32 %v17238_v38, 0.0  ;;  %17301 = vst.msk [vmem:[%s26149_s24 + $0x20] sm:$0xff] %vm920_vm0, %v17269_v3  ;;  %v16722_v13 = vadd.f32 %v16658_v40, %v16500_v28  ;;  %v16595_v55 = vadd.f32 %v16563_v41, %v16531_v24  ;;  %v16785_v50 = vadd.f32 %v16721_v26, %v16563_v41 }
 0x861   : > { %v16913_v25 = vadd.f32 %v16849_v59, %v16500_v28  ;;  %v16976_v23 = vadd.f32 %v16912_v33, %v16563_v41  ;;  %v16596_v12 = vadd.f32 %v16564_v22, %v16532_v58 }
 0x862   : > { %17302 = vst.msk [vmem:[%s26149_s24 + $0x28] sm:$0xff] %vm920_vm0, %v17270_v37  ;;  %v16786_v7 = vadd.f32 %v16722_v13, %v16564_v22 }
 0x863   : > { %v16977_v32 = vadd.f32 %v16913_v25, %v16564_v22  ;;  %v17200_v35 = vmul.f32 %v17067_v62, %v16976_v23  ;;  %v16437_v30 = vld [vmem:[#allocation5 + $0x1a7] sm:$0xff]  ;;  %v16212_v34 = vpop.f32.mrb[8].mxu1 }
 0x864   : > { %v16501_v1 = vld [vmem:[#allocation5 + $0x1a8] sm:$0xff]  ;;  %v16659_v20 = vadd.f32 %v16595_v55, %v16437_v30  ;;  %v16850_v9 = vadd.f32 %v16785_v50, %v16437_v30  ;;  %16404 = vst.msk [vmem:[#allocation5 + $0x1c8] sm:$0xff] %vm920_vm0, %v16212_v34  ;;  %v16214_v2 = vpop.f32.mrb[9].mxu1  ;;  %v17087_v50 = vpop.permute.xlu0 %17086 }
 0x865   : > { %v17201_v51 = vmul.f32 %v17072_v14, %v16977_v32  ;;  %v17239_v60 = vadd.f32 %v26141_v18, %v17200_v35  ;;  %v16438_v45 = vld [vmem:[#allocation5 + $0x1af] sm:$0xff]  ;;  %v16215_v11 = vpop.f32.mrb[10].mxu1  ;;  %v16533_v39 = vadd.f32 %v16501_v1, %v16437_v30 }
 0x866   : > { %v16723_v17 = vadd.f32 %v16659_v20, %v16501_v1  ;;  %v16914_v5 = vadd.f32 %v16850_v9, %v16501_v1  ;;  %v16502_v53 = vld [vmem:[#allocation5 + $0x1b0] sm:$0xff]  ;;  %16405 = vst.msk [vmem:[#allocation5 + $0x1d0] sm:$0xff] %vm920_vm0, %v16215_v11  ;;  %v16217_v42 = vpop.f32.mrb[11].mxu1  ;;  %v16660_v16 = vadd.f32 %v16596_v12, %v16438_v45  ;;  %v16851_v6 = vadd.f32 %v16786_v7, %v16438_v45  ;;  %v17092_v7 = vpop.permute.xlu1 %17091 }
 0x867   : > { %v17240_v15 = vadd.f32 %v26141_v18, %v17201_v51  ;;  %v17271_v4 = vmax.f32 %v17239_v60, 0.0  ;;  %v16565_v29 = vld [vmem:[#allocation5 + $0x1a9] sm:$0xff]  ;;  %v16534_v43 = vadd.f32 %v16502_v53, %v16438_v45  ;;  %v16566_v31 = vld [vmem:[#allocation5 + $0x1b1] sm:$0xff] }
 0x868   : > { %v16978_v46 = vadd.f32 %v16914_v5, %v16565_v29  ;;  %v16724_v44 = vadd.f32 %v16660_v16, %v16502_v53  ;;  %v16915_v48 = vadd.f32 %v16851_v6, %v16502_v53  ;;  %v16597_v10 = vadd.f32 %v16565_v29, %v16533_v39 }
 0x869   : > { %v17272_v21 = vmax.f32 %v17240_v15, 0.0  ;;  %17303 = vst.msk [vmem:[%s26149_s24 + $0x30] sm:$0xff] %vm920_vm0, %v17271_v4  ;;  %v16787_v57 = vadd.f32 %v16723_v17, %v16565_v29  ;;  %v16598_v27 = vadd.f32 %v16566_v31, %v16534_v43 }
 0x86a   : > { %v17202_v8 = vmul.f32 %v17077_v52, %v16978_v46  ;;  %v16979_v49 = vadd.f32 %v16915_v48, %v16566_v31  ;;  %v16788_v24 = vadd.f32 %v16724_v44, %v16566_v31  ;;  %v17097_v31 = vpop.permute.xlu0 %17096 }
 0x86b   : > { %17304 = vst.msk [vmem:[%s26149_s24 + $0x38] sm:$0xff] %vm920_vm0, %v17272_v21  ;;  %v16439_v0 = vld [vmem:[#allocation5 + $0x1c7] sm:$0xff]  ;;  %v16220_v63 = vpop.f32.mrb[12].mxu1 }
 0x86c   : > { %v16503_v47 = vld [vmem:[#allocation5 + $0x1c8] sm:$0xff]  ;;  %v17241_v54 = vadd.f32 %v26141_v18, %v17202_v8  ;;  %v16661_v36 = vadd.f32 %v16597_v10, %v16439_v0  ;;  %v16852_v28 = vadd.f32 %v16787_v57, %v16439_v0  ;;  %16406 = vst.msk [vmem:[#allocation5 + $0x1e8] sm:$0xff] %vm920_vm0, %v16220_v63  ;;  %v16222_v61 = vpop.f32.mrb[13].mxu1  ;;  %v17203_v26 = vmul.f32 %v17082_v56, %v16979_v49 }
 0x86d   : > { %v16440_v40 = vld [vmem:[#allocation5 + $0x1cf] sm:$0xff]  ;;  %v16223_v19 = vpop.f32.mrb[14].mxu1  ;;  %v16535_v3 = vadd.f32 %v16503_v47, %v16439_v0 }
 0x86e   : > { %v17273_v38 = vmax.f32 %v17241_v54, 0.0  ;;  %v16725_v41 = vadd.f32 %v16661_v36, %v16503_v47  ;;  %v16916_v59 = vadd.f32 %v16852_v28, %v16503_v47  ;;  %v16504_v33 = vld [vmem:[#allocation5 + $0x1d0] sm:$0xff]  ;;  %16407 = vst.msk [vmem:[#allocation5 + $0x1f0] sm:$0xff] %vm920_vm0, %v16223_v19  ;;  %v16225_v58 = vpop.f32.mrb[15].mxu1  ;;  %v17242_v37 = vadd.f32 %v26141_v18, %v17203_v26 }
 0x86f   : > { %v16567_v13 = vld [vmem:[#allocation5 + $0x1c9] sm:$0xff]  ;;  %v16662_v25 = vadd.f32 %v16598_v27, %v16440_v40  ;;  %v16853_v23 = vadd.f32 %v16788_v24, %v16440_v40  ;;  %v16536_v62 = vadd.f32 %v16504_v33, %v16440_v40  ;;  %v16568_v30 = vld [vmem:[#allocation5 + $0x1d1] sm:$0xff]  ;;  %v17102_v27 = vpop.permute.xlu1 %17101 }
 0x870   : > { %17305 = vst.msk [vmem:[%s26149_s24 + $0x40] sm:$0xff] %vm920_vm0, %v17273_v38  ;;  %v16980_v22 = vadd.f32 %v16916_v59, %v16567_v13  ;;  %v17274_v55 = vmax.f32 %v17242_v37, 0.0  ;;  %v16599_v1 = vadd.f32 %v16567_v13, %v16535_v3  ;;  %v16789_v34 = vadd.f32 %v16725_v41, %v16567_v13 }
 0x871   : > { %v16726_v32 = vadd.f32 %v16662_v25, %v16504_v33  ;;  %v16917_v35 = vadd.f32 %v16853_v23, %v16504_v33  ;;  %v16600_v39 = vadd.f32 %v16568_v30, %v16536_v62 }
 0x872   : > { %v17204_v14 = vmul.f32 %v17087_v50, %v16980_v22  ;;  %17306 = vst.msk [vmem:[%s26149_s24 + $0x48] sm:$0xff] %vm920_vm0, %v17274_v55 }
 0x873   : > { %v16981_v20 = vadd.f32 %v16917_v35, %v16568_v30  ;;  %v16441_v9 = vld [vmem:[#allocation5 + $0x1e7] sm:$0xff]  ;;  %v16228_v12 = vpop.f32.mrb[16].mxu1  ;;  %v16790_v17 = vadd.f32 %v16726_v32, %v16568_v30  ;;  %v17107_v30 = vpop.permute.xlu0 %17106 }
 0x874   : > { %v16505_v2 = vld [vmem:[#allocation5 + $0x1e8] sm:$0xff]  ;;  %v17243_v51 = vadd.f32 %v26141_v18, %v17204_v14  ;;  %v16663_v60 = vadd.f32 %v16599_v1, %v16441_v9  ;;  %v16854_v45 = vadd.f32 %v16789_v34, %v16441_v9  ;;  %16408 = vst.msk [vmem:[#allocation5 + $0x208] sm:$0xff] %vm920_vm0, %v16228_v12  ;;  %v16230_v11 = vpop.f32.mrb[17].mxu1 }
 0x875   : > { %v17205_v5 = vmul.f32 %v17092_v7, %v16981_v20  ;;  %v16442_v53 = vld [vmem:[#allocation5 + $0x1ef] sm:$0xff]  ;;  %v16231_v42 = vpop.f32.mrb[18].mxu1  ;;  %v16537_v4 = vadd.f32 %v16505_v2, %v16441_v9 }
 0x876   : > { %v17275_v15 = vmax.f32 %v17243_v51, 0.0  ;;  %v16727_v29 = vadd.f32 %v16663_v60, %v16505_v2  ;;  %v16918_v16 = vadd.f32 %v16854_v45, %v16505_v2  ;;  %v16506_v6 = vld [vmem:[#allocation5 + $0x1f0] sm:$0xff]  ;;  %16409 = vst.msk [vmem:[#allocation5 + $0x210] sm:$0xff] %vm920_vm0, %v16231_v42  ;;  %v16233_v46 = vpop.f32.mrb[19].mxu1  ;;  %v16664_v43 = vadd.f32 %v16600_v39, %v16442_v53  ;;  %v17112_v39 = vpop.permute.xlu1 %17111 }
 0x877   : > { %v17244_v21 = vadd.f32 %v26141_v18, %v17205_v5  ;;  %v16569_v52 = vld [vmem:[#allocation5 + $0x1e9] sm:$0xff]  ;;  %v16855_v44 = vadd.f32 %v16790_v17, %v16442_v53  ;;  %v16538_v57 = vadd.f32 %v16506_v6, %v16442_v53  ;;  %v16570_v0 = vld [vmem:[#allocation5 + $0x1f1] sm:$0xff] }
 0x878   : > { %17307 = vst.msk [vmem:[%s26149_s24 + $0x50] sm:$0xff] %vm920_vm0, %v17275_v15  ;;  %v16982_v48 = vadd.f32 %v16918_v16, %v16569_v52  ;;  %v16728_v8 = vadd.f32 %v16664_v43, %v16506_v6  ;;  %v16601_v47 = vadd.f32 %v16569_v52, %v16537_v4  ;;  %v16791_v63 = vadd.f32 %v16727_v29, %v16569_v52  ;;  %v26210_v4 = vld [vmem:[%s26392_s6] ss:$0 sm:$0xff] }
 0x879   : > { %v17276_v10 = vmax.f32 %v17244_v21, 0.0  ;;  %v16919_v49 = vadd.f32 %v16855_v44, %v16506_v6  ;;  %v16602_v38 = vadd.f32 %v16570_v0, %v16538_v57 }
 0x87a   : > { %v17206_v56 = vmul.f32 %v17097_v31, %v16982_v48  ;;  %v16792_v3 = vadd.f32 %v16728_v8, %v16570_v0 }
 0x87b   : > { %17308 = vst.msk [vmem:[%s26149_s24 + $0x58] sm:$0xff] %vm920_vm0, %v17276_v10  ;;  %v16983_v54 = vadd.f32 %v16919_v49, %v16570_v0  ;;  %v16443_v36 = vld [vmem:[#allocation5 + $0x207] sm:$0xff]  ;;  %v16236_v61 = vpop.f32.mrb[20].mxu1 }
 0x87c   : > { %v16507_v28 = vld [vmem:[#allocation5 + $0x208] sm:$0xff]  ;;  %v17245_v24 = vadd.f32 %v26141_v18, %v17206_v56  ;;  %v16665_v26 = vadd.f32 %v16601_v47, %v16443_v36  ;;  %v16856_v40 = vadd.f32 %v16791_v63, %v16443_v36  ;;  %16410 = vst.msk [vmem:[#allocation5 + $0x228] sm:$0xff] %vm920_vm0, %v16236_v61  ;;  %v16238_v19 = vpop.f32.mrb[21].mxu1 }
 0x87d   : > { %v17207_v41 = vmul.f32 %v17102_v27, %v16983_v54  ;;  %v16444_v59 = vld [vmem:[#allocation5 + $0x20f] sm:$0xff]  ;;  %v16239_v33 = vpop.f32.mrb[22].mxu1  ;;  %v16539_v37 = vadd.f32 %v16507_v28, %v16443_v36  ;;  %v17117_v27 = vpop.permute.xlu0 %17116 }
 0x87e   : > { %v17277_v58 = vmax.f32 %v17245_v24, 0.0  ;;  %v16729_v13 = vadd.f32 %v16665_v26, %v16507_v28  ;;  %v16920_v25 = vadd.f32 %v16856_v40, %v16507_v28  ;;  %v16508_v23 = vld [vmem:[#allocation5 + $0x210] sm:$0xff]  ;;  %16411 = vst.msk [vmem:[#allocation5 + $0x230] sm:$0xff] %vm920_vm0, %v16239_v33  ;;  %v16241_v22 = vpop.f32.mrb[23].mxu1  ;;  %v16666_v62 = vadd.f32 %v16602_v38, %v16444_v59 }
 0x87f   : > { %v17246_v55 = vadd.f32 %v26141_v18, %v17207_v41  ;;  %v16571_v50 = vld [vmem:[#allocation5 + $0x209] sm:$0xff]  ;;  %v16857_v32 = vadd.f32 %v16792_v3, %v16444_v59  ;;  %v16540_v34 = vadd.f32 %v16508_v23, %v16444_v59  ;;  %v16572_v9 = vld [vmem:[#allocation5 + $0x211] sm:$0xff] }
 0x880   : > { %17309 = vst.msk [vmem:[%s26149_s24 + $0x60] sm:$0xff] %vm920_vm0, %v17277_v58  ;;  %v16984_v35 = vadd.f32 %v16920_v25, %v16571_v50  ;;  %v16730_v14 = vadd.f32 %v16666_v62, %v16508_v23  ;;  %v16603_v2 = vadd.f32 %v16571_v50, %v16539_v37  ;;  %v16793_v12 = vadd.f32 %v16729_v13, %v16571_v50  ;;  %v17122_v50 = vpop.permute.xlu1 %17121 }
 0x881   : > { %v17278_v1 = vmax.f32 %v17246_v55, 0.0  ;;  %v16921_v20 = vadd.f32 %v16857_v32, %v16508_v23  ;;  %v16604_v29 = vadd.f32 %v16572_v9, %v16540_v34 }
 0x882   : > { %v17208_v7 = vmul.f32 %v17107_v30, %v16984_v35  ;;  %v16794_v16 = vadd.f32 %v16730_v14, %v16572_v9 }
 0x883   : > { %17310 = vst.msk [vmem:[%s26149_s24 + $0x68] sm:$0xff] %vm920_vm0, %v17278_v1  ;;  %v16985_v51 = vadd.f32 %v16921_v20, %v16572_v9  ;;  %v16445_v60 = vld [vmem:[#allocation5 + $0x227] sm:$0xff]  ;;  %v16244_v11 = vpop.f32.mrb[24].mxu1 }
 0x884   : > { %v16509_v45 = vld [vmem:[#allocation5 + $0x228] sm:$0xff]  ;;  %v17247_v17 = vadd.f32 %v26141_v18, %v17208_v7  ;;  %v16667_v53 = vadd.f32 %v16603_v2, %v16445_v60  ;;  %v16858_v42 = vadd.f32 %v16793_v12, %v16445_v60  ;;  %16412 = vst.msk [vmem:[#allocation5 + $0x248] sm:$0xff] %vm920_vm0, %v16244_v11  ;;  %v16246_v15 = vpop.f32.mrb[25].mxu1 }
 0x885   : > { %v16541_v5 = vadd.f32 %v16509_v45, %v16445_v60  ;;  %v17209_v6 = vmul.f32 %v17112_v39, %v16985_v51  ;;  %v16446_v46 = vld [vmem:[#allocation5 + $0x22f] sm:$0xff]  ;;  %v16247_v43 = vpop.f32.mrb[26].mxu1 }
 0x886   : > { %v16510_v21 = vld [vmem:[#allocation5 + $0x230] sm:$0xff]  ;;  %v17279_v44 = vmax.f32 %v17247_v17, 0.0  ;;  %v16731_v48 = vadd.f32 %v16667_v53, %v16509_v45  ;;  %v16922_v31 = vadd.f32 %v16858_v42, %v16509_v45  ;;  %16413 = vst.msk [vmem:[#allocation5 + $0x250] sm:$0xff] %vm920_vm0, %v16247_v43  ;;  %v20282_v10 = vpop.f32.mrb[16].mxu0  ;;  %v16249_v57 = vpop.f32.mrb[27].mxu1  ;;  %v16668_v0 = vadd.f32 %v16604_v29, %v16446_v46 }
 0x887   : > { %v16573_v52 = vld [vmem:[#allocation5 + $0x229] sm:$0xff]  ;;  %v17248_v8 = vadd.f32 %v26141_v18, %v17209_v6  ;;  %v16542_v49 = vadd.f32 %v16510_v21, %v16446_v46  ;;  %v16859_v47 = vadd.f32 %v16794_v16, %v16446_v46  ;;  %v9236_v63 = vpop.f32.mrb[17].mxu0  ;;  %v9404_v28 = vadd.f32 %v20282_v10, %v26210_v4  ;;  %v16574_v3 = vld [vmem:[#allocation5 + $0x231] sm:$0xff]  ;;  %v17127_v43 = vpop.permute.xlu0 %17126 }
 0x888   : > { %17311 = vst.msk [vmem:[%s26149_s24 + $0x70] sm:$0xff] %vm920_vm0, %v17279_v44  ;;  %v16605_v56 = vadd.f32 %v16573_v52, %v16541_v5  ;;  %v16795_v54 = vadd.f32 %v16731_v48, %v16573_v52  ;;  %v16986_v36 = vadd.f32 %v16922_v31, %v16573_v52  ;;  %v20283_v61 = vpop.f32.mrb[18].mxu0  ;;  %v16732_v26 = vadd.f32 %v16668_v0, %v16510_v21 }
 0x889   : > { %v17280_v24 = vmax.f32 %v17248_v8, 0.0  ;;  %v16923_v40 = vadd.f32 %v16859_v47, %v16510_v21  ;;  %v9402_v19 = vadd.f32 %v26210_v4, %v9236_v63  ;;  %v9239_v38 = vpop.f32.mrb[19].mxu0  ;;  %v9436_v59 = vmax.f32 %v9404_v28, 0.0 }
 0x88a   : > { %v17210_v41 = vmul.f32 %v17117_v27, %v16986_v36  ;;  %v9405_v33 = vadd.f32 %v20283_v61, %v26210_v4  ;;  %v9403_v58 = vadd.f32 %v26210_v4, %v9239_v38  ;;  %v16606_v37 = vadd.f32 %v16574_v3, %v16542_v49 }
 0x88b   : > { %17312 = vst.msk [vmem:[%s26149_s24 + $0x78] sm:$0xff] %vm920_vm0, %v17280_v24  ;;  %v16987_v13 = vadd.f32 %v16923_v40, %v16574_v3  ;;  %v16447_v25 = vld [vmem:[#allocation5 + $0x247] sm:$0xff]  ;;  %v9434_v22 = vmax.f32 %v9402_v19, 0.0  ;;  %v16252_v55 = vpop.f32.mrb[28].mxu1  ;;  %9468 = vst.msk [vmem:[%s26221_s29 + $0x10] sm:$0xff] %vm920_vm0, %v9436_v59  ;;  %v16796_v34 = vadd.f32 %v16732_v26, %v16574_v3  ;;  %v17132_v24 = vpop.permute.xlu1 %17131 }
 0x88c   : > { %v16511_v23 = vld [vmem:[#allocation5 + $0x248] sm:$0xff]  ;;  %v17249_v62 = vadd.f32 %v26141_v18, %v17210_v41  ;;  %v16669_v35 = vadd.f32 %v16605_v56, %v16447_v25  ;;  %v16860_v30 = vadd.f32 %v16795_v54, %v16447_v25  ;;  %16414 = vst.msk [vmem:[#allocation5 + $0x268] sm:$0xff] %vm920_vm0, %v16252_v55  ;;  %v16254_v1 = vpop.f32.mrb[29].mxu1  ;;  %v9437_v12 = vmax.f32 %v9405_v33, 0.0 }
 0x88d   : > { %v16543_v32 = vadd.f32 %v16511_v23, %v16447_v25  ;;  %v17211_v14 = vmul.f32 %v17122_v50, %v16987_v13  ;;  %v16448_v20 = vld [vmem:[#allocation5 + $0x24f] sm:$0xff]  ;;  %9466 = vst.msk [vmem:[%s26221_s29] sm:$0xff] %vm920_vm0, %v9434_v22  ;;  %v9435_v7 = vmax.f32 %v9403_v58, 0.0  ;;  %v16255_v51 = vpop.f32.mrb[30].mxu1 }
 0x88e   : > { %v16512_v9 = vld [vmem:[#allocation5 + $0x250] sm:$0xff]  ;;  %v17281_v60 = vmax.f32 %v17249_v62, 0.0  ;;  %v16733_v45 = vadd.f32 %v16669_v35, %v16511_v23  ;;  %v16924_v11 = vadd.f32 %v16860_v30, %v16511_v23  ;;  %16415 = vst.msk [vmem:[#allocation5 + $0x270] sm:$0xff] %vm920_vm0, %v16255_v51  ;;  %v20286_v39 = vpop.f32.mrb[20].mxu0  ;;  %v16257_v17 = vpop.f32.mrb[31].mxu1  ;;  %v16670_v42 = vadd.f32 %v16606_v37, %v16448_v20  ;;  %9469 = vst.msk [vmem:[%s26221_s29 + $0x18] sm:$0xff] %vm920_vm0, %v9437_v12 }
 0x88f   : > { %v16575_v2 = vld [vmem:[#allocation5 + $0x249] sm:$0xff]  ;;  %v17250_v5 = vadd.f32 %v26141_v18, %v17211_v14  ;;  %v16544_v53 = vadd.f32 %v16512_v9, %v16448_v20  ;;  %v16861_v15 = vadd.f32 %v16796_v34, %v16448_v20  ;;  %9467 = vst.msk [vmem:[%s26221_s29 + $0x8] sm:$0xff] %vm920_vm0, %v9435_v7  ;;  %v9252_v29 = vpop.f32.mrb[21].mxu0  ;;  %v9408_v21 = vadd.f32 %v20286_v39, %v26210_v4  ;;  %v16576_v8 = vld [vmem:[#allocation5 + $0x251] sm:$0xff]  ;;  %v17137_v51 = vpop.permute.xlu0 %17136 }
 0x890   : > { %17313 = vst.msk [vmem:[%s26149_s24 + $0x80] sm:$0xff] %vm920_vm0, %v17281_v60  ;;  %v16607_v16 = vadd.f32 %v16575_v2, %v16543_v32  ;;  %v16797_v6 = vadd.f32 %v16733_v45, %v16575_v2  ;;  %v16988_v46 = vadd.f32 %v16924_v11, %v16575_v2  ;;  %v20287_v52 = vpop.f32.mrb[22].mxu0  ;;  %v16734_v48 = vadd.f32 %v16670_v42, %v16512_v9 }
 0x891   : > { %v17282_v44 = vmax.f32 %v17250_v5, 0.0  ;;  %v16925_v31 = vadd.f32 %v16861_v15, %v16512_v9  ;;  %v9406_v10 = vadd.f32 %v26210_v4, %v9252_v29  ;;  %v9255_v57 = vpop.f32.mrb[23].mxu0  ;;  %v9440_v0 = vmax.f32 %v9408_v21, 0.0 }
 0x892   : > { %v17212_v49 = vmul.f32 %v17127_v43, %v16988_v46  ;;  %v9409_v47 = vadd.f32 %v20287_v52, %v26210_v4  ;;  %v9407_v63 = vadd.f32 %v26210_v4, %v9255_v57  ;;  %v16608_v56 = vadd.f32 %v16576_v8, %v16544_v53 }
 0x893   : > { %17314 = vst.msk [vmem:[%s26149_s24 + $0x88] sm:$0xff] %vm920_vm0, %v17282_v44  ;;  %v16989_v54 = vadd.f32 %v16925_v31, %v16576_v8  ;;  %v16449_v36 = vld [vmem:[#allocation5 + $0x267] sm:$0xff]  ;;  %v9438_v61 = vmax.f32 %v9406_v10, 0.0  ;;  %v16260_v27 = vpop.f32.mrb[32].mxu1  ;;  %9472 = vst.msk [vmem:[%s26221_s29 + $0x30] sm:$0xff] %vm920_vm0, %v9440_v0  ;;  %v16798_v41 = vadd.f32 %v16734_v48, %v16576_v8  ;;  %v17142_v44 = vpop.permute.xlu1 %17141 }
 0x894   : > { %v16513_v28 = vld [vmem:[#allocation5 + $0x268] sm:$0xff]  ;;  %v17251_v26 = vadd.f32 %v26141_v18, %v17212_v49  ;;  %v16671_v19 = vadd.f32 %v16607_v16, %v16449_v36  ;;  %v16862_v38 = vadd.f32 %v16797_v6, %v16449_v36  ;;  %16416 = vst.msk [vmem:[#allocation5 + $0x288] sm:$0xff] %vm920_vm0, %v16260_v27  ;;  %v16262_v3 = vpop.f32.mrb[33].mxu1  ;;  %v9441_v13 = vmax.f32 %v9409_v47, 0.0 }
 0x895   : > { %v16545_v40 = vadd.f32 %v16513_v28, %v16449_v36  ;;  %v17213_v59 = vmul.f32 %v17132_v24, %v16989_v54  ;;  %v16450_v33 = vld [vmem:[#allocation5 + $0x26f] sm:$0xff]  ;;  %9470 = vst.msk [vmem:[%s26221_s29 + $0x20] sm:$0xff] %vm920_vm0, %v9438_v61  ;;  %v9439_v25 = vmax.f32 %v9407_v63, 0.0  ;;  %v16263_v23 = vpop.f32.mrb[34].mxu1 }
 0x896   : > { %v16514_v58 = vld [vmem:[#allocation5 + $0x270] sm:$0xff]  ;;  %v17283_v22 = vmax.f32 %v17251_v26, 0.0  ;;  %v16735_v55 = vadd.f32 %v16671_v19, %v16513_v28  ;;  %v16926_v50 = vadd.f32 %v16862_v38, %v16513_v28  ;;  %16417 = vst.msk [vmem:[#allocation5 + $0x290] sm:$0xff] %vm920_vm0, %v16263_v23  ;;  %v20290_v62 = vpop.f32.mrb[24].mxu0  ;;  %v16265_v32 = vpop.f32.mrb[35].mxu1  ;;  %v16672_v1 = vadd.f32 %v16608_v56, %v16450_v33  ;;  %9473 = vst.msk [vmem:[%s26221_s29 + $0x38] sm:$0xff] %vm920_vm0, %v9441_v13 }
 0x897   : > { %v16577_v37 = vld [vmem:[#allocation5 + $0x269] sm:$0xff]  ;;  %v17252_v35 = vadd.f32 %v26141_v18, %v17213_v59  ;;  %v16546_v30 = vadd.f32 %v16514_v58, %v16450_v33  ;;  %v16863_v34 = vadd.f32 %v16798_v41, %v16450_v33  ;;  %9471 = vst.msk [vmem:[%s26221_s29 + $0x28] sm:$0xff] %vm920_vm0, %v9439_v25  ;;  %v9268_v14 = vpop.f32.mrb[25].mxu0  ;;  %v9412_v12 = vadd.f32 %v20290_v62, %v26210_v4  ;;  %v16578_v5 = vld [vmem:[#allocation5 + $0x271] sm:$0xff]  ;;  %v17147_v23 = vpop.permute.xlu0 %17146 }
 0x898   : > { %17315 = vst.msk [vmem:[%s26149_s24 + $0x90] sm:$0xff] %vm920_vm0, %v17283_v22  ;;  %v16609_v20 = vadd.f32 %v16577_v37, %v16545_v40  ;;  %v16799_v9 = vadd.f32 %v16735_v55, %v16577_v37  ;;  %v16990_v2 = vadd.f32 %v16926_v50, %v16577_v37  ;;  %v20291_v7 = vpop.f32.mrb[26].mxu0  ;;  %v16736_v45 = vadd.f32 %v16672_v1, %v16514_v58 }
 0x899   : > { %v17284_v60 = vmax.f32 %v17252_v35, 0.0  ;;  %v16927_v11 = vadd.f32 %v16863_v34, %v16514_v58  ;;  %v9410_v39 = vadd.f32 %v26210_v4, %v9268_v14  ;;  %v9271_v17 = vpop.f32.mrb[27].mxu0  ;;  %v9444_v42 = vmax.f32 %v9412_v12, 0.0 }
 0x89a   : > { %v17214_v53 = vmul.f32 %v17137_v51, %v16990_v2  ;;  %v9413_v15 = vadd.f32 %v20291_v7, %v26210_v4  ;;  %v9411_v29 = vadd.f32 %v26210_v4, %v9271_v17  ;;  %v16610_v16 = vadd.f32 %v16578_v5, %v16546_v30 }
 0x89b   : > { %17316 = vst.msk [vmem:[%s26149_s24 + $0x98] sm:$0xff] %vm920_vm0, %v17284_v60  ;;  %v16991_v6 = vadd.f32 %v16927_v11, %v16578_v5  ;;  %v16451_v46 = vld [vmem:[#allocation5 + $0x287] sm:$0xff]  ;;  %v9442_v52 = vmax.f32 %v9410_v39, 0.0  ;;  %v16268_v43 = vpop.f32.mrb[36].mxu1  ;;  %9476 = vst.msk [vmem:[%s26221_s29 + $0x50] sm:$0xff] %vm920_vm0, %v9444_v42  ;;  %v16800_v49 = vadd.f32 %v16736_v45, %v16578_v5  ;;  %v17152_v60 = vpop.permute.xlu1 %17151 }
 0x89c   : > { %v16515_v21 = vld [vmem:[#allocation5 + $0x288] sm:$0xff]  ;;  %v17253_v48 = vadd.f32 %v26141_v18, %v17214_v53  ;;  %v16673_v10 = vadd.f32 %v16609_v20, %v16451_v46  ;;  %v16864_v57 = vadd.f32 %v16799_v9, %v16451_v46  ;;  %16418 = vst.msk [vmem:[#allocation5 + $0x2a8] sm:$0xff] %vm920_vm0, %v16268_v43  ;;  %v16270_v8 = vpop.f32.mrb[37].mxu1  ;;  %v9445_v54 = vmax.f32 %v9413_v15, 0.0 }
 0x89d   : > { %v16547_v31 = vadd.f32 %v16515_v21, %v16451_v46  ;;  %v17215_v0 = vmul.f32 %v17142_v44, %v16991_v6  ;;  %v16452_v47 = vld [vmem:[#allocation5 + $0x28f] sm:$0xff]  ;;  %9474 = vst.msk [vmem:[%s26221_s29 + $0x40] sm:$0xff] %vm920_vm0, %v9442_v52  ;;  %v9443_v36 = vmax.f32 %v9411_v29, 0.0  ;;  %v16271_v28 = vpop.f32.mrb[38].mxu1 }
 0x89e   : > { %v16516_v63 = vld [vmem:[#allocation5 + $0x290] sm:$0xff]  ;;  %v17285_v61 = vmax.f32 %v17253_v48, 0.0  ;;  %v16737_v27 = vadd.f32 %v16673_v10, %v16515_v21  ;;  %v16928_v24 = vadd.f32 %v16864_v57, %v16515_v21  ;;  %16419 = vst.msk [vmem:[#allocation5 + $0x2b0] sm:$0xff] %vm920_vm0, %v16271_v28  ;;  %v20294_v26 = vpop.f32.mrb[28].mxu0  ;;  %v16273_v40 = vpop.f32.mrb[39].mxu1  ;;  %v16674_v3 = vadd.f32 %v16610_v16, %v16452_v47  ;;  %9477 = vst.msk [vmem:[%s26221_s29 + $0x58] sm:$0xff] %vm920_vm0, %v9445_v54 }
 0x89f   : > { %v16579_v56 = vld [vmem:[#allocation5 + $0x289] sm:$0xff]  ;;  %v17254_v19 = vadd.f32 %v26141_v18, %v17215_v0  ;;  %v16548_v38 = vadd.f32 %v16516_v63, %v16452_v47  ;;  %v16865_v41 = vadd.f32 %v16800_v49, %v16452_v47  ;;  %9475 = vst.msk [vmem:[%s26221_s29 + $0x48] sm:$0xff] %vm920_vm0, %v9443_v36  ;;  %v9284_v59 = vpop.f32.mrb[29].mxu0  ;;  %v9416_v13 = vadd.f32 %v20294_v26, %v26210_v4  ;;  %v16580_v35 = vld [vmem:[#allocation5 + $0x291] sm:$0xff]  ;;  %v17157_v28 = vpop.permute.xlu0 %17156 }
 0x8a0   : > { %17317 = vst.msk [vmem:[%s26149_s24 + $0xa0] sm:$0xff] %vm920_vm0, %v17285_v61  ;;  %v16611_v33 = vadd.f32 %v16579_v56, %v16547_v31  ;;  %v16801_v58 = vadd.f32 %v16737_v27, %v16579_v56  ;;  %v16992_v37 = vadd.f32 %v16928_v24, %v16579_v56  ;;  %v20295_v25 = vpop.f32.mrb[30].mxu0  ;;  %v16738_v55 = vadd.f32 %v16674_v3, %v16516_v63  ;;  %v26298_v31 = vld [vmem:[%s26400_s14] ss:$0 sm:$0xff] }
 0x8a1   : > { %v17286_v22 = vmax.f32 %v17254_v19, 0.0  ;;  %v16929_v50 = vadd.f32 %v16865_v41, %v16516_v63  ;;  %v9414_v62 = vadd.f32 %v26210_v4, %v9284_v59  ;;  %v9287_v32 = vpop.f32.mrb[31].mxu0  ;;  %v9448_v1 = vmax.f32 %v9416_v13, 0.0 }
 0x8a2   : > { %v17216_v30 = vmul.f32 %v17147_v23, %v16992_v37  ;;  %v9417_v34 = vadd.f32 %v20295_v25, %v26210_v4  ;;  %v9415_v14 = vadd.f32 %v26210_v4, %v9287_v32  ;;  %v16612_v20 = vadd.f32 %v16580_v35, %v16548_v38 }
 0x8a3   : > { %17318 = vst.msk [vmem:[%s26149_s24 + $0xa8] sm:$0xff] %vm920_vm0, %v17286_v22  ;;  %v16993_v9 = vadd.f32 %v16929_v50, %v16580_v35  ;;  %v16453_v2 = vld [vmem:[#allocation5 + $0x2a7] sm:$0xff]  ;;  %v9446_v7 = vmax.f32 %v9414_v62, 0.0  ;;  %v16276_v51 = vpop.f32.mrb[40].mxu1  ;;  %9480 = vst.msk [vmem:[%s26221_s29 + $0x70] sm:$0xff] %vm920_vm0, %v9448_v1  ;;  %v16802_v53 = vadd.f32 %v16738_v55, %v16580_v35  ;;  %v17162_v22 = vpop.permute.xlu1 %17161 }
 0x8a4   : > { %v16517_v12 = vld [vmem:[#allocation5 + $0x2a8] sm:$0xff]  ;;  %v17255_v45 = vadd.f32 %v26141_v18, %v17216_v30  ;;  %v16675_v39 = vadd.f32 %v16611_v33, %v16453_v2  ;;  %v16866_v17 = vadd.f32 %v16801_v58, %v16453_v2  ;;  %16420 = vst.msk [vmem:[#allocation5 + $0x2c8] sm:$0xff] %vm920_vm0, %v16276_v51  ;;  %v16278_v5 = vpop.f32.mrb[41].mxu1  ;;  %v9449_v6 = vmax.f32 %v9417_v34, 0.0 }
 0x8a5   : > { %v16549_v11 = vadd.f32 %v16517_v12, %v16453_v2  ;;  %v17217_v42 = vmul.f32 %v17152_v60, %v16993_v9  ;;  %v16454_v15 = vld [vmem:[#allocation5 + $0x2af] sm:$0xff]  ;;  %9478 = vst.msk [vmem:[%s26221_s29 + $0x60] sm:$0xff] %vm920_vm0, %v9446_v7  ;;  %v9447_v46 = vmax.f32 %v9415_v14, 0.0  ;;  %v16279_v18 = vpop.f32.mrb[42].mxu1 }
 0x8a6   : > { %v16518_v29 = vld [vmem:[#allocation5 + $0x2b0] sm:$0xff]  ;;  %v17287_v21 = vmax.f32 %v17255_v45, 0.0  ;;  %v16739_v52 = vadd.f32 %v16675_v39, %v16517_v12  ;;  %v16930_v43 = vadd.f32 %v16866_v17, %v16517_v12  ;;  %16421 = vst.msk [vmem:[#allocation5 + $0x2d0] sm:$0xff] %vm920_vm0, %v16279_v18  ;;  %v20298_v44 = vpop.f32.mrb[32].mxu0  ;;  %v16281_v48 = vpop.f32.mrb[43].mxu1  ;;  %v16676_v8 = vadd.f32 %v16612_v20, %v16454_v15  ;;  %9481 = vst.msk [vmem:[%s26221_s29 + $0x78] sm:$0xff] %vm920_vm0, %v9449_v6 }
 0x8a7   : > { %v16581_v16 = vld [vmem:[#allocation5 + $0x2a9] sm:$0xff]  ;;  %v17256_v10 = vadd.f32 %v26298_v31, %v17217_v42  ;;  %v16550_v57 = vadd.f32 %v16518_v29, %v16454_v15  ;;  %v16867_v49 = vadd.f32 %v16802_v53, %v16454_v15  ;;  %9479 = vst.msk [vmem:[%s26221_s29 + $0x68] sm:$0xff] %vm920_vm0, %v9447_v46  ;;  %v9300_v0 = vpop.f32.mrb[33].mxu0  ;;  %v9420_v54 = vadd.f32 %v20298_v44, %v26210_v4  ;;  %v16582_v19 = vld [vmem:[#allocation5 + $0x2b1] sm:$0xff]  ;;  %v17167_v18 = vpop.permute.xlu0 %17166 }
 0x8a8   : > { %17319 = vst.msk [vmem:[%s26149_s24 + $0xb0] sm:$0xff] %vm920_vm0, %v17287_v21  ;;  %v16613_v47 = vadd.f32 %v16581_v16, %v16549_v11  ;;  %v16803_v63 = vadd.f32 %v16739_v52, %v16581_v16  ;;  %v16994_v56 = vadd.f32 %v16930_v43, %v16581_v16  ;;  %v20299_v36 = vpop.f32.mrb[34].mxu0  ;;  %v16740_v27 = vadd.f32 %v16676_v8, %v16518_v29 }
 0x8a9   : > { %v17288_v61 = vmax.f32 %v17256_v10, 0.0  ;;  %v16931_v24 = vadd.f32 %v16867_v49, %v16518_v29  ;;  %v9418_v26 = vadd.f32 %v26210_v4, %v9300_v0  ;;  %v9303_v40 = vpop.f32.mrb[35].mxu0  ;;  %v9452_v3 = vmax.f32 %v9420_v54, 0.0 }
 0x8aa   : > { %v17218_v38 = vmul.f32 %v17157_v28, %v16994_v56  ;;  %v9421_v41 = vadd.f32 %v20299_v36, %v26210_v4  ;;  %v9419_v59 = vadd.f32 %v26210_v4, %v9303_v40  ;;  %v16614_v33 = vadd.f32 %v16582_v19, %v16550_v57  ;;  %v17172_v36 = vpop.permute.xlu1 %17171 }
 0x8ab   : > { %17320 = vst.msk [vmem:[%s26149_s24 + $0xb8] sm:$0xff] %vm920_vm0, %v17288_v61  ;;  %v16995_v58 = vadd.f32 %v16931_v24, %v16582_v19  ;;  %v16455_v37 = vld [vmem:[#allocation5 + $0x2c7] sm:$0xff]  ;;  %v9450_v25 = vmax.f32 %v9418_v26, 0.0  ;;  %v16284_v23 = vpop.f32.mrb[44].mxu1  ;;  %9484 = vst.msk [vmem:[%s26221_s29 + $0x90] sm:$0xff] %vm920_vm0, %v9452_v3  ;;  %v16804_v30 = vadd.f32 %v16740_v27, %v16582_v19 }
 0x8ac   : > { %v16519_v13 = vld [vmem:[#allocation5 + $0x2c8] sm:$0xff]  ;;  %v17257_v55 = vadd.f32 %v26298_v31, %v17218_v38  ;;  %v16677_v62 = vadd.f32 %v16613_v47, %v16455_v37  ;;  %v16868_v32 = vadd.f32 %v16803_v63, %v16455_v37  ;;  %16422 = vst.msk [vmem:[#allocation5 + $0x2e8] sm:$0xff] %vm920_vm0, %v16284_v23  ;;  %v16286_v35 = vpop.f32.mrb[45].mxu1  ;;  %v9453_v9 = vmax.f32 %v9421_v41, 0.0 }
 0x8ad   : > { %v16551_v50 = vadd.f32 %v16519_v13, %v16455_v37  ;;  %v17219_v1 = vmul.f32 %v17162_v22, %v16995_v58  ;;  %v16456_v34 = vld [vmem:[#allocation5 + $0x2cf] sm:$0xff]  ;;  %9482 = vst.msk [vmem:[%s26221_s29 + $0x80] sm:$0xff] %vm920_vm0, %v9450_v25  ;;  %v9451_v2 = vmax.f32 %v9419_v59, 0.0  ;;  %v16287_v12 = vpop.f32.mrb[46].mxu1  ;;  %v16840_v22 = vld [vmem:[#allocation5 + $0x307] sm:$0xff] }
 0x8ae   : > { %v16520_v14 = vld [vmem:[#allocation5 + $0x2d0] sm:$0xff]  ;;  %v17289_v7 = vmax.f32 %v17257_v55, 0.0  ;;  %v16741_v51 = vadd.f32 %v16677_v62, %v16519_v13  ;;  %v16932_v60 = vadd.f32 %v16868_v32, %v16519_v13  ;;  %16423 = vst.msk [vmem:[#allocation5 + $0x2f0] sm:$0xff] %vm920_vm0, %v16287_v12  ;;  %v20302_v45 = vpop.f32.mrb[36].mxu0  ;;  %v16289_v11 = vpop.f32.mrb[47].mxu1  ;;  %v16678_v5 = vadd.f32 %v16614_v33, %v16456_v34  ;;  %9485 = vst.msk [vmem:[%s26221_s29 + $0x98] sm:$0xff] %vm920_vm0, %v9453_v9 }
 0x8af   : > { %v16583_v20 = vld [vmem:[#allocation5 + $0x2c9] sm:$0xff]  ;;  %v17258_v39 = vadd.f32 %v26298_v31, %v17219_v1  ;;  %v16552_v17 = vadd.f32 %v16520_v14, %v16456_v34  ;;  %v16869_v53 = vadd.f32 %v16804_v30, %v16456_v34  ;;  %9483 = vst.msk [vmem:[%s26221_s29 + $0x88] sm:$0xff] %vm920_vm0, %v9451_v2  ;;  %v9316_v42 = vpop.f32.mrb[37].mxu0  ;;  %v9424_v6 = vadd.f32 %v20302_v45, %v26210_v4  ;;  %v16584_v10 = vld [vmem:[#allocation5 + $0x2d1] sm:$0xff] }
 0x8b0   : > { %17321 = vst.msk [vmem:[%s26149_s24 + $0xc0] sm:$0xff] %vm920_vm0, %v17289_v7  ;;  %v16615_v15 = vadd.f32 %v16583_v20, %v16551_v50  ;;  %v16805_v29 = vadd.f32 %v16741_v51, %v16583_v20  ;;  %v16996_v16 = vadd.f32 %v16932_v60, %v16583_v20  ;;  %v20303_v46 = vpop.f32.mrb[38].mxu0  ;;  %v16742_v52 = vadd.f32 %v16678_v5, %v16520_v14  ;;  %v16841_v2 = vld [vmem:[#allocation5 + $0x30f] sm:$0xff] }
 0x8b1   : > { %v17290_v21 = vmax.f32 %v17258_v39, 0.0  ;;  %v16933_v43 = vadd.f32 %v16869_v53, %v16520_v14  ;;  %v9422_v44 = vadd.f32 %v26210_v4, %v9316_v42  ;;  %v9319_v48 = vpop.f32.mrb[39].mxu0  ;;  %v9456_v8 = vmax.f32 %v9424_v6, 0.0  ;;  %v17177_v14 = vpop.permute.xlu0 %17176  ;;  %v16904_v12 = vld [vmem:[#allocation5 + $0x308] sm:$0xff]  ;;  %v16905_v42 = vld [vmem:[#allocation5 + $0x310] sm:$0xff] }
 0x8b2   : > { %v17220_v57 = vmul.f32 %v17167_v18, %v16996_v16  ;;  %v9425_v49 = vadd.f32 %v20303_v46, %v26210_v4  ;;  %v9423_v0 = vadd.f32 %v26210_v4, %v9319_v48  ;;  %v16616_v47 = vadd.f32 %v16584_v10, %v16552_v17  ;;  %v17182_v53 = vpop.permute.xlu1 %17181 }
 0x8b3   : > { %17322 = vst.msk [vmem:[%s26149_s24 + $0xc8] sm:$0xff] %vm920_vm0, %v17290_v21  ;;  %v16997_v63 = vadd.f32 %v16933_v43, %v16584_v10  ;;  %v16647_v56 = vld [vmem:[#allocation5 + $0x2e7] sm:$0xff]  ;;  %v9454_v54 = vmax.f32 %v9422_v44, 0.0  ;;  %9488 = vst.msk [vmem:[%s26221_s29 + $0xb0] sm:$0xff] %vm920_vm0, %v9456_v8  ;;  %v16806_v26 = vadd.f32 %v16742_v52, %v16584_v10  ;;  %v16969_v52 = vld [vmem:[#allocation5 + $0x311] sm:$0xff] }
 0x8b4   : > { %v17259_v28 = vadd.f32 %v26298_v31, %v17220_v57  ;;  %v16679_v61 = vadd.f32 %v16647_v56, %v16615_v15  ;;  %v16870_v27 = vadd.f32 %v16805_v29, %v16647_v56  ;;  %v9457_v24 = vmax.f32 %v9425_v49, 0.0  ;;  %v16711_v19 = vld [vmem:[#allocation5 + $0x2e8] sm:$0xff] }
 0x8b5   : > { %v17221_v40 = vmul.f32 %v17172_v36, %v16997_v63  ;;  %v16648_v38 = vld [vmem:[#allocation5 + $0x2ef] sm:$0xff]  ;;  %9486 = vst.msk [vmem:[%s26221_s29 + $0xa0] sm:$0xff] %vm920_vm0, %v9454_v54  ;;  %v9455_v3 = vmax.f32 %v9423_v0, 0.0  ;;  %v17187_v49 = vpop.permute.xlu0 %17186 }
 0x8b6   : > { %v17291_v41 = vmax.f32 %v17259_v28, 0.0  ;;  %v16743_v59 = vadd.f32 %v16711_v19, %v16679_v61  ;;  %v16934_v33 = vadd.f32 %v16870_v27, %v16711_v19  ;;  %v16680_v58 = vadd.f32 %v16648_v38, %v16616_v47  ;;  %9489 = vst.msk [vmem:[%s26221_s29 + $0xb8] sm:$0xff] %vm920_vm0, %v9457_v24  ;;  %v20306_v37 = vpop.f32.mrb[40].mxu0  ;;  %v16712_v25 = vld [vmem:[#allocation5 + $0x2f0] sm:$0xff]  ;;  %v17192_v61 = vpop.permute.xlu1 %17191 }
 0x8b7   : > { %v17260_v13 = vadd.f32 %v26298_v31, %v17221_v40  ;;  %v16775_v23 = vld [vmem:[#allocation5 + $0x2e9] sm:$0xff]  ;;  %v16871_v55 = vadd.f32 %v16806_v26, %v16648_v38  ;;  %9487 = vst.msk [vmem:[%s26221_s29 + $0xa8] sm:$0xff] %vm920_vm0, %v9455_v3  ;;  %v9428_v50 = vadd.f32 %v20306_v37, %v26210_v4  ;;  %v9332_v62 = vpop.f32.mrb[41].mxu0  ;;  %v16776_v9 = vld [vmem:[#allocation5 + $0x2f1] sm:$0xff] }
 0x8b8   : > { %17323 = vst.msk [vmem:[%s26149_s24 + $0xd0] sm:$0xff] %vm920_vm0, %v17291_v41  ;;  %v16744_v32 = vadd.f32 %v16712_v25, %v16680_v58  ;;  %v16807_v35 = vadd.f32 %v16775_v23, %v16743_v59  ;;  %v16998_v30 = vadd.f32 %v16934_v33, %v16775_v23  ;;  %v9426_v1 = vadd.f32 %v26210_v4, %v9332_v62  ;;  %v20307_v34 = vpop.f32.mrb[42].mxu0  ;;  %v16968_v15 = vld [vmem:[#allocation5 + $0x309] sm:$0xff] }
 0x8b9   : > { %v17292_v20 = vmax.f32 %v17260_v13, 0.0  ;;  %v16935_v7 = vadd.f32 %v16871_v55, %v16712_v25  ;;  %v9460_v51 = vmax.f32 %v9428_v50, 0.0  ;;  %v9429_v60 = vadd.f32 %v20307_v34, %v26210_v4  ;;  %v9335_v45 = vpop.f32.mrb[43].mxu0 }
 0x8ba   : > { %v16808_v11 = vadd.f32 %v16776_v9, %v16744_v32  ;;  %v16872_v39 = vadd.f32 %v16840_v22, %v16807_v35  ;;  %v17222_v17 = vmul.f32 %v17177_v14, %v16998_v30  ;;  %v9458_v5 = vmax.f32 %v9426_v1, 0.0 }
 0x8bb   : > { %17324 = vst.msk [vmem:[%s26149_s24 + $0xd8] sm:$0xff] %vm920_vm0, %v17292_v20  ;;  %v16999_v29 = vadd.f32 %v16935_v7, %v16776_v9  ;;  %9492 = vst.msk [vmem:[%s26221_s29 + $0xd0] sm:$0xff] %vm920_vm0, %v9460_v51  ;;  %v9461_v16 = vmax.f32 %v9429_v60, 0.0  ;;  %v9427_v6 = vadd.f32 %v26210_v4, %v9335_v45 }
 0x8bc   : > { %v16873_v46 = vadd.f32 %v16841_v2, %v16808_v11  ;;  %v16936_v18 = vadd.f32 %v16904_v12, %v16872_v39  ;;  %v17261_v21 = vadd.f32 %v26298_v31, %v17222_v17  ;;  %9490 = vst.msk [vmem:[%s26221_s29 + $0xc0] sm:$0xff] %vm920_vm0, %v9458_v5 }
 0x8bd   : > { %v17223_v43 = vmul.f32 %v17182_v53, %v16999_v29  ;;  %9493 = vst.msk [vmem:[%s26221_s29 + $0xd8] sm:$0xff] %vm920_vm0, %v9461_v16  ;;  %v9459_v44 = vmax.f32 %v9427_v6, 0.0 }
 0x8be   : > { %v16937_v48 = vadd.f32 %v16905_v42, %v16873_v46  ;;  %v17000_v10 = vadd.f32 %v16968_v15, %v16936_v18  ;;  %v17293_v57 = vmax.f32 %v17261_v21, 0.0  ;;  %v20310_v8 = vpop.f32.mrb[44].mxu0 }
 0x8bf   : > { %v17262_v0 = vadd.f32 %v26298_v31, %v17223_v43  ;;  %9491 = vst.msk [vmem:[%s26221_s29 + $0xc8] sm:$0xff] %vm920_vm0, %v9459_v44  ;;  %v9432_v47 = vadd.f32 %v20310_v8, %v26210_v4  ;;  %v9348_v63 = vpop.f32.mrb[45].mxu0 }
 0x8c0   : > { %v17001_v56 = vadd.f32 %v16969_v52, %v16937_v48  ;;  %v17224_v54 = vmul.f32 %v17187_v49, %v17000_v10  ;;  %17325 = vst.msk [vmem:[%s26149_s24 + $0xe0] sm:$0xff] %vm920_vm0, %v17293_v57  ;;  %v9430_v36 = vadd.f32 %v26210_v4, %v9348_v63  ;;  %v20311_v28 = vpop.f32.mrb[46].mxu0 }
 0x8c1   : > { %v17294_v27 = vmax.f32 %v17262_v0, 0.0  ;;  %v9464_v24 = vmax.f32 %v9432_v47, 0.0  ;;  %v9433_v26 = vadd.f32 %v20311_v28, %v26210_v4  ;;  %v9351_v40 = vpop.f32.mrb[47].mxu0 }
 0x8c2   : > { %v17225_v19 = vmul.f32 %v17192_v61, %v17001_v56  ;;  %v17263_v38 = vadd.f32 %v26298_v31, %v17224_v54  ;;  %v9462_v3 = vmax.f32 %v9430_v36, 0.0  ;;  %v9431_v41 = vadd.f32 %v26210_v4, %v9351_v40 }
 0x8c3   : > { %17326 = vst.msk [vmem:[%s26149_s24 + $0xe8] sm:$0xff] %vm920_vm0, %v17294_v27  ;;  %9496 = vst.msk [vmem:[%s26221_s29 + $0xf0] sm:$0xff] %vm920_vm0, %v9464_v24  ;;  %v9465_v59 = vmax.f32 %v9433_v26, 0.0 }
 0x8c4   : > { %v17264_v33 = vadd.f32 %v26298_v31, %v17225_v19  ;;  %v17295_v58 = vmax.f32 %v17263_v38, 0.0  ;;  %9494 = vst.msk [vmem:[%s26221_s29 + $0xe0] sm:$0xff] %vm920_vm0, %v9462_v3  ;;  %v9463_v37 = vmax.f32 %v9431_v41, 0.0 }
 0x8c5   : > { %9497 = vst.msk [vmem:[%s26221_s29 + $0xf8] sm:$0xff] %vm920_vm0, %v9465_v59 }
 0x8c6   : > { %v17296_v13 = vmax.f32 %v17264_v33, 0.0  ;;  %17327 = vst.msk [vmem:[%s26149_s24 + $0xf0] sm:$0xff] %vm920_vm0, %v17295_v58  ;;  %9495 = vst.msk [vmem:[%s26221_s29 + $0xe8] sm:$0xff] %vm920_vm0, %v9463_v37 }
 0x8c8   : > { %17328 = vst.msk [vmem:[%s26149_s24 + $0xf8] sm:$0xff] %vm920_vm0, %v17296_v13 }
 0x8c9 PF: > { %s30_s0 = sadd.s32 1, %s22717_s0  }
 0x8ca   : > { %p27_p4 = scmp.ge.s32.totalorder %s30_s0, 4  }
 0x8cc   :  { %29 = sbr.rel (!%p27_p4) target bundleno = 5 (0x5), region = 164 }

</bundles_post_ra>
